<compile_context>
chip_gen: v7x
topology: tpu7x:2x2x1
jax: 0.10.0
libtpu: 0.0.40
codegen_flags: <defaults>
</compile_context>

<pallas_src>
import math
import functools

import jax
import jax.numpy as jnp
from jax import lax
from jax.experimental import pallas as pl
from jax.experimental.pallas import tpu as pltpu

_DN_T = (((1,), (1,)), ((), ()))   # contract last dims: x[M,K] . w[N,K] -> [M,N]
NEG = jnp.float32(-1e9)            # stands in for float('-inf') in additive masks
BF16 = jnp.bfloat16


# ----------------------- in-kernel helper math -----------------------

def _linear(x, w_bf16, b_f32):
    # PyTorch Linear: y = x @ W^T + b with W in [out, in] layout (no transpose op).
    # bf16 operands at the MXU input, f32 accumulation.
    return lax.dot_general(x.astype(BF16), w_bf16, _DN_T,
                           preferred_element_type=jnp.float32) + b_f32


def _layernorm(x, g, b, eps=1e-5):
    mu = jnp.mean(x, axis=-1, keepdims=True)
    var = jnp.mean(jnp.square(x - mu), axis=-1, keepdims=True)
    return (x - mu) * lax.rsqrt(var + eps) * g + b


def _mha(q, k, v, kpm, attn_mask, wo, bo, nhead, n_batch, lq, lk, ho_sc):
    """Multi-head attention on batch-flattened rows.

    q: [N*lq, E] f32 (1/sqrt(hd) pre-folded into W_q); k, v: [N*lk, E] f32.
    kpm: [N, 1, lk] additive key-padding mask; attn_mask: [lq, lk] additive or 0.0.
    ho_sc: VMEM scratch [N*lq, E] head-output buffer -> ONE out-proj matmul (K=E).
    """
    E = q.shape[-1]
    hd = E // nhead
    for n in range(n_batch):                         # static unroll over batch
        qn = q[n * lq:(n + 1) * lq]
        kn = k[n * lk:(n + 1) * lk]
        vn = v[n * lk:(n + 1) * lk]
        mask = attn_mask + kpm[n]                    # additive, broadcast to [lq, lk]
        for h in range(nhead):                       # static unroll over heads
            sl = slice(h * hd, (h + 1) * hd)
            s = lax.dot_general(qn[:, sl].astype(BF16), kn[:, sl].astype(BF16),
                                _DN_T, preferred_element_type=jnp.float32) + mask
            m = jnp.max(s, axis=-1, keepdims=True)
            p = jnp.exp(s - m)                       # softmax kept exact, in f32
            inv = 1.0 / jnp.sum(p, axis=-1, keepdims=True)
            ho_sc[n * lq:(n + 1) * lq, h * hd:(h + 1) * hd] = (
                jnp.dot(p.astype(BF16), vn[:, sl].astype(BF16),
                        preferred_element_type=jnp.float32) * inv)
    return _linear(ho_sc[...], wo, bo)               # single [N*lq,E] x [E,E] out-proj


# -------------------------------- Pallas kernels -------------------------------

def _encoder_stack_kernel(nhead, emb_scale,
                          src_ref, pos_ref, am_ref, kpm_ref,
                          wqkv_ref, bqkv_ref, wo_ref, bo_ref, g1_ref, b1_ref,
                          w1_ref, fb1_ref, w2_ref, fb2_ref, g2_ref, b2_ref,
                          fng_ref, fnb_ref,
                          o_ref, x_sc, ho_sc):
    l = pl.program_id(0)
    N, S, E = src_ref.shape

    @pl.when(l == 0)                                 # fused embed-scale + pos add
    def _():
        x_sc[...] = src_ref[...].astype(jnp.float32) * emb_scale + pos_ref[...]

    x = x_sc[...].reshape(N * S, E)                  # batch folded into MXU M dim
    qkv = _linear(x, wqkv_ref[0], bqkv_ref[0])       # fused QKV [N*S, 3E]
    sa = _mha(qkv[:, :E], qkv[:, E:2 * E], qkv[:, 2 * E:],
              kpm_ref[...], am_ref[...], wo_ref[0], bo_ref[0],
              nhead, N, S, S, ho_sc)
    h1 = _layernorm(x + sa, g1_ref[0], b1_ref[0])
    f = jnp.maximum(_linear(h1, w1_ref[0], fb1_ref[0]), 0.0)
    f = _linear(f, w2_ref[0], fb2_ref[0])
    y = _layernorm(h1 + f, g2_ref[0], b2_ref[0])     # [N*S, E]
    x_sc[...] = y.reshape(N, S, E)                   # carry to next layer (VMEM)

    @pl.when(l == pl.num_programs(0) - 1)            # fused final encoder LayerNorm
    def _():
        o_ref[...] = _layernorm(y, fng_ref[...], fnb_ref[...]
                                ).reshape(N, S, E).astype(o_ref.dtype)


def _decoder_stack_kernel(nhead, emb_scale,
                          tgt_ref, pos_ref, mem_ref, tm_ref, tkpm_ref, mkpm_ref,
                          sa_w_ref, sa_b_ref, sa_wo_ref, sa_bo_ref, g1_ref, b1_ref,
                          cq_w_ref, cq_b_ref, ckv_w_ref, ckv_b_ref, c_wo_ref, c_bo_ref,
                          g2_ref, b2_ref,
                          w1_ref, fb1_ref, w2_ref, fb2_ref, g3_ref, b3_ref,
                          o_ref, x_sc, ho_sc):
    l = pl.program_id(0)
    N, T, E = tgt_ref.shape
    S = mem_ref.shape[1]

    @pl.when(l == 0)                                 # fused embed-scale + pos add
    def _():
        x_sc[...] = tgt_ref[...].astype(jnp.float32) * emb_scale + pos_ref[...]

    x = x_sc[...].reshape(N * T, E)
    mem = mem_ref[...].astype(jnp.float32).reshape(N * S, E)

    # masked self-attention
    qkv = _linear(x, sa_w_ref[0], sa_b_ref[0])       # [N*T, 3E]
    sa = _mha(qkv[:, :E], qkv[:, E:2 * E], qkv[:, 2 * E:],
              tkpm_ref[...], tm_ref[...], sa_wo_ref[0], sa_bo_ref[0],
              nhead, N, T, T, ho_sc)
    h1 = _layernorm(x + sa, g1_ref[0], b1_ref[0])

    # cross attention (memory_mask is None in the PyTorch forward; only mem KPM)
    qc = _linear(h1, cq_w_ref[0], cq_b_ref[0])       # [N*T, E]
    kv = _linear(mem, ckv_w_ref[0], ckv_b_ref[0])    # fused KV [N*S, 2E]
    ca = _mha(qc, kv[:, :E], kv[:, E:],
              mkpm_ref[...], 0.0, c_wo_ref[0], c_bo_ref[0],
              nhead, N, T, S, ho_sc)
    h2 = _layernorm(h1 + ca, g2_ref[0], b2_ref[0])

    # FFN
    f = jnp.maximum(_linear(h2, w1_ref[0], fb1_ref[0]), 0.0)
    f = _linear(f, w2_ref[0], fb2_ref[0])
    y = _layernorm(h2 + f, g3_ref[0], b3_ref[0])     # [N*T, E]
    x_sc[...] = y.reshape(N, T, E)

    @pl.when(l == pl.num_programs(0) - 1)
    def _():
        o_ref[...] = y.reshape(N, T, E).astype(o_ref.dtype)


def _ln_generator_kernel(x_ref, g_ref, b_ref, w_ref, bias_ref, o_ref):
    # fused final decoder LayerNorm + generator linear over one lane-dense vocab tile
    xn = _layernorm(x_ref[...].astype(jnp.float32), g_ref[...], b_ref[...])
    o_ref[...] = _linear(xn, w_ref[...], bias_ref[...]).astype(o_ref.dtype)


# ------------------------------ pallas_call wrappers ----------------------------

def _rep(shape):   # same block every grid step -> VMEM-resident (activations/masks)
    nd = len(shape)
    return pl.BlockSpec(shape, lambda l, nd=nd: (0,) * nd)


def _lyr(arr):     # layer-indexed block on dim 0 (stacked weights, pipelined DMA)
    nd = arr.ndim
    return pl.BlockSpec((1,) + tuple(arr.shape[1:]),
                        lambda l, nd=nd: (l,) + (0,) * (nd - 1))


def encoder_stack(src_e, pos, attn_mask, kpm, pp, nhead, emb_scale):
    ep = pp["enc"]
    N, S, E = src_e.shape
    Lnum = ep["wqkv"].shape[0]
    F = ep["w1"].shape[1]

    args = (src_e, pos, attn_mask, kpm,
            ep["wqkv"], ep["bqkv"], ep["wo"], ep["bo"], ep["g1"], ep["b1"],
            ep["w1"], ep["fb1"], ep["w2"], ep["fb2"], ep["g2"], ep["b2"],
            pp["enc_norm_g"], pp["enc_norm_b"])
    in_specs = ([_rep((N, S, E)), _rep((1, S, E)), _rep((S, S)), _rep((N, 1, S))]
                + [_lyr(a) for a in args[4:16]]
                + [_rep((1, E)), _rep((1, E))])

    flops = Lnum * (2 * N * S * E * 3 * E + 4 * N * S * S * E
                    + 2 * N * S * E * E + 4 * N * S * E * F)
    bytes_acc = sum(int(a.size) * a.dtype.itemsize for a in args) + N * S * E * 4
    cost = pl.CostEstimate(flops=int(flops),
                           transcendentals=int(Lnum * N * nhead * S * S),
                           bytes_accessed=int(bytes_acc))

    return pl.pallas_call(
        functools.partial(_encoder_stack_kernel, nhead, emb_scale),
        out_shape=jax.ShapeDtypeStruct((N, S, E), jnp.float32),
        grid=(Lnum,),
        in_specs=in_specs,
        out_specs=_rep((N, S, E)),
        scratch_shapes=[pltpu.VMEM((N, S, E), jnp.float32),     # layer carry
                        pltpu.VMEM((N * S, E), jnp.float32)],   # head-output buffer
        compiler_params=pltpu.CompilerParams(dimension_semantics=("arbitrary",)),
        cost_estimate=cost,
    )(*args)


def decoder_stack(tgt_e, pos, memory, tgt_mask, tgt_kpm, mem_kpm, pp, nhead, emb_scale):
    dp = pp["dec"]
    N, T, E = tgt_e.shape
    S = memory.shape[1]
    Lnum = dp["sa_w"].shape[0]
    F = dp["w1"].shape[1]

    args = (tgt_e, pos, memory, tgt_mask, tgt_kpm, mem_kpm,
            dp["sa_w"], dp["sa_b"], dp["sa_wo"], dp["sa_bo"], dp["g1"], dp["b1"],
            dp["cq_w"], dp["cq_b"], dp["ckv_w"], dp["ckv_b"], dp["c_wo"], dp["c_bo"],
            dp["g2"], dp["b2"],
            dp["w1"], dp["fb1"], dp["w2"], dp["fb2"], dp["g3"], dp["b3"])
    in_specs = ([_rep((N, T, E)), _rep((1, T, E)), _rep((N, S, E)),
                 _rep((T, T)), _rep((N, 1, T)), _rep((N, 1, S))]
                + [_lyr(a) for a in args[6:]])

    flops = Lnum * (2 * N * T * E * 3 * E + 4 * N * T * T * E + 2 * N * T * E * E
                    + 2 * N * T * E * E + 4 * N * S * E * E + 4 * N * T * S * E
                    + 2 * N * T * E * E + 4 * N * T * E * F)
    bytes_acc = sum(int(a.size) * a.dtype.itemsize for a in args) + N * T * E * 4
    cost = pl.CostEstimate(flops=int(flops),
                           transcendentals=int(Lnum * N * nhead * (T * T + T * S)),
                           bytes_accessed=int(bytes_acc))

    return pl.pallas_call(
        functools.partial(_decoder_stack_kernel, nhead, emb_scale),
        out_shape=jax.ShapeDtypeStruct((N, T, E), jnp.float32),
        grid=(Lnum,),
        in_specs=in_specs,
        out_specs=_rep((N, T, E)),
        scratch_shapes=[pltpu.VMEM((N, T, E), jnp.float32),
                        pltpu.VMEM((N * T, E), jnp.float32)],
        compiler_params=pltpu.CompilerParams(dimension_semantics=("arbitrary",)),
        cost_estimate=cost,
    )(*args)


def ln_generator(x2d, g, b, w, bias):
    # x2d: [N*T, E]; w: [Vp, E] bf16 (vocab pre-padded to 128 lanes); bias: [1, Vp].
    NT, E = x2d.shape
    Vp = w.shape[0]
    VT = 256 if Vp % 256 == 0 else 128               # 256-wide tiles for v6e/v7x MXU
    cost = pl.CostEstimate(flops=int(2 * NT * E * Vp), transcendentals=0,
                           bytes_accessed=int(x2d.size * 4 + int(w.size) * 2
                                              + bias.size * 4 + NT * Vp * 4))
    return pl.pallas_call(
        _ln_generator_kernel,
        out_shape=jax.ShapeDtypeStruct((NT, Vp), jnp.float32),
        grid=(Vp // VT,),
        in_specs=[pl.BlockSpec((NT, E), lambda j: (0, 0)),
                  pl.BlockSpec((1, E), lambda j: (0, 0)),
                  pl.BlockSpec((1, E), lambda j: (0, 0)),
                  pl.BlockSpec((VT, E), lambda j: (j, 0)),
                  pl.BlockSpec((1, VT), lambda j: (0, j))],
        out_specs=pl.BlockSpec((NT, VT), lambda j: (0, j)),
        compiler_params=pltpu.CompilerParams(dimension_semantics=("parallel",)),
        cost_estimate=cost,
    )(x2d, g, b, w, bias)


# ----------------------------- parameters / buffers -----------------------------

def make_pos_embedding(maxlen, E):
    # exact PositionalEncoding buffer from the PyTorch module: [maxlen, 1, E]
    den = jnp.exp(-jnp.arange(0, E, 2, dtype=jnp.float32) * (math.log(10000.0) / E))
    pos = jnp.arange(0, maxlen, dtype=jnp.float32)[:, None]
    pe = jnp.zeros((maxlen, E), jnp.float32)
    pe = pe.at[:, 0::2].set(jnp.sin(pos * den))
    pe = pe.at[:, 1::2].set(jnp.cos(pos * den))
    return pe[:, None, :]


def init_params(key, nel, ndl, E, nhead, src_vocab, tgt_vocab, ffd):
    keys = iter(jax.random.split(key, 256))

    def w(shape, scale=0.02):
        return jax.random.normal(next(keys), shape, jnp.float32) * scale

    def mha_params():
        return dict(in_proj_w=w((3 * E, E)), in_proj_b=jnp.zeros((3 * E,), jnp.float32),
                    out_proj_w=w((E, E)), out_proj_b=jnp.zeros((E,), jnp.float32))

    def enc_layer_p():
        return dict(self_attn=mha_params(),
                    l1_w=w((ffd, E)), l1_b=jnp.zeros((ffd,), jnp.float32),
                    l2_w=w((E, ffd)), l2_b=jnp.zeros((E,), jnp.float32),
                    ln1_g=jnp.ones((E,), jnp.float32), ln1_b=jnp.zeros((E,), jnp.float32),
                    ln2_g=jnp.ones((E,), jnp.float32), ln2_b=jnp.zeros((E,), jnp.float32))

    def dec_layer_p():
        return dict(self_attn=mha_params(), cross_attn=mha_params(),
                    l1_w=w((ffd, E)), l1_b=jnp.zeros((ffd,), jnp.float32),
                    l2_w=w((E, ffd)), l2_b=jnp.zeros((E,), jnp.float32),
                    ln1_g=jnp.ones((E,), jnp.float32), ln1_b=jnp.zeros((E,), jnp.float32),
                    ln2_g=jnp.ones((E,), jnp.float32), ln2_b=jnp.zeros((E,), jnp.float32),
                    ln3_g=jnp.ones((E,), jnp.float32), ln3_b=jnp.zeros((E,), jnp.float32))

    return dict(
        src_emb=w((src_vocab, E), 1.0),       # nn.Embedding default ~ N(0,1)
        tgt_emb=w((tgt_vocab, E), 1.0),
        enc_layers=[enc_layer_p() for _ in range(nel)],
        dec_layers=[dec_layer_p() for _ in range(ndl)],
        enc_norm_g=jnp.ones((E,), jnp.float32), enc_norm_b=jnp.zeros((E,), jnp.float32),
        dec_norm_g=jnp.ones((E,), jnp.float32), dec_norm_b=jnp.zeros((E,), jnp.float32),
        gen_w=w((tgt_vocab, E)), gen_b=jnp.zeros((tgt_vocab,), jnp.float32),
    )


def prepare_params(params, nhead):
    # One-time packing: fold 1/sqrt(head_dim) into W_q/b_q, stack per-layer weights
    # on a leading layer axis, cast matmul weights to bf16, pad generator vocab.
    E = params["src_emb"].shape[1]
    scale = 1.0 / math.sqrt(E // nhead)

    def wstack(mats):                                  # [L, out, in] bf16
        return jnp.stack(mats).astype(BF16)

    def vstack(vecs):                                  # [L, 1, dim] f32
        return jnp.stack([v.reshape(1, -1) for v in vecs]).astype(jnp.float32)

    enc = params["enc_layers"]
    ep = dict(
        wqkv=wstack([lp["self_attn"]["in_proj_w"].at[:E].multiply(scale) for lp in enc]),
        bqkv=vstack([lp["self_attn"]["in_proj_b"].at[:E].multiply(scale) for lp in enc]),
        wo=wstack([lp["self_attn"]["out_proj_w"] for lp in enc]),
        bo=vstack([lp["self_attn"]["out_proj_b"] for lp in enc]),
        g1=vstack([lp["ln1_g"] for lp in enc]), b1=vstack([lp["ln1_b"] for lp in enc]),
        w1=wstack([lp["l1_w"] for lp in enc]), fb1=vstack([lp["l1_b"] for lp in enc]),
        w2=wstack([lp["l2_w"] for lp in enc]), fb2=vstack([lp["l2_b"] for lp in enc]),
        g2=vstack([lp["ln2_g"] for lp in enc]), b2=vstack([lp["ln2_b"] for lp in enc]),
    )

    dec = params["dec_layers"]
    dp = dict(
        sa_w=wstack([lp["self_attn"]["in_proj_w"].at[:E].multiply(scale) for lp in dec]),
        sa_b=vstack([lp["self_attn"]["in_proj_b"].at[:E].multiply(scale) for lp in dec]),
        sa_wo=wstack([lp["self_attn"]["out_proj_w"] for lp in dec]),
        sa_bo=vstack([lp["self_attn"]["out_proj_b"] for lp in dec]),
        g1=vstack([lp["ln1_g"] for lp in dec]), b1=vstack([lp["ln1_b"] for lp in dec]),
        cq_w=wstack([lp["cross_attn"]["in_proj_w"][:E] * scale for lp in dec]),
        cq_b=vstack([lp["cross_attn"]["in_proj_b"][:E] * scale for lp in dec]),
        ckv_w=wstack([lp["cross_attn"]["in_proj_w"][E:] for lp in dec]),
        ckv_b=vstack([lp["cross_attn"]["in_proj_b"][E:] for lp in dec]),
        c_wo=wstack([lp["cross_attn"]["out_proj_w"] for lp in dec]),
        c_bo=vstack([lp["cross_attn"]["out_proj_b"] for lp in dec]),
        g2=vstack([lp["ln2_g"] for lp in dec]), b2=vstack([lp["ln2_b"] for lp in dec]),
        w1=wstack([lp["l1_w"] for lp in dec]), fb1=vstack([lp["l1_b"] for lp in dec]),
        w2=wstack([lp["l2_w"] for lp in dec]), fb2=vstack([lp["l2_b"] for lp in dec]),
        g3=vstack([lp["ln3_g"] for lp in dec]), b3=vstack([lp["ln3_b"] for lp in dec]),
    )

    V = params["gen_w"].shape[0]
    Vp = ((V + 127) // 128) * 128
    gen_w = jnp.zeros((Vp, E), jnp.float32).at[:V].set(params["gen_w"]).astype(BF16)
    gen_b = jnp.zeros((1, Vp), jnp.float32).at[0, :V].set(params["gen_b"])

    return dict(
        src_emb=params["src_emb"], tgt_emb=params["tgt_emb"],
        enc=ep, dec=dp,
        enc_norm_g=params["enc_norm_g"].reshape(1, E),
        enc_norm_b=params["enc_norm_b"].reshape(1, E),
        dec_norm_g=params["dec_norm_g"].reshape(1, E),
        dec_norm_b=params["dec_norm_b"].reshape(1, E),
        gen_w=gen_w, gen_b=gen_b,
    )


# ----------------------------------- forward -----------------------------------

def seq2seq_transformer_forward(pp, pos_emb, nhead, tgt_vocab, src, trg,
                                src_mask, tgt_mask, src_padding_mask,
                                tgt_padding_mask, memory_key_padding_mask):
    # TODO(synk): dropout layers are omitted (eval-mode / p=0 semantics).
    E = pp["src_emb"].shape[1]
    emb_scale = math.sqrt(E)
    S, N = src.shape
    T = trg.shape[0]

    # bool key-padding masks -> per-batch additive rows [N, 1, L] (built once, in glue)
    src_kpm = jnp.where(src_padding_mask, NEG, 0.0).astype(jnp.float32)[:, None, :]
    tgt_kpm = jnp.where(tgt_padding_mask, NEG, 0.0).astype(jnp.float32)[:, None, :]
    mem_kpm = jnp.where(memory_key_padding_mask, NEG, 0.0).astype(jnp.float32)[:, None, :]
    src_am = src_mask.astype(jnp.float32)
    tgt_am = tgt_mask.astype(jnp.float32)

    pos_s = pos_emb[:S, 0][None]          # [1, S, E] resident block
    pos_t = pos_emb[:T, 0][None]          # [1, T, E]

    # Token-embedding gather (glue); *sqrt(E) + positional add happens inside layer 0
    # of each stack kernel. Activations are batch-first [N, L, E].
    src_e = pp["src_emb"][src.T]          # [N, S, E]
    tgt_e = pp["tgt_emb"][trg.T]          # [N, T, E]

    # Encoder stack (fused layers + final encoder LayerNorm), one pallas_call.
    memory = encoder_stack(src_e, pos_s, src_am, src_kpm, pp, nhead, emb_scale)

    # Decoder stack (memory_mask=None in the PyTorch forward), one pallas_call.
    out = decoder_stack(tgt_e, pos_t, memory, tgt_am, tgt_kpm, mem_kpm,
                        pp, nhead, emb_scale)

    # Final decoder LayerNorm fused with the generator; vocab pre-padded to 128 lanes.
    logits = ln_generator(out.reshape(N * T, E), pp["dec_norm_g"], pp["dec_norm_b"],
                          pp["gen_w"], pp["gen_b"])
    logits = logits.reshape(N, T, -1)[:, :, :tgt_vocab]
    return logits.transpose(1, 0, 2)      # back to seq-first [T, N, V]


# ------------------------------------- main -------------------------------------

if __name__ == "__main__":
    NUM_ENC, NUM_DEC = 2, 2
    EMB_SIZE, NHEAD = 32, 4
    SRC_VOCAB, TGT_VOCAB = 19, 17
    FFD = 64
    S, T, N = 8, 10, 2          # src seq, tgt seq, batch

    key = jax.random.PRNGKey(0)
    pkey, skey, tkey = jax.random.split(key, 3)

    params = init_params(pkey, NUM_ENC, NUM_DEC, EMB_SIZE, NHEAD,
                         SRC_VOCAB, TGT_VOCAB, FFD)
    prepped = prepare_params(params, NHEAD)           # one-time weight packing
    pos_emb = make_pos_embedding(64, EMB_SIZE)

    src = jax.random.randint(skey, (S, N), 0, SRC_VOCAB, jnp.int32)
    trg = jax.random.randint(tkey, (T, N), 0, TGT_VOCAB, jnp.int32)

    src_mask = jnp.zeros((S, S), jnp.float32)
    tgt_mask = jnp.where(jnp.arange(T)[None, :] > jnp.arange(T)[:, None],
                         NEG, jnp.float32(0.0))                       # causal
    src_padding_mask = jnp.zeros((N, S), dtype=bool).at[1, S - 1].set(True)
    tgt_padding_mask = jnp.zeros((N, T), dtype=bool).at[1, T - 1].set(True)
    memory_key_padding_mask = src_padding_mask

    fwd = jax.jit(seq2seq_transformer_forward, static_argnums=(2, 3))
    logits = fwd(prepped, pos_emb, NHEAD, TGT_VOCAB, src, trg, src_mask, tgt_mask,
                 src_padding_mask, tgt_padding_mask, memory_key_padding_mask)
    logits = jax.block_until_ready(logits)

    assert logits.shape == (T, N, TGT_VOCAB), logits.shape
    assert bool(jnp.all(jnp.isfinite(logits)))
    print("KERNEL_OK")
</pallas_src>

<mosaic_0001>
module attributes {stable_mosaic.version = 11 : i64} {
  func.func @_decoder_stack_kernel(%arg0: i32, %arg1: memref<2x10x32xf32, #tpu.memory_space<vmem>>, %arg2: memref<1x10x32xf32, #tpu.memory_space<vmem>>, %arg3: memref<2x8x32xf32, #tpu.memory_space<vmem>>, %arg4: memref<10x10xf32, #tpu.memory_space<vmem>>, %arg5: memref<2x1x10xf32, #tpu.memory_space<vmem>>, %arg6: memref<2x1x8xf32, #tpu.memory_space<vmem>>, %arg7: memref<1x96x32xbf16, #tpu.memory_space<vmem>>, %arg8: memref<1x1x96xf32, #tpu.memory_space<vmem>>, %arg9: memref<1x32x32xbf16, #tpu.memory_space<vmem>>, %arg10: memref<1x1x32xf32, #tpu.memory_space<vmem>>, %arg11: memref<1x1x32xf32, #tpu.memory_space<vmem>>, %arg12: memref<1x1x32xf32, #tpu.memory_space<vmem>>, %arg13: memref<1x32x32xbf16, #tpu.memory_space<vmem>>, %arg14: memref<1x1x32xf32, #tpu.memory_space<vmem>>, %arg15: memref<1x64x32xbf16, #tpu.memory_space<vmem>>, %arg16: memref<1x1x64xf32, #tpu.memory_space<vmem>>, %arg17: memref<1x32x32xbf16, #tpu.memory_space<vmem>>, %arg18: memref<1x1x32xf32, #tpu.memory_space<vmem>>, %arg19: memref<1x1x32xf32, #tpu.memory_space<vmem>>, %arg20: memref<1x1x32xf32, #tpu.memory_space<vmem>>, %arg21: memref<1x64x32xbf16, #tpu.memory_space<vmem>>, %arg22: memref<1x1x64xf32, #tpu.memory_space<vmem>>, %arg23: memref<1x32x64xbf16, #tpu.memory_space<vmem>>, %arg24: memref<1x1x32xf32, #tpu.memory_space<vmem>>, %arg25: memref<1x1x32xf32, #tpu.memory_space<vmem>>, %arg26: memref<1x1x32xf32, #tpu.memory_space<vmem>>, %arg27: memref<2x10x32xf32, #tpu.memory_space<vmem>>, %arg28: memref<2x10x32xf32, #tpu.memory_space<vmem>>, %arg29: memref<20x32xf32, #tpu.memory_space<vmem>>) attributes {dimension_semantics = [#tpu.dimension_semantics<arbitrary>], iteration_bounds = array<i64: 2>, scalar_prefetch = 0 : i64, scratch_operands = 2 : i64, tpu.core_type = #tpu.core_type<tc>, window_params = [{pipeline_mode = #tpu.pipeline_mode<synchronous>, transform_indices = @transform_0, window_bounds = array<i64: 2, 10, 32>}, {pipeline_mode = #tpu.pipeline_mode<synchronous>, transform_indices = @transform_1, window_bounds = array<i64: 1, 10, 32>}, {pipeline_mode = #tpu.pipeline_mode<synchronous>, transform_indices = @transform_2, window_bounds = array<i64: 2, 8, 32>}, {pipeline_mode = #tpu.pipeline_mode<synchronous>, transform_indices = @transform_3, window_bounds = array<i64: 10, 10>}, {pipeline_mode = #tpu.pipeline_mode<synchronous>, transform_indices = @transform_4, window_bounds = array<i64: 2, 1, 10>}, {pipeline_mode = #tpu.pipeline_mode<synchronous>, transform_indices = @transform_5, window_bounds = array<i64: 2, 1, 8>}, {transform_indices = @transform_6, window_bounds = array<i64: 1, 96, 32>}, {transform_indices = @transform_7, window_bounds = array<i64: 1, 1, 96>}, {transform_indices = @transform_8, window_bounds = array<i64: 1, 32, 32>}, {transform_indices = @transform_9, window_bounds = array<i64: 1, 1, 32>}, {transform_indices = @transform_10, window_bounds = array<i64: 1, 1, 32>}, {transform_indices = @transform_11, window_bounds = array<i64: 1, 1, 32>}, {transform_indices = @transform_12, window_bounds = array<i64: 1, 32, 32>}, {transform_indices = @transform_13, window_bounds = array<i64: 1, 1, 32>}, {transform_indices = @transform_14, window_bounds = array<i64: 1, 64, 32>}, {transform_indices = @transform_15, window_bounds = array<i64: 1, 1, 64>}, {transform_indices = @transform_16, window_bounds = array<i64: 1, 32, 32>}, {transform_indices = @transform_17, window_bounds = array<i64: 1, 1, 32>}, {transform_indices = @transform_18, window_bounds = array<i64: 1, 1, 32>}, {transform_indices = @transform_19, window_bounds = array<i64: 1, 1, 32>}, {transform_indices = @transform_20, window_bounds = array<i64: 1, 64, 32>}, {transform_indices = @transform_21, window_bounds = array<i64: 1, 1, 64>}, {transform_indices = @transform_22, window_bounds = array<i64: 1, 32, 64>}, {transform_indices = @transform_23, window_bounds = array<i64: 1, 1, 32>}, {transform_indices = @transform_24, window_bounds = array<i64: 1, 1, 32>}, {transform_indices = @transform_25, window_bounds = array<i64: 1, 1, 32>}, {pipeline_mode = #tpu.pipeline_mode<synchronous>, transform_indices = @transform_26, window_bounds = array<i64: 2, 10, 32>}]} {
    %c0_i32 = arith.constant 0 : i32
    %0 = arith.cmpi eq, %arg0, %c0_i32 : i32
    %1 = arith.extui %0 : i1 to i32
    %c0_i32_0 = arith.constant 0 : i32
    %2 = arith.cmpi ne, %1, %c0_i32_0 : i32
    scf.if %2 {
      %c0_214 = arith.constant 0 : index
      %c0_215 = arith.constant 0 : index
      %c0_216 = arith.constant 0 : index
      %549 = vector.load %arg1[%c0_214, %c0_215, %c0_216] : memref<2x10x32xf32, #tpu.memory_space<vmem>>, vector<2x10x32xf32>
      %cst_217 = arith.constant 5.65685415 : f32
      %550 = vector.broadcast %cst_217 : f32 to vector<2x10x32xf32>
      %551 = arith.mulf %549, %550 : vector<2x10x32xf32>
      %c0_218 = arith.constant 0 : index
      %c0_219 = arith.constant 0 : index
      %c0_220 = arith.constant 0 : index
      %552 = vector.load %arg2[%c0_218, %c0_219, %c0_220] : memref<1x10x32xf32, #tpu.memory_space<vmem>>, vector<1x10x32xf32>
      %553 = vector.broadcast %552 : vector<1x10x32xf32> to vector<2x10x32xf32>
      %554 = arith.addf %551, %553 : vector<2x10x32xf32>
      %c0_221 = arith.constant 0 : index
      %c0_222 = arith.constant 0 : index
      %c0_223 = arith.constant 0 : index
      %555 = vector.load %arg28[%c0_221, %c0_222, %c0_223] : memref<2x10x32xf32, #tpu.memory_space<vmem>>, vector<2x10x32xf32>
      tpu.vector_store %arg28[%c0_221, %c0_222, %c0_223], %554 {strides = array<i32>} : memref<2x10x32xf32, #tpu.memory_space<vmem>>, vector<2x10x32xf32>,
    } else {
    }
    %c0 = arith.constant 0 : index
    %c0_1 = arith.constant 0 : index
    %c0_2 = arith.constant 0 : index
    %3 = vector.load %arg28[%c0, %c0_1, %c0_2] : memref<2x10x32xf32, #tpu.memory_space<vmem>>, vector<2x10x32xf32>
    %4 = vector.shape_cast %3 : vector<2x10x32xf32> to vector<20x32xf32>
    %c0_3 = arith.constant 0 : index
    %c0_4 = arith.constant 0 : index
    %c0_5 = arith.constant 0 : index
    %5 = vector.load %arg3[%c0_3, %c0_4, %c0_5] : memref<2x8x32xf32, #tpu.memory_space<vmem>>, vector<2x8x32xf32>
    %6 = vector.shape_cast %5 : vector<2x8x32xf32> to vector<16x32xf32>
    %c0_6 = arith.constant 0 : index
    %c0_7 = arith.constant 0 : index
    %c0_8 = arith.constant 0 : index
    %7 = vector.load %arg7[%c0_6, %c0_7, %c0_8] : memref<1x96x32xbf16, #tpu.memory_space<vmem>>, vector<1x96x32xbf16>
    %8 = vector.shape_cast %7 : vector<1x96x32xbf16> to vector<96x32xbf16>
    %c0_9 = arith.constant 0 : index
    %c0_10 = arith.constant 0 : index
    %c0_11 = arith.constant 0 : index
    %9 = vector.load %arg8[%c0_9, %c0_10, %c0_11] : memref<1x1x96xf32, #tpu.memory_space<vmem>>, vector<1x1x96xf32>
    %10 = vector.shape_cast %9 : vector<1x1x96xf32> to vector<1x96xf32>
    %11 = arith.truncf %4 : vector<20x32xf32> to vector<20x32xbf16>
    %cst = arith.constant dense<0.000000e+00> : vector<20x96xf32>
    %12 = tpu.matmul %11, %8, %cst {dimension_numbers = #tpu.dot_dimension_numbers<[1], [1], [0], [0], [0, 0, 1, 0], [], []>} : vector<20x32xbf16>, vector<96x32xbf16>, vector<20x96xf32> -> vector<20x96xf32>
    %13 = vector.broadcast %10 : vector<1x96xf32> to vector<20x96xf32>
    %14 = arith.addf %12, %13 : vector<20x96xf32>
    %15 = vector.extract_strided_slice %14 {offsets = [0, 0], sizes = [20, 32], strides = [1, 1]} : vector<20x96xf32> to vector<20x32xf32>
    %16 = vector.extract_strided_slice %14 {offsets = [0, 32], sizes = [20, 32], strides = [1, 1]} : vector<20x96xf32> to vector<20x32xf32>
    %17 = vector.extract_strided_slice %14 {offsets = [0, 64], sizes = [20, 32], strides = [1, 1]} : vector<20x96xf32> to vector<20x32xf32>
    %c0_12 = arith.constant 0 : index
    %c0_13 = arith.constant 0 : index
    %c0_14 = arith.constant 0 : index
    %18 = vector.load %arg5[%c0_12, %c0_13, %c0_14] : memref<2x1x10xf32, #tpu.memory_space<vmem>>, vector<2x1x10xf32>
    %c0_15 = arith.constant 0 : index
    %c0_16 = arith.constant 0 : index
    %19 = vector.load %arg4[%c0_15, %c0_16] : memref<10x10xf32, #tpu.memory_space<vmem>>, vector<10x10xf32>
    %c0_17 = arith.constant 0 : index
    %c0_18 = arith.constant 0 : index
    %c0_19 = arith.constant 0 : index
    %20 = vector.load %arg9[%c0_17, %c0_18, %c0_19] : memref<1x32x32xbf16, #tpu.memory_space<vmem>>, vector<1x32x32xbf16>
    %21 = vector.shape_cast %20 : vector<1x32x32xbf16> to vector<32x32xbf16>
    %c0_20 = arith.constant 0 : index
    %c0_21 = arith.constant 0 : index
    %c0_22 = arith.constant 0 : index
    %22 = vector.load %arg10[%c0_20, %c0_21, %c0_22] : memref<1x1x32xf32, #tpu.memory_space<vmem>>, vector<1x1x32xf32>
    %23 = vector.shape_cast %22 : vector<1x1x32xf32> to vector<1x32xf32>
    %24 = vector.extract_strided_slice %15 {offsets = [0, 0], sizes = [10, 32], strides = [1, 1]} : vector<20x32xf32> to vector<10x32xf32>
    %25 = vector.extract_strided_slice %16 {offsets = [0, 0], sizes = [10, 32], strides = [1, 1]} : vector<20x32xf32> to vector<10x32xf32>
    %26 = vector.extract_strided_slice %17 {offsets = [0, 0], sizes = [10, 32], strides = [1, 1]} : vector<20x32xf32> to vector<10x32xf32>
    %27 = vector.extract_strided_slice %18 {offsets = [0, 0, 0], sizes = [1, 1, 10], strides = [1, 1, 1]} : vector<2x1x10xf32> to vector<1x1x10xf32>
    %28 = vector.shape_cast %27 : vector<1x1x10xf32> to vector<1x10xf32>
    %29 = vector.broadcast %28 : vector<1x10xf32> to vector<10x10xf32>
    %30 = arith.addf %19, %29 : vector<10x10xf32>
    %31 = vector.extract_strided_slice %24 {offsets = [0, 0], sizes = [10, 8], strides = [1, 1]} : vector<10x32xf32> to vector<10x8xf32>
    %32 = arith.truncf %31 : vector<10x8xf32> to vector<10x8xbf16>
    %33 = vector.extract_strided_slice %25 {offsets = [0, 0], sizes = [10, 8], strides = [1, 1]} : vector<10x32xf32> to vector<10x8xf32>
    %34 = arith.truncf %33 : vector<10x8xf32> to vector<10x8xbf16>
    %cst_23 = arith.constant dense<0.000000e+00> : vector<10x10xf32>
    %35 = tpu.matmul %32, %34, %cst_23 {dimension_numbers = #tpu.dot_dimension_numbers<[1], [1], [0], [0], [0, 0, 1, 0], [], []>} : vector<10x8xbf16>, vector<10x8xbf16>, vector<10x10xf32> -> vector<10x10xf32>
    %36 = arith.addf %35, %30 : vector<10x10xf32>
    %cst_24 = arith.constant dense<0xFF800000> : vector<10xf32>
    %37 = vector.multi_reduction <maximumf>, %36, %cst_24 [1] : vector<10x10xf32> to vector<10xf32>
    %38 = vector.shape_cast %37 : vector<10xf32> to vector<10x1xf32>
    %39 = vector.broadcast %38 : vector<10x1xf32> to vector<10x10xf32>
    %40 = arith.subf %36, %39 : vector<10x10xf32>
    %41 = math.exp %40 : vector<10x10xf32>
    %cst_25 = arith.constant dense<0.000000e+00> : vector<10xf32>
    %42 = vector.multi_reduction <add>, %41, %cst_25 [1] : vector<10x10xf32> to vector<10xf32>
    %43 = vector.shape_cast %42 : vector<10xf32> to vector<10x1xf32>
    %cst_26 = arith.constant 1.000000e+00 : f32
    %44 = vector.broadcast %cst_26 : f32 to vector<10x1xf32>
    %45 = arith.divf %44, %43 : vector<10x1xf32>
    %46 = arith.truncf %41 : vector<10x10xf32> to vector<10x10xbf16>
    %47 = vector.extract_strided_slice %26 {offsets = [0, 0], sizes = [10, 8], strides = [1, 1]} : vector<10x32xf32> to vector<10x8xf32>
    %48 = arith.truncf %47 : vector<10x8xf32> to vector<10x8xbf16>
    %cst_27 = arith.constant dense<0.000000e+00> : vector<10x8xf32>
    %49 = tpu.matmul %46, %48, %cst_27 {dimension_numbers = #tpu.dot_dimension_numbers<[1], [0], [0], [1], [0, 0, 1, 1], [], []>} : vector<10x10xbf16>, vector<10x8xbf16>, vector<10x8xf32> -> vector<10x8xf32>
    %50 = vector.broadcast %45 : vector<10x1xf32> to vector<10x8xf32>
    %51 = arith.mulf %49, %50 : vector<10x8xf32>
    %c0_28 = arith.constant 0 : index
    %c0_29 = arith.constant 0 : index
    %52 = vector.load %arg29[%c0_28, %c0_29] : memref<20x32xf32, #tpu.memory_space<vmem>>, vector<10x8xf32>
    tpu.vector_store %arg29[%c0_28, %c0_29], %51 {strides = array<i32>} : memref<20x32xf32, #tpu.memory_space<vmem>>, vector<10x8xf32>,
    %53 = vector.extract_strided_slice %24 {offsets = [0, 8], sizes = [10, 8], strides = [1, 1]} : vector<10x32xf32> to vector<10x8xf32>
    %54 = arith.truncf %53 : vector<10x8xf32> to vector<10x8xbf16>
    %55 = vector.extract_strided_slice %25 {offsets = [0, 8], sizes = [10, 8], strides = [1, 1]} : vector<10x32xf32> to vector<10x8xf32>
    %56 = arith.truncf %55 : vector<10x8xf32> to vector<10x8xbf16>
    %cst_30 = arith.constant dense<0.000000e+00> : vector<10x10xf32>
    %57 = tpu.matmul %54, %56, %cst_30 {dimension_numbers = #tpu.dot_dimension_numbers<[1], [1], [0], [0], [0, 0, 1, 0], [], []>} : vector<10x8xbf16>, vector<10x8xbf16>, vector<10x10xf32> -> vector<10x10xf32>
    %58 = arith.addf %57, %30 : vector<10x10xf32>
    %cst_31 = arith.constant dense<0xFF800000> : vector<10xf32>
    %59 = vector.multi_reduction <maximumf>, %58, %cst_31 [1] : vector<10x10xf32> to vector<10xf32>
    %60 = vector.shape_cast %59 : vector<10xf32> to vector<10x1xf32>
    %61 = vector.broadcast %60 : vector<10x1xf32> to vector<10x10xf32>
    %62 = arith.subf %58, %61 : vector<10x10xf32>
    %63 = math.exp %62 : vector<10x10xf32>
    %cst_32 = arith.constant dense<0.000000e+00> : vector<10xf32>
    %64 = vector.multi_reduction <add>, %63, %cst_32 [1] : vector<10x10xf32> to vector<10xf32>
    %65 = vector.shape_cast %64 : vector<10xf32> to vector<10x1xf32>
    %cst_33 = arith.constant 1.000000e+00 : f32
    %66 = vector.broadcast %cst_33 : f32 to vector<10x1xf32>
    %67 = arith.divf %66, %65 : vector<10x1xf32>
    %68 = arith.truncf %63 : vector<10x10xf32> to vector<10x10xbf16>
    %69 = vector.extract_strided_slice %26 {offsets = [0, 8], sizes = [10, 8], strides = [1, 1]} : vector<10x32xf32> to vector<10x8xf32>
    %70 = arith.truncf %69 : vector<10x8xf32> to vector<10x8xbf16>
    %cst_34 = arith.constant dense<0.000000e+00> : vector<10x8xf32>
    %71 = tpu.matmul %68, %70, %cst_34 {dimension_numbers = #tpu.dot_dimension_numbers<[1], [0], [0], [1], [0, 0, 1, 1], [], []>} : vector<10x10xbf16>, vector<10x8xbf16>, vector<10x8xf32> -> vector<10x8xf32>
    %72 = vector.broadcast %67 : vector<10x1xf32> to vector<10x8xf32>
    %73 = arith.mulf %71, %72 : vector<10x8xf32>
    %c0_35 = arith.constant 0 : index
    %c8 = arith.constant 8 : index
    %74 = vector.load %arg29[%c0_35, %c8] : memref<20x32xf32, #tpu.memory_space<vmem>>, vector<10x8xf32>
    tpu.vector_store %arg29[%c0_35, %c8], %73 {strides = array<i32>} : memref<20x32xf32, #tpu.memory_space<vmem>>, vector<10x8xf32>,
    %75 = vector.extract_strided_slice %24 {offsets = [0, 16], sizes = [10, 8], strides = [1, 1]} : vector<10x32xf32> to vector<10x8xf32>
    %76 = arith.truncf %75 : vector<10x8xf32> to vector<10x8xbf16>
    %77 = vector.extract_strided_slice %25 {offsets = [0, 16], sizes = [10, 8], strides = [1, 1]} : vector<10x32xf32> to vector<10x8xf32>
    %78 = arith.truncf %77 : vector<10x8xf32> to vector<10x8xbf16>
    %cst_36 = arith.constant dense<0.000000e+00> : vector<10x10xf32>
    %79 = tpu.matmul %76, %78, %cst_36 {dimension_numbers = #tpu.dot_dimension_numbers<[1], [1], [0], [0], [0, 0, 1, 0], [], []>} : vector<10x8xbf16>, vector<10x8xbf16>, vector<10x10xf32> -> vector<10x10xf32>
    %80 = arith.addf %79, %30 : vector<10x10xf32>
    %cst_37 = arith.constant dense<0xFF800000> : vector<10xf32>
    %81 = vector.multi_reduction <maximumf>, %80, %cst_37 [1] : vector<10x10xf32> to vector<10xf32>
    %82 = vector.shape_cast %81 : vector<10xf32> to vector<10x1xf32>
    %83 = vector.broadcast %82 : vector<10x1xf32> to vector<10x10xf32>
    %84 = arith.subf %80, %83 : vector<10x10xf32>
    %85 = math.exp %84 : vector<10x10xf32>
    %cst_38 = arith.constant dense<0.000000e+00> : vector<10xf32>
    %86 = vector.multi_reduction <add>, %85, %cst_38 [1] : vector<10x10xf32> to vector<10xf32>
    %87 = vector.shape_cast %86 : vector<10xf32> to vector<10x1xf32>
    %cst_39 = arith.constant 1.000000e+00 : f32
    %88 = vector.broadcast %cst_39 : f32 to vector<10x1xf32>
    %89 = arith.divf %88, %87 : vector<10x1xf32>
    %90 = arith.truncf %85 : vector<10x10xf32> to vector<10x10xbf16>
    %91 = vector.extract_strided_slice %26 {offsets = [0, 16], sizes = [10, 8], strides = [1, 1]} : vector<10x32xf32> to vector<10x8xf32>
    %92 = arith.truncf %91 : vector<10x8xf32> to vector<10x8xbf16>
    %cst_40 = arith.constant dense<0.000000e+00> : vector<10x8xf32>
    %93 = tpu.matmul %90, %92, %cst_40 {dimension_numbers = #tpu.dot_dimension_numbers<[1], [0], [0], [1], [0, 0, 1, 1], [], []>} : vector<10x10xbf16>, vector<10x8xbf16>, vector<10x8xf32> -> vector<10x8xf32>
    %94 = vector.broadcast %89 : vector<10x1xf32> to vector<10x8xf32>
    %95 = arith.mulf %93, %94 : vector<10x8xf32>
    %c0_41 = arith.constant 0 : index
    %c16 = arith.constant 16 : index
    %96 = vector.load %arg29[%c0_41, %c16] : memref<20x32xf32, #tpu.memory_space<vmem>>, vector<10x8xf32>
    tpu.vector_store %arg29[%c0_41, %c16], %95 {strides = array<i32>} : memref<20x32xf32, #tpu.memory_space<vmem>>, vector<10x8xf32>,
    %97 = vector.extract_strided_slice %24 {offsets = [0, 24], sizes = [10, 8], strides = [1, 1]} : vector<10x32xf32> to vector<10x8xf32>
    %98 = arith.truncf %97 : vector<10x8xf32> to vector<10x8xbf16>
    %99 = vector.extract_strided_slice %25 {offsets = [0, 24], sizes = [10, 8], strides = [1, 1]} : vector<10x32xf32> to vector<10x8xf32>
    %100 = arith.truncf %99 : vector<10x8xf32> to vector<10x8xbf16>
    %cst_42 = arith.constant dense<0.000000e+00> : vector<10x10xf32>
    %101 = tpu.matmul %98, %100, %cst_42 {dimension_numbers = #tpu.dot_dimension_numbers<[1], [1], [0], [0], [0, 0, 1, 0], [], []>} : vector<10x8xbf16>, vector<10x8xbf16>, vector<10x10xf32> -> vector<10x10xf32>
    %102 = arith.addf %101, %30 : vector<10x10xf32>
    %cst_43 = arith.constant dense<0xFF800000> : vector<10xf32>
    %103 = vector.multi_reduction <maximumf>, %102, %cst_43 [1] : vector<10x10xf32> to vector<10xf32>
    %104 = vector.shape_cast %103 : vector<10xf32> to vector<10x1xf32>
    %105 = vector.broadcast %104 : vector<10x1xf32> to vector<10x10xf32>
    %106 = arith.subf %102, %105 : vector<10x10xf32>
    %107 = math.exp %106 : vector<10x10xf32>
    %cst_44 = arith.constant dense<0.000000e+00> : vector<10xf32>
    %108 = vector.multi_reduction <add>, %107, %cst_44 [1] : vector<10x10xf32> to vector<10xf32>
    %109 = vector.shape_cast %108 : vector<10xf32> to vector<10x1xf32>
    %cst_45 = arith.constant 1.000000e+00 : f32
    %110 = vector.broadcast %cst_45 : f32 to vector<10x1xf32>
    %111 = arith.divf %110, %109 : vector<10x1xf32>
    %112 = arith.truncf %107 : vector<10x10xf32> to vector<10x10xbf16>
    %113 = vector.extract_strided_slice %26 {offsets = [0, 24], sizes = [10, 8], strides = [1, 1]} : vector<10x32xf32> to vector<10x8xf32>
    %114 = arith.truncf %113 : vector<10x8xf32> to vector<10x8xbf16>
    %cst_46 = arith.constant dense<0.000000e+00> : vector<10x8xf32>
    %115 = tpu.matmul %112, %114, %cst_46 {dimension_numbers = #tpu.dot_dimension_numbers<[1], [0], [0], [1], [0, 0, 1, 1], [], []>} : vector<10x10xbf16>, vector<10x8xbf16>, vector<10x8xf32> -> vector<10x8xf32>
    %116 = vector.broadcast %111 : vector<10x1xf32> to vector<10x8xf32>
    %117 = arith.mulf %115, %116 : vector<10x8xf32>
    %c0_47 = arith.constant 0 : index
    %c24 = arith.constant 24 : index
    %118 = vector.load %arg29[%c0_47, %c24] : memref<20x32xf32, #tpu.memory_space<vmem>>, vector<10x8xf32>
    tpu.vector_store %arg29[%c0_47, %c24], %117 {strides = array<i32>} : memref<20x32xf32, #tpu.memory_space<vmem>>, vector<10x8xf32>,
    %119 = vector.extract_strided_slice %15 {offsets = [10, 0], sizes = [10, 32], strides = [1, 1]} : vector<20x32xf32> to vector<10x32xf32>
    %120 = vector.extract_strided_slice %16 {offsets = [10, 0], sizes = [10, 32], strides = [1, 1]} : vector<20x32xf32> to vector<10x32xf32>
    %121 = vector.extract_strided_slice %17 {offsets = [10, 0], sizes = [10, 32], strides = [1, 1]} : vector<20x32xf32> to vector<10x32xf32>
    %122 = vector.extract_strided_slice %18 {offsets = [1, 0, 0], sizes = [1, 1, 10], strides = [1, 1, 1]} : vector<2x1x10xf32> to vector<1x1x10xf32>
    %123 = vector.shape_cast %122 : vector<1x1x10xf32> to vector<1x10xf32>
    %124 = vector.broadcast %123 : vector<1x10xf32> to vector<10x10xf32>
    %125 = arith.addf %19, %124 : vector<10x10xf32>
    %126 = vector.extract_strided_slice %119 {offsets = [0, 0], sizes = [10, 8], strides = [1, 1]} : vector<10x32xf32> to vector<10x8xf32>
    %127 = arith.truncf %126 : vector<10x8xf32> to vector<10x8xbf16>
    %128 = vector.extract_strided_slice %120 {offsets = [0, 0], sizes = [10, 8], strides = [1, 1]} : vector<10x32xf32> to vector<10x8xf32>
    %129 = arith.truncf %128 : vector<10x8xf32> to vector<10x8xbf16>
    %cst_48 = arith.constant dense<0.000000e+00> : vector<10x10xf32>
    %130 = tpu.matmul %127, %129, %cst_48 {dimension_numbers = #tpu.dot_dimension_numbers<[1], [1], [0], [0], [0, 0, 1, 0], [], []>} : vector<10x8xbf16>, vector<10x8xbf16>, vector<10x10xf32> -> vector<10x10xf32>
    %131 = arith.addf %130, %125 : vector<10x10xf32>
    %cst_49 = arith.constant dense<0xFF800000> : vector<10xf32>
    %132 = vector.multi_reduction <maximumf>, %131, %cst_49 [1] : vector<10x10xf32> to vector<10xf32>
    %133 = vector.shape_cast %132 : vector<10xf32> to vector<10x1xf32>
    %134 = vector.broadcast %133 : vector<10x1xf32> to vector<10x10xf32>
    %135 = arith.subf %131, %134 : vector<10x10xf32>
    %136 = math.exp %135 : vector<10x10xf32>
    %cst_50 = arith.constant dense<0.000000e+00> : vector<10xf32>
    %137 = vector.multi_reduction <add>, %136, %cst_50 [1] : vector<10x10xf32> to vector<10xf32>
    %138 = vector.shape_cast %137 : vector<10xf32> to vector<10x1xf32>
    %cst_51 = arith.constant 1.000000e+00 : f32
    %139 = vector.broadcast %cst_51 : f32 to vector<10x1xf32>
    %140 = arith.divf %139, %138 : vector<10x1xf32>
    %141 = arith.truncf %136 : vector<10x10xf32> to vector<10x10xbf16>
    %142 = vector.extract_strided_slice %121 {offsets = [0, 0], sizes = [10, 8], strides = [1, 1]} : vector<10x32xf32> to vector<10x8xf32>
    %143 = arith.truncf %142 : vector<10x8xf32> to vector<10x8xbf16>
    %cst_52 = arith.constant dense<0.000000e+00> : vector<10x8xf32>
    %144 = tpu.matmul %141, %143, %cst_52 {dimension_numbers = #tpu.dot_dimension_numbers<[1], [0], [0], [1], [0, 0, 1, 1], [], []>} : vector<10x10xbf16>, vector<10x8xbf16>, vector<10x8xf32> -> vector<10x8xf32>
    %145 = vector.broadcast %140 : vector<10x1xf32> to vector<10x8xf32>
    %146 = arith.mulf %144, %145 : vector<10x8xf32>
    %c10 = arith.constant 10 : index
    %c0_53 = arith.constant 0 : index
    %147 = vector.load %arg29[%c10, %c0_53] : memref<20x32xf32, #tpu.memory_space<vmem>>, vector<10x8xf32>
    tpu.vector_store %arg29[%c10, %c0_53], %146 {strides = array<i32>} : memref<20x32xf32, #tpu.memory_space<vmem>>, vector<10x8xf32>,
    %148 = vector.extract_strided_slice %119 {offsets = [0, 8], sizes = [10, 8], strides = [1, 1]} : vector<10x32xf32> to vector<10x8xf32>
    %149 = arith.truncf %148 : vector<10x8xf32> to vector<10x8xbf16>
    %150 = vector.extract_strided_slice %120 {offsets = [0, 8], sizes = [10, 8], strides = [1, 1]} : vector<10x32xf32> to vector<10x8xf32>
    %151 = arith.truncf %150 : vector<10x8xf32> to vector<10x8xbf16>
    %cst_54 = arith.constant dense<0.000000e+00> : vector<10x10xf32>
    %152 = tpu.matmul %149, %151, %cst_54 {dimension_numbers = #tpu.dot_dimension_numbers<[1], [1], [0], [0], [0, 0, 1, 0], [], []>} : vector<10x8xbf16>, vector<10x8xbf16>, vector<10x10xf32> -> vector<10x10xf32>
    %153 = arith.addf %152, %125 : vector<10x10xf32>
    %cst_55 = arith.constant dense<0xFF800000> : vector<10xf32>
    %154 = vector.multi_reduction <maximumf>, %153, %cst_55 [1] : vector<10x10xf32> to vector<10xf32>
    %155 = vector.shape_cast %154 : vector<10xf32> to vector<10x1xf32>
    %156 = vector.broadcast %155 : vector<10x1xf32> to vector<10x10xf32>
    %157 = arith.subf %153, %156 : vector<10x10xf32>
    %158 = math.exp %157 : vector<10x10xf32>
    %cst_56 = arith.constant dense<0.000000e+00> : vector<10xf32>
    %159 = vector.multi_reduction <add>, %158, %cst_56 [1] : vector<10x10xf32> to vector<10xf32>
    %160 = vector.shape_cast %159 : vector<10xf32> to vector<10x1xf32>
    %cst_57 = arith.constant 1.000000e+00 : f32
    %161 = vector.broadcast %cst_57 : f32 to vector<10x1xf32>
    %162 = arith.divf %161, %160 : vector<10x1xf32>
    %163 = arith.truncf %158 : vector<10x10xf32> to vector<10x10xbf16>
    %164 = vector.extract_strided_slice %121 {offsets = [0, 8], sizes = [10, 8], strides = [1, 1]} : vector<10x32xf32> to vector<10x8xf32>
    %165 = arith.truncf %164 : vector<10x8xf32> to vector<10x8xbf16>
    %cst_58 = arith.constant dense<0.000000e+00> : vector<10x8xf32>
    %166 = tpu.matmul %163, %165, %cst_58 {dimension_numbers = #tpu.dot_dimension_numbers<[1], [0], [0], [1], [0, 0, 1, 1], [], []>} : vector<10x10xbf16>, vector<10x8xbf16>, vector<10x8xf32> -> vector<10x8xf32>
    %167 = vector.broadcast %162 : vector<10x1xf32> to vector<10x8xf32>
    %168 = arith.mulf %166, %167 : vector<10x8xf32>
    %c10_59 = arith.constant 10 : index
    %c8_60 = arith.constant 8 : index
    %169 = vector.load %arg29[%c10_59, %c8_60] : memref<20x32xf32, #tpu.memory_space<vmem>>, vector<10x8xf32>
    tpu.vector_store %arg29[%c10_59, %c8_60], %168 {strides = array<i32>} : memref<20x32xf32, #tpu.memory_space<vmem>>, vector<10x8xf32>,
    %170 = vector.extract_strided_slice %119 {offsets = [0, 16], sizes = [10, 8], strides = [1, 1]} : vector<10x32xf32> to vector<10x8xf32>
    %171 = arith.truncf %170 : vector<10x8xf32> to vector<10x8xbf16>
    %172 = vector.extract_strided_slice %120 {offsets = [0, 16], sizes = [10, 8], strides = [1, 1]} : vector<10x32xf32> to vector<10x8xf32>
    %173 = arith.truncf %172 : vector<10x8xf32> to vector<10x8xbf16>
    %cst_61 = arith.constant dense<0.000000e+00> : vector<10x10xf32>
    %174 = tpu.matmul %171, %173, %cst_61 {dimension_numbers = #tpu.dot_dimension_numbers<[1], [1], [0], [0], [0, 0, 1, 0], [], []>} : vector<10x8xbf16>, vector<10x8xbf16>, vector<10x10xf32> -> vector<10x10xf32>
    %175 = arith.addf %174, %125 : vector<10x10xf32>
    %cst_62 = arith.constant dense<0xFF800000> : vector<10xf32>
    %176 = vector.multi_reduction <maximumf>, %175, %cst_62 [1] : vector<10x10xf32> to vector<10xf32>
    %177 = vector.shape_cast %176 : vector<10xf32> to vector<10x1xf32>
    %178 = vector.broadcast %177 : vector<10x1xf32> to vector<10x10xf32>
    %179 = arith.subf %175, %178 : vector<10x10xf32>
    %180 = math.exp %179 : vector<10x10xf32>
    %cst_63 = arith.constant dense<0.000000e+00> : vector<10xf32>
    %181 = vector.multi_reduction <add>, %180, %cst_63 [1] : vector<10x10xf32> to vector<10xf32>
    %182 = vector.shape_cast %181 : vector<10xf32> to vector<10x1xf32>
    %cst_64 = arith.constant 1.000000e+00 : f32
    %183 = vector.broadcast %cst_64 : f32 to vector<10x1xf32>
    %184 = arith.divf %183, %182 : vector<10x1xf32>
    %185 = arith.truncf %180 : vector<10x10xf32> to vector<10x10xbf16>
    %186 = vector.extract_strided_slice %121 {offsets = [0, 16], sizes = [10, 8], strides = [1, 1]} : vector<10x32xf32> to vector<10x8xf32>
    %187 = arith.truncf %186 : vector<10x8xf32> to vector<10x8xbf16>
    %cst_65 = arith.constant dense<0.000000e+00> : vector<10x8xf32>
    %188 = tpu.matmul %185, %187, %cst_65 {dimension_numbers = #tpu.dot_dimension_numbers<[1], [0], [0], [1], [0, 0, 1, 1], [], []>} : vector<10x10xbf16>, vector<10x8xbf16>, vector<10x8xf32> -> vector<10x8xf32>
    %189 = vector.broadcast %184 : vector<10x1xf32> to vector<10x8xf32>
    %190 = arith.mulf %188, %189 : vector<10x8xf32>
    %c10_66 = arith.constant 10 : index
    %c16_67 = arith.constant 16 : index
    %191 = vector.load %arg29[%c10_66, %c16_67] : memref<20x32xf32, #tpu.memory_space<vmem>>, vector<10x8xf32>
    tpu.vector_store %arg29[%c10_66, %c16_67], %190 {strides = array<i32>} : memref<20x32xf32, #tpu.memory_space<vmem>>, vector<10x8xf32>,
    %192 = vector.extract_strided_slice %119 {offsets = [0, 24], sizes = [10, 8], strides = [1, 1]} : vector<10x32xf32> to vector<10x8xf32>
    %193 = arith.truncf %192 : vector<10x8xf32> to vector<10x8xbf16>
    %194 = vector.extract_strided_slice %120 {offsets = [0, 24], sizes = [10, 8], strides = [1, 1]} : vector<10x32xf32> to vector<10x8xf32>
    %195 = arith.truncf %194 : vector<10x8xf32> to vector<10x8xbf16>
    %cst_68 = arith.constant dense<0.000000e+00> : vector<10x10xf32>
    %196 = tpu.matmul %193, %195, %cst_68 {dimension_numbers = #tpu.dot_dimension_numbers<[1], [1], [0], [0], [0, 0, 1, 0], [], []>} : vector<10x8xbf16>, vector<10x8xbf16>, vector<10x10xf32> -> vector<10x10xf32>
    %197 = arith.addf %196, %125 : vector<10x10xf32>
    %cst_69 = arith.constant dense<0xFF800000> : vector<10xf32>
    %198 = vector.multi_reduction <maximumf>, %197, %cst_69 [1] : vector<10x10xf32> to vector<10xf32>
    %199 = vector.shape_cast %198 : vector<10xf32> to vector<10x1xf32>
    %200 = vector.broadcast %199 : vector<10x1xf32> to vector<10x10xf32>
    %201 = arith.subf %197, %200 : vector<10x10xf32>
    %202 = math.exp %201 : vector<10x10xf32>
    %cst_70 = arith.constant dense<0.000000e+00> : vector<10xf32>
    %203 = vector.multi_reduction <add>, %202, %cst_70 [1] : vector<10x10xf32> to vector<10xf32>
    %204 = vector.shape_cast %203 : vector<10xf32> to vector<10x1xf32>
    %cst_71 = arith.constant 1.000000e+00 : f32
    %205 = vector.broadcast %cst_71 : f32 to vector<10x1xf32>
    %206 = arith.divf %205, %204 : vector<10x1xf32>
    %207 = arith.truncf %202 : vector<10x10xf32> to vector<10x10xbf16>
    %208 = vector.extract_strided_slice %121 {offsets = [0, 24], sizes = [10, 8], strides = [1, 1]} : vector<10x32xf32> to vector<10x8xf32>
    %209 = arith.truncf %208 : vector<10x8xf32> to vector<10x8xbf16>
    %cst_72 = arith.constant dense<0.000000e+00> : vector<10x8xf32>
    %210 = tpu.matmul %207, %209, %cst_72 {dimension_numbers = #tpu.dot_dimension_numbers<[1], [0], [0], [1], [0, 0, 1, 1], [], []>} : vector<10x10xbf16>, vector<10x8xbf16>, vector<10x8xf32> -> vector<10x8xf32>
    %211 = vector.broadcast %206 : vector<10x1xf32> to vector<10x8xf32>
    %212 = arith.mulf %210, %211 : vector<10x8xf32>
    %c10_73 = arith.constant 10 : index
    %c24_74 = arith.constant 24 : index
    %213 = vector.load %arg29[%c10_73, %c24_74] : memref<20x32xf32, #tpu.memory_space<vmem>>, vector<10x8xf32>
    tpu.vector_store %arg29[%c10_73, %c24_74], %212 {strides = array<i32>} : memref<20x32xf32, #tpu.memory_space<vmem>>, vector<10x8xf32>,
    %c0_75 = arith.constant 0 : index
    %c0_76 = arith.constant 0 : index
    %214 = vector.load %arg29[%c0_75, %c0_76] : memref<20x32xf32, #tpu.memory_space<vmem>>, vector<20x32xf32>
    %215 = arith.truncf %214 : vector<20x32xf32> to vector<20x32xbf16>
    %cst_77 = arith.constant dense<0.000000e+00> : vector<20x32xf32>
    %216 = tpu.matmul %215, %21, %cst_77 {dimension_numbers = #tpu.dot_dimension_numbers<[1], [1], [0], [0], [0, 0, 1, 0], [], []>} : vector<20x32xbf16>, vector<32x32xbf16>, vector<20x32xf32> -> vector<20x32xf32>
    %217 = vector.broadcast %23 : vector<1x32xf32> to vector<20x32xf32>
    %218 = arith.addf %216, %217 : vector<20x32xf32>
    %219 = arith.addf %4, %218 : vector<20x32xf32>
    %c0_78 = arith.constant 0 : index
    %c0_79 = arith.constant 0 : index
    %c0_80 = arith.constant 0 : index
    %220 = vector.load %arg11[%c0_78, %c0_79, %c0_80] : memref<1x1x32xf32, #tpu.memory_space<vmem>>, vector<1x1x32xf32>
    %221 = vector.shape_cast %220 : vector<1x1x32xf32> to vector<1x32xf32>
    %c0_81 = arith.constant 0 : index
    %c0_82 = arith.constant 0 : index
    %c0_83 = arith.constant 0 : index
    %222 = vector.load %arg12[%c0_81, %c0_82, %c0_83] : memref<1x1x32xf32, #tpu.memory_space<vmem>>, vector<1x1x32xf32>
    %223 = vector.shape_cast %222 : vector<1x1x32xf32> to vector<1x32xf32>
    %cst_84 = arith.constant dense<0.000000e+00> : vector<20xf32>
    %224 = vector.multi_reduction <add>, %219, %cst_84 [1] : vector<20x32xf32> to vector<20xf32>
    %225 = vector.shape_cast %224 : vector<20xf32> to vector<20x1xf32>
    %cst_85 = arith.constant 3.200000e+01 : f32
    %226 = vector.broadcast %cst_85 : f32 to vector<20x1xf32>
    %227 = arith.divf %225, %226 : vector<20x1xf32>
    %228 = vector.broadcast %227 : vector<20x1xf32> to vector<20x32xf32>
    %229 = arith.subf %219, %228 : vector<20x32xf32>
    %230 = arith.mulf %229, %229 : vector<20x32xf32>
    %cst_86 = arith.constant dense<0.000000e+00> : vector<20xf32>
    %231 = vector.multi_reduction <add>, %230, %cst_86 [1] : vector<20x32xf32> to vector<20xf32>
    %232 = vector.shape_cast %231 : vector<20xf32> to vector<20x1xf32>
    %cst_87 = arith.constant 3.200000e+01 : f32
    %233 = vector.broadcast %cst_87 : f32 to vector<20x1xf32>
    %234 = arith.divf %232, %233 : vector<20x1xf32>
    %235 = vector.broadcast %227 : vector<20x1xf32> to vector<20x32xf32>
    %236 = arith.subf %219, %235 : vector<20x32xf32>
    %cst_88 = arith.constant 9.99999974E-6 : f32
    %237 = vector.broadcast %cst_88 : f32 to vector<20x1xf32>
    %238 = arith.addf %234, %237 : vector<20x1xf32>
    %239 = math.rsqrt %238 : vector<20x1xf32>
    %240 = vector.broadcast %239 : vector<20x1xf32> to vector<20x32xf32>
    %241 = arith.mulf %236, %240 : vector<20x32xf32>
    %242 = vector.broadcast %221 : vector<1x32xf32> to vector<20x32xf32>
    %243 = arith.mulf %241, %242 : vector<20x32xf32>
    %244 = vector.broadcast %223 : vector<1x32xf32> to vector<20x32xf32>
    %245 = arith.addf %243, %244 : vector<20x32xf32>
    %c0_89 = arith.constant 0 : index
    %c0_90 = arith.constant 0 : index
    %c0_91 = arith.constant 0 : index
    %246 = vector.load %arg13[%c0_89, %c0_90, %c0_91] : memref<1x32x32xbf16, #tpu.memory_space<vmem>>, vector<1x32x32xbf16>
    %247 = vector.shape_cast %246 : vector<1x32x32xbf16> to vector<32x32xbf16>
    %c0_92 = arith.constant 0 : index
    %c0_93 = arith.constant 0 : index
    %c0_94 = arith.constant 0 : index
    %248 = vector.load %arg14[%c0_92, %c0_93, %c0_94] : memref<1x1x32xf32, #tpu.memory_space<vmem>>, vector<1x1x32xf32>
    %249 = vector.shape_cast %248 : vector<1x1x32xf32> to vector<1x32xf32>
    %250 = arith.truncf %245 : vector<20x32xf32> to vector<20x32xbf16>
    %cst_95 = arith.constant dense<0.000000e+00> : vector<20x32xf32>
    %251 = tpu.matmul %250, %247, %cst_95 {dimension_numbers = #tpu.dot_dimension_numbers<[1], [1], [0], [0], [0, 0, 1, 0], [], []>} : vector<20x32xbf16>, vector<32x32xbf16>, vector<20x32xf32> -> vector<20x32xf32>
    %252 = vector.broadcast %249 : vector<1x32xf32> to vector<20x32xf32>
    %253 = arith.addf %251, %252 : vector<20x32xf32>
    %c0_96 = arith.constant 0 : index
    %c0_97 = arith.constant 0 : index
    %c0_98 = arith.constant 0 : index
    %254 = vector.load %arg15[%c0_96, %c0_97, %c0_98] : memref<1x64x32xbf16, #tpu.memory_space<vmem>>, vector<1x64x32xbf16>
    %255 = vector.shape_cast %254 : vector<1x64x32xbf16> to vector<64x32xbf16>
    %c0_99 = arith.constant 0 : index
    %c0_100 = arith.constant 0 : index
    %c0_101 = arith.constant 0 : index
    %256 = vector.load %arg16[%c0_99, %c0_100, %c0_101] : memref<1x1x64xf32, #tpu.memory_space<vmem>>, vector<1x1x64xf32>
    %257 = vector.shape_cast %256 : vector<1x1x64xf32> to vector<1x64xf32>
    %258 = arith.truncf %6 : vector<16x32xf32> to vector<16x32xbf16>
    %cst_102 = arith.constant dense<0.000000e+00> : vector<16x64xf32>
    %259 = tpu.matmul %258, %255, %cst_102 {dimension_numbers = #tpu.dot_dimension_numbers<[1], [1], [0], [0], [0, 0, 1, 0], [], []>} : vector<16x32xbf16>, vector<64x32xbf16>, vector<16x64xf32> -> vector<16x64xf32>
    %260 = vector.broadcast %257 : vector<1x64xf32> to vector<16x64xf32>
    %261 = arith.addf %259, %260 : vector<16x64xf32>
    %262 = vector.extract_strided_slice %261 {offsets = [0, 0], sizes = [16, 32], strides = [1, 1]} : vector<16x64xf32> to vector<16x32xf32>
    %263 = vector.extract_strided_slice %261 {offsets = [0, 32], sizes = [16, 32], strides = [1, 1]} : vector<16x64xf32> to vector<16x32xf32>
    %c0_103 = arith.constant 0 : index
    %c0_104 = arith.constant 0 : index
    %c0_105 = arith.constant 0 : index
    %264 = vector.load %arg6[%c0_103, %c0_104, %c0_105] : memref<2x1x8xf32, #tpu.memory_space<vmem>>, vector<2x1x8xf32>
    %c0_106 = arith.constant 0 : index
    %c0_107 = arith.constant 0 : index
    %c0_108 = arith.constant 0 : index
    %265 = vector.load %arg17[%c0_106, %c0_107, %c0_108] : memref<1x32x32xbf16, #tpu.memory_space<vmem>>, vector<1x32x32xbf16>
    %266 = vector.shape_cast %265 : vector<1x32x32xbf16> to vector<32x32xbf16>
    %c0_109 = arith.constant 0 : index
    %c0_110 = arith.constant 0 : index
    %c0_111 = arith.constant 0 : index
    %267 = vector.load %arg18[%c0_109, %c0_110, %c0_111] : memref<1x1x32xf32, #tpu.memory_space<vmem>>, vector<1x1x32xf32>
    %268 = vector.shape_cast %267 : vector<1x1x32xf32> to vector<1x32xf32>
    %269 = vector.extract_strided_slice %253 {offsets = [0, 0], sizes = [10, 32], strides = [1, 1]} : vector<20x32xf32> to vector<10x32xf32>
    %270 = vector.extract_strided_slice %262 {offsets = [0, 0], sizes = [8, 32], strides = [1, 1]} : vector<16x32xf32> to vector<8x32xf32>
    %271 = vector.extract_strided_slice %263 {offsets = [0, 0], sizes = [8, 32], strides = [1, 1]} : vector<16x32xf32> to vector<8x32xf32>
    %272 = vector.extract_strided_slice %264 {offsets = [0, 0, 0], sizes = [1, 1, 8], strides = [1, 1, 1]} : vector<2x1x8xf32> to vector<1x1x8xf32>
    %273 = vector.shape_cast %272 : vector<1x1x8xf32> to vector<1x8xf32>
    %cst_112 = arith.constant 0.000000e+00 : f32
    %274 = vector.broadcast %cst_112 : f32 to vector<1x8xf32>
    %275 = arith.addf %274, %273 : vector<1x8xf32>
    %276 = vector.extract_strided_slice %269 {offsets = [0, 0], sizes = [10, 8], strides = [1, 1]} : vector<10x32xf32> to vector<10x8xf32>
    %277 = arith.truncf %276 : vector<10x8xf32> to vector<10x8xbf16>
    %278 = vector.extract_strided_slice %270 {offsets = [0, 0], sizes = [8, 8], strides = [1, 1]} : vector<8x32xf32> to vector<8x8xf32>
    %279 = arith.truncf %278 : vector<8x8xf32> to vector<8x8xbf16>
    %cst_113 = arith.constant dense<0.000000e+00> : vector<10x8xf32>
    %280 = tpu.matmul %277, %279, %cst_113 {dimension_numbers = #tpu.dot_dimension_numbers<[1], [1], [0], [0], [0, 0, 1, 0], [], []>} : vector<10x8xbf16>, vector<8x8xbf16>, vector<10x8xf32> -> vector<10x8xf32>
    %281 = vector.broadcast %275 : vector<1x8xf32> to vector<10x8xf32>
    %282 = arith.addf %280, %281 : vector<10x8xf32>
    %cst_114 = arith.constant dense<0xFF800000> : vector<10xf32>
    %283 = vector.multi_reduction <maximumf>, %282, %cst_114 [1] : vector<10x8xf32> to vector<10xf32>
    %284 = vector.shape_cast %283 : vector<10xf32> to vector<10x1xf32>
    %285 = vector.broadcast %284 : vector<10x1xf32> to vector<10x8xf32>
    %286 = arith.subf %282, %285 : vector<10x8xf32>
    %287 = math.exp %286 : vector<10x8xf32>
    %cst_115 = arith.constant dense<0.000000e+00> : vector<10xf32>
    %288 = vector.multi_reduction <add>, %287, %cst_115 [1] : vector<10x8xf32> to vector<10xf32>
    %289 = vector.shape_cast %288 : vector<10xf32> to vector<10x1xf32>
    %cst_116 = arith.constant 1.000000e+00 : f32
    %290 = vector.broadcast %cst_116 : f32 to vector<10x1xf32>
    %291 = arith.divf %290, %289 : vector<10x1xf32>
    %292 = arith.truncf %287 : vector<10x8xf32> to vector<10x8xbf16>
    %293 = vector.extract_strided_slice %271 {offsets = [0, 0], sizes = [8, 8], strides = [1, 1]} : vector<8x32xf32> to vector<8x8xf32>
    %294 = arith.truncf %293 : vector<8x8xf32> to vector<8x8xbf16>
    %cst_117 = arith.constant dense<0.000000e+00> : vector<10x8xf32>
    %295 = tpu.matmul %292, %294, %cst_117 {dimension_numbers = #tpu.dot_dimension_numbers<[1], [0], [0], [1], [0, 0, 1, 1], [], []>} : vector<10x8xbf16>, vector<8x8xbf16>, vector<10x8xf32> -> vector<10x8xf32>
    %296 = vector.broadcast %291 : vector<10x1xf32> to vector<10x8xf32>
    %297 = arith.mulf %295, %296 : vector<10x8xf32>
    %c0_118 = arith.constant 0 : index
    %c0_119 = arith.constant 0 : index
    %298 = vector.load %arg29[%c0_118, %c0_119] : memref<20x32xf32, #tpu.memory_space<vmem>>, vector<10x8xf32>
    tpu.vector_store %arg29[%c0_118, %c0_119], %297 {strides = array<i32>} : memref<20x32xf32, #tpu.memory_space<vmem>>, vector<10x8xf32>,
    %299 = vector.extract_strided_slice %269 {offsets = [0, 8], sizes = [10, 8], strides = [1, 1]} : vector<10x32xf32> to vector<10x8xf32>
    %300 = arith.truncf %299 : vector<10x8xf32> to vector<10x8xbf16>
    %301 = vector.extract_strided_slice %270 {offsets = [0, 8], sizes = [8, 8], strides = [1, 1]} : vector<8x32xf32> to vector<8x8xf32>
    %302 = arith.truncf %301 : vector<8x8xf32> to vector<8x8xbf16>
    %cst_120 = arith.constant dense<0.000000e+00> : vector<10x8xf32>
    %303 = tpu.matmul %300, %302, %cst_120 {dimension_numbers = #tpu.dot_dimension_numbers<[1], [1], [0], [0], [0, 0, 1, 0], [], []>} : vector<10x8xbf16>, vector<8x8xbf16>, vector<10x8xf32> -> vector<10x8xf32>
    %304 = vector.broadcast %275 : vector<1x8xf32> to vector<10x8xf32>
    %305 = arith.addf %303, %304 : vector<10x8xf32>
    %cst_121 = arith.constant dense<0xFF800000> : vector<10xf32>
    %306 = vector.multi_reduction <maximumf>, %305, %cst_121 [1] : vector<10x8xf32> to vector<10xf32>
    %307 = vector.shape_cast %306 : vector<10xf32> to vector<10x1xf32>
    %308 = vector.broadcast %307 : vector<10x1xf32> to vector<10x8xf32>
    %309 = arith.subf %305, %308 : vector<10x8xf32>
    %310 = math.exp %309 : vector<10x8xf32>
    %cst_122 = arith.constant dense<0.000000e+00> : vector<10xf32>
    %311 = vector.multi_reduction <add>, %310, %cst_122 [1] : vector<10x8xf32> to vector<10xf32>
    %312 = vector.shape_cast %311 : vector<10xf32> to vector<10x1xf32>
    %cst_123 = arith.constant 1.000000e+00 : f32
    %313 = vector.broadcast %cst_123 : f32 to vector<10x1xf32>
    %314 = arith.divf %313, %312 : vector<10x1xf32>
    %315 = arith.truncf %310 : vector<10x8xf32> to vector<10x8xbf16>
    %316 = vector.extract_strided_slice %271 {offsets = [0, 8], sizes = [8, 8], strides = [1, 1]} : vector<8x32xf32> to vector<8x8xf32>
    %317 = arith.truncf %316 : vector<8x8xf32> to vector<8x8xbf16>
    %cst_124 = arith.constant dense<0.000000e+00> : vector<10x8xf32>
    %318 = tpu.matmul %315, %317, %cst_124 {dimension_numbers = #tpu.dot_dimension_numbers<[1], [0], [0], [1], [0, 0, 1, 1], [], []>} : vector<10x8xbf16>, vector<8x8xbf16>, vector<10x8xf32> -> vector<10x8xf32>
    %319 = vector.broadcast %314 : vector<10x1xf32> to vector<10x8xf32>
    %320 = arith.mulf %318, %319 : vector<10x8xf32>
    %c0_125 = arith.constant 0 : index
    %c8_126 = arith.constant 8 : index
    %321 = vector.load %arg29[%c0_125, %c8_126] : memref<20x32xf32, #tpu.memory_space<vmem>>, vector<10x8xf32>
    tpu.vector_store %arg29[%c0_125, %c8_126], %320 {strides = array<i32>} : memref<20x32xf32, #tpu.memory_space<vmem>>, vector<10x8xf32>,
    %322 = vector.extract_strided_slice %269 {offsets = [0, 16], sizes = [10, 8], strides = [1, 1]} : vector<10x32xf32> to vector<10x8xf32>
    %323 = arith.truncf %322 : vector<10x8xf32> to vector<10x8xbf16>
    %324 = vector.extract_strided_slice %270 {offsets = [0, 16], sizes = [8, 8], strides = [1, 1]} : vector<8x32xf32> to vector<8x8xf32>
    %325 = arith.truncf %324 : vector<8x8xf32> to vector<8x8xbf16>
    %cst_127 = arith.constant dense<0.000000e+00> : vector<10x8xf32>
    %326 = tpu.matmul %323, %325, %cst_127 {dimension_numbers = #tpu.dot_dimension_numbers<[1], [1], [0], [0], [0, 0, 1, 0], [], []>} : vector<10x8xbf16>, vector<8x8xbf16>, vector<10x8xf32> -> vector<10x8xf32>
    %327 = vector.broadcast %275 : vector<1x8xf32> to vector<10x8xf32>
    %328 = arith.addf %326, %327 : vector<10x8xf32>
    %cst_128 = arith.constant dense<0xFF800000> : vector<10xf32>
    %329 = vector.multi_reduction <maximumf>, %328, %cst_128 [1] : vector<10x8xf32> to vector<10xf32>
    %330 = vector.shape_cast %329 : vector<10xf32> to vector<10x1xf32>
    %331 = vector.broadcast %330 : vector<10x1xf32> to vector<10x8xf32>
    %332 = arith.subf %328, %331 : vector<10x8xf32>
    %333 = math.exp %332 : vector<10x8xf32>
    %cst_129 = arith.constant dense<0.000000e+00> : vector<10xf32>
    %334 = vector.multi_reduction <add>, %333, %cst_129 [1] : vector<10x8xf32> to vector<10xf32>
    %335 = vector.shape_cast %334 : vector<10xf32> to vector<10x1xf32>
    %cst_130 = arith.constant 1.000000e+00 : f32
    %336 = vector.broadcast %cst_130 : f32 to vector<10x1xf32>
    %337 = arith.divf %336, %335 : vector<10x1xf32>
    %338 = arith.truncf %333 : vector<10x8xf32> to vector<10x8xbf16>
    %339 = vector.extract_strided_slice %271 {offsets = [0, 16], sizes = [8, 8], strides = [1, 1]} : vector<8x32xf32> to vector<8x8xf32>
    %340 = arith.truncf %339 : vector<8x8xf32> to vector<8x8xbf16>
    %cst_131 = arith.constant dense<0.000000e+00> : vector<10x8xf32>
    %341 = tpu.matmul %338, %340, %cst_131 {dimension_numbers = #tpu.dot_dimension_numbers<[1], [0], [0], [1], [0, 0, 1, 1], [], []>} : vector<10x8xbf16>, vector<8x8xbf16>, vector<10x8xf32> -> vector<10x8xf32>
    %342 = vector.broadcast %337 : vector<10x1xf32> to vector<10x8xf32>
    %343 = arith.mulf %341, %342 : vector<10x8xf32>
    %c0_132 = arith.constant 0 : index
    %c16_133 = arith.constant 16 : index
    %344 = vector.load %arg29[%c0_132, %c16_133] : memref<20x32xf32, #tpu.memory_space<vmem>>, vector<10x8xf32>
    tpu.vector_store %arg29[%c0_132, %c16_133], %343 {strides = array<i32>} : memref<20x32xf32, #tpu.memory_space<vmem>>, vector<10x8xf32>,
    %345 = vector.extract_strided_slice %269 {offsets = [0, 24], sizes = [10, 8], strides = [1, 1]} : vector<10x32xf32> to vector<10x8xf32>
    %346 = arith.truncf %345 : vector<10x8xf32> to vector<10x8xbf16>
    %347 = vector.extract_strided_slice %270 {offsets = [0, 24], sizes = [8, 8], strides = [1, 1]} : vector<8x32xf32> to vector<8x8xf32>
    %348 = arith.truncf %347 : vector<8x8xf32> to vector<8x8xbf16>
    %cst_134 = arith.constant dense<0.000000e+00> : vector<10x8xf32>
    %349 = tpu.matmul %346, %348, %cst_134 {dimension_numbers = #tpu.dot_dimension_numbers<[1], [1], [0], [0], [0, 0, 1, 0], [], []>} : vector<10x8xbf16>, vector<8x8xbf16>, vector<10x8xf32> -> vector<10x8xf32>
    %350 = vector.broadcast %275 : vector<1x8xf32> to vector<10x8xf32>
    %351 = arith.addf %349, %350 : vector<10x8xf32>
    %cst_135 = arith.constant dense<0xFF800000> : vector<10xf32>
    %352 = vector.multi_reduction <maximumf>, %351, %cst_135 [1] : vector<10x8xf32> to vector<10xf32>
    %353 = vector.shape_cast %352 : vector<10xf32> to vector<10x1xf32>
    %354 = vector.broadcast %353 : vector<10x1xf32> to vector<10x8xf32>
    %355 = arith.subf %351, %354 : vector<10x8xf32>
    %356 = math.exp %355 : vector<10x8xf32>
    %cst_136 = arith.constant dense<0.000000e+00> : vector<10xf32>
    %357 = vector.multi_reduction <add>, %356, %cst_136 [1] : vector<10x8xf32> to vector<10xf32>
    %358 = vector.shape_cast %357 : vector<10xf32> to vector<10x1xf32>
    %cst_137 = arith.constant 1.000000e+00 : f32
    %359 = vector.broadcast %cst_137 : f32 to vector<10x1xf32>
    %360 = arith.divf %359, %358 : vector<10x1xf32>
    %361 = arith.truncf %356 : vector<10x8xf32> to vector<10x8xbf16>
    %362 = vector.extract_strided_slice %271 {offsets = [0, 24], sizes = [8, 8], strides = [1, 1]} : vector<8x32xf32> to vector<8x8xf32>
    %363 = arith.truncf %362 : vector<8x8xf32> to vector<8x8xbf16>
    %cst_138 = arith.constant dense<0.000000e+00> : vector<10x8xf32>
    %364 = tpu.matmul %361, %363, %cst_138 {dimension_numbers = #tpu.dot_dimension_numbers<[1], [0], [0], [1], [0, 0, 1, 1], [], []>} : vector<10x8xbf16>, vector<8x8xbf16>, vector<10x8xf32> -> vector<10x8xf32>
    %365 = vector.broadcast %360 : vector<10x1xf32> to vector<10x8xf32>
    %366 = arith.mulf %364, %365 : vector<10x8xf32>
    %c0_139 = arith.constant 0 : index
    %c24_140 = arith.constant 24 : index
    %367 = vector.load %arg29[%c0_139, %c24_140] : memref<20x32xf32, #tpu.memory_space<vmem>>, vector<10x8xf32>
    tpu.vector_store %arg29[%c0_139, %c24_140], %366 {strides = array<i32>} : memref<20x32xf32, #tpu.memory_space<vmem>>, vector<10x8xf32>,
    %368 = vector.extract_strided_slice %253 {offsets = [10, 0], sizes = [10, 32], strides = [1, 1]} : vector<20x32xf32> to vector<10x32xf32>
    %369 = vector.extract_strided_slice %262 {offsets = [8, 0], sizes = [8, 32], strides = [1, 1]} : vector<16x32xf32> to vector<8x32xf32>
    %370 = vector.extract_strided_slice %263 {offsets = [8, 0], sizes = [8, 32], strides = [1, 1]} : vector<16x32xf32> to vector<8x32xf32>
    %371 = vector.extract_strided_slice %264 {offsets = [1, 0, 0], sizes = [1, 1, 8], strides = [1, 1, 1]} : vector<2x1x8xf32> to vector<1x1x8xf32>
    %372 = vector.shape_cast %371 : vector<1x1x8xf32> to vector<1x8xf32>
    %cst_141 = arith.constant 0.000000e+00 : f32
    %373 = vector.broadcast %cst_141 : f32 to vector<1x8xf32>
    %374 = arith.addf %373, %372 : vector<1x8xf32>
    %375 = vector.extract_strided_slice %368 {offsets = [0, 0], sizes = [10, 8], strides = [1, 1]} : vector<10x32xf32> to vector<10x8xf32>
    %376 = arith.truncf %375 : vector<10x8xf32> to vector<10x8xbf16>
    %377 = vector.extract_strided_slice %369 {offsets = [0, 0], sizes = [8, 8], strides = [1, 1]} : vector<8x32xf32> to vector<8x8xf32>
    %378 = arith.truncf %377 : vector<8x8xf32> to vector<8x8xbf16>
    %cst_142 = arith.constant dense<0.000000e+00> : vector<10x8xf32>
    %379 = tpu.matmul %376, %378, %cst_142 {dimension_numbers = #tpu.dot_dimension_numbers<[1], [1], [0], [0], [0, 0, 1, 0], [], []>} : vector<10x8xbf16>, vector<8x8xbf16>, vector<10x8xf32> -> vector<10x8xf32>
    %380 = vector.broadcast %374 : vector<1x8xf32> to vector<10x8xf32>
    %381 = arith.addf %379, %380 : vector<10x8xf32>
    %cst_143 = arith.constant dense<0xFF800000> : vector<10xf32>
    %382 = vector.multi_reduction <maximumf>, %381, %cst_143 [1] : vector<10x8xf32> to vector<10xf32>
    %383 = vector.shape_cast %382 : vector<10xf32> to vector<10x1xf32>
    %384 = vector.broadcast %383 : vector<10x1xf32> to vector<10x8xf32>
    %385 = arith.subf %381, %384 : vector<10x8xf32>
    %386 = math.exp %385 : vector<10x8xf32>
    %cst_144 = arith.constant dense<0.000000e+00> : vector<10xf32>
    %387 = vector.multi_reduction <add>, %386, %cst_144 [1] : vector<10x8xf32> to vector<10xf32>
    %388 = vector.shape_cast %387 : vector<10xf32> to vector<10x1xf32>
    %cst_145 = arith.constant 1.000000e+00 : f32
    %389 = vector.broadcast %cst_145 : f32 to vector<10x1xf32>
    %390 = arith.divf %389, %388 : vector<10x1xf32>
    %391 = arith.truncf %386 : vector<10x8xf32> to vector<10x8xbf16>
    %392 = vector.extract_strided_slice %370 {offsets = [0, 0], sizes = [8, 8], strides = [1, 1]} : vector<8x32xf32> to vector<8x8xf32>
    %393 = arith.truncf %392 : vector<8x8xf32> to vector<8x8xbf16>
    %cst_146 = arith.constant dense<0.000000e+00> : vector<10x8xf32>
    %394 = tpu.matmul %391, %393, %cst_146 {dimension_numbers = #tpu.dot_dimension_numbers<[1], [0], [0], [1], [0, 0, 1, 1], [], []>} : vector<10x8xbf16>, vector<8x8xbf16>, vector<10x8xf32> -> vector<10x8xf32>
    %395 = vector.broadcast %390 : vector<10x1xf32> to vector<10x8xf32>
    %396 = arith.mulf %394, %395 : vector<10x8xf32>
    %c10_147 = arith.constant 10 : index
    %c0_148 = arith.constant 0 : index
    %397 = vector.load %arg29[%c10_147, %c0_148] : memref<20x32xf32, #tpu.memory_space<vmem>>, vector<10x8xf32>
    tpu.vector_store %arg29[%c10_147, %c0_148], %396 {strides = array<i32>} : memref<20x32xf32, #tpu.memory_space<vmem>>, vector<10x8xf32>,
    %398 = vector.extract_strided_slice %368 {offsets = [0, 8], sizes = [10, 8], strides = [1, 1]} : vector<10x32xf32> to vector<10x8xf32>
    %399 = arith.truncf %398 : vector<10x8xf32> to vector<10x8xbf16>
    %400 = vector.extract_strided_slice %369 {offsets = [0, 8], sizes = [8, 8], strides = [1, 1]} : vector<8x32xf32> to vector<8x8xf32>
    %401 = arith.truncf %400 : vector<8x8xf32> to vector<8x8xbf16>
    %cst_149 = arith.constant dense<0.000000e+00> : vector<10x8xf32>
    %402 = tpu.matmul %399, %401, %cst_149 {dimension_numbers = #tpu.dot_dimension_numbers<[1], [1], [0], [0], [0, 0, 1, 0], [], []>} : vector<10x8xbf16>, vector<8x8xbf16>, vector<10x8xf32> -> vector<10x8xf32>
    %403 = vector.broadcast %374 : vector<1x8xf32> to vector<10x8xf32>
    %404 = arith.addf %402, %403 : vector<10x8xf32>
    %cst_150 = arith.constant dense<0xFF800000> : vector<10xf32>
    %405 = vector.multi_reduction <maximumf>, %404, %cst_150 [1] : vector<10x8xf32> to vector<10xf32>
    %406 = vector.shape_cast %405 : vector<10xf32> to vector<10x1xf32>
    %407 = vector.broadcast %406 : vector<10x1xf32> to vector<10x8xf32>
    %408 = arith.subf %404, %407 : vector<10x8xf32>
    %409 = math.exp %408 : vector<10x8xf32>
    %cst_151 = arith.constant dense<0.000000e+00> : vector<10xf32>
    %410 = vector.multi_reduction <add>, %409, %cst_151 [1] : vector<10x8xf32> to vector<10xf32>
    %411 = vector.shape_cast %410 : vector<10xf32> to vector<10x1xf32>
    %cst_152 = arith.constant 1.000000e+00 : f32
    %412 = vector.broadcast %cst_152 : f32 to vector<10x1xf32>
    %413 = arith.divf %412, %411 : vector<10x1xf32>
    %414 = arith.truncf %409 : vector<10x8xf32> to vector<10x8xbf16>
    %415 = vector.extract_strided_slice %370 {offsets = [0, 8], sizes = [8, 8], strides = [1, 1]} : vector<8x32xf32> to vector<8x8xf32>
    %416 = arith.truncf %415 : vector<8x8xf32> to vector<8x8xbf16>
    %cst_153 = arith.constant dense<0.000000e+00> : vector<10x8xf32>
    %417 = tpu.matmul %414, %416, %cst_153 {dimension_numbers = #tpu.dot_dimension_numbers<[1], [0], [0], [1], [0, 0, 1, 1], [], []>} : vector<10x8xbf16>, vector<8x8xbf16>, vector<10x8xf32> -> vector<10x8xf32>
    %418 = vector.broadcast %413 : vector<10x1xf32> to vector<10x8xf32>
    %419 = arith.mulf %417, %418 : vector<10x8xf32>
    %c10_154 = arith.constant 10 : index
    %c8_155 = arith.constant 8 : index
    %420 = vector.load %arg29[%c10_154, %c8_155] : memref<20x32xf32, #tpu.memory_space<vmem>>, vector<10x8xf32>
    tpu.vector_store %arg29[%c10_154, %c8_155], %419 {strides = array<i32>} : memref<20x32xf32, #tpu.memory_space<vmem>>, vector<10x8xf32>,
    %421 = vector.extract_strided_slice %368 {offsets = [0, 16], sizes = [10, 8], strides = [1, 1]} : vector<10x32xf32> to vector<10x8xf32>
    %422 = arith.truncf %421 : vector<10x8xf32> to vector<10x8xbf16>
    %423 = vector.extract_strided_slice %369 {offsets = [0, 16], sizes = [8, 8], strides = [1, 1]} : vector<8x32xf32> to vector<8x8xf32>
    %424 = arith.truncf %423 : vector<8x8xf32> to vector<8x8xbf16>
    %cst_156 = arith.constant dense<0.000000e+00> : vector<10x8xf32>
    %425 = tpu.matmul %422, %424, %cst_156 {dimension_numbers = #tpu.dot_dimension_numbers<[1], [1], [0], [0], [0, 0, 1, 0], [], []>} : vector<10x8xbf16>, vector<8x8xbf16>, vector<10x8xf32> -> vector<10x8xf32>
    %426 = vector.broadcast %374 : vector<1x8xf32> to vector<10x8xf32>
    %427 = arith.addf %425, %426 : vector<10x8xf32>
    %cst_157 = arith.constant dense<0xFF800000> : vector<10xf32>
    %428 = vector.multi_reduction <maximumf>, %427, %cst_157 [1] : vector<10x8xf32> to vector<10xf32>
    %429 = vector.shape_cast %428 : vector<10xf32> to vector<10x1xf32>
    %430 = vector.broadcast %429 : vector<10x1xf32> to vector<10x8xf32>
    %431 = arith.subf %427, %430 : vector<10x8xf32>
    %432 = math.exp %431 : vector<10x8xf32>
    %cst_158 = arith.constant dense<0.000000e+00> : vector<10xf32>
    %433 = vector.multi_reduction <add>, %432, %cst_158 [1] : vector<10x8xf32> to vector<10xf32>
    %434 = vector.shape_cast %433 : vector<10xf32> to vector<10x1xf32>
    %cst_159 = arith.constant 1.000000e+00 : f32
    %435 = vector.broadcast %cst_159 : f32 to vector<10x1xf32>
    %436 = arith.divf %435, %434 : vector<10x1xf32>
    %437 = arith.truncf %432 : vector<10x8xf32> to vector<10x8xbf16>
    %438 = vector.extract_strided_slice %370 {offsets = [0, 16], sizes = [8, 8], strides = [1, 1]} : vector<8x32xf32> to vector<8x8xf32>
    %439 = arith.truncf %438 : vector<8x8xf32> to vector<8x8xbf16>
    %cst_160 = arith.constant dense<0.000000e+00> : vector<10x8xf32>
    %440 = tpu.matmul %437, %439, %cst_160 {dimension_numbers = #tpu.dot_dimension_numbers<[1], [0], [0], [1], [0, 0, 1, 1], [], []>} : vector<10x8xbf16>, vector<8x8xbf16>, vector<10x8xf32> -> vector<10x8xf32>
    %441 = vector.broadcast %436 : vector<10x1xf32> to vector<10x8xf32>
    %442 = arith.mulf %440, %441 : vector<10x8xf32>
    %c10_161 = arith.constant 10 : index
    %c16_162 = arith.constant 16 : index
    %443 = vector.load %arg29[%c10_161, %c16_162] : memref<20x32xf32, #tpu.memory_space<vmem>>, vector<10x8xf32>
    tpu.vector_store %arg29[%c10_161, %c16_162], %442 {strides = array<i32>} : memref<20x32xf32, #tpu.memory_space<vmem>>, vector<10x8xf32>,
    %444 = vector.extract_strided_slice %368 {offsets = [0, 24], sizes = [10, 8], strides = [1, 1]} : vector<10x32xf32> to vector<10x8xf32>
    %445 = arith.truncf %444 : vector<10x8xf32> to vector<10x8xbf16>
    %446 = vector.extract_strided_slice %369 {offsets = [0, 24], sizes = [8, 8], strides = [1, 1]} : vector<8x32xf32> to vector<8x8xf32>
    %447 = arith.truncf %446 : vector<8x8xf32> to vector<8x8xbf16>
    %cst_163 = arith.constant dense<0.000000e+00> : vector<10x8xf32>
    %448 = tpu.matmul %445, %447, %cst_163 {dimension_numbers = #tpu.dot_dimension_numbers<[1], [1], [0], [0], [0, 0, 1, 0], [], []>} : vector<10x8xbf16>, vector<8x8xbf16>, vector<10x8xf32> -> vector<10x8xf32>
    %449 = vector.broadcast %374 : vector<1x8xf32> to vector<10x8xf32>
    %450 = arith.addf %448, %449 : vector<10x8xf32>
    %cst_164 = arith.constant dense<0xFF800000> : vector<10xf32>
    %451 = vector.multi_reduction <maximumf>, %450, %cst_164 [1] : vector<10x8xf32> to vector<10xf32>
    %452 = vector.shape_cast %451 : vector<10xf32> to vector<10x1xf32>
    %453 = vector.broadcast %452 : vector<10x1xf32> to vector<10x8xf32>
    %454 = arith.subf %450, %453 : vector<10x8xf32>
    %455 = math.exp %454 : vector<10x8xf32>
    %cst_165 = arith.constant dense<0.000000e+00> : vector<10xf32>
    %456 = vector.multi_reduction <add>, %455, %cst_165 [1] : vector<10x8xf32> to vector<10xf32>
    %457 = vector.shape_cast %456 : vector<10xf32> to vector<10x1xf32>
    %cst_166 = arith.constant 1.000000e+00 : f32
    %458 = vector.broadcast %cst_166 : f32 to vector<10x1xf32>
    %459 = arith.divf %458, %457 : vector<10x1xf32>
    %460 = arith.truncf %455 : vector<10x8xf32> to vector<10x8xbf16>
    %461 = vector.extract_strided_slice %370 {offsets = [0, 24], sizes = [8, 8], strides = [1, 1]} : vector<8x32xf32> to vector<8x8xf32>
    %462 = arith.truncf %461 : vector<8x8xf32> to vector<8x8xbf16>
    %cst_167 = arith.constant dense<0.000000e+00> : vector<10x8xf32>
    %463 = tpu.matmul %460, %462, %cst_167 {dimension_numbers = #tpu.dot_dimension_numbers<[1], [0], [0], [1], [0, 0, 1, 1], [], []>} : vector<10x8xbf16>, vector<8x8xbf16>, vector<10x8xf32> -> vector<10x8xf32>
    %464 = vector.broadcast %459 : vector<10x1xf32> to vector<10x8xf32>
    %465 = arith.mulf %463, %464 : vector<10x8xf32>
    %c10_168 = arith.constant 10 : index
    %c24_169 = arith.constant 24 : index
    %466 = vector.load %arg29[%c10_168, %c24_169] : memref<20x32xf32, #tpu.memory_space<vmem>>, vector<10x8xf32>
    tpu.vector_store %arg29[%c10_168, %c24_169], %465 {strides = array<i32>} : memref<20x32xf32, #tpu.memory_space<vmem>>, vector<10x8xf32>,
    %c0_170 = arith.constant 0 : index
    %c0_171 = arith.constant 0 : index
    %467 = vector.load %arg29[%c0_170, %c0_171] : memref<20x32xf32, #tpu.memory_space<vmem>>, vector<20x32xf32>
    %468 = arith.truncf %467 : vector<20x32xf32> to vector<20x32xbf16>
    %cst_172 = arith.constant dense<0.000000e+00> : vector<20x32xf32>
    %469 = tpu.matmul %468, %266, %cst_172 {dimension_numbers = #tpu.dot_dimension_numbers<[1], [1], [0], [0], [0, 0, 1, 0], [], []>} : vector<20x32xbf16>, vector<32x32xbf16>, vector<20x32xf32> -> vector<20x32xf32>
    %470 = vector.broadcast %268 : vector<1x32xf32> to vector<20x32xf32>
    %471 = arith.addf %469, %470 : vector<20x32xf32>
    %472 = arith.addf %245, %471 : vector<20x32xf32>
    %c0_173 = arith.constant 0 : index
    %c0_174 = arith.constant 0 : index
    %c0_175 = arith.constant 0 : index
    %473 = vector.load %arg19[%c0_173, %c0_174, %c0_175] : memref<1x1x32xf32, #tpu.memory_space<vmem>>, vector<1x1x32xf32>
    %474 = vector.shape_cast %473 : vector<1x1x32xf32> to vector<1x32xf32>
    %c0_176 = arith.constant 0 : index
    %c0_177 = arith.constant 0 : index
    %c0_178 = arith.constant 0 : index
    %475 = vector.load %arg20[%c0_176, %c0_177, %c0_178] : memref<1x1x32xf32, #tpu.memory_space<vmem>>, vector<1x1x32xf32>
    %476 = vector.shape_cast %475 : vector<1x1x32xf32> to vector<1x32xf32>
    %cst_179 = arith.constant dense<0.000000e+00> : vector<20xf32>
    %477 = vector.multi_reduction <add>, %472, %cst_179 [1] : vector<20x32xf32> to vector<20xf32>
    %478 = vector.shape_cast %477 : vector<20xf32> to vector<20x1xf32>
    %cst_180 = arith.constant 3.200000e+01 : f32
    %479 = vector.broadcast %cst_180 : f32 to vector<20x1xf32>
    %480 = arith.divf %478, %479 : vector<20x1xf32>
    %481 = vector.broadcast %480 : vector<20x1xf32> to vector<20x32xf32>
    %482 = arith.subf %472, %481 : vector<20x32xf32>
    %483 = arith.mulf %482, %482 : vector<20x32xf32>
    %cst_181 = arith.constant dense<0.000000e+00> : vector<20xf32>
    %484 = vector.multi_reduction <add>, %483, %cst_181 [1] : vector<20x32xf32> to vector<20xf32>
    %485 = vector.shape_cast %484 : vector<20xf32> to vector<20x1xf32>
    %cst_182 = arith.constant 3.200000e+01 : f32
    %486 = vector.broadcast %cst_182 : f32 to vector<20x1xf32>
    %487 = arith.divf %485, %486 : vector<20x1xf32>
    %488 = vector.broadcast %480 : vector<20x1xf32> to vector<20x32xf32>
    %489 = arith.subf %472, %488 : vector<20x32xf32>
    %cst_183 = arith.constant 9.99999974E-6 : f32
    %490 = vector.broadcast %cst_183 : f32 to vector<20x1xf32>
    %491 = arith.addf %487, %490 : vector<20x1xf32>
    %492 = math.rsqrt %491 : vector<20x1xf32>
    %493 = vector.broadcast %492 : vector<20x1xf32> to vector<20x32xf32>
    %494 = arith.mulf %489, %493 : vector<20x32xf32>
    %495 = vector.broadcast %474 : vector<1x32xf32> to vector<20x32xf32>
    %496 = arith.mulf %494, %495 : vector<20x32xf32>
    %497 = vector.broadcast %476 : vector<1x32xf32> to vector<20x32xf32>
    %498 = arith.addf %496, %497 : vector<20x32xf32>
    %c0_184 = arith.constant 0 : index
    %c0_185 = arith.constant 0 : index
    %c0_186 = arith.constant 0 : index
    %499 = vector.load %arg21[%c0_184, %c0_185, %c0_186] : memref<1x64x32xbf16, #tpu.memory_space<vmem>>, vector<1x64x32xbf16>
    %500 = vector.shape_cast %499 : vector<1x64x32xbf16> to vector<64x32xbf16>
    %c0_187 = arith.constant 0 : index
    %c0_188 = arith.constant 0 : index
    %c0_189 = arith.constant 0 : index
    %501 = vector.load %arg22[%c0_187, %c0_188, %c0_189] : memref<1x1x64xf32, #tpu.memory_space<vmem>>, vector<1x1x64xf32>
    %502 = vector.shape_cast %501 : vector<1x1x64xf32> to vector<1x64xf32>
    %503 = arith.truncf %498 : vector<20x32xf32> to vector<20x32xbf16>
    %cst_190 = arith.constant dense<0.000000e+00> : vector<20x64xf32>
    %504 = tpu.matmul %503, %500, %cst_190 {dimension_numbers = #tpu.dot_dimension_numbers<[1], [1], [0], [0], [0, 0, 1, 0], [], []>} : vector<20x32xbf16>, vector<64x32xbf16>, vector<20x64xf32> -> vector<20x64xf32>
    %505 = vector.broadcast %502 : vector<1x64xf32> to vector<20x64xf32>
    %506 = arith.addf %504, %505 : vector<20x64xf32>
    %cst_191 = arith.constant 0.000000e+00 : f32
    %507 = vector.broadcast %cst_191 : f32 to vector<20x64xf32>
    %508 = arith.maximumf %506, %507 : vector<20x64xf32>
    %c0_192 = arith.constant 0 : index
    %c0_193 = arith.constant 0 : index
    %c0_194 = arith.constant 0 : index
    %509 = vector.load %arg23[%c0_192, %c0_193, %c0_194] : memref<1x32x64xbf16, #tpu.memory_space<vmem>>, vector<1x32x64xbf16>
    %510 = vector.shape_cast %509 : vector<1x32x64xbf16> to vector<32x64xbf16>
    %c0_195 = arith.constant 0 : index
    %c0_196 = arith.constant 0 : index
    %c0_197 = arith.constant 0 : index
    %511 = vector.load %arg24[%c0_195, %c0_196, %c0_197] : memref<1x1x32xf32, #tpu.memory_space<vmem>>, vector<1x1x32xf32>
    %512 = vector.shape_cast %511 : vector<1x1x32xf32> to vector<1x32xf32>
    %513 = arith.truncf %508 : vector<20x64xf32> to vector<20x64xbf16>
    %cst_198 = arith.constant dense<0.000000e+00> : vector<20x32xf32>
    %514 = tpu.matmul %513, %510, %cst_198 {dimension_numbers = #tpu.dot_dimension_numbers<[1], [1], [0], [0], [0, 0, 1, 0], [], []>} : vector<20x64xbf16>, vector<32x64xbf16>, vector<20x32xf32> -> vector<20x32xf32>
    %515 = vector.broadcast %512 : vector<1x32xf32> to vector<20x32xf32>
    %516 = arith.addf %514, %515 : vector<20x32xf32>
    %517 = arith.addf %498, %516 : vector<20x32xf32>
    %c0_199 = arith.constant 0 : index
    %c0_200 = arith.constant 0 : index
    %c0_201 = arith.constant 0 : index
    %518 = vector.load %arg25[%c0_199, %c0_200, %c0_201] : memref<1x1x32xf32, #tpu.memory_space<vmem>>, vector<1x1x32xf32>
    %519 = vector.shape_cast %518 : vector<1x1x32xf32> to vector<1x32xf32>
    %c0_202 = arith.constant 0 : index
    %c0_203 = arith.constant 0 : index
    %c0_204 = arith.constant 0 : index
    %520 = vector.load %arg26[%c0_202, %c0_203, %c0_204] : memref<1x1x32xf32, #tpu.memory_space<vmem>>, vector<1x1x32xf32>
    %521 = vector.shape_cast %520 : vector<1x1x32xf32> to vector<1x32xf32>
    %cst_205 = arith.constant dense<0.000000e+00> : vector<20xf32>
    %522 = vector.multi_reduction <add>, %517, %cst_205 [1] : vector<20x32xf32> to vector<20xf32>
    %523 = vector.shape_cast %522 : vector<20xf32> to vector<20x1xf32>
    %cst_206 = arith.constant 3.200000e+01 : f32
    %524 = vector.broadcast %cst_206 : f32 to vector<20x1xf32>
    %525 = arith.divf %523, %524 : vector<20x1xf32>
    %526 = vector.broadcast %525 : vector<20x1xf32> to vector<20x32xf32>
    %527 = arith.subf %517, %526 : vector<20x32xf32>
    %528 = arith.mulf %527, %527 : vector<20x32xf32>
    %cst_207 = arith.constant dense<0.000000e+00> : vector<20xf32>
    %529 = vector.multi_reduction <add>, %528, %cst_207 [1] : vector<20x32xf32> to vector<20xf32>
    %530 = vector.shape_cast %529 : vector<20xf32> to vector<20x1xf32>
    %cst_208 = arith.constant 3.200000e+01 : f32
    %531 = vector.broadcast %cst_208 : f32 to vector<20x1xf32>
    %532 = arith.divf %530, %531 : vector<20x1xf32>
    %533 = vector.broadcast %525 : vector<20x1xf32> to vector<20x32xf32>
    %534 = arith.subf %517, %533 : vector<20x32xf32>
    %cst_209 = arith.constant 9.99999974E-6 : f32
    %535 = vector.broadcast %cst_209 : f32 to vector<20x1xf32>
    %536 = arith.addf %532, %535 : vector<20x1xf32>
    %537 = math.rsqrt %536 : vector<20x1xf32>
    %538 = vector.broadcast %537 : vector<20x1xf32> to vector<20x32xf32>
    %539 = arith.mulf %534, %538 : vector<20x32xf32>
    %540 = vector.broadcast %519 : vector<1x32xf32> to vector<20x32xf32>
    %541 = arith.mulf %539, %540 : vector<20x32xf32>
    %542 = vector.broadcast %521 : vector<1x32xf32> to vector<20x32xf32>
    %543 = arith.addf %541, %542 : vector<20x32xf32>
    %544 = vector.shape_cast %543 : vector<20x32xf32> to vector<2x10x32xf32>
    %c0_210 = arith.constant 0 : index
    %c0_211 = arith.constant 0 : index
    %c0_212 = arith.constant 0 : index
    %545 = vector.load %arg28[%c0_210, %c0_211, %c0_212] : memref<2x10x32xf32, #tpu.memory_space<vmem>>, vector<2x10x32xf32>
    tpu.vector_store %arg28[%c0_210, %c0_211, %c0_212], %544 {strides = array<i32>} : memref<2x10x32xf32, #tpu.memory_space<vmem>>, vector<2x10x32xf32>,
    %c1_i32 = arith.constant 1 : i32
    %546 = arith.cmpi eq, %arg0, %c1_i32 : i32
    %547 = arith.extui %546 : i1 to i32
    %c0_i32_213 = arith.constant 0 : i32
    %548 = arith.cmpi ne, %547, %c0_i32_213 : i32
    scf.if %548 {
      %549 = vector.shape_cast %543 : vector<20x32xf32> to vector<2x10x32xf32>
      %c0_214 = arith.constant 0 : index
      %c0_215 = arith.constant 0 : index
      %c0_216 = arith.constant 0 : index
      %550 = vector.load %arg27[%c0_214, %c0_215, %c0_216] : memref<2x10x32xf32, #tpu.memory_space<vmem>>, vector<2x10x32xf32>
      tpu.vector_store %arg27[%c0_214, %c0_215, %c0_216], %549 {strides = array<i32>} : memref<2x10x32xf32, #tpu.memory_space<vmem>>, vector<2x10x32xf32>,
    } else {
    }
    return
  }
  func.func @transform_0(%arg0: i32) -> (i32, i32, i32) {
    %c0_i32 = arith.constant 0 : i32
    %c0_i32_0 = arith.constant 0 : i32
    %c0_i32_1 = arith.constant 0 : i32
    %c0_i32_2 = arith.constant 0 : i32
    return %c0_i32, %c0_i32_0, %c0_i32_1 : i32, i32, i32
  }
  func.func @transform_1(%arg0: i32) -> (i32, i32, i32) {
    %c0_i32 = arith.constant 0 : i32
    %c0_i32_0 = arith.constant 0 : i32
    %c0_i32_1 = arith.constant 0 : i32
    %c0_i32_2 = arith.constant 0 : i32
    return %c0_i32, %c0_i32_0, %c0_i32_1 : i32, i32, i32
  }
  func.func @transform_2(%arg0: i32) -> (i32, i32, i32) {
    %c0_i32 = arith.constant 0 : i32
    %c0_i32_0 = arith.constant 0 : i32
    %c0_i32_1 = arith.constant 0 : i32
    %c0_i32_2 = arith.constant 0 : i32
    return %c0_i32, %c0_i32_0, %c0_i32_1 : i32, i32, i32
  }
  func.func @transform_3(%arg0: i32) -> (i32, i32) {
    %c0_i32 = arith.constant 0 : i32
    %c0_i32_0 = arith.constant 0 : i32
    %c0_i32_1 = arith.constant 0 : i32
    return %c0_i32, %c0_i32_0 : i32, i32
  }
  func.func @transform_4(%arg0: i32) -> (i32, i32, i32) {
    %c0_i32 = arith.constant 0 : i32
    %c0_i32_0 = arith.constant 0 : i32
    %c0_i32_1 = arith.constant 0 : i32
    %c0_i32_2 = arith.constant 0 : i32
    return %c0_i32, %c0_i32_0, %c0_i32_1 : i32, i32, i32
  }
  func.func @transform_5(%arg0: i32) -> (i32, i32, i32) {
    %c0_i32 = arith.constant 0 : i32
    %c0_i32_0 = arith.constant 0 : i32
    %c0_i32_1 = arith.constant 0 : i32
    %c0_i32_2 = arith.constant 0 : i32
    return %c0_i32, %c0_i32_0, %c0_i32_1 : i32, i32, i32
  }
  func.func @transform_6(%arg0: i32) -> (i32, i32, i32) {
    %c0_i32 = arith.constant 0 : i32
    %c0_i32_0 = arith.constant 0 : i32
    %c0_i32_1 = arith.constant 0 : i32
    return %arg0, %c0_i32, %c0_i32_0 : i32, i32, i32
  }
  func.func @transform_7(%arg0: i32) -> (i32, i32, i32) {
    %c0_i32 = arith.constant 0 : i32
    %c0_i32_0 = arith.constant 0 : i32
    %c0_i32_1 = arith.constant 0 : i32
    return %arg0, %c0_i32, %c0_i32_0 : i32, i32, i32
  }
  func.func @transform_8(%arg0: i32) -> (i32, i32, i32) {
    %c0_i32 = arith.constant 0 : i32
    %c0_i32_0 = arith.constant 0 : i32
    %c0_i32_1 = arith.constant 0 : i32
    return %arg0, %c0_i32, %c0_i32_0 : i32, i32, i32
  }
  func.func @transform_9(%arg0: i32) -> (i32, i32, i32) {
    %c0_i32 = arith.constant 0 : i32
    %c0_i32_0 = arith.constant 0 : i32
    %c0_i32_1 = arith.constant 0 : i32
    return %arg0, %c0_i32, %c0_i32_0 : i32, i32, i32
  }
  func.func @transform_10(%arg0: i32) -> (i32, i32, i32) {
    %c0_i32 = arith.constant 0 : i32
    %c0_i32_0 = arith.constant 0 : i32
    %c0_i32_1 = arith.constant 0 : i32
    return %arg0, %c0_i32, %c0_i32_0 : i32, i32, i32
  }
  func.func @transform_11(%arg0: i32) -> (i32, i32, i32) {
    %c0_i32 = arith.constant 0 : i32
    %c0_i32_0 = arith.constant 0 : i32
    %c0_i32_1 = arith.constant 0 : i32
    return %arg0, %c0_i32, %c0_i32_0 : i32, i32, i32
  }
  func.func @transform_12(%arg0: i32) -> (i32, i32, i32) {
    %c0_i32 = arith.constant 0 : i32
    %c0_i32_0 = arith.constant 0 : i32
    %c0_i32_1 = arith.constant 0 : i32
    return %arg0, %c0_i32, %c0_i32_0 : i32, i32, i32
  }
  func.func @transform_13(%arg0: i32) -> (i32, i32, i32) {
    %c0_i32 = arith.constant 0 : i32
    %c0_i32_0 = arith.constant 0 : i32
    %c0_i32_1 = arith.constant 0 : i32
    return %arg0, %c0_i32, %c0_i32_0 : i32, i32, i32
  }
  func.func @transform_14(%arg0: i32) -> (i32, i32, i32) {
    %c0_i32 = arith.constant 0 : i32
    %c0_i32_0 = arith.constant 0 : i32
    %c0_i32_1 = arith.constant 0 : i32
    return %arg0, %c0_i32, %c0_i32_0 : i32, i32, i32
  }
  func.func @transform_15(%arg0: i32) -> (i32, i32, i32) {
    %c0_i32 = arith.constant 0 : i32
    %c0_i32_0 = arith.constant 0 : i32
    %c0_i32_1 = arith.constant 0 : i32
    return %arg0, %c0_i32, %c0_i32_0 : i32, i32, i32
  }
  func.func @transform_16(%arg0: i32) -> (i32, i32, i32) {
    %c0_i32 = arith.constant 0 : i32
    %c0_i32_0 = arith.constant 0 : i32
    %c0_i32_1 = arith.constant 0 : i32
    return %arg0, %c0_i32, %c0_i32_0 : i32, i32, i32
  }
  func.func @transform_17(%arg0: i32) -> (i32, i32, i32) {
    %c0_i32 = arith.constant 0 : i32
    %c0_i32_0 = arith.constant 0 : i32
    %c0_i32_1 = arith.constant 0 : i32
    return %arg0, %c0_i32, %c0_i32_0 : i32, i32, i32
  }
  func.func @transform_18(%arg0: i32) -> (i32, i32, i32) {
    %c0_i32 = arith.constant 0 : i32
    %c0_i32_0 = arith.constant 0 : i32
    %c0_i32_1 = arith.constant 0 : i32
    return %arg0, %c0_i32, %c0_i32_0 : i32, i32, i32
  }
  func.func @transform_19(%arg0: i32) -> (i32, i32, i32) {
    %c0_i32 = arith.constant 0 : i32
    %c0_i32_0 = arith.constant 0 : i32
    %c0_i32_1 = arith.constant 0 : i32
    return %arg0, %c0_i32, %c0_i32_0 : i32, i32, i32
  }
  func.func @transform_20(%arg0: i32) -> (i32, i32, i32) {
    %c0_i32 = arith.constant 0 : i32
    %c0_i32_0 = arith.constant 0 : i32
    %c0_i32_1 = arith.constant 0 : i32
    return %arg0, %c0_i32, %c0_i32_0 : i32, i32, i32
  }
  func.func @transform_21(%arg0: i32) -> (i32, i32, i32) {
    %c0_i32 = arith.constant 0 : i32
    %c0_i32_0 = arith.constant 0 : i32
    %c0_i32_1 = arith.constant 0 : i32
    return %arg0, %c0_i32, %c0_i32_0 : i32, i32, i32
  }
  func.func @transform_22(%arg0: i32) -> (i32, i32, i32) {
    %c0_i32 = arith.constant 0 : i32
    %c0_i32_0 = arith.constant 0 : i32
    %c0_i32_1 = arith.constant 0 : i32
    return %arg0, %c0_i32, %c0_i32_0 : i32, i32, i32
  }
  func.func @transform_23(%arg0: i32) -> (i32, i32, i32) {
    %c0_i32 = arith.constant 0 : i32
    %c0_i32_0 = arith.constant 0 : i32
    %c0_i32_1 = arith.constant 0 : i32
    return %arg0, %c0_i32, %c0_i32_0 : i32, i32, i32
  }
  func.func @transform_24(%arg0: i32) -> (i32, i32, i32) {
    %c0_i32 = arith.constant 0 : i32
    %c0_i32_0 = arith.constant 0 : i32
    %c0_i32_1 = arith.constant 0 : i32
    return %arg0, %c0_i32, %c0_i32_0 : i32, i32, i32
  }
  func.func @transform_25(%arg0: i32) -> (i32, i32, i32) {
    %c0_i32 = arith.constant 0 : i32
    %c0_i32_0 = arith.constant 0 : i32
    %c0_i32_1 = arith.constant 0 : i32
    return %arg0, %c0_i32, %c0_i32_0 : i32, i32, i32
  }
  func.func @transform_26(%arg0: i32) -> (i32, i32, i32) {
    %c0_i32 = arith.constant 0 : i32
    %c0_i32_0 = arith.constant 0 : i32
    %c0_i32_1 = arith.constant 0 : i32
    %c0_i32_2 = arith.constant 0 : i32
    return %c0_i32, %c0_i32_0, %c0_i32_1 : i32, i32, i32
  }
}

module attributes {stable_mosaic.version = 11 : i64} {
  func.func @_encoder_stack_kernel(%arg0: i32, %arg1: memref<2x8x32xf32, #tpu.memory_space<vmem>>, %arg2: memref<1x8x32xf32, #tpu.memory_space<vmem>>, %arg3: memref<8x8xf32, #tpu.memory_space<vmem>>, %arg4: memref<2x1x8xf32, #tpu.memory_space<vmem>>, %arg5: memref<1x96x32xbf16, #tpu.memory_space<vmem>>, %arg6: memref<1x1x96xf32, #tpu.memory_space<vmem>>, %arg7: memref<1x32x32xbf16, #tpu.memory_space<vmem>>, %arg8: memref<1x1x32xf32, #tpu.memory_space<vmem>>, %arg9: memref<1x1x32xf32, #tpu.memory_space<vmem>>, %arg10: memref<1x1x32xf32, #tpu.memory_space<vmem>>, %arg11: memref<1x64x32xbf16, #tpu.memory_space<vmem>>, %arg12: memref<1x1x64xf32, #tpu.memory_space<vmem>>, %arg13: memref<1x32x64xbf16, #tpu.memory_space<vmem>>, %arg14: memref<1x1x32xf32, #tpu.memory_space<vmem>>, %arg15: memref<1x1x32xf32, #tpu.memory_space<vmem>>, %arg16: memref<1x1x32xf32, #tpu.memory_space<vmem>>, %arg17: memref<1x32xf32, #tpu.memory_space<vmem>>, %arg18: memref<1x32xf32, #tpu.memory_space<vmem>>, %arg19: memref<2x8x32xf32, #tpu.memory_space<vmem>>, %arg20: memref<2x8x32xf32, #tpu.memory_space<vmem>>, %arg21: memref<16x32xf32, #tpu.memory_space<vmem>>) attributes {dimension_semantics = [#tpu.dimension_semantics<arbitrary>], iteration_bounds = array<i64: 2>, scalar_prefetch = 0 : i64, scratch_operands = 2 : i64, tpu.core_type = #tpu.core_type<tc>, window_params = [{pipeline_mode = #tpu.pipeline_mode<synchronous>, transform_indices = @transform_0, window_bounds = array<i64: 2, 8, 32>}, {pipeline_mode = #tpu.pipeline_mode<synchronous>, transform_indices = @transform_1, window_bounds = array<i64: 1, 8, 32>}, {pipeline_mode = #tpu.pipeline_mode<synchronous>, transform_indices = @transform_2, window_bounds = array<i64: 8, 8>}, {pipeline_mode = #tpu.pipeline_mode<synchronous>, transform_indices = @transform_3, window_bounds = array<i64: 2, 1, 8>}, {transform_indices = @transform_4, window_bounds = array<i64: 1, 96, 32>}, {transform_indices = @transform_5, window_bounds = array<i64: 1, 1, 96>}, {transform_indices = @transform_6, window_bounds = array<i64: 1, 32, 32>}, {transform_indices = @transform_7, window_bounds = array<i64: 1, 1, 32>}, {transform_indices = @transform_8, window_bounds = array<i64: 1, 1, 32>}, {transform_indices = @transform_9, window_bounds = array<i64: 1, 1, 32>}, {transform_indices = @transform_10, window_bounds = array<i64: 1, 64, 32>}, {transform_indices = @transform_11, window_bounds = array<i64: 1, 1, 64>}, {transform_indices = @transform_12, window_bounds = array<i64: 1, 32, 64>}, {transform_indices = @transform_13, window_bounds = array<i64: 1, 1, 32>}, {transform_indices = @transform_14, window_bounds = array<i64: 1, 1, 32>}, {transform_indices = @transform_15, window_bounds = array<i64: 1, 1, 32>}, {pipeline_mode = #tpu.pipeline_mode<synchronous>, transform_indices = @transform_16, window_bounds = array<i64: 1, 32>}, {pipeline_mode = #tpu.pipeline_mode<synchronous>, transform_indices = @transform_17, window_bounds = array<i64: 1, 32>}, {pipeline_mode = #tpu.pipeline_mode<synchronous>, transform_indices = @transform_18, window_bounds = array<i64: 2, 8, 32>}]} {
    %c0_i32 = arith.constant 0 : i32
    %0 = arith.cmpi eq, %arg0, %c0_i32 : i32
    %1 = arith.extui %0 : i1 to i32
    %c0_i32_0 = arith.constant 0 : i32
    %2 = arith.cmpi ne, %1, %c0_i32_0 : i32
    scf.if %2 {
      %c0_117 = arith.constant 0 : index
      %c0_118 = arith.constant 0 : index
      %c0_119 = arith.constant 0 : index
      %294 = vector.load %arg1[%c0_117, %c0_118, %c0_119] : memref<2x8x32xf32, #tpu.memory_space<vmem>>, vector<2x8x32xf32>
      %cst_120 = arith.constant 5.65685415 : f32
      %295 = vector.broadcast %cst_120 : f32 to vector<2x8x32xf32>
      %296 = arith.mulf %294, %295 : vector<2x8x32xf32>
      %c0_121 = arith.constant 0 : index
      %c0_122 = arith.constant 0 : index
      %c0_123 = arith.constant 0 : index
      %297 = vector.load %arg2[%c0_121, %c0_122, %c0_123] : memref<1x8x32xf32, #tpu.memory_space<vmem>>, vector<1x8x32xf32>
      %298 = vector.broadcast %297 : vector<1x8x32xf32> to vector<2x8x32xf32>
      %299 = arith.addf %296, %298 : vector<2x8x32xf32>
      %c0_124 = arith.constant 0 : index
      %c0_125 = arith.constant 0 : index
      %c0_126 = arith.constant 0 : index
      %300 = vector.load %arg20[%c0_124, %c0_125, %c0_126] : memref<2x8x32xf32, #tpu.memory_space<vmem>>, vector<2x8x32xf32>
      tpu.vector_store %arg20[%c0_124, %c0_125, %c0_126], %299 {strides = array<i32>} : memref<2x8x32xf32, #tpu.memory_space<vmem>>, vector<2x8x32xf32>,
    } else {
    }
    %c0 = arith.constant 0 : index
    %c0_1 = arith.constant 0 : index
    %c0_2 = arith.constant 0 : index
    %3 = vector.load %arg20[%c0, %c0_1, %c0_2] : memref<2x8x32xf32, #tpu.memory_space<vmem>>, vector<2x8x32xf32>
    %4 = vector.shape_cast %3 : vector<2x8x32xf32> to vector<16x32xf32>
    %c0_3 = arith.constant 0 : index
    %c0_4 = arith.constant 0 : index
    %c0_5 = arith.constant 0 : index
    %5 = vector.load %arg5[%c0_3, %c0_4, %c0_5] : memref<1x96x32xbf16, #tpu.memory_space<vmem>>, vector<1x96x32xbf16>
    %6 = vector.shape_cast %5 : vector<1x96x32xbf16> to vector<96x32xbf16>
    %c0_6 = arith.constant 0 : index
    %c0_7 = arith.constant 0 : index
    %c0_8 = arith.constant 0 : index
    %7 = vector.load %arg6[%c0_6, %c0_7, %c0_8] : memref<1x1x96xf32, #tpu.memory_space<vmem>>, vector<1x1x96xf32>
    %8 = vector.shape_cast %7 : vector<1x1x96xf32> to vector<1x96xf32>
    %9 = arith.truncf %4 : vector<16x32xf32> to vector<16x32xbf16>
    %cst = arith.constant dense<0.000000e+00> : vector<16x96xf32>
    %10 = tpu.matmul %9, %6, %cst {dimension_numbers = #tpu.dot_dimension_numbers<[1], [1], [0], [0], [0, 0, 1, 0], [], []>} : vector<16x32xbf16>, vector<96x32xbf16>, vector<16x96xf32> -> vector<16x96xf32>
    %11 = vector.broadcast %8 : vector<1x96xf32> to vector<16x96xf32>
    %12 = arith.addf %10, %11 : vector<16x96xf32>
    %13 = vector.extract_strided_slice %12 {offsets = [0, 0], sizes = [16, 32], strides = [1, 1]} : vector<16x96xf32> to vector<16x32xf32>
    %14 = vector.extract_strided_slice %12 {offsets = [0, 32], sizes = [16, 32], strides = [1, 1]} : vector<16x96xf32> to vector<16x32xf32>
    %15 = vector.extract_strided_slice %12 {offsets = [0, 64], sizes = [16, 32], strides = [1, 1]} : vector<16x96xf32> to vector<16x32xf32>
    %c0_9 = arith.constant 0 : index
    %c0_10 = arith.constant 0 : index
    %c0_11 = arith.constant 0 : index
    %16 = vector.load %arg4[%c0_9, %c0_10, %c0_11] : memref<2x1x8xf32, #tpu.memory_space<vmem>>, vector<2x1x8xf32>
    %c0_12 = arith.constant 0 : index
    %c0_13 = arith.constant 0 : index
    %17 = vector.load %arg3[%c0_12, %c0_13] : memref<8x8xf32, #tpu.memory_space<vmem>>, vector<8x8xf32>
    %c0_14 = arith.constant 0 : index
    %c0_15 = arith.constant 0 : index
    %c0_16 = arith.constant 0 : index
    %18 = vector.load %arg7[%c0_14, %c0_15, %c0_16] : memref<1x32x32xbf16, #tpu.memory_space<vmem>>, vector<1x32x32xbf16>
    %19 = vector.shape_cast %18 : vector<1x32x32xbf16> to vector<32x32xbf16>
    %c0_17 = arith.constant 0 : index
    %c0_18 = arith.constant 0 : index
    %c0_19 = arith.constant 0 : index
    %20 = vector.load %arg8[%c0_17, %c0_18, %c0_19] : memref<1x1x32xf32, #tpu.memory_space<vmem>>, vector<1x1x32xf32>
    %21 = vector.shape_cast %20 : vector<1x1x32xf32> to vector<1x32xf32>
    %22 = vector.extract_strided_slice %13 {offsets = [0, 0], sizes = [8, 32], strides = [1, 1]} : vector<16x32xf32> to vector<8x32xf32>
    %23 = vector.extract_strided_slice %14 {offsets = [0, 0], sizes = [8, 32], strides = [1, 1]} : vector<16x32xf32> to vector<8x32xf32>
    %24 = vector.extract_strided_slice %15 {offsets = [0, 0], sizes = [8, 32], strides = [1, 1]} : vector<16x32xf32> to vector<8x32xf32>
    %25 = vector.extract_strided_slice %16 {offsets = [0, 0, 0], sizes = [1, 1, 8], strides = [1, 1, 1]} : vector<2x1x8xf32> to vector<1x1x8xf32>
    %26 = vector.shape_cast %25 : vector<1x1x8xf32> to vector<1x8xf32>
    %27 = vector.broadcast %26 : vector<1x8xf32> to vector<8x8xf32>
    %28 = arith.addf %17, %27 : vector<8x8xf32>
    %29 = vector.extract_strided_slice %22 {offsets = [0, 0], sizes = [8, 8], strides = [1, 1]} : vector<8x32xf32> to vector<8x8xf32>
    %30 = arith.truncf %29 : vector<8x8xf32> to vector<8x8xbf16>
    %31 = vector.extract_strided_slice %23 {offsets = [0, 0], sizes = [8, 8], strides = [1, 1]} : vector<8x32xf32> to vector<8x8xf32>
    %32 = arith.truncf %31 : vector<8x8xf32> to vector<8x8xbf16>
    %cst_20 = arith.constant dense<0.000000e+00> : vector<8x8xf32>
    %33 = tpu.matmul %30, %32, %cst_20 {dimension_numbers = #tpu.dot_dimension_numbers<[1], [1], [0], [0], [0, 0, 1, 0], [], []>} : vector<8x8xbf16>, vector<8x8xbf16>, vector<8x8xf32> -> vector<8x8xf32>
    %34 = arith.addf %33, %28 : vector<8x8xf32>
    %cst_21 = arith.constant dense<0xFF800000> : vector<8xf32>
    %35 = vector.multi_reduction <maximumf>, %34, %cst_21 [1] : vector<8x8xf32> to vector<8xf32>
    %36 = vector.shape_cast %35 : vector<8xf32> to vector<8x1xf32>
    %37 = vector.broadcast %36 : vector<8x1xf32> to vector<8x8xf32>
    %38 = arith.subf %34, %37 : vector<8x8xf32>
    %39 = math.exp %38 : vector<8x8xf32>
    %cst_22 = arith.constant dense<0.000000e+00> : vector<8xf32>
    %40 = vector.multi_reduction <add>, %39, %cst_22 [1] : vector<8x8xf32> to vector<8xf32>
    %41 = vector.shape_cast %40 : vector<8xf32> to vector<8x1xf32>
    %cst_23 = arith.constant 1.000000e+00 : f32
    %42 = vector.broadcast %cst_23 : f32 to vector<8x1xf32>
    %43 = arith.divf %42, %41 : vector<8x1xf32>
    %44 = arith.truncf %39 : vector<8x8xf32> to vector<8x8xbf16>
    %45 = vector.extract_strided_slice %24 {offsets = [0, 0], sizes = [8, 8], strides = [1, 1]} : vector<8x32xf32> to vector<8x8xf32>
    %46 = arith.truncf %45 : vector<8x8xf32> to vector<8x8xbf16>
    %cst_24 = arith.constant dense<0.000000e+00> : vector<8x8xf32>
    %47 = tpu.matmul %44, %46, %cst_24 {dimension_numbers = #tpu.dot_dimension_numbers<[1], [0], [0], [1], [0, 0, 1, 1], [], []>} : vector<8x8xbf16>, vector<8x8xbf16>, vector<8x8xf32> -> vector<8x8xf32>
    %48 = vector.broadcast %43 : vector<8x1xf32> to vector<8x8xf32>
    %49 = arith.mulf %47, %48 : vector<8x8xf32>
    %c0_25 = arith.constant 0 : index
    %c0_26 = arith.constant 0 : index
    %50 = vector.load %arg21[%c0_25, %c0_26] : memref<16x32xf32, #tpu.memory_space<vmem>>, vector<8x8xf32>
    tpu.vector_store %arg21[%c0_25, %c0_26], %49 {strides = array<i32>} : memref<16x32xf32, #tpu.memory_space<vmem>>, vector<8x8xf32>,
    %51 = vector.extract_strided_slice %22 {offsets = [0, 8], sizes = [8, 8], strides = [1, 1]} : vector<8x32xf32> to vector<8x8xf32>
    %52 = arith.truncf %51 : vector<8x8xf32> to vector<8x8xbf16>
    %53 = vector.extract_strided_slice %23 {offsets = [0, 8], sizes = [8, 8], strides = [1, 1]} : vector<8x32xf32> to vector<8x8xf32>
    %54 = arith.truncf %53 : vector<8x8xf32> to vector<8x8xbf16>
    %cst_27 = arith.constant dense<0.000000e+00> : vector<8x8xf32>
    %55 = tpu.matmul %52, %54, %cst_27 {dimension_numbers = #tpu.dot_dimension_numbers<[1], [1], [0], [0], [0, 0, 1, 0], [], []>} : vector<8x8xbf16>, vector<8x8xbf16>, vector<8x8xf32> -> vector<8x8xf32>
    %56 = arith.addf %55, %28 : vector<8x8xf32>
    %cst_28 = arith.constant dense<0xFF800000> : vector<8xf32>
    %57 = vector.multi_reduction <maximumf>, %56, %cst_28 [1] : vector<8x8xf32> to vector<8xf32>
    %58 = vector.shape_cast %57 : vector<8xf32> to vector<8x1xf32>
    %59 = vector.broadcast %58 : vector<8x1xf32> to vector<8x8xf32>
    %60 = arith.subf %56, %59 : vector<8x8xf32>
    %61 = math.exp %60 : vector<8x8xf32>
    %cst_29 = arith.constant dense<0.000000e+00> : vector<8xf32>
    %62 = vector.multi_reduction <add>, %61, %cst_29 [1] : vector<8x8xf32> to vector<8xf32>
    %63 = vector.shape_cast %62 : vector<8xf32> to vector<8x1xf32>
    %cst_30 = arith.constant 1.000000e+00 : f32
    %64 = vector.broadcast %cst_30 : f32 to vector<8x1xf32>
    %65 = arith.divf %64, %63 : vector<8x1xf32>
    %66 = arith.truncf %61 : vector<8x8xf32> to vector<8x8xbf16>
    %67 = vector.extract_strided_slice %24 {offsets = [0, 8], sizes = [8, 8], strides = [1, 1]} : vector<8x32xf32> to vector<8x8xf32>
    %68 = arith.truncf %67 : vector<8x8xf32> to vector<8x8xbf16>
    %cst_31 = arith.constant dense<0.000000e+00> : vector<8x8xf32>
    %69 = tpu.matmul %66, %68, %cst_31 {dimension_numbers = #tpu.dot_dimension_numbers<[1], [0], [0], [1], [0, 0, 1, 1], [], []>} : vector<8x8xbf16>, vector<8x8xbf16>, vector<8x8xf32> -> vector<8x8xf32>
    %70 = vector.broadcast %65 : vector<8x1xf32> to vector<8x8xf32>
    %71 = arith.mulf %69, %70 : vector<8x8xf32>
    %c0_32 = arith.constant 0 : index
    %c8 = arith.constant 8 : index
    %72 = vector.load %arg21[%c0_32, %c8] : memref<16x32xf32, #tpu.memory_space<vmem>>, vector<8x8xf32>
    tpu.vector_store %arg21[%c0_32, %c8], %71 {strides = array<i32>} : memref<16x32xf32, #tpu.memory_space<vmem>>, vector<8x8xf32>,
    %73 = vector.extract_strided_slice %22 {offsets = [0, 16], sizes = [8, 8], strides = [1, 1]} : vector<8x32xf32> to vector<8x8xf32>
    %74 = arith.truncf %73 : vector<8x8xf32> to vector<8x8xbf16>
    %75 = vector.extract_strided_slice %23 {offsets = [0, 16], sizes = [8, 8], strides = [1, 1]} : vector<8x32xf32> to vector<8x8xf32>
    %76 = arith.truncf %75 : vector<8x8xf32> to vector<8x8xbf16>
    %cst_33 = arith.constant dense<0.000000e+00> : vector<8x8xf32>
    %77 = tpu.matmul %74, %76, %cst_33 {dimension_numbers = #tpu.dot_dimension_numbers<[1], [1], [0], [0], [0, 0, 1, 0], [], []>} : vector<8x8xbf16>, vector<8x8xbf16>, vector<8x8xf32> -> vector<8x8xf32>
    %78 = arith.addf %77, %28 : vector<8x8xf32>
    %cst_34 = arith.constant dense<0xFF800000> : vector<8xf32>
    %79 = vector.multi_reduction <maximumf>, %78, %cst_34 [1] : vector<8x8xf32> to vector<8xf32>
    %80 = vector.shape_cast %79 : vector<8xf32> to vector<8x1xf32>
    %81 = vector.broadcast %80 : vector<8x1xf32> to vector<8x8xf32>
    %82 = arith.subf %78, %81 : vector<8x8xf32>
    %83 = math.exp %82 : vector<8x8xf32>
    %cst_35 = arith.constant dense<0.000000e+00> : vector<8xf32>
    %84 = vector.multi_reduction <add>, %83, %cst_35 [1] : vector<8x8xf32> to vector<8xf32>
    %85 = vector.shape_cast %84 : vector<8xf32> to vector<8x1xf32>
    %cst_36 = arith.constant 1.000000e+00 : f32
    %86 = vector.broadcast %cst_36 : f32 to vector<8x1xf32>
    %87 = arith.divf %86, %85 : vector<8x1xf32>
    %88 = arith.truncf %83 : vector<8x8xf32> to vector<8x8xbf16>
    %89 = vector.extract_strided_slice %24 {offsets = [0, 16], sizes = [8, 8], strides = [1, 1]} : vector<8x32xf32> to vector<8x8xf32>
    %90 = arith.truncf %89 : vector<8x8xf32> to vector<8x8xbf16>
    %cst_37 = arith.constant dense<0.000000e+00> : vector<8x8xf32>
    %91 = tpu.matmul %88, %90, %cst_37 {dimension_numbers = #tpu.dot_dimension_numbers<[1], [0], [0], [1], [0, 0, 1, 1], [], []>} : vector<8x8xbf16>, vector<8x8xbf16>, vector<8x8xf32> -> vector<8x8xf32>
    %92 = vector.broadcast %87 : vector<8x1xf32> to vector<8x8xf32>
    %93 = arith.mulf %91, %92 : vector<8x8xf32>
    %c0_38 = arith.constant 0 : index
    %c16 = arith.constant 16 : index
    %94 = vector.load %arg21[%c0_38, %c16] : memref<16x32xf32, #tpu.memory_space<vmem>>, vector<8x8xf32>
    tpu.vector_store %arg21[%c0_38, %c16], %93 {strides = array<i32>} : memref<16x32xf32, #tpu.memory_space<vmem>>, vector<8x8xf32>,
    %95 = vector.extract_strided_slice %22 {offsets = [0, 24], sizes = [8, 8], strides = [1, 1]} : vector<8x32xf32> to vector<8x8xf32>
    %96 = arith.truncf %95 : vector<8x8xf32> to vector<8x8xbf16>
    %97 = vector.extract_strided_slice %23 {offsets = [0, 24], sizes = [8, 8], strides = [1, 1]} : vector<8x32xf32> to vector<8x8xf32>
    %98 = arith.truncf %97 : vector<8x8xf32> to vector<8x8xbf16>
    %cst_39 = arith.constant dense<0.000000e+00> : vector<8x8xf32>
    %99 = tpu.matmul %96, %98, %cst_39 {dimension_numbers = #tpu.dot_dimension_numbers<[1], [1], [0], [0], [0, 0, 1, 0], [], []>} : vector<8x8xbf16>, vector<8x8xbf16>, vector<8x8xf32> -> vector<8x8xf32>
    %100 = arith.addf %99, %28 : vector<8x8xf32>
    %cst_40 = arith.constant dense<0xFF800000> : vector<8xf32>
    %101 = vector.multi_reduction <maximumf>, %100, %cst_40 [1] : vector<8x8xf32> to vector<8xf32>
    %102 = vector.shape_cast %101 : vector<8xf32> to vector<8x1xf32>
    %103 = vector.broadcast %102 : vector<8x1xf32> to vector<8x8xf32>
    %104 = arith.subf %100, %103 : vector<8x8xf32>
    %105 = math.exp %104 : vector<8x8xf32>
    %cst_41 = arith.constant dense<0.000000e+00> : vector<8xf32>
    %106 = vector.multi_reduction <add>, %105, %cst_41 [1] : vector<8x8xf32> to vector<8xf32>
    %107 = vector.shape_cast %106 : vector<8xf32> to vector<8x1xf32>
    %cst_42 = arith.constant 1.000000e+00 : f32
    %108 = vector.broadcast %cst_42 : f32 to vector<8x1xf32>
    %109 = arith.divf %108, %107 : vector<8x1xf32>
    %110 = arith.truncf %105 : vector<8x8xf32> to vector<8x8xbf16>
    %111 = vector.extract_strided_slice %24 {offsets = [0, 24], sizes = [8, 8], strides = [1, 1]} : vector<8x32xf32> to vector<8x8xf32>
    %112 = arith.truncf %111 : vector<8x8xf32> to vector<8x8xbf16>
    %cst_43 = arith.constant dense<0.000000e+00> : vector<8x8xf32>
    %113 = tpu.matmul %110, %112, %cst_43 {dimension_numbers = #tpu.dot_dimension_numbers<[1], [0], [0], [1], [0, 0, 1, 1], [], []>} : vector<8x8xbf16>, vector<8x8xbf16>, vector<8x8xf32> -> vector<8x8xf32>
    %114 = vector.broadcast %109 : vector<8x1xf32> to vector<8x8xf32>
    %115 = arith.mulf %113, %114 : vector<8x8xf32>
    %c0_44 = arith.constant 0 : index
    %c24 = arith.constant 24 : index
    %116 = vector.load %arg21[%c0_44, %c24] : memref<16x32xf32, #tpu.memory_space<vmem>>, vector<8x8xf32>
    tpu.vector_store %arg21[%c0_44, %c24], %115 {strides = array<i32>} : memref<16x32xf32, #tpu.memory_space<vmem>>, vector<8x8xf32>,
    %117 = vector.extract_strided_slice %13 {offsets = [8, 0], sizes = [8, 32], strides = [1, 1]} : vector<16x32xf32> to vector<8x32xf32>
    %118 = vector.extract_strided_slice %14 {offsets = [8, 0], sizes = [8, 32], strides = [1, 1]} : vector<16x32xf32> to vector<8x32xf32>
    %119 = vector.extract_strided_slice %15 {offsets = [8, 0], sizes = [8, 32], strides = [1, 1]} : vector<16x32xf32> to vector<8x32xf32>
    %120 = vector.extract_strided_slice %16 {offsets = [1, 0, 0], sizes = [1, 1, 8], strides = [1, 1, 1]} : vector<2x1x8xf32> to vector<1x1x8xf32>
    %121 = vector.shape_cast %120 : vector<1x1x8xf32> to vector<1x8xf32>
    %122 = vector.broadcast %121 : vector<1x8xf32> to vector<8x8xf32>
    %123 = arith.addf %17, %122 : vector<8x8xf32>
    %124 = vector.extract_strided_slice %117 {offsets = [0, 0], sizes = [8, 8], strides = [1, 1]} : vector<8x32xf32> to vector<8x8xf32>
    %125 = arith.truncf %124 : vector<8x8xf32> to vector<8x8xbf16>
    %126 = vector.extract_strided_slice %118 {offsets = [0, 0], sizes = [8, 8], strides = [1, 1]} : vector<8x32xf32> to vector<8x8xf32>
    %127 = arith.truncf %126 : vector<8x8xf32> to vector<8x8xbf16>
    %cst_45 = arith.constant dense<0.000000e+00> : vector<8x8xf32>
    %128 = tpu.matmul %125, %127, %cst_45 {dimension_numbers = #tpu.dot_dimension_numbers<[1], [1], [0], [0], [0, 0, 1, 0], [], []>} : vector<8x8xbf16>, vector<8x8xbf16>, vector<8x8xf32> -> vector<8x8xf32>
    %129 = arith.addf %128, %123 : vector<8x8xf32>
    %cst_46 = arith.constant dense<0xFF800000> : vector<8xf32>
    %130 = vector.multi_reduction <maximumf>, %129, %cst_46 [1] : vector<8x8xf32> to vector<8xf32>
    %131 = vector.shape_cast %130 : vector<8xf32> to vector<8x1xf32>
    %132 = vector.broadcast %131 : vector<8x1xf32> to vector<8x8xf32>
    %133 = arith.subf %129, %132 : vector<8x8xf32>
    %134 = math.exp %133 : vector<8x8xf32>
    %cst_47 = arith.constant dense<0.000000e+00> : vector<8xf32>
    %135 = vector.multi_reduction <add>, %134, %cst_47 [1] : vector<8x8xf32> to vector<8xf32>
    %136 = vector.shape_cast %135 : vector<8xf32> to vector<8x1xf32>
    %cst_48 = arith.constant 1.000000e+00 : f32
    %137 = vector.broadcast %cst_48 : f32 to vector<8x1xf32>
    %138 = arith.divf %137, %136 : vector<8x1xf32>
    %139 = arith.truncf %134 : vector<8x8xf32> to vector<8x8xbf16>
    %140 = vector.extract_strided_slice %119 {offsets = [0, 0], sizes = [8, 8], strides = [1, 1]} : vector<8x32xf32> to vector<8x8xf32>
    %141 = arith.truncf %140 : vector<8x8xf32> to vector<8x8xbf16>
    %cst_49 = arith.constant dense<0.000000e+00> : vector<8x8xf32>
    %142 = tpu.matmul %139, %141, %cst_49 {dimension_numbers = #tpu.dot_dimension_numbers<[1], [0], [0], [1], [0, 0, 1, 1], [], []>} : vector<8x8xbf16>, vector<8x8xbf16>, vector<8x8xf32> -> vector<8x8xf32>
    %143 = vector.broadcast %138 : vector<8x1xf32> to vector<8x8xf32>
    %144 = arith.mulf %142, %143 : vector<8x8xf32>
    %c8_50 = arith.constant 8 : index
    %c0_51 = arith.constant 0 : index
    %145 = vector.load %arg21[%c8_50, %c0_51] : memref<16x32xf32, #tpu.memory_space<vmem>>, vector<8x8xf32>
    tpu.vector_store %arg21[%c8_50, %c0_51], %144 {strides = array<i32>} : memref<16x32xf32, #tpu.memory_space<vmem>>, vector<8x8xf32>,
    %146 = vector.extract_strided_slice %117 {offsets = [0, 8], sizes = [8, 8], strides = [1, 1]} : vector<8x32xf32> to vector<8x8xf32>
    %147 = arith.truncf %146 : vector<8x8xf32> to vector<8x8xbf16>
    %148 = vector.extract_strided_slice %118 {offsets = [0, 8], sizes = [8, 8], strides = [1, 1]} : vector<8x32xf32> to vector<8x8xf32>
    %149 = arith.truncf %148 : vector<8x8xf32> to vector<8x8xbf16>
    %cst_52 = arith.constant dense<0.000000e+00> : vector<8x8xf32>
    %150 = tpu.matmul %147, %149, %cst_52 {dimension_numbers = #tpu.dot_dimension_numbers<[1], [1], [0], [0], [0, 0, 1, 0], [], []>} : vector<8x8xbf16>, vector<8x8xbf16>, vector<8x8xf32> -> vector<8x8xf32>
    %151 = arith.addf %150, %123 : vector<8x8xf32>
    %cst_53 = arith.constant dense<0xFF800000> : vector<8xf32>
    %152 = vector.multi_reduction <maximumf>, %151, %cst_53 [1] : vector<8x8xf32> to vector<8xf32>
    %153 = vector.shape_cast %152 : vector<8xf32> to vector<8x1xf32>
    %154 = vector.broadcast %153 : vector<8x1xf32> to vector<8x8xf32>
    %155 = arith.subf %151, %154 : vector<8x8xf32>
    %156 = math.exp %155 : vector<8x8xf32>
    %cst_54 = arith.constant dense<0.000000e+00> : vector<8xf32>
    %157 = vector.multi_reduction <add>, %156, %cst_54 [1] : vector<8x8xf32> to vector<8xf32>
    %158 = vector.shape_cast %157 : vector<8xf32> to vector<8x1xf32>
    %cst_55 = arith.constant 1.000000e+00 : f32
    %159 = vector.broadcast %cst_55 : f32 to vector<8x1xf32>
    %160 = arith.divf %159, %158 : vector<8x1xf32>
    %161 = arith.truncf %156 : vector<8x8xf32> to vector<8x8xbf16>
    %162 = vector.extract_strided_slice %119 {offsets = [0, 8], sizes = [8, 8], strides = [1, 1]} : vector<8x32xf32> to vector<8x8xf32>
    %163 = arith.truncf %162 : vector<8x8xf32> to vector<8x8xbf16>
    %cst_56 = arith.constant dense<0.000000e+00> : vector<8x8xf32>
    %164 = tpu.matmul %161, %163, %cst_56 {dimension_numbers = #tpu.dot_dimension_numbers<[1], [0], [0], [1], [0, 0, 1, 1], [], []>} : vector<8x8xbf16>, vector<8x8xbf16>, vector<8x8xf32> -> vector<8x8xf32>
    %165 = vector.broadcast %160 : vector<8x1xf32> to vector<8x8xf32>
    %166 = arith.mulf %164, %165 : vector<8x8xf32>
    %c8_57 = arith.constant 8 : index
    %c8_58 = arith.constant 8 : index
    %167 = vector.load %arg21[%c8_57, %c8_58] : memref<16x32xf32, #tpu.memory_space<vmem>>, vector<8x8xf32>
    tpu.vector_store %arg21[%c8_57, %c8_58], %166 {strides = array<i32>} : memref<16x32xf32, #tpu.memory_space<vmem>>, vector<8x8xf32>,
    %168 = vector.extract_strided_slice %117 {offsets = [0, 16], sizes = [8, 8], strides = [1, 1]} : vector<8x32xf32> to vector<8x8xf32>
    %169 = arith.truncf %168 : vector<8x8xf32> to vector<8x8xbf16>
    %170 = vector.extract_strided_slice %118 {offsets = [0, 16], sizes = [8, 8], strides = [1, 1]} : vector<8x32xf32> to vector<8x8xf32>
    %171 = arith.truncf %170 : vector<8x8xf32> to vector<8x8xbf16>
    %cst_59 = arith.constant dense<0.000000e+00> : vector<8x8xf32>
    %172 = tpu.matmul %169, %171, %cst_59 {dimension_numbers = #tpu.dot_dimension_numbers<[1], [1], [0], [0], [0, 0, 1, 0], [], []>} : vector<8x8xbf16>, vector<8x8xbf16>, vector<8x8xf32> -> vector<8x8xf32>
    %173 = arith.addf %172, %123 : vector<8x8xf32>
    %cst_60 = arith.constant dense<0xFF800000> : vector<8xf32>
    %174 = vector.multi_reduction <maximumf>, %173, %cst_60 [1] : vector<8x8xf32> to vector<8xf32>
    %175 = vector.shape_cast %174 : vector<8xf32> to vector<8x1xf32>
    %176 = vector.broadcast %175 : vector<8x1xf32> to vector<8x8xf32>
    %177 = arith.subf %173, %176 : vector<8x8xf32>
    %178 = math.exp %177 : vector<8x8xf32>
    %cst_61 = arith.constant dense<0.000000e+00> : vector<8xf32>
    %179 = vector.multi_reduction <add>, %178, %cst_61 [1] : vector<8x8xf32> to vector<8xf32>
    %180 = vector.shape_cast %179 : vector<8xf32> to vector<8x1xf32>
    %cst_62 = arith.constant 1.000000e+00 : f32
    %181 = vector.broadcast %cst_62 : f32 to vector<8x1xf32>
    %182 = arith.divf %181, %180 : vector<8x1xf32>
    %183 = arith.truncf %178 : vector<8x8xf32> to vector<8x8xbf16>
    %184 = vector.extract_strided_slice %119 {offsets = [0, 16], sizes = [8, 8], strides = [1, 1]} : vector<8x32xf32> to vector<8x8xf32>
    %185 = arith.truncf %184 : vector<8x8xf32> to vector<8x8xbf16>
    %cst_63 = arith.constant dense<0.000000e+00> : vector<8x8xf32>
    %186 = tpu.matmul %183, %185, %cst_63 {dimension_numbers = #tpu.dot_dimension_numbers<[1], [0], [0], [1], [0, 0, 1, 1], [], []>} : vector<8x8xbf16>, vector<8x8xbf16>, vector<8x8xf32> -> vector<8x8xf32>
    %187 = vector.broadcast %182 : vector<8x1xf32> to vector<8x8xf32>
    %188 = arith.mulf %186, %187 : vector<8x8xf32>
    %c8_64 = arith.constant 8 : index
    %c16_65 = arith.constant 16 : index
    %189 = vector.load %arg21[%c8_64, %c16_65] : memref<16x32xf32, #tpu.memory_space<vmem>>, vector<8x8xf32>
    tpu.vector_store %arg21[%c8_64, %c16_65], %188 {strides = array<i32>} : memref<16x32xf32, #tpu.memory_space<vmem>>, vector<8x8xf32>,
    %190 = vector.extract_strided_slice %117 {offsets = [0, 24], sizes = [8, 8], strides = [1, 1]} : vector<8x32xf32> to vector<8x8xf32>
    %191 = arith.truncf %190 : vector<8x8xf32> to vector<8x8xbf16>
    %192 = vector.extract_strided_slice %118 {offsets = [0, 24], sizes = [8, 8], strides = [1, 1]} : vector<8x32xf32> to vector<8x8xf32>
    %193 = arith.truncf %192 : vector<8x8xf32> to vector<8x8xbf16>
    %cst_66 = arith.constant dense<0.000000e+00> : vector<8x8xf32>
    %194 = tpu.matmul %191, %193, %cst_66 {dimension_numbers = #tpu.dot_dimension_numbers<[1], [1], [0], [0], [0, 0, 1, 0], [], []>} : vector<8x8xbf16>, vector<8x8xbf16>, vector<8x8xf32> -> vector<8x8xf32>
    %195 = arith.addf %194, %123 : vector<8x8xf32>
    %cst_67 = arith.constant dense<0xFF800000> : vector<8xf32>
    %196 = vector.multi_reduction <maximumf>, %195, %cst_67 [1] : vector<8x8xf32> to vector<8xf32>
    %197 = vector.shape_cast %196 : vector<8xf32> to vector<8x1xf32>
    %198 = vector.broadcast %197 : vector<8x1xf32> to vector<8x8xf32>
    %199 = arith.subf %195, %198 : vector<8x8xf32>
    %200 = math.exp %199 : vector<8x8xf32>
    %cst_68 = arith.constant dense<0.000000e+00> : vector<8xf32>
    %201 = vector.multi_reduction <add>, %200, %cst_68 [1] : vector<8x8xf32> to vector<8xf32>
    %202 = vector.shape_cast %201 : vector<8xf32> to vector<8x1xf32>
    %cst_69 = arith.constant 1.000000e+00 : f32
    %203 = vector.broadcast %cst_69 : f32 to vector<8x1xf32>
    %204 = arith.divf %203, %202 : vector<8x1xf32>
    %205 = arith.truncf %200 : vector<8x8xf32> to vector<8x8xbf16>
    %206 = vector.extract_strided_slice %119 {offsets = [0, 24], sizes = [8, 8], strides = [1, 1]} : vector<8x32xf32> to vector<8x8xf32>
    %207 = arith.truncf %206 : vector<8x8xf32> to vector<8x8xbf16>
    %cst_70 = arith.constant dense<0.000000e+00> : vector<8x8xf32>
    %208 = tpu.matmul %205, %207, %cst_70 {dimension_numbers = #tpu.dot_dimension_numbers<[1], [0], [0], [1], [0, 0, 1, 1], [], []>} : vector<8x8xbf16>, vector<8x8xbf16>, vector<8x8xf32> -> vector<8x8xf32>
    %209 = vector.broadcast %204 : vector<8x1xf32> to vector<8x8xf32>
    %210 = arith.mulf %208, %209 : vector<8x8xf32>
    %c8_71 = arith.constant 8 : index
    %c24_72 = arith.constant 24 : index
    %211 = vector.load %arg21[%c8_71, %c24_72] : memref<16x32xf32, #tpu.memory_space<vmem>>, vector<8x8xf32>
    tpu.vector_store %arg21[%c8_71, %c24_72], %210 {strides = array<i32>} : memref<16x32xf32, #tpu.memory_space<vmem>>, vector<8x8xf32>,
    %c0_73 = arith.constant 0 : index
    %c0_74 = arith.constant 0 : index
    %212 = vector.load %arg21[%c0_73, %c0_74] : memref<16x32xf32, #tpu.memory_space<vmem>>, vector<16x32xf32>
    %213 = arith.truncf %212 : vector<16x32xf32> to vector<16x32xbf16>
    %cst_75 = arith.constant dense<0.000000e+00> : vector<16x32xf32>
    %214 = tpu.matmul %213, %19, %cst_75 {dimension_numbers = #tpu.dot_dimension_numbers<[1], [1], [0], [0], [0, 0, 1, 0], [], []>} : vector<16x32xbf16>, vector<32x32xbf16>, vector<16x32xf32> -> vector<16x32xf32>
    %215 = vector.broadcast %21 : vector<1x32xf32> to vector<16x32xf32>
    %216 = arith.addf %214, %215 : vector<16x32xf32>
    %217 = arith.addf %4, %216 : vector<16x32xf32>
    %c0_76 = arith.constant 0 : index
    %c0_77 = arith.constant 0 : index
    %c0_78 = arith.constant 0 : index
    %218 = vector.load %arg9[%c0_76, %c0_77, %c0_78] : memref<1x1x32xf32, #tpu.memory_space<vmem>>, vector<1x1x32xf32>
    %219 = vector.shape_cast %218 : vector<1x1x32xf32> to vector<1x32xf32>
    %c0_79 = arith.constant 0 : index
    %c0_80 = arith.constant 0 : index
    %c0_81 = arith.constant 0 : index
    %220 = vector.load %arg10[%c0_79, %c0_80, %c0_81] : memref<1x1x32xf32, #tpu.memory_space<vmem>>, vector<1x1x32xf32>
    %221 = vector.shape_cast %220 : vector<1x1x32xf32> to vector<1x32xf32>
    %cst_82 = arith.constant dense<0.000000e+00> : vector<16xf32>
    %222 = vector.multi_reduction <add>, %217, %cst_82 [1] : vector<16x32xf32> to vector<16xf32>
    %223 = vector.shape_cast %222 : vector<16xf32> to vector<16x1xf32>
    %cst_83 = arith.constant 3.200000e+01 : f32
    %224 = vector.broadcast %cst_83 : f32 to vector<16x1xf32>
    %225 = arith.divf %223, %224 : vector<16x1xf32>
    %226 = vector.broadcast %225 : vector<16x1xf32> to vector<16x32xf32>
    %227 = arith.subf %217, %226 : vector<16x32xf32>
    %228 = arith.mulf %227, %227 : vector<16x32xf32>
    %cst_84 = arith.constant dense<0.000000e+00> : vector<16xf32>
    %229 = vector.multi_reduction <add>, %228, %cst_84 [1] : vector<16x32xf32> to vector<16xf32>
    %230 = vector.shape_cast %229 : vector<16xf32> to vector<16x1xf32>
    %cst_85 = arith.constant 3.200000e+01 : f32
    %231 = vector.broadcast %cst_85 : f32 to vector<16x1xf32>
    %232 = arith.divf %230, %231 : vector<16x1xf32>
    %233 = vector.broadcast %225 : vector<16x1xf32> to vector<16x32xf32>
    %234 = arith.subf %217, %233 : vector<16x32xf32>
    %cst_86 = arith.constant 9.99999974E-6 : f32
    %235 = vector.broadcast %cst_86 : f32 to vector<16x1xf32>
    %236 = arith.addf %232, %235 : vector<16x1xf32>
    %237 = math.rsqrt %236 : vector<16x1xf32>
    %238 = vector.broadcast %237 : vector<16x1xf32> to vector<16x32xf32>
    %239 = arith.mulf %234, %238 : vector<16x32xf32>
    %240 = vector.broadcast %219 : vector<1x32xf32> to vector<16x32xf32>
    %241 = arith.mulf %239, %240 : vector<16x32xf32>
    %242 = vector.broadcast %221 : vector<1x32xf32> to vector<16x32xf32>
    %243 = arith.addf %241, %242 : vector<16x32xf32>
    %c0_87 = arith.constant 0 : index
    %c0_88 = arith.constant 0 : index
    %c0_89 = arith.constant 0 : index
    %244 = vector.load %arg11[%c0_87, %c0_88, %c0_89] : memref<1x64x32xbf16, #tpu.memory_space<vmem>>, vector<1x64x32xbf16>
    %245 = vector.shape_cast %244 : vector<1x64x32xbf16> to vector<64x32xbf16>
    %c0_90 = arith.constant 0 : index
    %c0_91 = arith.constant 0 : index
    %c0_92 = arith.constant 0 : index
    %246 = vector.load %arg12[%c0_90, %c0_91, %c0_92] : memref<1x1x64xf32, #tpu.memory_space<vmem>>, vector<1x1x64xf32>
    %247 = vector.shape_cast %246 : vector<1x1x64xf32> to vector<1x64xf32>
    %248 = arith.truncf %243 : vector<16x32xf32> to vector<16x32xbf16>
    %cst_93 = arith.constant dense<0.000000e+00> : vector<16x64xf32>
    %249 = tpu.matmul %248, %245, %cst_93 {dimension_numbers = #tpu.dot_dimension_numbers<[1], [1], [0], [0], [0, 0, 1, 0], [], []>} : vector<16x32xbf16>, vector<64x32xbf16>, vector<16x64xf32> -> vector<16x64xf32>
    %250 = vector.broadcast %247 : vector<1x64xf32> to vector<16x64xf32>
    %251 = arith.addf %249, %250 : vector<16x64xf32>
    %cst_94 = arith.constant 0.000000e+00 : f32
    %252 = vector.broadcast %cst_94 : f32 to vector<16x64xf32>
    %253 = arith.maximumf %251, %252 : vector<16x64xf32>
    %c0_95 = arith.constant 0 : index
    %c0_96 = arith.constant 0 : index
    %c0_97 = arith.constant 0 : index
    %254 = vector.load %arg13[%c0_95, %c0_96, %c0_97] : memref<1x32x64xbf16, #tpu.memory_space<vmem>>, vector<1x32x64xbf16>
    %255 = vector.shape_cast %254 : vector<1x32x64xbf16> to vector<32x64xbf16>
    %c0_98 = arith.constant 0 : index
    %c0_99 = arith.constant 0 : index
    %c0_100 = arith.constant 0 : index
    %256 = vector.load %arg14[%c0_98, %c0_99, %c0_100] : memref<1x1x32xf32, #tpu.memory_space<vmem>>, vector<1x1x32xf32>
    %257 = vector.shape_cast %256 : vector<1x1x32xf32> to vector<1x32xf32>
    %258 = arith.truncf %253 : vector<16x64xf32> to vector<16x64xbf16>
    %cst_101 = arith.constant dense<0.000000e+00> : vector<16x32xf32>
    %259 = tpu.matmul %258, %255, %cst_101 {dimension_numbers = #tpu.dot_dimension_numbers<[1], [1], [0], [0], [0, 0, 1, 0], [], []>} : vector<16x64xbf16>, vector<32x64xbf16>, vector<16x32xf32> -> vector<16x32xf32>
    %260 = vector.broadcast %257 : vector<1x32xf32> to vector<16x32xf32>
    %261 = arith.addf %259, %260 : vector<16x32xf32>
    %262 = arith.addf %243, %261 : vector<16x32xf32>
    %c0_102 = arith.constant 0 : index
    %c0_103 = arith.constant 0 : index
    %c0_104 = arith.constant 0 : index
    %263 = vector.load %arg15[%c0_102, %c0_103, %c0_104] : memref<1x1x32xf32, #tpu.memory_space<vmem>>, vector<1x1x32xf32>
    %264 = vector.shape_cast %263 : vector<1x1x32xf32> to vector<1x32xf32>
    %c0_105 = arith.constant 0 : index
    %c0_106 = arith.constant 0 : index
    %c0_107 = arith.constant 0 : index
    %265 = vector.load %arg16[%c0_105, %c0_106, %c0_107] : memref<1x1x32xf32, #tpu.memory_space<vmem>>, vector<1x1x32xf32>
    %266 = vector.shape_cast %265 : vector<1x1x32xf32> to vector<1x32xf32>
    %cst_108 = arith.constant dense<0.000000e+00> : vector<16xf32>
    %267 = vector.multi_reduction <add>, %262, %cst_108 [1] : vector<16x32xf32> to vector<16xf32>
    %268 = vector.shape_cast %267 : vector<16xf32> to vector<16x1xf32>
    %cst_109 = arith.constant 3.200000e+01 : f32
    %269 = vector.broadcast %cst_109 : f32 to vector<16x1xf32>
    %270 = arith.divf %268, %269 : vector<16x1xf32>
    %271 = vector.broadcast %270 : vector<16x1xf32> to vector<16x32xf32>
    %272 = arith.subf %262, %271 : vector<16x32xf32>
    %273 = arith.mulf %272, %272 : vector<16x32xf32>
    %cst_110 = arith.constant dense<0.000000e+00> : vector<16xf32>
    %274 = vector.multi_reduction <add>, %273, %cst_110 [1] : vector<16x32xf32> to vector<16xf32>
    %275 = vector.shape_cast %274 : vector<16xf32> to vector<16x1xf32>
    %cst_111 = arith.constant 3.200000e+01 : f32
    %276 = vector.broadcast %cst_111 : f32 to vector<16x1xf32>
    %277 = arith.divf %275, %276 : vector<16x1xf32>
    %278 = vector.broadcast %270 : vector<16x1xf32> to vector<16x32xf32>
    %279 = arith.subf %262, %278 : vector<16x32xf32>
    %cst_112 = arith.constant 9.99999974E-6 : f32
    %280 = vector.broadcast %cst_112 : f32 to vector<16x1xf32>
    %281 = arith.addf %277, %280 : vector<16x1xf32>
    %282 = math.rsqrt %281 : vector<16x1xf32>
    %283 = vector.broadcast %282 : vector<16x1xf32> to vector<16x32xf32>
    %284 = arith.mulf %279, %283 : vector<16x32xf32>
    %285 = vector.broadcast %264 : vector<1x32xf32> to vector<16x32xf32>
    %286 = arith.mulf %284, %285 : vector<16x32xf32>
    %287 = vector.broadcast %266 : vector<1x32xf32> to vector<16x32xf32>
    %288 = arith.addf %286, %287 : vector<16x32xf32>
    %289 = vector.shape_cast %288 : vector<16x32xf32> to vector<2x8x32xf32>
    %c0_113 = arith.constant 0 : index
    %c0_114 = arith.constant 0 : index
    %c0_115 = arith.constant 0 : index
    %290 = vector.load %arg20[%c0_113, %c0_114, %c0_115] : memref<2x8x32xf32, #tpu.memory_space<vmem>>, vector<2x8x32xf32>
    tpu.vector_store %arg20[%c0_113, %c0_114, %c0_115], %289 {strides = array<i32>} : memref<2x8x32xf32, #tpu.memory_space<vmem>>, vector<2x8x32xf32>,
    %c1_i32 = arith.constant 1 : i32
    %291 = arith.cmpi eq, %arg0, %c1_i32 : i32
    %292 = arith.extui %291 : i1 to i32
    %c0_i32_116 = arith.constant 0 : i32
    %293 = arith.cmpi ne, %292, %c0_i32_116 : i32
    scf.if %293 {
      %c0_117 = arith.constant 0 : index
      %c0_118 = arith.constant 0 : index
      %294 = vector.load %arg17[%c0_117, %c0_118] : memref<1x32xf32, #tpu.memory_space<vmem>>, vector<1x32xf32>
      %c0_119 = arith.constant 0 : index
      %c0_120 = arith.constant 0 : index
      %295 = vector.load %arg18[%c0_119, %c0_120] : memref<1x32xf32, #tpu.memory_space<vmem>>, vector<1x32xf32>
      %cst_121 = arith.constant dense<0.000000e+00> : vector<16xf32>
      %296 = vector.multi_reduction <add>, %288, %cst_121 [1] : vector<16x32xf32> to vector<16xf32>
      %297 = vector.shape_cast %296 : vector<16xf32> to vector<16x1xf32>
      %cst_122 = arith.constant 3.200000e+01 : f32
      %298 = vector.broadcast %cst_122 : f32 to vector<16x1xf32>
      %299 = arith.divf %297, %298 : vector<16x1xf32>
      %300 = vector.broadcast %299 : vector<16x1xf32> to vector<16x32xf32>
      %301 = arith.subf %288, %300 : vector<16x32xf32>
      %302 = arith.mulf %301, %301 : vector<16x32xf32>
      %cst_123 = arith.constant dense<0.000000e+00> : vector<16xf32>
      %303 = vector.multi_reduction <add>, %302, %cst_123 [1] : vector<16x32xf32> to vector<16xf32>
      %304 = vector.shape_cast %303 : vector<16xf32> to vector<16x1xf32>
      %cst_124 = arith.constant 3.200000e+01 : f32
      %305 = vector.broadcast %cst_124 : f32 to vector<16x1xf32>
      %306 = arith.divf %304, %305 : vector<16x1xf32>
      %307 = vector.broadcast %299 : vector<16x1xf32> to vector<16x32xf32>
      %308 = arith.subf %288, %307 : vector<16x32xf32>
      %cst_125 = arith.constant 9.99999974E-6 : f32
      %309 = vector.broadcast %cst_125 : f32 to vector<16x1xf32>
      %310 = arith.addf %306, %309 : vector<16x1xf32>
      %311 = math.rsqrt %310 : vector<16x1xf32>
      %312 = vector.broadcast %311 : vector<16x1xf32> to vector<16x32xf32>
      %313 = arith.mulf %308, %312 : vector<16x32xf32>
      %314 = vector.broadcast %294 : vector<1x32xf32> to vector<16x32xf32>
      %315 = arith.mulf %313, %314 : vector<16x32xf32>
      %316 = vector.broadcast %295 : vector<1x32xf32> to vector<16x32xf32>
      %317 = arith.addf %315, %316 : vector<16x32xf32>
      %318 = vector.shape_cast %317 : vector<16x32xf32> to vector<2x8x32xf32>
      %c0_126 = arith.constant 0 : index
      %c0_127 = arith.constant 0 : index
      %c0_128 = arith.constant 0 : index
      %319 = vector.load %arg19[%c0_126, %c0_127, %c0_128] : memref<2x8x32xf32, #tpu.memory_space<vmem>>, vector<2x8x32xf32>
      tpu.vector_store %arg19[%c0_126, %c0_127, %c0_128], %318 {strides = array<i32>} : memref<2x8x32xf32, #tpu.memory_space<vmem>>, vector<2x8x32xf32>,
    } else {
    }
    return
  }
  func.func @transform_0(%arg0: i32) -> (i32, i32, i32) {
    %c0_i32 = arith.constant 0 : i32
    %c0_i32_0 = arith.constant 0 : i32
    %c0_i32_1 = arith.constant 0 : i32
    %c0_i32_2 = arith.constant 0 : i32
    return %c0_i32, %c0_i32_0, %c0_i32_1 : i32, i32, i32
  }
  func.func @transform_1(%arg0: i32) -> (i32, i32, i32) {
    %c0_i32 = arith.constant 0 : i32
    %c0_i32_0 = arith.constant 0 : i32
    %c0_i32_1 = arith.constant 0 : i32
    %c0_i32_2 = arith.constant 0 : i32
    return %c0_i32, %c0_i32_0, %c0_i32_1 : i32, i32, i32
  }
  func.func @transform_2(%arg0: i32) -> (i32, i32) {
    %c0_i32 = arith.constant 0 : i32
    %c0_i32_0 = arith.constant 0 : i32
    %c0_i32_1 = arith.constant 0 : i32
    return %c0_i32, %c0_i32_0 : i32, i32
  }
  func.func @transform_3(%arg0: i32) -> (i32, i32, i32) {
    %c0_i32 = arith.constant 0 : i32
    %c0_i32_0 = arith.constant 0 : i32
    %c0_i32_1 = arith.constant 0 : i32
    %c0_i32_2 = arith.constant 0 : i32
    return %c0_i32, %c0_i32_0, %c0_i32_1 : i32, i32, i32
  }
  func.func @transform_4(%arg0: i32) -> (i32, i32, i32) {
    %c0_i32 = arith.constant 0 : i32
    %c0_i32_0 = arith.constant 0 : i32
    %c0_i32_1 = arith.constant 0 : i32
    return %arg0, %c0_i32, %c0_i32_0 : i32, i32, i32
  }
  func.func @transform_5(%arg0: i32) -> (i32, i32, i32) {
    %c0_i32 = arith.constant 0 : i32
    %c0_i32_0 = arith.constant 0 : i32
    %c0_i32_1 = arith.constant 0 : i32
    return %arg0, %c0_i32, %c0_i32_0 : i32, i32, i32
  }
  func.func @transform_6(%arg0: i32) -> (i32, i32, i32) {
    %c0_i32 = arith.constant 0 : i32
    %c0_i32_0 = arith.constant 0 : i32
    %c0_i32_1 = arith.constant 0 : i32
    return %arg0, %c0_i32, %c0_i32_0 : i32, i32, i32
  }
  func.func @transform_7(%arg0: i32) -> (i32, i32, i32) {
    %c0_i32 = arith.constant 0 : i32
    %c0_i32_0 = arith.constant 0 : i32
    %c0_i32_1 = arith.constant 0 : i32
    return %arg0, %c0_i32, %c0_i32_0 : i32, i32, i32
  }
  func.func @transform_8(%arg0: i32) -> (i32, i32, i32) {
    %c0_i32 = arith.constant 0 : i32
    %c0_i32_0 = arith.constant 0 : i32
    %c0_i32_1 = arith.constant 0 : i32
    return %arg0, %c0_i32, %c0_i32_0 : i32, i32, i32
  }
  func.func @transform_9(%arg0: i32) -> (i32, i32, i32) {
    %c0_i32 = arith.constant 0 : i32
    %c0_i32_0 = arith.constant 0 : i32
    %c0_i32_1 = arith.constant 0 : i32
    return %arg0, %c0_i32, %c0_i32_0 : i32, i32, i32
  }
  func.func @transform_10(%arg0: i32) -> (i32, i32, i32) {
    %c0_i32 = arith.constant 0 : i32
    %c0_i32_0 = arith.constant 0 : i32
    %c0_i32_1 = arith.constant 0 : i32
    return %arg0, %c0_i32, %c0_i32_0 : i32, i32, i32
  }
  func.func @transform_11(%arg0: i32) -> (i32, i32, i32) {
    %c0_i32 = arith.constant 0 : i32
    %c0_i32_0 = arith.constant 0 : i32
    %c0_i32_1 = arith.constant 0 : i32
    return %arg0, %c0_i32, %c0_i32_0 : i32, i32, i32
  }
  func.func @transform_12(%arg0: i32) -> (i32, i32, i32) {
    %c0_i32 = arith.constant 0 : i32
    %c0_i32_0 = arith.constant 0 : i32
    %c0_i32_1 = arith.constant 0 : i32
    return %arg0, %c0_i32, %c0_i32_0 : i32, i32, i32
  }
  func.func @transform_13(%arg0: i32) -> (i32, i32, i32) {
    %c0_i32 = arith.constant 0 : i32
    %c0_i32_0 = arith.constant 0 : i32
    %c0_i32_1 = arith.constant 0 : i32
    return %arg0, %c0_i32, %c0_i32_0 : i32, i32, i32
  }
  func.func @transform_14(%arg0: i32) -> (i32, i32, i32) {
    %c0_i32 = arith.constant 0 : i32
    %c0_i32_0 = arith.constant 0 : i32
    %c0_i32_1 = arith.constant 0 : i32
    return %arg0, %c0_i32, %c0_i32_0 : i32, i32, i32
  }
  func.func @transform_15(%arg0: i32) -> (i32, i32, i32) {
    %c0_i32 = arith.constant 0 : i32
    %c0_i32_0 = arith.constant 0 : i32
    %c0_i32_1 = arith.constant 0 : i32
    return %arg0, %c0_i32, %c0_i32_0 : i32, i32, i32
  }
  func.func @transform_16(%arg0: i32) -> (i32, i32) {
    %c0_i32 = arith.constant 0 : i32
    %c0_i32_0 = arith.constant 0 : i32
    %c0_i32_1 = arith.constant 0 : i32
    return %c0_i32, %c0_i32_0 : i32, i32
  }
  func.func @transform_17(%arg0: i32) -> (i32, i32) {
    %c0_i32 = arith.constant 0 : i32
    %c0_i32_0 = arith.constant 0 : i32
    %c0_i32_1 = arith.constant 0 : i32
    return %c0_i32, %c0_i32_0 : i32, i32
  }
  func.func @transform_18(%arg0: i32) -> (i32, i32, i32) {
    %c0_i32 = arith.constant 0 : i32
    %c0_i32_0 = arith.constant 0 : i32
    %c0_i32_1 = arith.constant 0 : i32
    %c0_i32_2 = arith.constant 0 : i32
    return %c0_i32, %c0_i32_0, %c0_i32_1 : i32, i32, i32
  }
}

module attributes {stable_mosaic.version = 11 : i64} {
  func.func @_ln_generator_kernel(%arg0: i32, %arg1: memref<20x32xf32, #tpu.memory_space<vmem>>, %arg2: memref<1x32xf32, #tpu.memory_space<vmem>>, %arg3: memref<1x32xf32, #tpu.memory_space<vmem>>, %arg4: memref<128x32xbf16, #tpu.memory_space<vmem>>, %arg5: memref<1x128xf32, #tpu.memory_space<vmem>>, %arg6: memref<20x128xf32, #tpu.memory_space<vmem>>) attributes {dimension_semantics = [#tpu.dimension_semantics<parallel>], iteration_bounds = array<i64: 1>, scalar_prefetch = 0 : i64, scratch_operands = 0 : i64, tpu.core_type = #tpu.core_type<tc>, window_params = [{pipeline_mode = #tpu.pipeline_mode<synchronous>, transform_indices = @transform_0, window_bounds = array<i64: 20, 32>}, {pipeline_mode = #tpu.pipeline_mode<synchronous>, transform_indices = @transform_1, window_bounds = array<i64: 1, 32>}, {pipeline_mode = #tpu.pipeline_mode<synchronous>, transform_indices = @transform_2, window_bounds = array<i64: 1, 32>}, {transform_indices = @transform_3, window_bounds = array<i64: 128, 32>}, {transform_indices = @transform_4, window_bounds = array<i64: 1, 128>}, {transform_indices = @transform_5, window_bounds = array<i64: 20, 128>}]} {
    %c0 = arith.constant 0 : index
    %c0_0 = arith.constant 0 : index
    %0 = vector.load %arg1[%c0, %c0_0] : memref<20x32xf32, #tpu.memory_space<vmem>>, vector<20x32xf32>
    %c0_1 = arith.constant 0 : index
    %c0_2 = arith.constant 0 : index
    %1 = vector.load %arg2[%c0_1, %c0_2] : memref<1x32xf32, #tpu.memory_space<vmem>>, vector<1x32xf32>
    %c0_3 = arith.constant 0 : index
    %c0_4 = arith.constant 0 : index
    %2 = vector.load %arg3[%c0_3, %c0_4] : memref<1x32xf32, #tpu.memory_space<vmem>>, vector<1x32xf32>
    %cst = arith.constant dense<0.000000e+00> : vector<20xf32>
    %3 = vector.multi_reduction <add>, %0, %cst [1] : vector<20x32xf32> to vector<20xf32>
    %4 = vector.shape_cast %3 : vector<20xf32> to vector<20x1xf32>
    %cst_5 = arith.constant 3.200000e+01 : f32
    %5 = vector.broadcast %cst_5 : f32 to vector<20x1xf32>
    %6 = arith.divf %4, %5 : vector<20x1xf32>
    %7 = vector.broadcast %6 : vector<20x1xf32> to vector<20x32xf32>
    %8 = arith.subf %0, %7 : vector<20x32xf32>
    %9 = arith.mulf %8, %8 : vector<20x32xf32>
    %cst_6 = arith.constant dense<0.000000e+00> : vector<20xf32>
    %10 = vector.multi_reduction <add>, %9, %cst_6 [1] : vector<20x32xf32> to vector<20xf32>
    %11 = vector.shape_cast %10 : vector<20xf32> to vector<20x1xf32>
    %cst_7 = arith.constant 3.200000e+01 : f32
    %12 = vector.broadcast %cst_7 : f32 to vector<20x1xf32>
    %13 = arith.divf %11, %12 : vector<20x1xf32>
    %14 = vector.broadcast %6 : vector<20x1xf32> to vector<20x32xf32>
    %15 = arith.subf %0, %14 : vector<20x32xf32>
    %cst_8 = arith.constant 9.99999974E-6 : f32
    %16 = vector.broadcast %cst_8 : f32 to vector<20x1xf32>
    %17 = arith.addf %13, %16 : vector<20x1xf32>
    %18 = math.rsqrt %17 : vector<20x1xf32>
    %19 = vector.broadcast %18 : vector<20x1xf32> to vector<20x32xf32>
    %20 = arith.mulf %15, %19 : vector<20x32xf32>
    %21 = vector.broadcast %1 : vector<1x32xf32> to vector<20x32xf32>
    %22 = arith.mulf %20, %21 : vector<20x32xf32>
    %23 = vector.broadcast %2 : vector<1x32xf32> to vector<20x32xf32>
    %24 = arith.addf %22, %23 : vector<20x32xf32>
    %c0_9 = arith.constant 0 : index
    %c0_10 = arith.constant 0 : index
    %25 = vector.load %arg4[%c0_9, %c0_10] : memref<128x32xbf16, #tpu.memory_space<vmem>>, vector<128x32xbf16>
    %c0_11 = arith.constant 0 : index
    %c0_12 = arith.constant 0 : index
    %26 = vector.load %arg5[%c0_11, %c0_12] : memref<1x128xf32, #tpu.memory_space<vmem>>, vector<1x128xf32>
    %27 = arith.truncf %24 : vector<20x32xf32> to vector<20x32xbf16>
    %cst_13 = arith.constant dense<0.000000e+00> : vector<20x128xf32>
    %28 = tpu.matmul %27, %25, %cst_13 {dimension_numbers = #tpu.dot_dimension_numbers<[1], [1], [0], [0], [0, 0, 1, 0], [], []>} : vector<20x32xbf16>, vector<128x32xbf16>, vector<20x128xf32> -> vector<20x128xf32>
    %29 = vector.broadcast %26 : vector<1x128xf32> to vector<20x128xf32>
    %30 = arith.addf %28, %29 : vector<20x128xf32>
    %c0_14 = arith.constant 0 : index
    %c0_15 = arith.constant 0 : index
    %31 = vector.load %arg6[%c0_14, %c0_15] : memref<20x128xf32, #tpu.memory_space<vmem>>, vector<20x128xf32>
    tpu.vector_store %arg6[%c0_14, %c0_15], %30 {strides = array<i32>} : memref<20x128xf32, #tpu.memory_space<vmem>>, vector<20x128xf32>,
    return
  }
  func.func @transform_0(%arg0: i32) -> (i32, i32) {
    %c0_i32 = arith.constant 0 : i32
    %c0_i32_0 = arith.constant 0 : i32
    %c0_i32_1 = arith.constant 0 : i32
    return %c0_i32, %c0_i32_0 : i32, i32
  }
  func.func @transform_1(%arg0: i32) -> (i32, i32) {
    %c0_i32 = arith.constant 0 : i32
    %c0_i32_0 = arith.constant 0 : i32
    %c0_i32_1 = arith.constant 0 : i32
    return %c0_i32, %c0_i32_0 : i32, i32
  }
  func.func @transform_2(%arg0: i32) -> (i32, i32) {
    %c0_i32 = arith.constant 0 : i32
    %c0_i32_0 = arith.constant 0 : i32
    %c0_i32_1 = arith.constant 0 : i32
    return %c0_i32, %c0_i32_0 : i32, i32
  }
  func.func @transform_3(%arg0: i32) -> (i32, i32) {
    %c0_i32 = arith.constant 0 : i32
    %c0_i32_0 = arith.constant 0 : i32
    return %arg0, %c0_i32 : i32, i32
  }
  func.func @transform_4(%arg0: i32) -> (i32, i32) {
    %c0_i32 = arith.constant 0 : i32
    %c0_i32_0 = arith.constant 0 : i32
    return %c0_i32, %arg0 : i32, i32
  }
  func.func @transform_5(%arg0: i32) -> (i32, i32) {
    %c0_i32 = arith.constant 0 : i32
    %c0_i32_0 = arith.constant 0 : i32
    return %c0_i32, %arg0 : i32, i32
  }
}

</mosaic_0001>

<bundles_post_ra>
// kernel: seq2seq_transformer_forward.5
= control target key start
LH: loop header
LB: loop body
LE: loop exit
PB: predicated region body
PF: predicated region fallthrough
CT: control target
= control target key end

     0   :  { %vm26_vm0 = vcmask 261120   ;;  %vm33_vm1 = vcmask 257024   ;;  %s406_s0 = inlined_call_operand.vmem [shape: f32[20,32], index: 0, kind: input, shape index: {}]   ;;  %s407_s3 = inlined_call_operand.vmem [shape: bf16[128,32], index: 3, kind: input, shape index: {}]   ;;  %s408_s1 = inlined_call_operand.vmem [shape: f32[1,32], index: 1, kind: input, shape index: {}]   ;;  %s409_s2 = inlined_call_operand.vmem [shape: f32[1,32], index: 2, kind: input, shape index: {}]   ;;  %s410_s4 = inlined_call_operand.vmem [shape: f32[1,128], index: 4, kind: input, shape index: {}]   ;;  %s411_s5 = inlined_call_operand.vmem [shape: f32[20,128], index: 5, kind: output, shape index: {}]  }
   0x1   :  { %v21_v0 = vld [vmem:[%s406_s0] sm:$0xff]  ;;  %v23_v1 = vld [vmem:[%s406_s0 + $0x10] sm:$0xf]  ;;  %v22_v2 = vld [vmem:[%s406_s0 + $0x8] sm:$0xff] }
   0x2   :  { %v27_v3 = vsel %vm26_vm0, %v21_v0, 0.0  ;;  %v34_v4 = vsel %vm33_vm1, %v23_v1, 0.0  ;;  %v30_v5 = vsel %vm26_vm0, %v22_v2, 0.0  ;;  %v287_v6 = vld [vmem:[%s407_s3] sm:$0xff]   ;;  %v288_v7 = vld [vmem:[%s407_s3 + $0x8] sm:$0xff]   ;;  %v289_v10 = vld [vmem:[%s407_s3 + $0x10] sm:$0xff]  }
   0x3   :  { %28 = vadd.xlane.f32.xlu0 %v27_v3  ;;  %35 = vadd.xlane.f32.xlu1 %v34_v4  ;;  %v158_v8 = vsel %vm26_vm0, %v287_v6, 0  ;;  %v161_v9 = vsel %vm26_vm0, %v288_v7, 0  ;;  %v164_v11 = vsel %vm26_vm0, %v289_v10, 0  ;;  %v290_v12 = vld [vmem:[%s407_s3 + $0x18] sm:$0xff]   ;;  %v291_v14 = vld [vmem:[%s407_s3 + $0x20] sm:$0xff]   ;;  %v292_v31 = vld [vmem:[%s407_s3 + $0x28] sm:$0xff]  }
   0x4   :  { %279 = vmatprep.subr.msk.bf16.mxu0 %vm26_vm0, %v287_v6  ;;  %v167_v13 = vsel %vm26_vm0, %v290_v12, 0  ;;  %v170_v15 = vsel %vm26_vm0, %v291_v14, 0  ;;  %v173_v32 = vsel %vm26_vm0, %v292_v31, 0  ;;  %v293_v33 = vld [vmem:[%s407_s3 + $0x30] sm:$0xff]   ;;  %v294_v35 = vld [vmem:[%s407_s3 + $0x38] sm:$0xff]  }
   0x5   :  { %260 = vmatpush3.bf16.xpose.msra.mxu0 %v158_v8  ;;  %v176_v34 = vsel %vm26_vm0, %v293_v33, 0  ;;  %v179_v36 = vsel %vm26_vm0, %v294_v35, 0  ;;  %v236_v48 = vld [vmem:[%s408_s1] ss:$0 sm:$0xff] }
   0x6   :  { %280 = vmatprep.subr.msk.bf16.mxu0 %vm26_vm0, %v288_v7  ;;  %v237_v54 = vld [vmem:[%s409_s2] ss:$0 sm:$0xff] }
   0x7   :  { %31 = vadd.xlane.f32.xlu0 %v30_v5  ;;  %v238_v62 = vld [vmem:[%s410_s4] ss:$0 sm:$0xff] }
   0xd   :  { %262 = vmatpush3.bf16.xpose.msra.mxu0 %v161_v9 }
   0xe   :  { %281 = vmatprep.subr.msk.bf16.mxu0 %vm26_vm0, %v289_v10 }
  0x15   :  { %264 = vmatpush3.bf16.xpose.msra.mxu0 %v164_v11 }
  0x16   :  { %282 = vmatprep.subr.msk.bf16.mxu0 %vm26_vm0, %v290_v12 }
  0x1d   :  { %266 = vmatpush3.bf16.xpose.msra.mxu0 %v167_v13 }
  0x1e   :  { %283 = vmatprep.subr.msk.bf16.mxu0 %vm26_vm0, %v291_v14 }
  0x25   :  { %268 = vmatpush3.bf16.xpose.msra.mxu0 %v170_v15 }
  0x26   :  { %284 = vmatprep.subr.msk.bf16.mxu0 %vm26_vm0, %v292_v31 }
  0x2d   :  { %270 = vmatpush3.bf16.xpose.msra.mxu0 %v173_v32 }
  0x2e   :  { %285 = vmatprep.subr.msk.bf16.mxu0 %vm26_vm0, %v293_v33 }
  0x35   :  { %272 = vmatpush3.bf16.xpose.msra.mxu0 %v176_v34 }
  0x36   :  { %286 = vmatprep.subr.msk.bf16.mxu0 %vm26_vm0, %v294_v35 }
  0x3d   :  { %274 = vmatpush3.bf16.xpose.msra.mxu0 %v179_v36 }
  0x90   :  { %v29_v16 = vpop.xlane.xlu0 %28  ;;  %v36_v17 = vpop.xlane.xlu1 %35 }
  0x91   :  { %v38_v18 = vmul.f32 0.03125, %v29_v16  ;;  %v40_v19 = vmul.f32 0.03125, %v36_v17 }
  0x93   :  { %v41_v20 = vsub.f32 %v21_v0, %v38_v18  ;;  %v43_v21 = vsub.f32 %v23_v1, %v40_v19 }
  0x94   :  { %v32_v22 = vpop.xlane.xlu0 %31 }
  0x95   :  { %v39_v23 = vmul.f32 0.03125, %v32_v22  ;;  %v44_v24 = vmul.f32 %v41_v20, %v41_v20  ;;  %v46_v25 = vmul.f32 %v43_v21, %v43_v21 }
  0x97   :  { %v42_v26 = vsub.f32 %v22_v2, %v39_v23  ;;  %v47_v27 = vsel %vm26_vm0, %v44_v24, 0.0  ;;  %v53_v28 = vsel %vm33_vm1, %v46_v25, 0.0 }
  0x98   :  { %48 = vadd.xlane.f32.xlu1 %v47_v27 }
  0x99   :  { %v45_v29 = vmul.f32 %v42_v26, %v42_v26 }
  0x9b   :  { %v50_v30 = vsel %vm26_vm0, %v45_v29, 0.0 }
  0x9c   :  { %54 = vadd.xlane.f32.xlu1 %v53_v28  ;;  %51 = vadd.xlane.f32.xlu0 %v50_v30 }
 0x125   :  { %v49_v37 = vpop.xlane.xlu1 %48 }
 0x126   :  { %v56_v38 = vmul.f32 0.03125, %v49_v37 }
 0x128   :  { %v59_v39 = vadd.f32 1e-05, %v56_v38 }
 0x129   :  { %v55_v40 = vpop.xlane.xlu1 %54  ;;  %v52_v41 = vpop.xlane.xlu0 %51 }
 0x12a   :  { %295 = vrsqrt.f32 %v59_v39  ;;  %v58_v42 = vmul.f32 0.03125, %v55_v40  ;;  %v57_v43 = vmul.f32 0.03125, %v52_v41 }
 0x12c   :  { %v61_v44 = vadd.f32 1e-05, %v58_v42  ;;  %v60_v45 = vadd.f32 1e-05, %v57_v43 }
 0x12e   :  { %297 = vrsqrt.f32 %v61_v44 }
 0x12f   :  { %299 = vrsqrt.f32 %v60_v45 }
 0x134   :  { %v296_v46 = vpop.eup %295 }
 0x135   :  { %v65_v47 = vmul.f32 %v296_v46, %v41_v20 }
 0x137   :  { %v74_v53 = vmul.f32 %v236_v48, %v65_v47 }
 0x138   :  { %v298_v49 = vpop.eup %297 }
 0x139   :  { %v300_v50 = vpop.eup %299  ;;  %v67_v51 = vmul.f32 %v298_v49, %v43_v21  ;;  %v83_v58 = vadd.f32 %v237_v54, %v74_v53 }
 0x13a   :  { %v66_v52 = vmul.f32 %v300_v50, %v42_v26 }
 0x13b   :  { %v76_v55 = vmul.f32 %v236_v48, %v67_v51 }
 0x13c   :  { %v75_v56 = vmul.f32 %v236_v48, %v66_v52 }
 0x13d   :  { %v85_v57 = vadd.f32 %v237_v54, %v76_v55 }
 0x13e   :  { %v84_v59 = vadd.f32 %v237_v54, %v75_v56 }
 0x13f   :  { %v104_v60 = vpack.c.bf16 %v85_v57, %v85_v57 }
 0x140   :  { %v103_v61 = vpack.c.bf16 %v84_v59, %v83_v58 }
 0x142   :  { %275 = vmatprep.mubr.msk.bf16.mxu0 %vm26_vm0, %v103_v61 }
 0x143   :  { %276 = vmatmul.mubr.msk.bf16.vlgmr.msra.gmra.mrb[0].mxu0 %vm26_vm0, %v104_v60 }
 0x216   :  { %v277_v63 = vpop.f32.mrb[0].mxu0 }
 0x217   :  { %v224_v0 = vadd.f32 %v277_v63, %v238_v62  ;;  %v215_v1 = vpop.f32.mrb[1].mxu0 }
 0x218   :  { %v216_v2 = vadd.f32 %v238_v62, %v215_v1  ;;  %v278_v3 = vpop.f32.mrb[2].mxu0 }
 0x219   :  { %231 = vst [vmem:[%s411_s5 + $0x10] sm:$0xf] %v224_v0  ;;  %v218_v4 = vpop.f32.mrb[3].mxu0 }
 0x21a   :  { %229 = vst [vmem:[%s411_s5] sm:$0xff] %v216_v2  ;;  %v219_v5 = vadd.f32 %v238_v62, %v218_v4 }
 0x21c   :  { %230 = vst [vmem:[%s411_s5 + $0x8] sm:$0xff] %v219_v5 }

// kernel: seq2seq_transformer_forward.3
= control target key start
LH: loop header
LB: loop body
LE: loop exit
PB: predicated region body
PF: predicated region fallthrough
CT: control target
= control target key end

     0   :  { %s2783_s27 = smov 0   ;;  %s3191_s0 = inlined_call_operand.vmem [shape: f32[2,8,32], index: 0, kind: input, shape index: {}]   ;;  %s3192_s1 = inlined_call_operand.vmem [shape: f32[1,8,32], index: 1, kind: input, shape index: {}]   ;;  %s3193_s2 = inlined_call_operand.vmem [shape: f32[8,8], index: 2, kind: input, shape index: {}]   ;;  %s3194_s3 = inlined_call_operand.vmem [shape: f32[2,1,8], index: 3, kind: input, shape index: {}]   ;;  %s3195_s4 = inlined_call_operand.vmem [shape: bf16[2,96,32], index: 4, kind: input, shape index: {}]   ;;  %s3196_s5 = inlined_call_operand.vmem [shape: f32[2,1,96], index: 5, kind: input, shape index: {}]   ;;  %s3197_s6 = inlined_call_operand.vmem [shape: bf16[2,32,32], index: 6, kind: input, shape index: {}]   ;;  %s3198_s7 = inlined_call_operand.vmem [shape: f32[2,1,32], index: 7, kind: input, shape index: {}]   ;;  %s3199_s8 = inlined_call_operand.vmem [shape: f32[2,1,32], index: 8, kind: input, shape index: {}]   ;;  %s3200_s9 = inlined_call_operand.vmem [shape: f32[2,1,32], index: 9, kind: input, shape index: {}]   ;;  %s3201_s10 = inlined_call_operand.vmem [shape: bf16[2,64,32], index: 10, kind: input, shape index: {}]   ;;  %s3202_s11 = inlined_call_operand.vmem [shape: f32[2,1,64], index: 11, kind: input, shape index: {}]   ;;  %s3203_s12 = inlined_call_operand.vmem [shape: bf16[2,32,64], index: 12, kind: input, shape index: {}]   ;;  %s3204_s13 = inlined_call_operand.vmem [shape: f32[2,1,32], index: 13, kind: input, shape index: {}]   ;;  %s3205_s14 = inlined_call_operand.vmem [shape: f32[2,1,32], index: 14, kind: input, shape index: {}]   ;;  %s3206_s15 = inlined_call_operand.vmem [shape: f32[2,1,32], index: 15, kind: input, shape index: {}]   ;;  %s3207_s16 = inlined_call_operand.vmem [shape: f32[1,32], index: 16, kind: input, shape index: {}]   ;;  %s3208_s17 = inlined_call_operand.vmem [shape: f32[1,32], index: 17, kind: input, shape index: {}]   ;;  %s3209_s18 = inlined_call_operand.vmem [shape: f32[2,8,32], index: 18, kind: output, shape index: {}]  }
   0x1   :  { %3214 = sst [smem:[#allocation5_spill]] %s3191_s0 }
   0x2   :  { %3215 = sst [smem:[#allocation6_spill]] %s3192_s1 }
   0x3   :  { %3216 = sst [smem:[#allocation7_spill]] %s3193_s2 }
   0x4   :  { %3217 = sst [smem:[#allocation8_spill]] %s3194_s3 }
   0x5   :  { %3218 = sst [smem:[#allocation9_spill]] %s3195_s4 }
   0x6   :  { %3219 = sst [smem:[#allocation10_spill]] %s3197_s6 }
   0x7   :  { %3220 = sst [smem:[#allocation11_spill]] %s3207_s16 }
   0x8   :  { %3221 = sst [smem:[#allocation12_spill]] %s3208_s17 }
   0x9   :  { %3222 = sst [smem:[#allocation13_spill]] %s3209_s18 }
   0xa LB: > { %3223 = sst [smem:[#allocation4_spill]] %s2670_s27  ;;  %s2789_s28 = sadd.s32 4294967295, %s2670_s27   ;;  %s2670_s27 = sphi %s2783_s27, %s28_s27  }
   0xb   : > { %p2330_p0 = scmp.ge.s32.totalorder %s2670_s27, 1  ;;  %p601_p1 = scmp.lt.s32.totalorder %s2670_s27, 3 }
   0xd   : > { %p602_p2 = pnand %p2330_p0, %p601_p1 }
   0xe   : > { %p689_p3 = scmp.lt.s32.totalorder (!%p602_p2), %s2789_s28, 1  ;;  %s3224_s4 = sld [smem:[#allocation9_spill]] (!%p602_p2) }
   0xf   : > { %605 = sbr.rel (%p602_p2) target bundleno = 3549 (0xddd), region = 92  ;;  %s3225_s6 = sld [smem:[#allocation10_spill]] (!%p602_p2) }
  0x10   : > { %p2338_p4 = scmp.ne.s32.totalorder (!%p602_p2), %s2789_s28, 0 }
  0x16   : > { %s2795_s29 = scalar_select %p689_p3, %s2789_s28, 1 }
  0x17   : > { %737 = sbr.rel (%p2338_p4) target bundleno = 39 (0x27), region = 96  ;;  %s3226_s24 = sld [smem:[#allocation5_spill]] (!%p2338_p4)  ;;  %vm745_vm0 = vcmask (!%p2338_p4), 261120  }
  0x18   : > { %s2581_s30 = smul.u32 48, %s2795_s29  ;;  %s2388_s20 = sshll.u32 %s2795_s29, 4 }
  0x19   : > { %s2815_s18 = scalar_lea.vmem %s3225_s6, %s2388_s20  ;;  %s2389_s21 = sshll.u32 %s2795_s29, 5 }
  0x1a   : > { %s2810_s25 = scalar_lea.vmem %s3224_s4, %s2581_s30  ;;  %s2833_s4 = scalar_lea.vmem %s3201_s10, %s2389_s21 }
  0x1b   : > { %s2838_s6 = scalar_lea.vmem %s3203_s12, %s2388_s20  ;;  %s726_s1 = scalar_lea.vmem %s3204_s13, %s2795_s29 }
  0x1c   : > { %s729_s0 = scalar_lea.vmem %s3205_s14, %s2795_s29  ;;  %s732_s23 = scalar_lea.vmem %s3206_s15, %s2795_s29 }
  0x1d   : > { %v738_v0 = vld [vmem:[%s3226_s24] sm:$0xff] (!%p2338_p4)  ;;  %s3227_s26 = sld [smem:[#allocation6_spill]] (!%p2338_p4)  ;;  %v739_v2 = vld [vmem:[%s3226_s24 + $0x8] sm:$0xff] (!%p2338_p4) }
  0x1e   : > { %v740_v3 = vmul.f32 5.656854, %v738_v0  ;;  %v741_v4 = vmul.f32 5.656854, %v739_v2 }
  0x23   : > { %v742_v1 = vld [vmem:[%s3227_s26] sm:$0xff] }
  0x24   : > { %v743_v5 = vadd.f32 %v742_v1, %v740_v3  ;;  %v744_v6 = vadd.f32 %v742_v1, %v741_v4 }
  0x26   : > { %746 = vst.msk [vmem:[#allocation2] sm:$0xff] %vm745_vm0, %v743_v5  ;;  %747 = vst.msk [vmem:[#allocation2 + $0x8] sm:$0xff] %vm745_vm0, %v744_v6 }
  0x27 PF: > { %v2606_v7 = vld [vmem:[%s2810_s25] sm:$0xff]   ;;  %v2672_v8 = vmov 0.0   ;;  %vm800_vm1 = vcmask 261120   ;;  %v2607_v10 = vld [vmem:[%s2810_s25 + $0x8] sm:$0xff]   ;;  %vm2673_vm2 = vmmov 0   ;;  %v2608_v12 = vld [vmem:[%s2810_s25 + $0x10] sm:$0xff]  }
  0x28   : > { %2441 = vmatprep.subr.bf16.mxu0 %v2672_v8  ;;  %2457 = vmatprep.subr.bf16.mxu1 %v2672_v8  ;;  %v805_v9 = vsel %vm800_vm1, %v2606_v7, 0  ;;  %v808_v11 = vsel %vm800_vm1, %v2607_v10, 0  ;;  %v811_v13 = vsel %vm800_vm1, %v2608_v12, 0  ;;  %v2609_v14 = vld [vmem:[%s2810_s25 + $0x18] sm:$0xff]   ;;  %v2610_v16 = vld [vmem:[%s2810_s25 + $0x20] sm:$0xff]   ;;  %v2611_v18 = vld [vmem:[%s2810_s25 + $0x28] sm:$0xff]   ;;  %s3228_s25 = scalar_lea.vmem %s3196_s5, %s2795_s29 }
  0x29   : > { %2442 = vmatpush3.bf16.xpose.msra.mxu0 %v805_v9  ;;  %2453 = vmatprep.mubr.msk.bf16.mxu0 %vm2673_vm2, %v2672_v8  ;;  %v814_v15 = vsel %vm800_vm1, %v2609_v14, 0  ;;  %v817_v17 = vsel %vm800_vm1, %v2610_v16, 0  ;;  %v820_v19 = vsel %vm800_vm1, %v2611_v18, 0  ;;  %v2339_v23 = vld [vmem:[%s3228_s25] ss:$0 sm:$0xff]  ;;  %s2674_s2 = smov 64  }
  0x2a   : > { %2443 = vmatprep.subr.bf16.mxu0 %v2672_v8  ;;  %2459 = vmatprep.mubr.msk.bf16.mxu1 %vm2673_vm2, %v2672_v8  ;;  %s2675_s22 = smov 96   ;;  %s2676_s21 = smov 88   ;;  %vm882_vm3 = vcmask 64512   ;;  %vm946_vm4 = vcmask 1043456   ;;  %vm1107_vm5 = vcmask 130112   ;;  %vm1224_vm6 = vcmask 195712  }
  0x2b   : > { %s2677_s30 = smov 120   ;;  %s3229_s26 = sld [smem:[#allocation8_spill]]  ;;  %vm1341_vm7 = vcmask 261312   ;;  %vm2042_vm8 = vcmask 523264  }
  0x2c   : > { %s3230_s3 = sld [smem:[#allocation7_spill]]  ;;  %s2678_s19 = smov 56  }
  0x2d   : > { %v2885_v20 = vld [vmem:[#allocation2] sm:$0xff]  ;;  %v2887_v21 = vld [vmem:[#allocation2 + $0x8] sm:$0xff]  ;;  %s2679_s25 = smov 112   ;;  %s2680_s20 = smov 72  }
  0x2e   : > { %v763_v22 = vpack.c.bf16 %v2887_v21, %v2885_v20  ;;  %s2681_s27 = smov 104   ;;  %s2682_s16 = smov 80  }
  0x2f   : > { %s2684_s17 = smov 40   ;;  %p2383_p5 = scmp.ne.s32.totalorder %s2789_s28, 1 }
  0x31   : > { %2444 = vmatpush3.bf16.xpose.msra.mxu0 %v808_v11  ;;  %v2347_v35 = vld [vmem:[%s3229_s26] ss:$0 sm:$0xff] }
  0x32   : > { %2445 = vmatprep.subr.bf16.mxu0 %v2672_v8  ;;  %v2924_v36 = vld [vmem:[%s3230_s3] sm:$0xff]  ;;  %s2686_s3 = smov 16  }
  0x33   : > { %v2927_v37 = vadd.f32 %v2347_v35, %v2924_v36 }
  0x39   : > { %2446 = vmatpush3.bf16.xpose.msra.mxu0 %v811_v13 }
  0x3a   : > { %2447 = vmatprep.subr.bf16.mxu0 %v2672_v8 }
  0x41   : > { %2448 = vmatpush3.bf16.xpose.msra.mxu0 %v814_v15 }
  0x42   : > { %2449 = vmatprep.subr.bf16.mxu0 %v2672_v8 }
  0x49   : > { %2450 = vmatpush3.bf16.xpose.msra.mxu0 %v817_v17 }
  0x4a   : > { %2451 = vmatprep.subr.bf16.mxu0 %v2672_v8 }
  0x51   : > { %2452 = vmatpush3.bf16.xpose.msra.mxu0 %v820_v19 }
  0x52   : > { %2493 = vmatprep.subr.bf16.mxu0 %v2672_v8 }
  0x58   : > { %2454 = vmatmul.mubr.msk.bf16.vlgmr.msra.gmra.mrb[0].mxu0 %vm800_vm1, %v763_v22 }
  0x59   : > { %2495 = vmatprep.mubr.msk.bf16.mxu0 %vm2673_vm2, %v2672_v8 }
 0x12b   : > { %v856_v24 = vpop.f32.mrb[0].mxu0 }
 0x12c   : > { %v857_v25 = vadd.f32 %v2339_v23, %v856_v24  ;;  %v2455_v26 = vpop.f32.mrb[1].mxu0 }
 0x12d   : > { %v859_v27 = vpop.f32.mrb[2].mxu0 }
 0x12e   : > { %v2900_v28 = vpack.c.bf16 %v857_v25, %v857_v25  ;;  %v860_v29 = vadd.f32 %v2339_v23, %v859_v27  ;;  %v2456_v30 = vpop.f32.mrb[3].mxu0 }
 0x130   : > { %941 = vrot.lane.b32.xlu1 %v2900_v28, %s2674_s2  ;;  %880 = vrot.lane.b32.xlu0 %v2900_v28, %s2675_s22  ;;  %v2938_v44 = vpack.c.bf16 %v860_v29, %v860_v29 }
 0x134   : > { %994 = vrot.lane.b32.xlu1 %v2900_v28, %s2676_s21 }
 0x138   : > { %992 = vrot.lane.b32.xlu1 %v2900_v28, %s2677_s30 }
 0x1a2   : > { %v881_v31 = vpop.permute.xlu0 %880  ;;  %v942_v33 = vpop.permute.xlu1 %941 }
 0x1a3   : > { %v887_v32 = vsel %vm882_vm3, %v881_v31, 0  ;;  %v948_v34 = vsel %vm946_vm4, %v942_v33, 0 }
 0x1a4   : > { %2458 = vmatpush3.bf16.xpose.msra.mxu1 %v887_v32 }
 0x1a5   : > { %2463 = vmatprep.subr.bf16.mxu1 %v2672_v8 }
 0x1a6   : > { %v995_v53 = vpop.permute.xlu1 %994 }
 0x1a7   : > { %v1000_v55 = vsel %vm882_vm3, %v995_v53, 0 }
 0x1aa   : > { %v993_v57 = vpop.permute.xlu1 %992 }
 0x1ab   : > { %2460 = vmatmul.mubr.msk.bf16.vlgmr.msra.gmra.mrb[0].mxu1 %vm882_vm3, %v2900_v28 }
 0x1ac   : > { %2464 = vmatpush3.bf16.msra.mxu1 %v948_v34  ;;  %2465 = vmatprep.mubr.msk.bf16.mxu1 %vm2673_vm2, %v2672_v8 }
 0x1ad   : > { %2469 = vmatprep.subr.bf16.mxu1 %v2672_v8 }
 0x27e   : > { %v923_v38 = vpop.f32.mrb[0].mxu1 }
 0x27f   : > { %v924_v39 = vadd.f32 %v923_v38, %v2927_v37  ;;  %v2461_v40 = vpop.f32.mrb[1].mxu1  ;;  %v2356_v38 = vld [vmem:[%s3229_s26 + $0x1] ss:$0 sm:$0xff] }
 0x280   : > { %v926_v41 = vpop.f32.mrb[2].mxu1 }
 0x281   : > { %v2462_v42 = vpop.f32.mrb[3].mxu1  ;;  %v929_v43 = vsel %vm882_vm3, %v924_v39, -inf }
 0x282   : > { %930 = vmax.xlane.f32.xlu0 %v929_v43 }
 0x298   : > { %1054 = vrot.lane.b32.xlu0 %v2900_v28, %s2678_s19 }
 0x29c   : > { %1109 = vrot.lane.b32.xlu0 %v2900_v28, %s2679_s25 }
 0x2a0   : > { %1228 = vrot.lane.b32.xlu0 %v2900_v28, %s2680_s20 }
 0x2a4   : > { %1226 = vrot.lane.b32.xlu0 %v2900_v28, %s2681_s27 }
 0x2a8   : > { %1464 = vrot.lane.b32.xlu0 %v2938_v44, %s2676_s21  ;;  %s2683_s21 = smov 48  }
 0x2ac   : > { %1580 = vrot.lane.b32.xlu0 %v2938_v44, %s2682_s16 }
 0x2b0   : > { %1696 = vrot.lane.b32.xlu0 %v2938_v44, %s2680_s20  ;;  %s3231_s20 = scalar_lea.vmem %s3198_s7, %s2795_s29 }
 0x30f   : > { %v931_v45 = vpop.xlane.xlu0 %930 }
 0x310   : > { %v932_v46 = vsub.f32 %v924_v39, %v931_v45  ;;  %v1349_v39 = vadd.f32 %v2356_v38, %v2924_v36 }
 0x312   : > { %v933_v47 = vmul.f32 1.442695, %v932_v46 }
 0x313   : > { %v1055_v48 = vpop.permute.xlu0 %1054 }
 0x314   : > { %2620 = vpow2.f32 %v933_v47  ;;  %v1060_v58 = vsel %vm946_vm4, %v1055_v48, 0 }
 0x317   : > { %v2945_v49 = vpop.permute.xlu0 %1109 }
 0x31b   : > { %v1229_v50 = vpop.permute.xlu0 %1228 }
 0x31c   : > { %v1234_v51 = vsel %vm882_vm3, %v1229_v50, 0 }
 0x31d   : > { %2494 = vmatpush3.bf16.xpose.msra.mxu0 %v1234_v51 }
 0x31e   : > { %v2948_v52 = vpop.eup %2620  ;;  %2505 = vmatprep.subr.bf16.mxu0 %v2672_v8 }
 0x31f   : > { %v940_v54 = vpack.c.bf16 %v2948_v52, %v2948_v52  ;;  %v1227_v56 = vpop.permute.xlu0 %1226 }
 0x321   : > { %2466 = vmatmul.mubr.msk.bf16.vlgmr.msra.gmra.mrb[4].mxu1 %vm882_vm3, %v940_v54 }
 0x322   : > { %2470 = vmatpush3.bf16.xpose.msra.mxu1 %v1000_v55  ;;  %2471 = vmatprep.mubr.msk.bf16.mxu1 %vm2673_vm2, %v2672_v8 }
 0x323   : > { %2475 = vmatprep.subr.bf16.mxu1 %v2672_v8  ;;  %v1465_v18 = vpop.permute.xlu0 %1464 }
 0x324   : > { %2496 = vmatmul.mubr.msk.bf16.vlgmr.msra.gmra.mrb[4].mxu0 %vm882_vm3, %v1227_v56  ;;  %v1470_v23 = vsel %vm882_vm3, %v1465_v18, 0 }
 0x325   : > { %2507 = vmatprep.mubr.msk.bf16.mxu0 %vm2673_vm2, %v2672_v8 }
 0x327   : > { %v1581_v25 = vpop.permute.xlu0 %1580 }
 0x328   : > { %v1586_v27 = vsel %vm882_vm3, %v1581_v25, 0 }
 0x329   : > { %2472 = vmatmul.mubr.msk.bf16.vlgmr.msra.gmra.mrb[8].mxu1 %vm882_vm3, %v993_v57 }
 0x32a   : > { %2476 = vmatpush3.bf16.msra.mxu1 %v1060_v58  ;;  %2477 = vmatprep.mubr.msk.bf16.mxu1 %vm2673_vm2, %v2672_v8 }
 0x32b   : > { %2481 = vmatprep.subr.bf16.mxu1 %v2672_v8  ;;  %v1697_v29 = vpop.permute.xlu0 %1696 }
 0x32c   : > { %v1702_v31 = vsel %vm882_vm3, %v1697_v29, 0 }
 0x3f4   : > { %v2966_v59 = vpop.f32.mrb[4].mxu1 }
 0x3f5   : > { %v2467_v60 = vpop.f32.mrb[5].mxu1 }
 0x3f6   : > { %v987_v61 = vpop.f32.mrb[6].mxu1 }
 0x3f7   : > { %v2468_v62 = vpop.f32.mrb[7].mxu1  ;;  %v1270_v63 = vpop.f32.mrb[4].mxu0 }
 0x3f8   : > { %v2497_v0 = vpop.f32.mrb[5].mxu0  ;;  %v2981_v10 = vadd.f32 %v1270_v63, %v2927_v37 }
 0x3f9   : > { %v1273_v1 = vpop.f32.mrb[6].mxu0 }
 0x3fa   : > { %v2498_v2 = vpop.f32.mrb[7].mxu0  ;;  %v1276_v11 = vsel %vm882_vm3, %v2981_v10, -inf }
 0x3fc   : > { %v1036_v3 = vpop.f32.mrb[8].mxu1 }
 0x3fd   : > { %v1037_v4 = vadd.f32 %v1036_v3, %v2927_v37  ;;  %v2473_v5 = vpop.f32.mrb[9].mxu1 }
 0x3fe   : > { %v1039_v6 = vpop.f32.mrb[10].mxu1 }
 0x3ff   : > { %v2474_v7 = vpop.f32.mrb[11].mxu1  ;;  %v1042_v9 = vsel %vm882_vm3, %v1037_v4, -inf }
 0x400   : > { %1043 = vmax.xlane.f32.xlu1 %v1042_v9 }
 0x411   : > { %1111 = vrot.lane.b32.xlu1 %v2900_v28, %s2682_s16  ;;  %s3232_s16 = scalar_lea.vmem %s3199_s8, %s2795_s29 }
 0x415   : > { %1352 = vrot.lane.b32.xlu1 %v2938_v44, %s2675_s22  ;;  %s3237_s22 = sld [smem:[#allocation13_spill]] (!%p2383_p5) }
 0x419   : > { %1462 = vrot.lane.b32.xlu1 %v2938_v44, %s2677_s30  ;;  %s3233_s30 = scalar_lea.vmem %s3200_s9, %s2795_s29 }
 0x41d   : > { %1578 = vrot.lane.b32.xlu1 %v2938_v44, %s2679_s25 }
 0x421   : > { %1694 = vrot.lane.b32.xlu1 %v2938_v44, %s2681_s27  ;;  %s3236_s27 = sld [smem:[#allocation12_spill]] (!%p2383_p5) }
 0x445   : > { %1277 = vmax.xlane.f32.xlu1 %v1276_v11 }
 0x456   : > { %1171 = vrot.lane.b32.xlu1 %v2900_v28, %s2683_s21 }
 0x48d   : > { %v1044_v12 = vpop.xlane.xlu1 %1043 }
 0x48e   : > { %v1045_v13 = vsub.f32 %v1037_v4, %v1044_v12 }
 0x490   : > { %v1046_v14 = vmul.f32 1.442695, %v1045_v13 }
 0x491   : > { %v1112_v15 = vpop.permute.xlu1 %1111 }
 0x492   : > { %2622 = vpow2.f32 %v1046_v14  ;;  %v1117_v24 = vsel %vm882_vm3, %v1112_v15, 0 }
 0x495   : > { %v1353_v16 = vpop.permute.xlu1 %1352 }
 0x496   : > { %v1358_v17 = vsel %vm882_vm3, %v1353_v16, 0 }
 0x497   : > { %2506 = vmatpush3.bf16.xpose.msra.mxu0 %v1358_v17 }
 0x498   : > { %2517 = vmatprep.subr.bf16.mxu0 %v2672_v8 }
 0x499   : > { %v1463_v26 = vpop.permute.xlu1 %1462 }
 0x49c   : > { %v2989_v19 = vpop.eup %2622 }
 0x49d   : > { %v1053_v22 = vpack.c.bf16 %v2989_v19, %v2989_v19  ;;  %v1579_v30 = vpop.permute.xlu1 %1578  ;;  %v1048_v13 = vsel %vm882_vm3, %v2989_v19, 0.0 }
 0x49e   : > { %2508 = vmatmul.mubr.msk.bf16.vlgmr.msra.gmra.mrb[8].mxu0 %vm882_vm3, %v2938_v44 }
 0x49f   : > { %2478 = vmatmul.mubr.msk.bf16.vlgmr.msra.gmra.mrb[12].mxu1 %vm882_vm3, %v1053_v22  ;;  %2518 = vmatpush3.bf16.xpose.msra.mxu0 %v1470_v23 }
 0x4a0   : > { %2482 = vmatpush3.bf16.xpose.msra.mxu1 %v1117_v24  ;;  %2519 = vmatprep.mubr.msk.bf16.mxu0 %vm2673_vm2, %v2672_v8 }
 0x4a1   : > { %2483 = vmatprep.mubr.msk.bf16.mxu1 %vm2673_vm2, %v2672_v8  ;;  %2529 = vmatprep.subr.bf16.mxu0 %v2672_v8  ;;  %v1695_v32 = vpop.permute.xlu1 %1694 }
 0x4a2   : > { %2487 = vmatprep.subr.bf16.mxu1 %v2672_v8 }
 0x4a6   : > { %2520 = vmatmul.mubr.msk.bf16.vlgmr.msra.gmra.mrb[12].mxu0 %vm882_vm3, %v1463_v26 }
 0x4a7   : > { %2484 = vmatmul.mubr.msk.bf16.vlgmr.msra.gmra.mrb[16].mxu1 %vm882_vm3, %v2945_v49  ;;  %2530 = vmatpush3.bf16.xpose.msra.mxu0 %v1586_v27 }
 0x4a8   : > { %2531 = vmatprep.mubr.msk.bf16.mxu0 %vm2673_vm2, %v2672_v8  ;;  %2541 = vmatprep.subr.bf16.mxu0 %v2672_v8 }
 0x4a9   : > { %2489 = vmatprep.mubr.msk.bf16.mxu1 %vm2673_vm2, %v2672_v8 }
 0x4ae   : > { %2532 = vmatmul.mubr.msk.bf16.vlgmr.msra.gmra.mrb[16].mxu0 %vm882_vm3, %v1579_v30 }
 0x4af   : > { %2542 = vmatpush3.bf16.xpose.msra.mxu0 %v1702_v31  ;;  %2543 = vmatprep.mubr.msk.bf16.mxu0 %vm2673_vm2, %v2672_v8 }
 0x4b0   : > { %2553 = vmatprep.subr.bf16.mxu0 %v2672_v8 }
 0x4b6   : > { %2544 = vmatmul.mubr.msk.bf16.vlgmr.msra.gmra.mrb[20].mxu0 %vm882_vm3, %v1695_v32 }
 0x4b7   : > { %2557 = vmatprep.mubr.msk.bf16.mxu0 %vm2673_vm2, %v2672_v8 }
 0x4d2   : > { %v3021_v33 = vpop.xlane.xlu1 %1277 }
 0x4d3   : > { %v1279_v25 = vsub.f32 %v2981_v10, %v3021_v33 }
 0x4d5   : > { %v1280_v29 = vmul.f32 1.442695, %v1279_v25 }
 0x4d6   : > { %v1172_v34 = vpop.permute.xlu1 %1171 }
 0x4d7   : > { %v1177_v35 = vsel %vm946_vm4, %v1172_v34, 0 }
 0x4d8   : > { %2488 = vmatpush3.bf16.msra.mxu1 %v1177_v35 }
 0x4d9   : > { %2499 = vmatprep.subr.bf16.mxu1 %v2672_v8 }
 0x571   : > { %v1394_v40 = vpop.f32.mrb[8].mxu0 }
 0x572   : > { %v1395_v41 = vadd.f32 %v1394_v40, %v1349_v39  ;;  %v3029_v42 = vpop.f32.mrb[12].mxu1  ;;  %v2509_v43 = vpop.f32.mrb[9].mxu0 }
 0x573   : > { %v2479_v45 = vpop.f32.mrb[13].mxu1  ;;  %v1397_v46 = vpop.f32.mrb[10].mxu0 }
 0x574   : > { %v1099_v47 = vpop.f32.mrb[14].mxu1  ;;  %v2510_v48 = vpop.f32.mrb[11].mxu0  ;;  %v1400_v49 = vsel %vm882_vm3, %v1395_v41, -inf }
 0x575   : > { %v2480_v50 = vpop.f32.mrb[15].mxu1  ;;  %1401 = vmax.xlane.f32.xlu0 %v1400_v49 }
 0x579   : > { %v1506_v51 = vpop.f32.mrb[12].mxu0 }
 0x57a   : > { %v1507_v53 = vadd.f32 %v1506_v51, %v1349_v39  ;;  %v1153_v54 = vpop.f32.mrb[16].mxu1  ;;  %v2521_v55 = vpop.f32.mrb[13].mxu0 }
 0x57b   : > { %v2485_v56 = vpop.f32.mrb[17].mxu1  ;;  %v1509_v57 = vpop.f32.mrb[14].mxu0  ;;  %v1154_v36 = vadd.f32 %v1153_v54, %v2927_v37 }
 0x57c   : > { %v1156_v58 = vpop.f32.mrb[18].mxu1  ;;  %v2522_v60 = vpop.f32.mrb[15].mxu0  ;;  %v1512_v61 = vsel %vm882_vm3, %v1507_v53, -inf  ;;  %v935_v57 = vsel %vm882_vm3, %v2948_v52, 0.0 }
 0x57d   : > { %v2486_v62 = vpop.f32.mrb[19].mxu1  ;;  %1513 = vmax.xlane.f32.xlu0 %v1512_v61  ;;  %v1159_v63 = vsel %vm882_vm3, %v1154_v36, -inf }
 0x581   : > { %1160 = vmax.xlane.f32.xlu0 %v1159_v63  ;;  %v1622_v0 = vpop.f32.mrb[16].mxu0 }
 0x582   : > { %v1623_v1 = vadd.f32 %v1622_v0, %v1349_v39  ;;  %v2533_v2 = vpop.f32.mrb[17].mxu0 }
 0x583   : > { %v1625_v3 = vpop.f32.mrb[18].mxu0 }
 0x584   : > { %v2534_v4 = vpop.f32.mrb[19].mxu0  ;;  %v1628_v5 = vsel %vm882_vm3, %v1623_v1, -inf }
 0x585   : > { %1629 = vmax.xlane.f32.xlu0 %v1628_v5 }
 0x589   : > { %v1738_v6 = vpop.f32.mrb[20].mxu0 }
 0x58a   : > { %v1739_v7 = vadd.f32 %v1738_v6, %v1349_v39  ;;  %v2545_v37 = vpop.f32.mrb[21].mxu0 }
 0x58b   : > { %v1741_v9 = vpop.f32.mrb[22].mxu0 }
 0x58c   : > { %v2546_v11 = vpop.f32.mrb[23].mxu0  ;;  %v1744_v12 = vsel %vm882_vm3, %v1739_v7, -inf }
 0x58d   : > { %1745 = vmax.xlane.f32.xlu1 %v1744_v12 }
 0x59b   : > { %1288 = vrot.lane.b32.xlu0 %v2900_v28, %s2684_s17 }
 0x59f   : > { %1412 = vrot.lane.b32.xlu0 %v2938_v44, %s2674_s2  ;;  %s2685_s2 = smov 8  }
 0x5a3   : > { %1524 = vrot.lane.b32.xlu0 %v2938_v44, %s2678_s19  ;;  %s2687_s19 = smov 24  }
 0x5a7   : > { %1640 = vrot.lane.b32.xlu0 %v2938_v44, %s2683_s21 }
 0x5ab   : > { %1756 = vrot.lane.b32.xlu0 %v2938_v44, %s2684_s17 }
 0x5ca   : > { %1049 = vadd.xlane.f32.xlu0 %v1048_v13 }
 0x602   : > { %v1402_v14 = vpop.xlane.xlu0 %1401 }
 0x603   : > { %v1403_v15 = vsub.f32 %v1395_v41, %v1402_v14 }
 0x605   : > { %v1404_v16 = vmul.f32 1.442695, %v1403_v15 }
 0x607   : > { %2624 = vpow2.f32 %v1404_v16 }
 0x60a   : > { %v1514_v28 = vpop.xlane.xlu0 %1513 }
 0x60b   : > { %v1515_v17 = vsub.f32 %v1507_v53, %v1514_v28 }
 0x60d   : > { %v1516_v18 = vmul.f32 1.442695, %v1515_v17 }
 0x60e   : > { %v1161_v22 = vpop.xlane.xlu0 %1160 }
 0x60f   : > { %2626 = vpow2.f32 %v1516_v18  ;;  %v1162_v23 = vsub.f32 %v1154_v36, %v1161_v22 }
 0x611   : > { %v2625_v24 = vpop.eup %2624  ;;  %v1163_v26 = vmul.f32 1.442695, %v1162_v23 }
 0x612   : > { %v1630_v44 = vpop.xlane.xlu0 %1629  ;;  %v1406_v27 = vsel %vm882_vm3, %v2625_v24, 0.0  ;;  %v1411_v55 = vpack.c.bf16 %v2625_v24, %v2625_v24 }
 0x613   : > { %2628 = vpow2.f32 %v1163_v26  ;;  %v1631_v19 = vsub.f32 %v1623_v1, %v1630_v44  ;;  %1407 = vadd.xlane.f32.xlu0 %v1406_v27 }
 0x615   : > { %v1632_v30 = vmul.f32 1.442695, %v1631_v19 }
 0x616   : > { %v1289_v39 = vpop.permute.xlu0 %1288 }
 0x617   : > { %2630 = vpow2.f32 %v1632_v30  ;;  %v1294_v40 = vsel %vm946_vm4, %v1289_v39, 0 }
 0x618   : > { %2632 = vpow2.f32 %v1280_v29 }
 0x619   : > { %v2627_v31 = vpop.eup %2626 }
 0x61a   : > { %v1746_v32 = vpop.xlane.xlu1 %1745  ;;  %v1518_v34 = vsel %vm882_vm3, %v2627_v31, 0.0  ;;  %v1413_v46 = vpop.permute.xlu0 %1412  ;;  %v1523_v58 = vpack.c.bf16 %v2627_v31, %v2627_v31  ;;  %v2612_v31 = vld [vmem:[%s2815_s18] sm:$0xff]  }
 0x61b   : > { %v1747_v35 = vsub.f32 %v1739_v7, %v1746_v32  ;;  %1519 = vadd.xlane.f32.xlu1 %v1518_v34  ;;  %v1418_v49 = vsel %vm946_vm4, %v1413_v46, 0 }
 0x61d   : > { %v2629_v38 = vpop.eup %2628  ;;  %v1748_v10 = vmul.f32 1.442695, %v1747_v35  ;;  %v1833_v35 = vsel %vm800_vm1, %v2612_v31, 0 }
 0x61e   : > { %v1170_v33 = vpack.c.bf16 %v2629_v38, %v2629_v38  ;;  %v1165_v50 = vsel %vm882_vm3, %v2629_v38, 0.0  ;;  %v1525_v53 = vpop.permute.xlu0 %1524  ;;  %2554 = vmatpush3.bf16.xpose.msra.mxu0 %v1833_v35 }
 0x61f   : > { %2634 = vpow2.f32 %v1748_v10  ;;  %v1530_v56 = vsel %vm946_vm4, %v1525_v53, 0  ;;  %2555 = vmatprep.subr.bf16.mxu0 %v2672_v8 }
 0x620   : > { %2490 = vmatmul.mubr.msk.bf16.vlgmr.msra.gmra.mrb[20].mxu1 %vm882_vm3, %v1170_v33 }
 0x621   : > { %v2631_v41 = vpop.eup %2630  ;;  %2500 = vmatpush3.bf16.msra.mxu1 %v1294_v40  ;;  %2501 = vmatprep.mubr.msk.bf16.mxu1 %vm2673_vm2, %v2672_v8  ;;  %v2613_v40 = vld [vmem:[%s2815_s18 + $0x8] sm:$0xff]  }
 0x622   : > { %v1634_v43 = vsel %vm882_vm3, %v2631_v41, 0.0  ;;  %2511 = vmatprep.subr.bf16.mxu1 %v2672_v8  ;;  %v2633_v45 = vpop.eup %2632  ;;  %v1641_v36 = vpop.permute.xlu0 %1640  ;;  %v1639_v62 = vpack.c.bf16 %v2631_v41, %v2631_v41 }
 0x623   : > { %1635 = vadd.xlane.f32.xlu1 %v1634_v43  ;;  %v1282_v47 = vsel %vm882_vm3, %v2633_v45, 0.0  ;;  %v1287_v48 = vpack.c.bf16 %v2633_v45, %v2633_v45  ;;  %v1646_v60 = vsel %vm946_vm4, %v1641_v36, 0  ;;  %v1836_v45 = vsel %vm800_vm1, %v2613_v40, 0 }
 0x626   : > { %v1757_v61 = vpop.permute.xlu0 %1756  ;;  %2556 = vmatpush3.bf16.xpose.msra.mxu0 %v1836_v45 }
 0x627   : > { %1283 = vadd.xlane.f32.xlu1 %v1282_v47  ;;  %v1762_v63 = vsel %vm946_vm4, %v1757_v61, 0  ;;  %2573 = vmatprep.subr.bf16.mxu0 %v2672_v8 }
 0x628   : > { %2502 = vmatmul.mubr.msk.bf16.vlgmr.msra.gmra.mrb[24].mxu1 %vm882_vm3, %v1287_v48 }
 0x629   : > { %2512 = vmatpush3.bf16.msra.mxu1 %v1418_v49  ;;  %2513 = vmatprep.mubr.msk.bf16.mxu1 %vm2673_vm2, %v2672_v8  ;;  %v2635_v51 = vpop.eup %2634 }
 0x62a   : > { %2523 = vmatprep.subr.bf16.mxu1 %v2672_v8  ;;  %v1750_v54 = vsel %vm882_vm3, %v2635_v51, 0.0  ;;  %v1755_v52 = vpack.c.bf16 %v2635_v51, %v2635_v51 }
 0x62b   : > { %1166 = vadd.xlane.f32.xlu1 %v1165_v50 }
 0x62f   : > { %1751 = vadd.xlane.f32.xlu1 %v1750_v54 }
 0x630   : > { %2514 = vmatmul.mubr.msk.bf16.vlgmr.msra.gmra.mrb[28].mxu1 %vm882_vm3, %v1411_v55 }
 0x631   : > { %2524 = vmatpush3.bf16.msra.mxu1 %v1530_v56  ;;  %2525 = vmatprep.mubr.msk.bf16.mxu1 %vm2673_vm2, %v2672_v8 }
 0x632   : > { %2535 = vmatprep.subr.bf16.mxu1 %v2672_v8 }
 0x633   : > { %936 = vadd.xlane.f32.xlu1 %v935_v57 }
 0x638   : > { %2526 = vmatmul.mubr.msk.bf16.vlgmr.msra.gmra.mrb[32].mxu1 %vm882_vm3, %v1523_v58 }
 0x639   : > { %2536 = vmatpush3.bf16.msra.mxu1 %v1646_v60  ;;  %2537 = vmatprep.mubr.msk.bf16.mxu1 %vm2673_vm2, %v2672_v8 }
 0x63a   : > { %2547 = vmatprep.subr.bf16.mxu1 %v2672_v8 }
 0x640   : > { %2538 = vmatmul.mubr.msk.bf16.vlgmr.msra.gmra.mrb[36].mxu1 %vm882_vm3, %v1639_v62 }
 0x641   : > { %2548 = vmatpush3.bf16.msra.mxu1 %v1762_v63  ;;  %2549 = vmatprep.mubr.msk.bf16.mxu1 %vm2673_vm2, %v2672_v8 }
 0x642   : > { %2561 = vmatprep.subr.bf16.mxu1 %v2672_v8 }
 0x648   : > { %2550 = vmatmul.mubr.msk.bf16.vlgmr.msra.gmra.mrb[40].mxu1 %vm882_vm3, %v1755_v52 }
 0x649   : > { %2569 = vmatprep.mubr.msk.bf16.mxu1 %vm2673_vm2, %v2672_v8 }
 0x657   : > { %v1050_v0 = vpop.xlane.xlu0 %1049 }
 0x658   : > { %2636 = vrcp.f32 %v1050_v0  ;;  %v2365_v0 = vld [vmem:[%s3231_s20] ss:$0 sm:$0xff] }
 0x662   : > { %v2637_v1 = vpop.eup %2636 }
 0x663   : > { %v1102_v2 = vmul.f32 %v2637_v1, %v3029_v42 }
 0x665   : > { %1104 = vrot.lane.b32.xlu1 %v1102_v2, %s2685_s2 }
 0x6a0   : > { %v1408_v28 = vpop.xlane.xlu0 %1407 }
 0x6a8   : > { %v1520_v3 = vpop.xlane.xlu1 %1519 }
 0x6b0   : > { %v1636_v4 = vpop.xlane.xlu1 %1635 }
 0x6b4   : > { %v1284_v5 = vpop.xlane.xlu1 %1283 }
 0x6b8   : > { %v1167_v6 = vpop.xlane.xlu1 %1166 }
 0x6bc   : > { %v1752_v7 = vpop.xlane.xlu1 %1751 }
 0x6c0   : > { %v937_v37 = vpop.xlane.xlu1 %936 }
 0x6c1   : > { %2638 = vrcp.f32 %v937_v37 }
 0x6c2   : > { %2640 = vrcp.f32 %v1167_v6 }
 0x6c3   : > { %2642 = vrcp.f32 %v1284_v5 }
 0x6c4   : > { %2644 = vrcp.f32 %v1408_v28 }
 0x6c5   : > { %2646 = vrcp.f32 %v1520_v3 }
 0x6c6   : > { %2648 = vrcp.f32 %v1636_v4 }
 0x6c7   : > { %2650 = vrcp.f32 %v1752_v7 }
 0x6cb   : > { %v2639_v9 = vpop.eup %2638 }
 0x6cc   : > { %v990_v11 = vmul.f32 %v2639_v9, %v2966_v59  ;;  %v2641_v42 = vpop.eup %2640 }
 0x6cd   : > { %v2643_v59 = vpop.eup %2642 }
 0x6ce   : > { %991 = vst.msk [vmem:[#allocation3] sm:$0xff] %vm882_vm3, %v990_v11  ;;  %v2645_v26 = vpop.eup %2644 }
 0x6cf   : > { %v2647_v32 = vpop.eup %2646 }
 0x6d0   : > { %v2649_v41 = vpop.eup %2648 }
 0x6d1   : > { %v2651_v50 = vpop.eup %2650 }
 0x6d7   : > { %v1105_v12 = vpop.permute.xlu1 %1104 }
 0x6d8   : > { %1108 = vst.msk [vmem:[#allocation3] sm:$0xff] %vm1107_vm5, %v1105_v12  ;;  %v2614_v12 = vld [vmem:[%s2833_s4] sm:$0xff]  }
 0x6f3   : > { %v1213_v13 = vpop.f32.mrb[20].mxu1 }
 0x6f4   : > { %v1219_v14 = vmul.f32 %v2641_v42, %v1213_v13  ;;  %v2491_v15 = vpop.f32.mrb[21].mxu1  ;;  %v1966_v42 = vsel %vm800_vm1, %v2614_v12, 0 }
 0x6f5   : > { %v1216_v16 = vpop.f32.mrb[22].mxu1  ;;  %2562 = vmatpush3.bf16.xpose.msra.mxu1 %v1966_v42 }
 0x6f6   : > { %v2492_v17 = vpop.f32.mrb[23].mxu1  ;;  %1221 = vrot.lane.b32.xlu1 %v1219_v14, %s2686_s3  ;;  %2563 = vmatprep.subr.bf16.mxu1 %v2672_v8 }
 0x6fb   : > { %v1330_v18 = vpop.f32.mrb[24].mxu1 }
 0x6fc   : > { %v1336_v22 = vmul.f32 %v2643_v59, %v1330_v18  ;;  %v2503_v23 = vpop.f32.mrb[25].mxu1 }
 0x6fd   : > { %v1333_v24 = vpop.f32.mrb[26].mxu1 }
 0x6fe   : > { %v2504_v25 = vpop.f32.mrb[27].mxu1  ;;  %v2616_v24 = vld [vmem:[%s2833_s4 + $0x10] sm:$0xff]  }
 0x6ff   : > { %v1972_v25 = vsel %vm800_vm1, %v2616_v24, 0 }
 0x703   : > { %v1454_v44 = vpop.f32.mrb[28].mxu1 }
 0x704   : > { %v1460_v27 = vmul.f32 %v2645_v26, %v1454_v44  ;;  %v2515_v19 = vpop.f32.mrb[29].mxu1  ;;  %v2617_v26 = vld [vmem:[%s2833_s4 + $0x18] sm:$0xff]  }
 0x705   : > { %v1457_v29 = vpop.f32.mrb[30].mxu1  ;;  %v1975_v44 = vsel %vm800_vm1, %v2617_v26, 0  ;;  %v2382_v26 = vld [vmem:[%s732_s23] ss:$0 sm:$0xff] }
 0x706   : > { %1461 = vst.msk [vmem:[#allocation3 + $0x8] sm:$0xff] %vm882_vm3, %v1460_v27  ;;  %v2516_v30 = vpop.f32.mrb[31].mxu1  ;;  %v2618_v27 = vld [vmem:[%s2838_s6] sm:$0xff]  }
 0x707   : > { %v2047_v19 = vsel %vm2042_vm8, %v2618_v27, 0 }
 0x70b   : > { %v1566_v34 = vpop.f32.mrb[32].mxu1 }
 0x70c   : > { %v1572_v38 = vmul.f32 %v2647_v32, %v1566_v34  ;;  %v2527_v39 = vpop.f32.mrb[33].mxu1 }
 0x70d   : > { %v1569_v10 = vpop.f32.mrb[34].mxu1 }
 0x70e   : > { %v2528_v33 = vpop.f32.mrb[35].mxu1  ;;  %1574 = vrot.lane.b32.xlu0 %v1572_v38, %s2685_s2  ;;  %v2369_v10 = vld [vmem:[%s3232_s16] ss:$0 sm:$0xff] }
 0x712   : > { %1338 = vrot.lane.b32.xlu0 %v1336_v22, %s2687_s19  ;;  %v2615_v22 = vld [vmem:[%s2833_s4 + $0x8] sm:$0xff]  }
 0x713   : > { %v1682_v43 = vpop.f32.mrb[36].mxu1  ;;  %v1969_v23 = vsel %vm800_vm1, %v2615_v22, 0 }
 0x714   : > { %v1688_v46 = vmul.f32 %v2649_v41, %v1682_v43  ;;  %v2539_v47 = vpop.f32.mrb[37].mxu1  ;;  %2564 = vmatpush3.bf16.xpose.msra.mxu1 %v1969_v23  ;;  %v2370_v41 = vld [vmem:[%s3233_s30] ss:$0 sm:$0xff] }
 0x715   : > { %v1685_v48 = vpop.f32.mrb[38].mxu1  ;;  %2565 = vmatprep.subr.bf16.mxu1 %v2672_v8  ;;  %v2381_v23 = vld [vmem:[%s729_s0] ss:$0 sm:$0xff]  ;;  %s3235_s0 = sld [smem:[#allocation11_spill]] (!%p2383_p5) }
 0x716   : > { %v2540_v49 = vpop.f32.mrb[39].mxu1  ;;  %1690 = vrot.lane.b32.xlu1 %v1688_v46, %s2686_s3  ;;  %v2619_v48 = vld [vmem:[%s2838_s6 + $0x8] sm:$0xff]   ;;  %s3234_s3 = scalar_lea.vmem %s3202_s11, %s2795_s29 }
 0x717   : > { %v2050_v49 = vsel %vm2042_vm8, %v2619_v48, 0 }
 0x71b   : > { %v1798_v51 = vpop.f32.mrb[40].mxu1 }
 0x71c   : > { %v1804_v53 = vmul.f32 %v2651_v50, %v1798_v51  ;;  %v2551_v54 = vpop.f32.mrb[41].mxu1  ;;  %2566 = vmatpush3.bf16.xpose.msra.mxu1 %v1972_v25  ;;  %v2371_v50 = vld [vmem:[%s3234_s3] ss:$0 sm:$0xff] }
 0x71d   : > { %v1801_v55 = vpop.f32.mrb[42].mxu1  ;;  %2567 = vmatprep.subr.bf16.mxu1 %v2672_v8 }
 0x71e   : > { %v2552_v56 = vpop.f32.mrb[43].mxu1  ;;  %1806 = vrot.lane.b32.xlu1 %v1804_v53, %s2687_s19 }
 0x724   : > { %2568 = vmatpush3.bf16.xpose.msra.mxu1 %v1975_v44 }
 0x768   : > { %v1222_v57 = vpop.permute.xlu1 %1221 }
 0x769   : > { %1225 = vst.msk [vmem:[#allocation3] sm:$0xff] %vm1224_vm6, %v1222_v57 }
 0x780   : > { %v1575_v36 = vpop.permute.xlu0 %1574 }
 0x781   : > { %1577 = vst.msk [vmem:[#allocation3 + $0x8] sm:$0xff] %vm1107_vm5, %v1575_v36 }
 0x784   : > { %v1339_v58 = vpop.permute.xlu0 %1338 }
 0x785   : > { %1342 = vst.msk [vmem:[#allocation3] sm:$0xff] %vm1341_vm7, %v1339_v58 }
 0x788   : > { %v1691_v60 = vpop.permute.xlu1 %1690 }
 0x789   : > { %1693 = vst.msk [vmem:[#allocation3 + $0x8] sm:$0xff] %vm1224_vm6, %v1691_v60 }
 0x78c   : > { %v1810_v62 = vld [vmem:[#allocation3] sm:$0xff] }
 0x790   : > { %v1807_v61 = vpop.permute.xlu1 %1806 }
 0x791   : > { %1809 = vst.msk [vmem:[#allocation3 + $0x8] sm:$0xff] %vm1341_vm7, %v1807_v61  ;;  %v2377_v61 = vld [vmem:[%s726_s1] ss:$0 sm:$0xff] }
 0x798   : > { %v1811_v63 = vld [vmem:[#allocation3 + $0x8] sm:$0xff] }
 0x799   : > { %v1812_v52 = vpack.c.bf16 %v1811_v63, %v1810_v62 }
 0x79b   : > { %2558 = vmatmul.mubr.msk.bf16.vlgmr.msra.gmra.mrb[24].mxu0 %vm800_vm1, %v1812_v52 }
 0x79c   : > { %2577 = vmatprep.mubr.msk.bf16.mxu0 %vm2673_vm2, %v2672_v8  ;;  %2574 = vmatpush3.bf16.xpose.msra.mxu0 %v2047_v19 }
 0x79d   : > { %2575 = vmatprep.subr.bf16.mxu0 %v2672_v8 }
 0x7a4   : > { %2576 = vmatpush3.bf16.xpose.msra.mxu0 %v2050_v49 }
 0x86e   : > { %v1872_v1 = vpop.f32.mrb[24].mxu0 }
 0x86f   : > { %v1873_v2 = vadd.f32 %v2365_v0, %v1872_v1  ;;  %v2559_v3 = vpop.f32.mrb[25].mxu0 }
 0x870   : > { %v1875_v4 = vpop.f32.mrb[26].mxu0 }
 0x871   : > { %v1876_v5 = vadd.f32 %v2365_v0, %v1875_v4  ;;  %v2560_v6 = vpop.f32.mrb[27].mxu0  ;;  %v1879_v7 = vadd.f32 %v1873_v2, %v2885_v20 }
 0x873   : > { %v1883_v37 = vsel %vm800_vm1, %v1879_v7, 0.0  ;;  %v1880_v9 = vadd.f32 %v1876_v5, %v2887_v21 }
 0x874   : > { %1884 = vadd.xlane.f32.xlu0 %v1883_v37 }
 0x875   : > { %v1886_v11 = vsel %vm800_vm1, %v1880_v9, 0.0 }
 0x876   : > { %1887 = vadd.xlane.f32.xlu1 %v1886_v11 }
 0x901   : > { %v1885_v13 = vpop.xlane.xlu0 %1884 }
 0x902   : > { %v1890_v14 = vmul.f32 0.03125, %v1885_v13 }
 0x903   : > { %v1888_v15 = vpop.xlane.xlu1 %1887 }
 0x904   : > { %v1892_v20 = vsub.f32 %v1879_v7, %v1890_v14  ;;  %v1891_v16 = vmul.f32 0.03125, %v1888_v15 }
 0x906   : > { %v1893_v28 = vsub.f32 %v1880_v9, %v1891_v16  ;;  %v1894_v21 = vmul.f32 %v1892_v20, %v1892_v20 }
 0x908   : > { %v1896_v17 = vsel %vm800_vm1, %v1894_v21, 0.0  ;;  %v1895_v59 = vmul.f32 %v1893_v28, %v1893_v28 }
 0x909   : > { %1897 = vadd.xlane.f32.xlu0 %v1896_v17 }
 0x90a   : > { %v1899_v18 = vsel %vm800_vm1, %v1895_v59, 0.0 }
 0x90d   : > { %1900 = vadd.xlane.f32.xlu0 %v1899_v18 }
 0x996   : > { %v1898_v29 = vpop.xlane.xlu0 %1897 }
 0x997   : > { %v1902_v30 = vmul.f32 0.03125, %v1898_v29 }
 0x999   : > { %v1904_v31 = vadd.f32 1e-05, %v1902_v30 }
 0x99a   : > { %v1901_v32 = vpop.xlane.xlu0 %1900 }
 0x99b   : > { %2652 = vrsqrt.f32 %v1904_v31  ;;  %v1903_v34 = vmul.f32 0.03125, %v1901_v32 }
 0x99d   : > { %v1905_v35 = vadd.f32 1e-05, %v1903_v34 }
 0x99f   : > { %2654 = vrsqrt.f32 %v1905_v35 }
 0x9a5   : > { %v2653_v38 = vpop.eup %2652 }
 0x9a6   : > { %v1908_v39 = vmul.f32 %v2653_v38, %v1892_v20 }
 0x9a8   : > { %v1916_v40 = vmul.f32 %v2369_v10, %v1908_v39 }
 0x9a9   : > { %v2655_v33 = vpop.eup %2654 }
 0x9aa   : > { %v1909_v8 = vmul.f32 %v2655_v33, %v1893_v28  ;;  %v1924_v45 = vadd.f32 %v2370_v41, %v1916_v40 }
 0x9ac   : > { %v1917_v43 = vmul.f32 %v2369_v10, %v1909_v8 }
 0x9ae   : > { %v1925_v46 = vadd.f32 %v2370_v41, %v1917_v43 }
 0x9b0   : > { %v1935_v47 = vpack.c.bf16 %v1925_v46, %v1924_v45 }
 0x9b2   : > { %2570 = vmatmul.mubr.msk.bf16.vlgmr.msra.gmra.mrb[44].mxu1 %vm800_vm1, %v1935_v47 }
 0xa85   : > { %v2011_v51 = vpop.f32.mrb[44].mxu1 }
 0xa86   : > { %v2012_v53 = vadd.f32 %v2371_v50, %v2011_v51  ;;  %v2571_v54 = vpop.f32.mrb[45].mxu1 }
 0xa87   : > { %v2014_v55 = vpop.f32.mrb[46].mxu1 }
 0xa88   : > { %v2015_v56 = vadd.f32 %v2371_v50, %v2014_v55  ;;  %v2572_v57 = vpop.f32.mrb[47].mxu1  ;;  %v2018_v36 = vmax.f32 %v2012_v53, 0.0  ;;  %v2384_v53 = vld [vmem:[%s3235_s0] ss:$0 sm:$0xff] (!%p2383_p5) }
 0xa89   : > { %v2385_v55 = vld [vmem:[%s3236_s27] ss:$0 sm:$0xff] (!%p2383_p5) }
 0xa8a   : > { %v2019_v58 = vmax.f32 %v2015_v56, 0.0 }
 0xa8c   : > { %v2025_v60 = vpack.c.bf16 %v2019_v58, %v2018_v36 }
 0xa8e   : > { %2578 = vmatmul.mubr.msk.bf16.vlgmr.msra.gmra.mrb[28].mxu0 %vm2042_vm8, %v2025_v60 }
 0xb61   : > { %v2086_v62 = vpop.f32.mrb[28].mxu0 }
 0xb62   : > { %v2087_v63 = vadd.f32 %v2377_v61, %v2086_v62  ;;  %v2579_v52 = vpop.f32.mrb[29].mxu0 }
 0xb63   : > { %v2089_v0 = vpop.f32.mrb[30].mxu0 }
 0xb64   : > { %v2090_v1 = vadd.f32 %v2377_v61, %v2089_v0  ;;  %v2580_v2 = vpop.f32.mrb[31].mxu0  ;;  %v2093_v3 = vadd.f32 %v2087_v63, %v1924_v45 }
 0xb66   : > { %v2097_v4 = vsel %vm800_vm1, %v2093_v3, 0.0  ;;  %v2094_v5 = vadd.f32 %v2090_v1, %v1925_v46 }
 0xb67   : > { %2098 = vadd.xlane.f32.xlu1 %v2097_v4 }
 0xb68   : > { %v2100_v6 = vsel %vm800_vm1, %v2094_v5, 0.0 }
 0xb69   : > { %2101 = vadd.xlane.f32.xlu0 %v2100_v6 }
 0xbf4   : > { %v2099_v7 = vpop.xlane.xlu1 %2098 }
 0xbf5   : > { %v2103_v37 = vmul.f32 0.03125, %v2099_v7 }
 0xbf6   : > { %v2102_v9 = vpop.xlane.xlu0 %2101 }
 0xbf7   : > { %v2105_v11 = vsub.f32 %v2093_v3, %v2103_v37  ;;  %v2104_v12 = vmul.f32 0.03125, %v2102_v9 }
 0xbf9   : > { %v2106_v42 = vsub.f32 %v2094_v5, %v2104_v12  ;;  %v2107_v13 = vmul.f32 %v2105_v11, %v2105_v11 }
 0xbfb   : > { %v2109_v14 = vsel %vm800_vm1, %v2107_v13, 0.0  ;;  %v2108_v15 = vmul.f32 %v2106_v42, %v2106_v42 }
 0xbfc   : > { %2110 = vadd.xlane.f32.xlu1 %v2109_v14 }
 0xbfd   : > { %v2112_v20 = vsel %vm800_vm1, %v2108_v15, 0.0 }
 0xbfe   : > { %2113 = vadd.xlane.f32.xlu0 %v2112_v20 }
 0xc89   : > { %v2111_v16 = vpop.xlane.xlu1 %2110 }
 0xc8a   : > { %v2115_v28 = vmul.f32 0.03125, %v2111_v16 }
 0xc8b   : > { %v2114_v21 = vpop.xlane.xlu0 %2113 }
 0xc8c   : > { %v2117_v17 = vadd.f32 1e-05, %v2115_v28  ;;  %v2116_v59 = vmul.f32 0.03125, %v2114_v21 }
 0xc8e   : > { %2656 = vrsqrt.f32 %v2117_v17  ;;  %v2118_v18 = vadd.f32 1e-05, %v2116_v59 }
 0xc90   : > { %2658 = vrsqrt.f32 %v2118_v18 }
 0xc98   : > { %v2657_v22 = vpop.eup %2656 }
 0xc99   : > { %v2121_v24 = vmul.f32 %v2657_v22, %v2105_v11 }
 0xc9a   : > { %v2659_v25 = vpop.eup %2658 }
 0xc9b   : > { %v2129_v44 = vmul.f32 %v2381_v23, %v2121_v24  ;;  %v2122_v27 = vmul.f32 %v2659_v25, %v2106_v42  ;;  %2144 = sbr.rel (%p2383_p5) target bundleno = 3549 (0xddd), region = 100 }
 0xc9d   : > { %v2137_v19 = vadd.f32 %v2382_v26, %v2129_v44  ;;  %v2130_v29 = vmul.f32 %v2381_v23, %v2122_v27 }
 0xc9f   : > { %2139 = vst.msk [vmem:[#allocation2] sm:$0xff] %vm800_vm1, %v2137_v19  ;;  %v2138_v30 = vadd.f32 %v2382_v26, %v2130_v29  ;;  %v2147_v31 = vsel (!%p2383_p5), %vm800_vm1, %v2137_v19, 0.0 }
 0xca0   : > { %2148 = vadd.xlane.f32.xlu0 (!%p2383_p5), %v2147_v31 }
 0xca1   : > { %2140 = vst.msk [vmem:[#allocation2 + $0x8] sm:$0xff] %vm800_vm1, %v2138_v30  ;;  %v2150_v32 = vsel (!%p2383_p5), %vm800_vm1, %v2138_v30, 0.0 }
 0xca4   : > { %2151 = vadd.xlane.f32.xlu0 %v2150_v32 }
 0xd2d   : > { %v2149_v34 = vpop.xlane.xlu0 %2148 }
 0xd2e   : > { %v2153_v35 = vmul.f32 0.03125, %v2149_v34 }
 0xd30   : > { %v2155_v38 = vsub.f32 %v2137_v19, %v2153_v35 }
 0xd31   : > { %v2152_v39 = vpop.xlane.xlu0 %2151 }
 0xd32   : > { %v2154_v10 = vmul.f32 0.03125, %v2152_v39  ;;  %v2157_v33 = vmul.f32 %v2155_v38, %v2155_v38 }
 0xd34   : > { %v2156_v40 = vsub.f32 %v2138_v30, %v2154_v10  ;;  %v2159_v8 = vsel %vm800_vm1, %v2157_v33, 0.0 }
 0xd35   : > { %2160 = vadd.xlane.f32.xlu1 %v2159_v8 }
 0xd36   : > { %v2158_v41 = vmul.f32 %v2156_v40, %v2156_v40 }
 0xd38   : > { %v2162_v43 = vsel %vm800_vm1, %v2158_v41, 0.0 }
 0xd39   : > { %2163 = vadd.xlane.f32.xlu1 %v2162_v43 }
 0xdc2   : > { %v2161_v45 = vpop.xlane.xlu1 %2160 }
 0xdc3   : > { %v2165_v46 = vmul.f32 0.03125, %v2161_v45 }
 0xdc5   : > { %v2167_v47 = vadd.f32 1e-05, %v2165_v46 }
 0xdc6   : > { %v2164_v48 = vpop.xlane.xlu1 %2163 }
 0xdc7   : > { %2660 = vrsqrt.f32 %v2167_v47  ;;  %v2166_v49 = vmul.f32 0.03125, %v2164_v48 }
 0xdc9   : > { %v2168_v50 = vadd.f32 1e-05, %v2166_v49 }
 0xdcb   : > { %2662 = vrsqrt.f32 %v2168_v50 }
 0xdd1   : > { %v2661_v51 = vpop.eup %2660 }
 0xdd2   : > { %v2171_v54 = vmul.f32 %v2661_v51, %v2155_v38 }
 0xdd4   : > { %v2179_v56 = vmul.f32 %v2384_v53, %v2171_v54 }
 0xdd5   : > { %v2663_v57 = vpop.eup %2662 }
 0xdd6   : > { %v2187_v36 = vadd.f32 %v2385_v55, %v2179_v56  ;;  %v2172_v58 = vmul.f32 %v2663_v57, %v2156_v40 }
 0xdd8   : > { %2189 = vst.msk [vmem:[%s3237_s22] sm:$0xff] %vm800_vm1, %v2187_v36  ;;  %v2180_v60 = vmul.f32 %v2384_v53, %v2172_v58 }
 0xdda   : > { %v2188_v61 = vadd.f32 %v2385_v55, %v2180_v60 }
 0xddc   : > { %2190 = vst.msk [vmem:[%s3237_s22 + $0x8] sm:$0xff] %vm800_vm1, %v2188_v61 }
 0xddd PF: > { %s3238_s2 = sld [smem:[#allocation4_spill]] }
 0xde3   : > { %s28_s27 = sadd.s32 1, %s3238_s2  }
 0xde4   : > { %p25_p6 = scmp.ge.s32.totalorder %s28_s27, 4  }
 0xde6   :  { %27 = sbr.rel (!%p25_p6) target bundleno = 10 (0xa), region = 159 }

// kernel: seq2seq_transformer_forward.4
= control target key start
LH: loop header
LB: loop body
LE: loop exit
PB: predicated region body
PF: predicated region fallthrough
CT: control target
= control target key end

     0   :  { %s6745_s27 = smov 0   ;;  %s8125_s0 = inlined_call_operand.vmem [shape: f32[2,10,32], index: 0, kind: input, shape index: {}]   ;;  %s8126_s1 = inlined_call_operand.vmem [shape: f32[1,10,32], index: 1, kind: input, shape index: {}]   ;;  %s8127_s2 = inlined_call_operand.vmem [shape: f32[2,8,32], index: 2, kind: input, shape index: {}]   ;;  %s8128_s3 = inlined_call_operand.vmem [shape: f32[10,10], index: 3, kind: input, shape index: {}]   ;;  %s8129_s4 = inlined_call_operand.vmem [shape: f32[2,1,10], index: 4, kind: input, shape index: {}]   ;;  %s8130_s5 = inlined_call_operand.vmem [shape: f32[2,1,8], index: 5, kind: input, shape index: {}]   ;;  %s8131_s6 = inlined_call_operand.vmem [shape: bf16[2,96,32], index: 6, kind: input, shape index: {}]   ;;  %s8132_s7 = inlined_call_operand.vmem [shape: f32[2,1,96], index: 7, kind: input, shape index: {}]   ;;  %s8133_s8 = inlined_call_operand.vmem [shape: bf16[2,32,32], index: 8, kind: input, shape index: {}]   ;;  %s8134_s9 = inlined_call_operand.vmem [shape: f32[2,1,32], index: 9, kind: input, shape index: {}]   ;;  %s8135_s10 = inlined_call_operand.vmem [shape: f32[2,1,32], index: 10, kind: input, shape index: {}]   ;;  %s8136_s11 = inlined_call_operand.vmem [shape: f32[2,1,32], index: 11, kind: input, shape index: {}]   ;;  %s8137_s12 = inlined_call_operand.vmem [shape: bf16[2,32,32], index: 12, kind: input, shape index: {}]   ;;  %s8138_s13 = inlined_call_operand.vmem [shape: f32[2,1,32], index: 13, kind: input, shape index: {}]   ;;  %s8139_s14 = inlined_call_operand.vmem [shape: bf16[2,64,32], index: 14, kind: input, shape index: {}]   ;;  %s8140_s15 = inlined_call_operand.vmem [shape: f32[2,1,64], index: 15, kind: input, shape index: {}]   ;;  %s8141_s16 = inlined_call_operand.vmem [shape: bf16[2,32,32], index: 16, kind: input, shape index: {}]   ;;  %s8142_s17 = inlined_call_operand.vmem [shape: f32[2,1,32], index: 17, kind: input, shape index: {}]   ;;  %s8143_s18 = inlined_call_operand.vmem [shape: f32[2,1,32], index: 18, kind: input, shape index: {}]   ;;  %s8144_s19 = inlined_call_operand.vmem [shape: f32[2,1,32], index: 19, kind: input, shape index: {}]   ;;  %s8145_s20 = inlined_call_operand.vmem [shape: bf16[2,64,32], index: 20, kind: input, shape index: {}]   ;;  %s8146_s21 = inlined_call_operand.vmem [shape: f32[2,1,64], index: 21, kind: input, shape index: {}]   ;;  %s8147_s22 = inlined_call_operand.vmem [shape: bf16[2,32,64], index: 22, kind: input, shape index: {}]   ;;  %s8148_s23 = inlined_call_operand.vmem [shape: f32[2,1,32], index: 23, kind: input, shape index: {}]   ;;  %s8149_s24 = inlined_call_operand.vmem [shape: f32[2,1,32], index: 24, kind: input, shape index: {}]   ;;  %s8150_s25 = inlined_call_operand.vmem [shape: f32[2,1,32], index: 25, kind: input, shape index: {}]   ;;  %s8151_s26 = inlined_call_operand.vmem [shape: f32[2,10,32], index: 26, kind: output, shape index: {}]  }
   0x1   :  { %8163 = sst [smem:[#allocation8_spill]] %s8125_s0 }
   0x2   :  { %8164 = sst [smem:[#allocation9_spill]] %s8126_s1 }
   0x3   :  { %8165 = sst [smem:[#allocation10_spill]] %s8127_s2 }
   0x4   :  { %8166 = sst [smem:[#allocation11_spill]] %s8128_s3 }
   0x5   :  { %8167 = sst [smem:[#allocation12_spill]] %s8129_s4 }
   0x6   :  { %8168 = sst [smem:[#allocation13_spill]] %s8130_s5 }
   0x7   :  { %8169 = sst [smem:[#allocation14_spill]] %s8131_s6 }
   0x8   :  { %8170 = sst [smem:[#allocation15_spill]] %s8132_s7 }
   0x9   :  { %8171 = sst [smem:[#allocation16_spill]] %s8133_s8 }
   0xa   :  { %8172 = sst [smem:[#allocation17_spill]] %s8134_s9 }
   0xb   :  { %8173 = sst [smem:[#allocation18_spill]] %s8135_s10 }
   0xc   :  { %8174 = sst [smem:[#allocation19_spill]] %s8137_s12 }
   0xd   :  { %8175 = sst [smem:[#allocation20_spill]] %s8139_s14 }
   0xe   :  { %8176 = sst [smem:[#allocation21_spill]] %s8141_s16 }
   0xf   :  { %8177 = sst [smem:[#allocation22_spill]] %s8143_s18 }
  0x10   :  { %8178 = sst [smem:[#allocation23_spill]] %s8144_s19 }
  0x11   :  { %8179 = sst [smem:[#allocation24_spill]] %s8145_s20 }
  0x12   :  { %8180 = sst [smem:[#allocation25_spill]] %s8147_s22 }
  0x13   :  { %8181 = sst [smem:[#allocation26_spill]] %s8148_s23 }
  0x14   :  { %8182 = sst [smem:[#allocation27_spill]] %s8149_s24 }
  0x15   :  { %8183 = sst [smem:[#allocation28_spill]] %s8150_s25 }
  0x16   :  { %8184 = sst [smem:[#allocation29_spill]] %s8151_s26 }
  0x17 LB: > { %8185 = sst [smem:[#allocation4_spill]] %s6587_s27  ;;  %s6751_s3 = sadd.s32 4294967295, %s6587_s27   ;;  %s6587_s27 = sphi %s6745_s27, %s36_s27  }
  0x18   : > { %8186 = sst [smem:[#allocation5_spill]] %s6751_s3  ;;  %p5888_p0 = scmp.ge.s32.totalorder %s6587_s27, 1 }
  0x19   : > { %p871_p1 = scmp.lt.s32.totalorder %s6587_s27, 3 }
  0x1b   : > { %p872_p2 = pnand %p5888_p0, %p871_p1 }
  0x1d   : > { %875 = sbr.rel (%p872_p2) target bundleno = 5352 (0x14e8), region = 124 }
  0x24   : > { %p1005_p3 = scmp.lt.s32.totalorder %s6751_s3, 1  ;;  %s8189_s27 = sld [smem:[#allocation14_spill]] }
  0x25   : > { %s8190_s24 = sld [smem:[#allocation16_spill]]  ;;  %s8192_s12 = sld [smem:[#allocation19_spill]] }
  0x26   : > { %s6757_s7 = scalar_select %p1005_p3, %s6751_s3, 1 }
  0x27   : > { %s8193_s14 = sld [smem:[#allocation20_spill]]  ;;  %s8194_s16 = sld [smem:[#allocation21_spill]] }
  0x28   : > { %s6379_s28 = smul.u32 48, %s6757_s7  ;;  %s5992_s9 = sshll.u32 %s6757_s7, 4 }
  0x29   : > { %s5994_s3 = sshll.u32 %s6757_s7, 5  ;;  %s8198_s20 = sld [smem:[#allocation24_spill]] }
  0x2a   : > { %s6772_s26 = scalar_lea.vmem %s8189_s27, %s6379_s28  ;;  %s8200_s6 = sld [smem:[#allocation25_spill]] }
  0x2b   : > { %s6777_s23 = scalar_lea.vmem %s8190_s24, %s5992_s9  ;;  %s6790_s27 = scalar_lea.vmem %s8192_s12, %s5992_s9 }
  0x2c   : > { %s8201_s12 = sld [smem:[#allocation26_spill]] }
  0x2d   : > { %s6804_s22 = scalar_lea.vmem %s8193_s14, %s5994_s3  ;;  %s6809_s5 = scalar_lea.vmem %s8194_s16, %s5992_s9 }
  0x2e   : > { %8195 = sst [smem:[#allocation6_spill]] %s6809_s5  ;;  %s1064_s16 = scalar_lea.vmem %s8146_s21, %s6757_s7 }
  0x2f   : > { %s6826_s14 = scalar_lea.vmem %s8198_s20, %s5994_s3 }
  0x30   : > { %8199 = sst [smem:[#allocation7_spill]] %s6826_s14  ;;  %s6835_s28 = scalar_lea.vmem %s8200_s6, %s5992_s9 }
  0x31   : > { %s8204_s14 = sld [smem:[#allocation5_spill]] }
  0x32   : > { %s1072_s18 = scalar_lea.vmem %s8201_s12, %s6757_s7 }
  0x37   : > { %p5902_p4 = scmp.ne.s32.totalorder %s8204_s14, 0 }
  0x38   : > { %s8205_s5 = sld [smem:[#allocation8_spill]] (!%p5902_p4)  ;;  %s8206_s6 = sld [smem:[#allocation9_spill]] (!%p5902_p4)  ;;  %vm1098_vm0 = vcmask (!%p5902_p4), 261120   ;;  %vm1100_vm1 = vcmask (!%p5902_p4), 254976  }
  0x39   : > { %1083 = sbr.rel (%p5902_p4) target bundleno = 71 (0x47), region = 128 }
  0x3e   : > { %v1084_v0 = vld [vmem:[%s8205_s5] sm:$0xff] (!%p5902_p4)  ;;  %v1085_v2 = vld [vmem:[%s8205_s5 + $0x8] sm:$0x3] (!%p5902_p4)  ;;  %v1086_v6 = vld [vmem:[%s8205_s5 + $0x10] sm:$0xff] (!%p5902_p4) }
  0x3f   : > { %v1092_v1 = vld [vmem:[%s8206_s6] sm:$0xff] (!%p5902_p4)  ;;  %v1088_v3 = vmul.f32 (!%p5902_p4), 5.656854, %v1084_v0  ;;  %v1089_v4 = vmul.f32 (!%p5902_p4), 5.656854, %v1085_v2 }
  0x40   : > { %v1093_v5 = vld [vmem:[%s8206_s6 + $0x8] sm:$0x3]  ;;  %v1087_v7 = vld [vmem:[%s8205_s5 + $0x18] sm:$0x3]  ;;  %v1090_v10 = vmul.f32 5.656854, %v1086_v6 }
  0x41   : > { %v1094_v8 = vadd.f32 %v1092_v1, %v1088_v3  ;;  %v1095_v9 = vadd.f32 %v1093_v5, %v1089_v4  ;;  %v1091_v11 = vmul.f32 5.656854, %v1087_v7 }
  0x42   : > { %v1096_v12 = vadd.f32 %v1092_v1, %v1090_v10 }
  0x43   : > { %1099 = vst.msk [vmem:[#allocation2] sm:$0xff] %vm1098_vm0, %v1094_v8  ;;  %v1097_v13 = vadd.f32 %v1093_v5, %v1091_v11 }
  0x44   : > { %1101 = vst.msk [vmem:[#allocation2 + $0x8] sm:$0x3] %vm1100_vm1, %v1095_v9 }
  0x45   : > { %1102 = vst.msk [vmem:[#allocation2 + $0x10] sm:$0xff] %vm1098_vm0, %v1096_v12 }
  0x46   : > { %1103 = vst.msk [vmem:[#allocation2 + $0x18] sm:$0x3] %vm1100_vm1, %v1097_v13 }
  0x47 PF: > { %v6409_v14 = vld [vmem:[%s6772_s26] sm:$0xff]   ;;  %vm1268_vm2 = vcmask 261120   ;;  %v6410_v15 = vld [vmem:[%s6772_s26 + $0x8] sm:$0xff]   ;;  %v6411_v17 = vld [vmem:[%s6772_s26 + $0x10] sm:$0xff]   ;;  %v1116_v18 = vlaneseq  ;;  %v6589_v23 = vmov 1983009808   ;;  %s8216_s19 = scalar_lea.vmem %s8136_s11, %s6757_s7  ;;  %s8218_s25 = scalar_lea.vmem %s8138_s13, %s6757_s7 }
  0x48   : > { %6361 = vmatprep.subr.msk.bf16.mxu0 %vm1268_vm2, %v6409_v14  ;;  %v1276_v16 = vsel %vm1268_vm2, %v6409_v14, 0  ;;  %v1279_v21 = vsel %vm1268_vm2, %v6410_v15, 0  ;;  %v1282_v22 = vsel %vm1268_vm2, %v6411_v17, 0  ;;  %v1114_v24 = vunpack.c.l.s4 %v6589_v23  ;;  %v6412_v31 = vld [vmem:[%s6772_s26 + $0x18] sm:$0xff]   ;;  %v6413_v50 = vld [vmem:[%s6772_s26 + $0x20] sm:$0xff]   ;;  %v6414_v53 = vld [vmem:[%s6772_s26 + $0x28] sm:$0xff]  }
  0x49   : > { %6098 = vmatpush3.bf16.xpose.msra.mxu0 %v1276_v16  ;;  %v6876_v25 = vshrl.u32 %v1116_v18, 7  ;;  %v1285_v49 = vsel %vm1268_vm2, %v6412_v31, 0  ;;  %v1288_v52 = vsel %vm1268_vm2, %v6413_v50, 0  ;;  %v1291_v57 = vsel %vm1268_vm2, %v6414_v53, 0  ;;  %s8207_s29 = sld [smem:[#allocation15_spill]]  ;;  %s6592_s30 = smov 64  }
  0x4a   : > { %6362 = vmatprep.subr.msk.bf16.mxu0 %vm1268_vm2, %v6410_v15  ;;  %v1104_v19 = vld [vmem:[#allocation2] sm:$0xff]  ;;  %v1115_v27 = vunpack.c.0.s8 %v1114_v24  ;;  %v6590_v60 = vmov 0.0   ;;  %vm6591_vm3 = vmmov 0   ;;  %s6593_s9 = smov 96   ;;  %vm1362_vm4 = vcmask 64512   ;;  %s8209_s24 = sld [smem:[#allocation12_spill]] }
  0x4b   : > { %v1112_v26 = vcombine.high %v1104_v19, %v1104_v19  ;;  %v5903_v29 = vld.sshfl [vmem:[#allocation2 + $0x8] sm:$0x3 pattern:$0x76325410]  ;;  %6113 = vmatprep.subr.bf16.mxu1 %v6590_v60  ;;  %6115 = vmatprep.mubr.msk.bf16.mxu1 %vm6591_vm3, %v6590_v60  ;;  %vm1440_vm5 = vcmask 1044480   ;;  %s8210_s14 = sld [smem:[#allocation11_spill]] }
  0x4c   : > { %v1106_v20 = vld [vmem:[#allocation2 + $0x10] sm:$0xff]  ;;  %v6880_v30 = vsub.s32 %v1115_v27, %v6876_v25  ;;  %vm1410_vm6 = vcmask 80896   ;;  %vm1414_vm7 = vcmask 74752   ;;  %s6594_s4 = smov 88   ;;  %s6595_s26 = smov 56   ;;  %vm1488_vm8 = vcmask 58368  }
  0x4d   : > { %v1136_v28 = vcombine.high %v1106_v20, %v1106_v20  ;;  %v5904_v55 = vld.sshfl [vmem:[#allocation2 + $0x18] sm:$0x3 pattern:$0x76325410]  ;;  %s6596_s3 = smov 120   ;;  %s6599_s0 = smov 112  }
  0x4e   : > { %v6884_v32 = vrot.slane %v1104_v19, %v6880_v30  ;;  %v6887_v33 = vrot.slane %v1112_v26, %v6880_v30  ;;  %v6890_v34 = vrot.slane %v1106_v20, %v6880_v30  ;;  %s6600_s12 = smov 104   ;;  %s6601_s10 = smov 48   ;;  %vm1625_vm9 = vcmask 123968  }
  0x4f   : > { %v6893_v35 = vrot.slane %v1136_v28, %v6880_v30  ;;  %s8208_s2 = scalar_lea.vmem %s8207_s29, %s6757_s7  ;;  %s6597_s29 = smov 72   ;;  %vm1623_vm10 = vcmask 130112   ;;  %vm1760_vm11 = vcmask 195712   ;;  %vm1762_vm12 = vcmask 189568  }
  0x50   : > { %v6897_v36 = vcombine.high %v6884_v32, %v6884_v32  ;;  %v6901_v37 = vcombine.high %v6887_v33, %v6887_v33  ;;  %v6905_v38 = vcombine.high %v6890_v34, %v6890_v34  ;;  %v1202_v39 = vcombine.low %v5903_v29, %v6890_v34  ;;  %v5905_v61 = vld [vmem:[%s8208_s2] ss:$0 sm:$0xff]  ;;  %s6598_s2 = smov 80   ;;  %s6602_s1 = smov 40  }
  0x51   : > { %6100 = vmatpush3.bf16.xpose.msra.mxu0 %v1279_v21  ;;  %v6927_v54 = vcombine.high %v6893_v35, %v6893_v35  ;;  %v5914_v11 = vld [vmem:[%s8209_s24] ss:$0 sm:$0xff]  ;;  %v6977_v13 = vld [vmem:[%s8210_s14 + $0x8] sm:$0x3]  ;;  %s6605_s8 = smov 24   ;;  %vm1897_vm13 = vcmask 261312  }
  0x52   : > { %6363 = vmatprep.subr.msk.bf16.mxu0 %vm1268_vm2, %v6411_v17  ;;  %v1185_v40 = vcombine.low %v6884_v32, %v6897_v36  ;;  %v1186_v41 = vcombine.low %v6887_v33, %v6901_v37  ;;  %v1203_v42 = vcombine.low %v6905_v38, %v6893_v35  ;;  %v1210_v43 = vrot.slane %v1202_v39, %v6880_v30  ;;  %v6972_v12 = vld [vmem:[%s8210_s14] sm:$0xff]  ;;  %s8219_s20 = sld [smem:[#allocation13_spill]] }
  0x53   : > { %v1219_v56 = vcombine.low %v6927_v54, %v5904_v55  ;;  %v6980_v14 = vadd.f32 %v5914_v11, %v6972_v12  ;;  %v6983_v15 = vadd.f32 %v5914_v11, %v6977_v13  ;;  %vm1899_vm14 = vcmask 255168  }
  0x54   : > { %v1193_v44 = vrot.slane %v1185_v40, %v6880_v30  ;;  %v1200_v45 = vrot.slane %v1186_v41, %v6880_v30  ;;  %v1217_v46 = vrot.slane %v1203_v42, %v6880_v30  ;;  %vm2651_vm15 = vcmask 257024  }
  0x55   : > { %v1226_v58 = vrot.slane %v1219_v56, %v6880_v30  ;;  %vm3322_vm0 = vcmask 1043456   ;;  %vm5057_vm1 = vcmask 523264  }
  0x56   : > { %v1201_v47 = vcombine.low %v1193_v44, %v1200_v45  ;;  %v1218_v48 = vcombine.low %v1210_v43, %v1217_v46 }
  0x57   : > { %v1231_v59 = vpack.c.bf16 %v1226_v58, %v1226_v58 }
  0x58   : > { %v1230_v51 = vpack.c.bf16 %v1218_v48, %v1201_v47 }
  0x59   : > { %6102 = vmatpush3.bf16.xpose.msra.mxu0 %v1282_v22 }
  0x5a   : > { %6364 = vmatprep.subr.msk.bf16.mxu0 %vm1268_vm2, %v6412_v31  ;;  %6109 = vmatprep.mubr.msk.bf16.mxu0 %vm1268_vm2, %v1230_v51 }
  0x61   : > { %6104 = vmatpush3.bf16.xpose.msra.mxu0 %v1285_v49 }
  0x62   : > { %6365 = vmatprep.subr.msk.bf16.mxu0 %vm1268_vm2, %v6413_v50 }
  0x69   : > { %6106 = vmatpush3.bf16.xpose.msra.mxu0 %v1288_v52 }
  0x6a   : > { %6366 = vmatprep.subr.msk.bf16.mxu0 %vm1268_vm2, %v6414_v53 }
  0x71   : > { %6108 = vmatpush3.bf16.xpose.msra.mxu0 %v1291_v57 }
  0x72   : > { %6149 = vmatprep.subr.bf16.mxu0 %v6590_v60 }
  0x78   : > { %6110 = vmatmul.mubr.msk.bf16.vlgmr.msra.gmra.mrb[0].mxu0 %vm1268_vm2, %v1231_v59 }
  0x79   : > { %6151 = vmatprep.mubr.msk.bf16.mxu0 %vm6591_vm3, %v6590_v60 }
 0x14b   : > { %v6111_v62 = vpop.f32.mrb[0].mxu0 }
 0x14c   : > { %v6945_v63 = vadd.f32 %v6111_v62, %v5905_v61  ;;  %v1327_v0 = vpop.f32.mrb[1].mxu0 }
 0x14d   : > { %v6112_v1 = vpop.f32.mrb[2].mxu0  ;;  %v1328_v3 = vadd.f32 %v5905_v61, %v1327_v0 }
 0x14e   : > { %v1330_v2 = vpop.f32.mrb[3].mxu0 }
 0x14f   : > { %v6947_v4 = vadd.f32 %v5905_v61, %v1330_v2 }
 0x151   : > { %v6950_v5 = vpack.c.bf16 %v6947_v4, %v1328_v3  ;;  %v1909_v6 = vpack.c.bf16 %v6945_v63, %v6947_v4 }
 0x153   : > { %1435 = vrot.lane.b32.xlu1 %v6950_v5, %s6592_s30  ;;  %1360 = vrot.lane.b32.xlu0 %v6950_v5, %s6593_s9  ;;  %v7024_v61 = vrot.slane %v1909_v6, 1 }
 0x1c5   : > { %v1361_v7 = vpop.permute.xlu0 %1360  ;;  %v1436_v9 = vpop.permute.xlu1 %1435 }
 0x1c6   : > { %v1367_v8 = vsel %vm1362_vm4, %v1361_v7, 0  ;;  %v1442_v10 = vsel %vm1440_vm5, %v1436_v9, 0 }
 0x1c7   : > { %6114 = vmatpush3.bf16.xpose.msra.mxu1 %v1367_v8 }
 0x1c8   : > { %6119 = vmatprep.subr.bf16.mxu1 %v6590_v60 }
 0x1ce   : > { %6116 = vmatmul.mubr.msk.bf16.vlgmr.msra.gmra.mrb[0].mxu1 %vm1362_vm4, %v6950_v5 }
 0x1cf   : > { %6120 = vmatpush3.bf16.msra.mxu1 %v1442_v10  ;;  %6121 = vmatprep.mubr.msk.bf16.mxu1 %vm6591_vm3, %v6590_v60 }
 0x1d0   : > { %6125 = vmatprep.subr.bf16.mxu1 %v6590_v60 }
 0x2a1   : > { %v1403_v16 = vpop.f32.mrb[0].mxu1 }
 0x2a2   : > { %v1404_v17 = vadd.f32 %v1403_v16, %v6980_v14  ;;  %v6117_v18 = vpop.f32.mrb[1].mxu1 }
 0x2a3   : > { %v1406_v19 = vpop.f32.mrb[2].mxu1 }
 0x2a4   : > { %v1407_v20 = vadd.f32 %v1406_v19, %v6983_v15  ;;  %v6118_v21 = vpop.f32.mrb[3].mxu1  ;;  %v1411_v22 = vsel %vm1410_vm6, %v1404_v17, -inf }
 0x2a5   : > { %1412 = vmax.xlane.f32.xlu0 %v1411_v22 }
 0x2a6   : > { %v1415_v23 = vsel %vm1414_vm7, %v1407_v20, -inf }
 0x2a7   : > { %1416 = vmax.xlane.f32.xlu1 %v1415_v23 }
 0x2b8   : > { %1492 = vrot.lane.b32.xlu1 %v6950_v5, %s6594_s4 }
 0x2bb   : > { %1564 = vrot.lane.b32.xlu0 %v6950_v5, %s6595_s26 }
 0x2bc   : > { %1490 = vrot.lane.b32.xlu1 %v6950_v5, %s6596_s3 }
 0x332   : > { %v1413_v24 = vpop.xlane.xlu0 %1412 }
 0x333   : > { %v1418_v26 = vsub.f32 %v1404_v17, %v1413_v24 }
 0x334   : > { %v1417_v27 = vpop.xlane.xlu1 %1416 }
 0x335   : > { %v1420_v28 = vmul.f32 1.442695, %v1418_v26  ;;  %v1419_v29 = vsub.f32 %v1407_v20, %v1417_v27 }
 0x336   : > { %v1565_v44 = vpop.permute.xlu0 %1564 }
 0x337   : > { %v1422_v31 = vmul.f32 1.442695, %v1419_v29  ;;  %6433 = vpow2.f32 %v1420_v28  ;;  %v1570_v46 = vsel %vm1440_vm5, %v1565_v44, 0 }
 0x338   : > { %v1493_v41 = vpop.permute.xlu1 %1492 }
 0x339   : > { %6435 = vpow2.f32 %v1422_v31  ;;  %v1498_v43 = vsel %vm1362_vm4, %v1493_v41, 0 }
 0x33c   : > { %v1491_v45 = vpop.permute.xlu1 %1490 }
 0x341   : > { %v6995_v39 = vpop.eup %6433 }
 0x343   : > { %v6997_v40 = vpop.eup %6435 }
 0x344   : > { %v1434_v42 = vpack.c.bf16 %v6997_v40, %v6995_v39 }
 0x346   : > { %6122 = vmatmul.mubr.msk.bf16.vlgmr.msra.gmra.mrb[4].mxu1 %vm1410_vm6, %v1434_v42 }
 0x347   : > { %6126 = vmatpush3.bf16.xpose.msra.mxu1 %v1498_v43  ;;  %6127 = vmatprep.mubr.msk.bf16.mxu1 %vm6591_vm3, %v6590_v60 }
 0x348   : > { %6131 = vmatprep.subr.bf16.mxu1 %v6590_v60 }
 0x34e   : > { %6128 = vmatmul.mubr.msk.bf16.vlgmr.msra.gmra.mrb[8].mxu1 %vm1362_vm4, %v1491_v45 }
 0x34f   : > { %6132 = vmatpush3.bf16.msra.mxu1 %v1570_v46  ;;  %6133 = vmatprep.mubr.msk.bf16.mxu1 %vm6591_vm3, %v6590_v60 }
 0x350   : > { %6137 = vmatprep.subr.bf16.mxu1 %v6590_v60 }
 0x419   : > { %v7011_v47 = vpop.f32.mrb[4].mxu1 }
 0x41a   : > { %v6123_v48 = vpop.f32.mrb[5].mxu1 }
 0x41b   : > { %v7013_v49 = vpop.f32.mrb[6].mxu1 }
 0x41c   : > { %v6124_v50 = vpop.f32.mrb[7].mxu1 }
 0x421   : > { %v1534_v51 = vpop.f32.mrb[8].mxu1 }
 0x422   : > { %v1535_v52 = vadd.f32 %v1534_v51, %v6980_v14  ;;  %v6129_v53 = vpop.f32.mrb[9].mxu1 }
 0x423   : > { %v1537_v55 = vpop.f32.mrb[10].mxu1 }
 0x424   : > { %v1538_v56 = vadd.f32 %v1537_v55, %v6983_v15  ;;  %v6130_v57 = vpop.f32.mrb[11].mxu1  ;;  %v1541_v58 = vsel %vm1410_vm6, %v1535_v52, -inf }
 0x425   : > { %1542 = vmax.xlane.f32.xlu1 %v1541_v58 }
 0x426   : > { %v1544_v59 = vsel %vm1414_vm7, %v1538_v56, -inf }
 0x427   : > { %1545 = vmax.xlane.f32.xlu0 %v1544_v59 }
 0x436   : > { %1766 = vrot.lane.b32.xlu1 %v6950_v5, %s6597_s29 }
 0x43a   : > { %2174 = vrot.lane.b32.xlu1 %v7024_v61, %s6598_s2 }
 0x43d   : > { %1629 = vrot.lane.b32.xlu0 %v6950_v5, %s6598_s2 }
 0x43e   : > { %2309 = vrot.lane.b32.xlu1 %v7024_v61, %s6597_s29 }
 0x441   : > { %1627 = vrot.lane.b32.xlu0 %v6950_v5, %s6599_s0 }
 0x445   : > { %1764 = vrot.lane.b32.xlu0 %v6950_v5, %s6600_s12 }
 0x449   : > { %1912 = vrot.lane.b32.xlu0 %v7024_v61, %s6593_s9 }
 0x44d   : > { %2039 = vrot.lane.b32.xlu0 %v7024_v61, %s6594_s4 }
 0x451   : > { %2037 = vrot.lane.b32.xlu0 %v7024_v61, %s6596_s3 }
 0x455   : > { %2172 = vrot.lane.b32.xlu0 %v7024_v61, %s6599_s0 }
 0x459   : > { %2307 = vrot.lane.b32.xlu0 %v7024_v61, %s6600_s12 }
 0x4b2   : > { %v1543_v62 = vpop.xlane.xlu1 %1542 }
 0x4b3   : > { %v1547_v63 = vsub.f32 %v1535_v52, %v1543_v62  ;;  %v5923_v52 = vld [vmem:[%s8209_s24 + $0x1] ss:$0 sm:$0xff] }
 0x4b4   : > { %v1546_v0 = vpop.xlane.xlu0 %1545  ;;  %v1908_v57 = vadd.f32 %v5923_v52, %v6977_v13 }
 0x4b5   : > { %v1549_v1 = vmul.f32 1.442695, %v1547_v63  ;;  %v1548_v2 = vsub.f32 %v1538_v56, %v1546_v0  ;;  %v1907_v56 = vadd.f32 %v5923_v52, %v6972_v12 }
 0x4b6   : > { %v1767_v3 = vpop.permute.xlu1 %1766 }
 0x4b7   : > { %v1551_v4 = vmul.f32 1.442695, %v1548_v2  ;;  %v1772_v6 = vsel %vm1362_vm4, %v1767_v3, 0  ;;  %6437 = vpow2.f32 %v1549_v1 }
 0x4b8   : > { %6150 = vmatpush3.bf16.xpose.msra.mxu0 %v1772_v6  ;;  %v1630_v7 = vpop.permute.xlu0 %1629 }
 0x4b9   : > { %6439 = vpow2.f32 %v1551_v4  ;;  %6161 = vmatprep.subr.bf16.mxu0 %v6590_v60  ;;  %v1635_v19 = vsel %vm1362_vm4, %v1630_v7, 0 }
 0x4ba   : > { %v2175_v22 = vpop.permute.xlu1 %2174 }
 0x4bb   : > { %v2180_v24 = vsel %vm1362_vm4, %v2175_v22, 0 }
 0x4bc   : > { %v1628_v8 = vpop.permute.xlu0 %1627 }
 0x4be   : > { %v2310_v26 = vpop.permute.xlu1 %2309 }
 0x4bf   : > { %v2315_v28 = vsel %vm1362_vm4, %v2310_v26, 0 }
 0x4c0   : > { %v1765_v9 = vpop.permute.xlu0 %1764 }
 0x4c1   : > { %6152 = vmatmul.mubr.msk.bf16.vlgmr.msra.gmra.mrb[4].mxu0 %vm1362_vm4, %v1765_v9  ;;  %v7049_v10 = vpop.eup %6437 }
 0x4c2   : > { %6163 = vmatprep.mubr.msk.bf16.mxu0 %vm6591_vm3, %v6590_v60 }
 0x4c3   : > { %v7053_v11 = vpop.eup %6439 }
 0x4c4   : > { %v1913_v16 = vpop.permute.xlu0 %1912  ;;  %v1563_v17 = vpack.c.bf16 %v7053_v11, %v7049_v10 }
 0x4c5   : > { %v1918_v18 = vsel %vm1362_vm4, %v1913_v16, 0 }
 0x4c6   : > { %6134 = vmatmul.mubr.msk.bf16.vlgmr.msra.gmra.mrb[12].mxu1 %vm1410_vm6, %v1563_v17  ;;  %6162 = vmatpush3.bf16.xpose.msra.mxu0 %v1918_v18 }
 0x4c7   : > { %6138 = vmatpush3.bf16.xpose.msra.mxu1 %v1635_v19  ;;  %6139 = vmatprep.mubr.msk.bf16.mxu1 %vm6591_vm3, %v6590_v60 }
 0x4c8   : > { %6173 = vmatprep.subr.bf16.mxu0 %v6590_v60  ;;  %6143 = vmatprep.subr.bf16.mxu1 %v6590_v60  ;;  %v2040_v20 = vpop.permute.xlu0 %2039 }
 0x4c9   : > { %v2045_v21 = vsel %vm1362_vm4, %v2040_v20, 0 }
 0x4cc   : > { %v2038_v23 = vpop.permute.xlu0 %2037 }
 0x4cd   : > { %6164 = vmatmul.mubr.msk.bf16.vlgmr.msra.gmra.mrb[8].mxu0 %vm1362_vm4, %v7024_v61 }
 0x4ce   : > { %6140 = vmatmul.mubr.msk.bf16.vlgmr.msra.gmra.mrb[16].mxu1 %vm1362_vm4, %v1628_v8  ;;  %6174 = vmatpush3.bf16.xpose.msra.mxu0 %v2045_v21 }
 0x4cf   : > { %6175 = vmatprep.mubr.msk.bf16.mxu0 %vm6591_vm3, %v6590_v60  ;;  %6185 = vmatprep.subr.bf16.mxu0 %v6590_v60 }
 0x4d0   : > { %6145 = vmatprep.mubr.msk.bf16.mxu1 %vm6591_vm3, %v6590_v60  ;;  %v2173_v27 = vpop.permute.xlu0 %2172 }
 0x4d4   : > { %v2308_v29 = vpop.permute.xlu0 %2307 }
 0x4d5   : > { %6176 = vmatmul.mubr.msk.bf16.vlgmr.msra.gmra.mrb[12].mxu0 %vm1362_vm4, %v2038_v23 }
 0x4d6   : > { %6186 = vmatpush3.bf16.xpose.msra.mxu0 %v2180_v24  ;;  %6187 = vmatprep.mubr.msk.bf16.mxu0 %vm6591_vm3, %v6590_v60 }
 0x4d7   : > { %6197 = vmatprep.subr.bf16.mxu0 %v6590_v60 }
 0x4dd   : > { %6188 = vmatmul.mubr.msk.bf16.vlgmr.msra.gmra.mrb[16].mxu0 %vm1362_vm4, %v2173_v27 }
 0x4de   : > { %6198 = vmatpush3.bf16.xpose.msra.mxu0 %v2315_v28  ;;  %6199 = vmatprep.mubr.msk.bf16.mxu0 %vm6591_vm3, %v6590_v60 }
 0x4e5   : > { %6200 = vmatmul.mubr.msk.bf16.vlgmr.msra.gmra.mrb[20].mxu0 %vm1362_vm4, %v2308_v29 }
 0x594   : > { %v1808_v31 = vpop.f32.mrb[4].mxu0 }
 0x595   : > { %v7084_v41 = vadd.f32 %v1808_v31, %v6980_v14  ;;  %v6153_v42 = vpop.f32.mrb[5].mxu0 }
 0x596   : > { %v1811_v43 = vpop.f32.mrb[6].mxu0 }
 0x597   : > { %v7087_v44 = vadd.f32 %v1811_v43, %v6983_v15  ;;  %v6154_v45 = vpop.f32.mrb[7].mxu0  ;;  %v1815_v46 = vsel %vm1410_vm6, %v7084_v41, -inf }
 0x598   : > { %1816 = vmax.xlane.f32.xlu0 %v1815_v46 }
 0x599   : > { %v7091_v48 = vpop.f32.mrb[12].mxu1  ;;  %v1818_v50 = vsel %vm1414_vm7, %v7087_v44, -inf }
 0x59a   : > { %1819 = vmax.xlane.f32.xlu1 %v1818_v50  ;;  %v6135_v51 = vpop.f32.mrb[13].mxu1 }
 0x59b   : > { %v7098_v53 = vpop.f32.mrb[14].mxu1 }
 0x59c   : > { %v6136_v55 = vpop.f32.mrb[15].mxu1 }
 0x5a0   : > { %v1954_v58 = vpop.f32.mrb[8].mxu0 }
 0x5a1   : > { %v7102_v59 = vadd.f32 %v1954_v58, %v1907_v56  ;;  %v1671_v62 = vpop.f32.mrb[16].mxu1  ;;  %v6165_v63 = vpop.f32.mrb[9].mxu0 }
 0x5a2   : > { %v6141_v0 = vpop.f32.mrb[17].mxu1  ;;  %v1957_v1 = vpop.f32.mrb[10].mxu0  ;;  %v1672_v21 = vadd.f32 %v1671_v62, %v6980_v14 }
 0x5a3   : > { %v7104_v2 = vadd.f32 %v1957_v1, %v1908_v57  ;;  %v1674_v3 = vpop.f32.mrb[18].mxu1  ;;  %v6166_v4 = vpop.f32.mrb[11].mxu0  ;;  %v1961_v6 = vsel %vm1410_vm6, %v7102_v59, -inf }
 0x5a4   : > { %1962 = vmax.xlane.f32.xlu0 %v1961_v6  ;;  %v6142_v7 = vpop.f32.mrb[19].mxu1  ;;  %v1675_v17 = vadd.f32 %v1674_v3, %v6983_v15  ;;  %v1678_v28 = vsel %vm1410_vm6, %v1672_v21, -inf }
 0x5a5   : > { %v1964_v12 = vsel %vm1414_vm7, %v7104_v2, -inf }
 0x5a6   : > { %1965 = vmax.xlane.f32.xlu1 %v1964_v12  ;;  %v1681_v23 = vsel %vm1414_vm7, %v1675_v17, -inf }
 0x5a8   : > { %v2081_v13 = vpop.f32.mrb[12].mxu0 }
 0x5a9   : > { %v2082_v8 = vadd.f32 %v2081_v13, %v1907_v56  ;;  %v6177_v9 = vpop.f32.mrb[13].mxu0 }
 0x5aa   : > { %v2084_v16 = vpop.f32.mrb[14].mxu0 }
 0x5ab   : > { %v2085_v18 = vadd.f32 %v2084_v16, %v1908_v57  ;;  %v6178_v19 = vpop.f32.mrb[15].mxu0  ;;  %v2088_v20 = vsel %vm1410_vm6, %v2082_v8, -inf }
 0x5ac   : > { %2089 = vmax.xlane.f32.xlu0 %v2088_v20 }
 0x5ad   : > { %v2091_v22 = vsel %vm1414_vm7, %v2085_v18, -inf }
 0x5ae   : > { %2092 = vmax.xlane.f32.xlu1 %v2091_v22 }
 0x5b0   : > { %v2216_v24 = vpop.f32.mrb[16].mxu0  ;;  %1682 = vmax.xlane.f32.xlu0 %v1681_v23 }
 0x5b1   : > { %v7115_v26 = vadd.f32 %v2216_v24, %v1907_v56  ;;  %v6189_v27 = vpop.f32.mrb[17].mxu0 }
 0x5b2   : > { %v2219_v15 = vpop.f32.mrb[18].mxu0  ;;  %1679 = vmax.xlane.f32.xlu1 %v1678_v28 }
 0x5b3   : > { %v6190_v29 = vpop.f32.mrb[19].mxu0  ;;  %v7118_v31 = vadd.f32 %v2219_v15, %v1908_v57  ;;  %v2223_v14 = vsel %vm1410_vm6, %v7115_v26, -inf }
 0x5b5   : > { %v2226_v46 = vsel %vm1414_vm7, %v7118_v31, -inf }
 0x5b6   : > { %2224 = vmax.xlane.f32.xlu1 %v2223_v14 }
 0x5b8   : > { %v2351_v42 = vpop.f32.mrb[20].mxu0 }
 0x5b9   : > { %v7122_v43 = vadd.f32 %v2351_v42, %v1907_v56  ;;  %v6201_v45 = vpop.f32.mrb[21].mxu0 }
 0x5ba   : > { %v2354_v50 = vpop.f32.mrb[22].mxu0  ;;  %2227 = vmax.xlane.f32.xlu1 %v2226_v46 }
 0x5bb   : > { %v7126_v51 = vadd.f32 %v2354_v50, %v1908_v57  ;;  %v6202_v52 = vpop.f32.mrb[23].mxu0  ;;  %v2358_v55 = vsel %vm1410_vm6, %v7122_v43, -inf  ;;  %v1553_v57 = vsel %vm1410_vm6, %v7049_v10, 0.0 }
 0x5bd   : > { %v2361_v56 = vsel %vm1414_vm7, %v7126_v51, -inf }
 0x5c6   : > { %1701 = vrot.lane.b32.xlu0 %v6950_v5, %s6601_s10 }
 0x5cb   : > { %1838 = vrot.lane.b32.xlu1 %v6950_v5, %s6602_s1  ;;  %v1556_v5 = vsel %vm1414_vm7, %v7053_v11, 0.0 }
 0x5e5   : > { %2359 = vmax.xlane.f32.xlu0 %v2358_v55 }
 0x5ef   : > { %2362 = vmax.xlane.f32.xlu1 %v2361_v56 }
 0x5fb   : > { %1984 = vrot.lane.b32.xlu0 %v7024_v61, %s6592_s30  ;;  %s6603_s30 = smov 8  }
 0x5ff   : > { %2246 = vrot.lane.b32.xlu0 %v7024_v61, %s6601_s10  ;;  %s8211_s10 = sld [smem:[#allocation17_spill]] }
 0x600   : > { %2111 = vrot.lane.b32.xlu1 %v7024_v61, %s6595_s26  ;;  %s6604_s26 = smov 16  }
 0x603   : > { %2381 = vrot.lane.b32.xlu0 %v7024_v61, %s6602_s1 }
 0x605   : > { %s8212_s1 = scalar_lea.vmem %s8211_s10, %s6757_s7  ;;  %s8213_s10 = sld [smem:[#allocation10_spill]] }
 0x622   : > { %1557 = vadd.xlane.f32.xlu0 %v1556_v5 }
 0x624   : > { %1554 = vadd.xlane.f32.xlu1 %v1553_v57 }
 0x625   : > { %v1817_v58 = vpop.xlane.xlu0 %1816 }
 0x626   : > { %v1821_v3 = vsub.f32 %v7084_v41, %v1817_v58 }
 0x627   : > { %v1820_v62 = vpop.xlane.xlu1 %1819 }
 0x628   : > { %v1823_v11 = vmul.f32 1.442695, %v1821_v3  ;;  %v1822_v22 = vsub.f32 %v7087_v44, %v1820_v62 }
 0x631   : > { %v7144_v63 = vpop.xlane.xlu0 %1962 }
 0x633   : > { %v7146_v0 = vpop.xlane.xlu1 %1965 }
 0x639   : > { %v2090_v1 = vpop.xlane.xlu0 %2089 }
 0x63a   : > { %v2094_v4 = vsub.f32 %v2082_v8, %v2090_v1 }
 0x63b   : > { %v2093_v6 = vpop.xlane.xlu1 %2092 }
 0x63c   : > { %v2096_v61 = vmul.f32 1.442695, %v2094_v4  ;;  %v2095_v7 = vsub.f32 %v2085_v18, %v2093_v6 }
 0x63d   : > { %v1683_v12 = vpop.xlane.xlu0 %1682 }
 0x63e   : > { %6441 = vpow2.f32 %v2096_v61  ;;  %v2098_v13 = vmul.f32 1.442695, %v2095_v7  ;;  %v1685_v9 = vsub.f32 %v1675_v17, %v1683_v12  ;;  %v1825_v17 = vmul.f32 1.442695, %v1822_v22 }
 0x63f   : > { %v1680_v10 = vpop.xlane.xlu1 %1679  ;;  %v1968_v61 = vsub.f32 %v7104_v2, %v7146_v0  ;;  %v1967_v7 = vsub.f32 %v7102_v59, %v7144_v63 }
 0x640   : > { %6443 = vpow2.f32 %v2098_v13  ;;  %v1688_v16 = vmul.f32 1.442695, %v1685_v9  ;;  %v1684_v19 = vsub.f32 %v1672_v21, %v1680_v10 }
 0x641   : > { %v1702_v20 = vpop.permute.xlu0 %1701  ;;  %6445 = vpow2.f32 %v1823_v11  ;;  %v1971_v12 = vmul.f32 1.442695, %v1968_v61  ;;  %v1969_v11 = vmul.f32 1.442695, %v1967_v7 }
 0x642   : > { %v1686_v23 = vmul.f32 1.442695, %v1684_v19  ;;  %v1707_v41 = vsel %vm1440_vm5, %v1702_v20, 0  ;;  %6447 = vpow2.f32 %v1688_v16 }
 0x643   : > { %v2225_v8 = vpop.xlane.xlu1 %2224  ;;  %6144 = vmatpush3.bf16.msra.mxu1 %v1707_v41 }
 0x644   : > { %6449 = vpow2.f32 %v1686_v23  ;;  %v2229_v18 = vsub.f32 %v7115_v26, %v2225_v8  ;;  %6155 = vmatprep.subr.bf16.mxu1 %v6590_v60 }
 0x646   : > { %v2231_v24 = vmul.f32 1.442695, %v2229_v18 }
 0x647   : > { %v2228_v27 = vpop.xlane.xlu1 %2227 }
 0x648   : > { %v7153_v28 = vpop.eup %6441  ;;  %6451 = vpow2.f32 %v2231_v24  ;;  %v2230_v21 = vsub.f32 %v7118_v31, %v2228_v27 }
 0x649   : > { %v2100_v44 = vsel %vm1410_vm6, %v7153_v28, 0.0  ;;  %6453 = vpow2.f32 %v1825_v17 }
 0x64a   : > { %v7158_v15 = vpop.eup %6443  ;;  %v2233_v29 = vmul.f32 1.442695, %v2230_v21  ;;  %2101 = vadd.xlane.f32.xlu0 %v2100_v44 }
 0x64b   : > { %v2103_v26 = vsel %vm1414_vm7, %v7158_v15, 0.0  ;;  %v2110_v14 = vpack.c.bf16 %v7158_v15, %v7153_v28  ;;  %v6446_v42 = vpop.eup %6445  ;;  %v1839_v31 = vpop.permute.xlu1 %1838 }
 0x64c   : > { %6455 = vpow2.f32 %v2233_v29  ;;  %2104 = vadd.xlane.f32.xlu1 %v2103_v26  ;;  %v6448_v45 = vpop.eup %6447  ;;  %v1827_v50 = vsel %vm1410_vm6, %v6446_v42, 0.0  ;;  %v1844_v55 = vsel %vm1440_vm5, %v1839_v31, 0 }
 0x64d   : > { %v1693_v6 = vsel %vm1414_vm7, %v6448_v45, 0.0  ;;  %6457 = vpow2.f32 %v1971_v12 }
 0x64e   : > { %v6450_v46 = vpop.eup %6449  ;;  %6459 = vpow2.f32 %v1969_v11 }
 0x64f   : > { %v1700_v52 = vpack.c.bf16 %v6448_v45, %v6450_v46  ;;  %v1690_v4 = vsel %vm1410_vm6, %v6450_v46, 0.0 }
 0x650   : > { %1828 = vadd.xlane.f32.xlu1 %v1827_v50 }
 0x651   : > { %6146 = vmatmul.mubr.msk.bf16.vlgmr.msra.gmra.mrb[20].mxu1 %vm1410_vm6, %v1700_v52 }
 0x652   : > { %v7167_v56 = vpop.eup %6451  ;;  %6156 = vmatpush3.bf16.msra.mxu1 %v1844_v55  ;;  %6157 = vmatprep.mubr.msk.bf16.mxu1 %vm6591_vm3, %v6590_v60 }
 0x653   : > { %v2235_v5 = vsel %vm1410_vm6, %v7167_v56, 0.0  ;;  %6167 = vmatprep.subr.bf16.mxu1 %v6590_v60  ;;  %v6454_v57 = vpop.eup %6453 }
 0x654   : > { %2236 = vadd.xlane.f32.xlu0 %v2235_v5  ;;  %v1830_v1 = vsel %vm1414_vm7, %v6454_v57, 0.0  ;;  %v1837_v3 = vpack.c.bf16 %v6454_v57, %v6446_v42 }
 0x656   : > { %v6456_v58 = vpop.eup %6455 }
 0x657   : > { %v2238_v62 = vsel %vm1414_vm7, %v6456_v58, 0.0  ;;  %v6458_v16 = vpop.eup %6457  ;;  %v2245_v44 = vpack.c.bf16 %v6456_v58, %v7167_v56 }
 0x658   : > { %2239 = vadd.xlane.f32.xlu1 %v2238_v62  ;;  %1831 = vadd.xlane.f32.xlu0 %v1830_v1  ;;  %v6460_v22 = vpop.eup %6459  ;;  %v1976_v26 = vsel %vm1414_vm7, %v6458_v16, 0.0 }
 0x659   : > { %6158 = vmatmul.mubr.msk.bf16.vlgmr.msra.gmra.mrb[24].mxu1 %vm1410_vm6, %v1837_v3  ;;  %v1983_v23 = vpack.c.bf16 %v6458_v16, %v6460_v22  ;;  %v1973_v27 = vsel %vm1410_vm6, %v6460_v22, 0.0 }
 0x65a   : > { %6169 = vmatprep.mubr.msk.bf16.mxu1 %vm6591_vm3, %v6590_v60 }
 0x65c   : > { %1691 = vadd.xlane.f32.xlu1 %v1690_v4  ;;  %1694 = vadd.xlane.f32.xlu0 %v1693_v6 }
 0x672   : > { %v2360_v13 = vpop.xlane.xlu0 %2359 }
 0x673   : > { %v2364_v9 = vsub.f32 %v7122_v43, %v2360_v13 }
 0x675   : > { %v2366_v10 = vmul.f32 1.442695, %v2364_v9 }
 0x676   : > { %v1985_v19 = vpop.permute.xlu0 %1984 }
 0x677   : > { %6461 = vpow2.f32 %v2366_v10  ;;  %v1990_v20 = vsel %vm1440_vm5, %v1985_v19, 0 }
 0x678   : > { %6168 = vmatpush3.bf16.msra.mxu1 %v1990_v20 }
 0x679   : > { %6179 = vmatprep.subr.bf16.mxu1 %v6590_v60 }
 0x67a   : > { %v2247_v8 = vpop.permute.xlu0 %2246 }
 0x67b   : > { %6170 = vmatmul.mubr.msk.bf16.vlgmr.msra.gmra.mrb[28].mxu1 %vm1410_vm6, %v1983_v23  ;;  %v2252_v17 = vsel %vm1440_vm5, %v2247_v8, 0 }
 0x67c   : > { %v2363_v59 = vpop.xlane.xlu1 %2362  ;;  %6181 = vmatprep.mubr.msk.bf16.mxu1 %vm6591_vm3, %v6590_v60 }
 0x67d   : > { %v2365_v2 = vsub.f32 %v7126_v51, %v2363_v59  ;;  %v1424_v51 = vsel %vm1410_vm6, %v6995_v39, 0.0  ;;  %v1427_v39 = vsel %vm1414_vm7, %v6997_v40, 0.0 }
 0x67e   : > { %v2382_v24 = vpop.permute.xlu0 %2381 }
 0x67f   : > { %v2368_v43 = vmul.f32 1.442695, %v2365_v2  ;;  %v2387_v15 = vsel %vm1440_vm5, %v2382_v24, 0 }
 0x680   : > { %v2112_v63 = vpop.permute.xlu1 %2111 }
 0x681   : > { %v6462_v0 = vpop.eup %6461  ;;  %6463 = vpow2.f32 %v2368_v43  ;;  %v2117_v41 = vsel %vm1440_vm5, %v2112_v63, 0 }
 0x682   : > { %6180 = vmatpush3.bf16.msra.mxu1 %v2117_v41  ;;  %v2370_v18 = vsel %vm1410_vm6, %v6462_v0, 0.0 }
 0x683   : > { %2371 = vadd.xlane.f32.xlu0 %v2370_v18  ;;  %6191 = vmatprep.subr.bf16.mxu1 %v6590_v60 }
 0x685   : > { %6182 = vmatmul.mubr.msk.bf16.vlgmr.msra.gmra.mrb[32].mxu1 %vm1410_vm6, %v2110_v14 }
 0x686   : > { %6192 = vmatpush3.bf16.msra.mxu1 %v2252_v17  ;;  %6193 = vmatprep.mubr.msk.bf16.mxu1 %vm6591_vm3, %v6590_v60 }
 0x687   : > { %1425 = vadd.xlane.f32.xlu0 %v1424_v51  ;;  %6203 = vmatprep.subr.bf16.mxu1 %v6590_v60 }
 0x68b   : > { %v6464_v21 = vpop.eup %6463  ;;  %1974 = vadd.xlane.f32.xlu0 %v1973_v27 }
 0x68c   : > { %v2373_v28 = vsel %vm1414_vm7, %v6464_v21, 0.0  ;;  %v2380_v29 = vpack.c.bf16 %v6464_v21, %v6462_v0 }
 0x68d   : > { %2374 = vadd.xlane.f32.xlu1 %v2373_v28  ;;  %6194 = vmatmul.mubr.msk.bf16.vlgmr.msra.gmra.mrb[36].mxu1 %vm1410_vm6, %v2245_v44 }
 0x68e   : > { %6204 = vmatpush3.bf16.msra.mxu1 %v2387_v15  ;;  %6205 = vmatprep.mubr.msk.bf16.mxu1 %vm6591_vm3, %v6590_v60 }
 0x691   : > { %1428 = vadd.xlane.f32.xlu1 %v1427_v39 }
 0x695   : > { %1977 = vadd.xlane.f32.xlu1 %v1976_v26  ;;  %6206 = vmatmul.mubr.msk.bf16.vlgmr.msra.gmra.mrb[40].mxu1 %vm1410_vm6, %v2380_v29  ;;  %v6417_v26 = vld [vmem:[%s6777_s23] sm:$0xff]  }
 0x696   : > { %6367 = vmatprep.subr.msk.bf16.mxu0 %vm1268_vm2, %v6417_v26 }
 0x6af   : > { %v1558_v14 = vpop.xlane.xlu0 %1557 }
 0x6b0   : > { %6465 = vrcp.f32 %v1558_v14 }
 0x6b1   : > { %v1555_v42 = vpop.xlane.xlu1 %1554 }
 0x6b2   : > { %6467 = vrcp.f32 %v1555_v42 }
 0x6ba   : > { %v6466_v45 = vpop.eup %6465 }
 0x6bb   : > { %v1614_v46 = vmul.f32 %v6466_v45, %v7098_v53 }
 0x6bc   : > { %v6468_v31 = vpop.eup %6467 }
 0x6bd   : > { %1619 = vrot.lane.b32.xlu1 %v1614_v46, %s6603_s30  ;;  %v1613_v40 = vmul.f32 %v6468_v31, %v7091_v48  ;;  %v2470_v31 = vsel %vm1268_vm2, %v6417_v26, 0 }
 0x6be   : > { %6210 = vmatpush3.bf16.xpose.msra.mxu0 %v2470_v31 }
 0x6bf   : > { %1617 = vrot.lane.b32.xlu0 %v1613_v40, %s6603_s30 }
 0x6d7   : > { %v2102_v50 = vpop.xlane.xlu0 %2101 }
 0x6d9   : > { %v2105_v55 = vpop.xlane.xlu1 %2104 }
 0x6dd   : > { %v1829_v5 = vpop.xlane.xlu1 %1828 }
 0x6e1   : > { %v7220_v52 = vpop.xlane.xlu0 %2236 }
 0x6e5   : > { %v1832_v56 = vpop.xlane.xlu0 %1831  ;;  %v7222_v58 = vpop.xlane.xlu1 %2239 }
 0x6e9   : > { %v1695_v57 = vpop.xlane.xlu0 %1694  ;;  %v1692_v1 = vpop.xlane.xlu1 %1691 }
 0x710   : > { %v7224_v62 = vpop.xlane.xlu0 %2371 }
 0x714   : > { %v1426_v53 = vpop.xlane.xlu0 %1425 }
 0x715   : > { %6469 = vrcp.f32 %v1426_v53 }
 0x716   : > { %6471 = vrcp.f32 %v1692_v1 }
 0x717   : > { %6473 = vrcp.f32 %v1695_v57 }
 0x718   : > { %v1975_v59 = vpop.xlane.xlu0 %1974 }
 0x71a   : > { %v7226_v3 = vpop.xlane.xlu1 %2374 }
 0x71e   : > { %v1429_v48 = vpop.xlane.xlu1 %1428 }
 0x71f   : > { %v6470_v4 = vpop.eup %6469  ;;  %6475 = vrcp.f32 %v1429_v48 }
 0x720   : > { %v1485_v6 = vmul.f32 %v6470_v4, %v7011_v47  ;;  %6477 = vrcp.f32 %v1829_v5  ;;  %v6472_v61 = vpop.eup %6471 }
 0x721   : > { %6479 = vrcp.f32 %v1832_v56  ;;  %v6474_v13 = vpop.eup %6473  ;;  %v6418_v56 = vld [vmem:[%s6777_s23 + $0x8] sm:$0xff]  }
 0x722   : > { %1487 = vst.msk [vmem:[#allocation3] sm:$0xff] %vm1362_vm4, %v1485_v6  ;;  %v1978_v20 = vpop.xlane.xlu1 %1977  ;;  %6481 = vrcp.f32 %v1975_v59  ;;  %6368 = vmatprep.subr.msk.bf16.mxu0 %vm1268_vm2, %v6418_v56  ;;  %v2473_v1 = vsel %vm1268_vm2, %v6418_v56, 0 }
 0x723   : > { %6483 = vrcp.f32 %v1978_v20  ;;  %6212 = vmatpush3.bf16.xpose.msra.mxu0 %v2473_v1 }
 0x724   : > { %v1743_v7 = vpop.f32.mrb[20].mxu1  ;;  %6485 = vrcp.f32 %v2102_v50  ;;  %6225 = vmatprep.subr.bf16.mxu0 %v6590_v60 }
 0x725   : > { %v1750_v12 = vmul.f32 %v6472_v61, %v1743_v7  ;;  %v6147_v11 = vpop.f32.mrb[21].mxu1  ;;  %6487 = vrcp.f32 %v2105_v55 }
 0x726   : > { %v1746_v9 = vpop.f32.mrb[22].mxu1  ;;  %6489 = vrcp.f32 %v7220_v52 }
 0x727   : > { %v1751_v10 = vmul.f32 %v6474_v13, %v1746_v9  ;;  %1754 = vrot.lane.b32.xlu0 %v1750_v12, %s6604_s26  ;;  %v6148_v16 = vpop.f32.mrb[23].mxu1  ;;  %6491 = vrcp.f32 %v7222_v58 }
 0x728   : > { %6493 = vrcp.f32 %v7224_v62 }
 0x729   : > { %v6476_v19 = vpop.eup %6475  ;;  %1756 = vrot.lane.b32.xlu1 %v1751_v10, %s6604_s26  ;;  %6495 = vrcp.f32 %v7226_v3 }
 0x72a   : > { %v1486_v47 = vmul.f32 %v6476_v19, %v7013_v49  ;;  %v6478_v22 = vpop.eup %6477 }
 0x72b   : > { %v6480_v63 = vpop.eup %6479 }
 0x72c   : > { %v1880_v23 = vpop.f32.mrb[24].mxu1  ;;  %1489 = vst.msk [vmem:[#allocation3 + $0x8] sm:$0x3] %vm1488_vm8, %v1486_v47  ;;  %v6482_v17 = vpop.eup %6481 }
 0x72d   : > { %v1887_v2 = vmul.f32 %v6478_v22, %v1880_v23  ;;  %v6159_v43 = vpop.f32.mrb[25].mxu1  ;;  %v6484_v21 = vpop.eup %6483 }
 0x72e   : > { %v1883_v0 = vpop.f32.mrb[26].mxu1  ;;  %v6486_v39 = vpop.eup %6485 }
 0x72f   : > { %v1888_v41 = vmul.f32 %v6480_v63, %v1883_v0  ;;  %v1620_v8 = vpop.permute.xlu1 %1619  ;;  %1891 = vrot.lane.b32.xlu0 %v1887_v2, %s6605_s8  ;;  %v6160_v18 = vpop.f32.mrb[27].mxu1 }
 0x730   : > { %1626 = vst.msk [vmem:[#allocation3 + $0x8] sm:$0x3] %vm1625_vm9, %v1620_v8  ;;  %v6488_v45 = vpop.eup %6487  ;;  %v5932_v18 = vld [vmem:[%s8212_s1] ss:$0 sm:$0xff] }
 0x731   : > { %v1618_v49 = vpop.permute.xlu0 %1617  ;;  %1893 = vrot.lane.b32.xlu1 %v1888_v41, %s6605_s8  ;;  %v6490_v52 = vpop.eup %6489 }
 0x732   : > { %1624 = vst.msk [vmem:[#allocation3] sm:$0xff] %vm1623_vm10, %v1618_v49  ;;  %v6492_v58 = vpop.eup %6491 }
 0x733   : > { %v6494_v62 = vpop.eup %6493 }
 0x734   : > { %v6496_v7 = vpop.eup %6495 }
 0x74e   : > { %v2026_v51 = vpop.f32.mrb[28].mxu1 }
 0x74f   : > { %v2033_v24 = vmul.f32 %v6482_v17, %v2026_v51  ;;  %v6171_v27 = vpop.f32.mrb[29].mxu1 }
 0x750   : > { %v2029_v44 = vpop.f32.mrb[30].mxu1 }
 0x751   : > { %2035 = vst.msk [vmem:[#allocation3 + $0xa] sm:$0xff] %vm1362_vm4, %v2033_v24  ;;  %v2034_v28 = vmul.f32 %v6484_v21, %v2029_v44  ;;  %v6172_v15 = vpop.f32.mrb[31].mxu1 }
 0x753   : > { %2036 = vst.msk [vmem:[#allocation3 + $0x12] sm:$0x3] %vm1488_vm8, %v2034_v28 }
 0x758   : > { %v2153_v29 = vpop.f32.mrb[32].mxu1 }
 0x759   : > { %v2160_v14 = vmul.f32 %v6486_v39, %v2153_v29  ;;  %v6183_v42 = vpop.f32.mrb[33].mxu1 }
 0x75a   : > { %v2156_v46 = vpop.f32.mrb[34].mxu1 }
 0x75b   : > { %v2161_v40 = vmul.f32 %v6488_v45, %v2156_v46  ;;  %2164 = vrot.lane.b32.xlu1 %v2160_v14, %s6603_s30  ;;  %v6184_v50 = vpop.f32.mrb[35].mxu1 }
 0x75d   : > { %2166 = vrot.lane.b32.xlu0 %v2161_v40, %s6603_s30 }
 0x760   : > { %v2288_v55 = vpop.f32.mrb[36].mxu1 }
 0x761   : > { %v2295_v5 = vmul.f32 %v6490_v52, %v2288_v55  ;;  %v6195_v57 = vpop.f32.mrb[37].mxu1 }
 0x762   : > { %v2291_v53 = vpop.f32.mrb[38].mxu1 }
 0x763   : > { %v2296_v48 = vmul.f32 %v6492_v58, %v2291_v53  ;;  %2299 = vrot.lane.b32.xlu1 %v2295_v5, %s6604_s26  ;;  %v6196_v4 = vpop.f32.mrb[39].mxu1  ;;  %v6579_v58 = vld.sshfl [vmem:[#allocation2 + $0x8] sm:$0x3 pattern:$0x76325410] }
 0x764   : > { %v6580_v4 = vld.sshfl [vmem:[#allocation2 + $0x18] sm:$0x3 pattern:$0x76325410] }
 0x765   : > { %2301 = vrot.lane.b32.xlu0 %v2296_v48, %s6604_s26 }
 0x768   : > { %v2423_v3 = vpop.f32.mrb[40].mxu1 }
 0x769   : > { %v2430_v6 = vmul.f32 %v6494_v62, %v2423_v3  ;;  %v6207_v61 = vpop.f32.mrb[41].mxu1 }
 0x76a   : > { %v2426_v12 = vpop.f32.mrb[42].mxu1 }
 0x76b   : > { %v2431_v11 = vmul.f32 %v6496_v7, %v2426_v12  ;;  %2434 = vrot.lane.b32.xlu1 %v2430_v6, %s6605_s8  ;;  %v6208_v13 = vpop.f32.mrb[43].mxu1 }
 0x76d   : > { %2436 = vrot.lane.b32.xlu0 %v2431_v11, %s6605_s8 }
 0x799   : > { %v1755_v9 = vpop.permute.xlu0 %1754 }
 0x79a   : > { %1761 = vst.msk [vmem:[#allocation3] sm:$0xff] %vm1760_vm11, %v1755_v9 }
 0x79b   : > { %v1757_v10 = vpop.permute.xlu1 %1756 }
 0x79c   : > { %1763 = vst.msk [vmem:[#allocation3 + $0x8] sm:$0x3] %vm1762_vm12, %v1757_v10  ;;  %v6419_v10 = vld [vmem:[%s6804_s22] sm:$0xff]  }
 0x7a1   : > { %v1892_v16 = vpop.permute.xlu0 %1891 }
 0x7a2   : > { %1898 = vst.msk [vmem:[#allocation3] sm:$0xff] %vm1897_vm13, %v1892_v16  ;;  %v3178_v16 = vsel %vm1268_vm2, %v6419_v10, 0 }
 0x7a3   : > { %v1894_v19 = vpop.permute.xlu1 %1893 }
 0x7a4   : > { %1900 = vst.msk [vmem:[#allocation3 + $0x8] sm:$0x3] %vm1899_vm14, %v1894_v19  ;;  %v6606_v19 = vmov 269488144  }
 0x7a9   : > { %v2442_v43 = vld [vmem:[#allocation3] sm:$0xff] }
 0x7cd   : > { %v2165_v47 = vpop.permute.xlu1 %2164 }
 0x7ce   : > { %2170 = vst.msk [vmem:[#allocation3 + $0xa] sm:$0xff] %vm1623_vm10, %v2165_v47  ;;  %v2663_v47 = vunpack.c.l.s4 %v6606_v19 }
 0x7cf   : > { %v2167_v20 = vpop.permute.xlu0 %2166 }
 0x7d0   : > { %2171 = vst.msk [vmem:[#allocation3 + $0x12] sm:$0x3] %vm1625_vm9, %v2167_v20  ;;  %v6607_v20 = vmov 842150450  }
 0x7d5   : > { %v2300_v22 = vpop.permute.xlu1 %2299 }
 0x7d6   : > { %2305 = vst.msk [vmem:[#allocation3 + $0xa] sm:$0xff] %vm1760_vm11, %v2300_v22  ;;  %v2670_v22 = vunpack.c.l.s4 %v6607_v20 }
 0x7d7   : > { %v2302_v23 = vpop.permute.xlu0 %2301 }
 0x7d8   : > { %2306 = vst.msk [vmem:[#allocation3 + $0x12] sm:$0x3] %vm1762_vm12, %v2302_v23  ;;  %v6608_v23 = vmov 1414812756  }
 0x7dd   : > { %v2435_v59 = vpop.permute.xlu1 %2434 }
 0x7de   : > { %2440 = vst.msk [vmem:[#allocation3 + $0xa] sm:$0xff] %vm1897_vm13, %v2435_v59  ;;  %v2677_v59 = vunpack.c.l.s4 %v6608_v23 }
 0x7df   : > { %v2437_v2 = vpop.permute.xlu0 %2436 }
 0x7e0   : > { %2441 = vst.msk [vmem:[#allocation3 + $0x12] sm:$0x3] %vm1899_vm14, %v2437_v2  ;;  %v6609_v2 = vmov 1987475062  }
 0x7e5   : > { %v2443_v63 = vld [vmem:[#allocation3 + $0x8] sm:$0xff] }
 0x7e6   : > { %v2445_v0 = vpack.c.bf16 %v2443_v63, %v2442_v43  ;;  %v2684_v43 = vunpack.c.l.s4 %v6609_v2  ;;  %v2664_v63 = vunpack.c.0.s8 %v2663_v47 }
 0x7e7   : > { %v2444_v41 = vld [vmem:[#allocation3 + $0x10] sm:$0xf] }
 0x7e8   : > { %6213 = vmatprep.mubr.msk.bf16.mxu0 %vm1268_vm2, %v2445_v0  ;;  %v2446_v8 = vpack.c.bf16 %v2444_v41, %v2444_v41  ;;  %v2671_v0 = vunpack.c.0.s8 %v2670_v22  ;;  %v2678_v41 = vunpack.c.0.s8 %v2677_v59  ;;  %v6420_v59 = vld [vmem:[%s6804_s22 + $0x8] sm:$0xff]  }
 0x7e9   : > { %v3181_v2 = vsel %vm1268_vm2, %v6420_v59, 0 }
 0x7ea   : > { %6214 = vmatmul.mubr.msk.bf16.vlgmr.msra.gmra.mrb[24].mxu0 %vm1268_vm2, %v2446_v8  ;;  %v2685_v8 = vunpack.c.0.s8 %v2684_v43  ;;  %v6421_v43 = vld [vmem:[%s6804_s22 + $0x10] sm:$0xff]  }
 0x7eb   : > { %6233 = vmatprep.mubr.msk.bf16.mxu0 %vm6591_vm3, %v6590_v60  ;;  %6226 = vmatpush3.bf16.xpose.msra.mxu0 %v3178_v16 }
 0x7ec   : > { %6227 = vmatprep.subr.bf16.mxu0 %v6590_v60 }
 0x7f3   : > { %6228 = vmatpush3.bf16.xpose.msra.mxu0 %v3181_v2 }
 0x7f4   : > { %6229 = vmatprep.subr.bf16.mxu0 %v6590_v60 }
 0x8bd   : > { %v6215_v49 = vpop.f32.mrb[24].mxu0 }
 0x8be   : > { %v2518_v17 = vadd.f32 %v6215_v49, %v5932_v18  ;;  %v2509_v51 = vpop.f32.mrb[25].mxu0  ;;  %v7322_v49 = vsub.s32 %v2671_v0, %v6876_v25  ;;  %v6422_v0 = vld [vmem:[%s6790_s27] sm:$0xff]  }
 0x8bf   : > { %v2510_v24 = vadd.f32 %v5932_v18, %v2509_v51  ;;  %v6216_v27 = vpop.f32.mrb[26].mxu0  ;;  %v7328_v51 = vsub.s32 %v2685_v8, %v6876_v25  ;;  %6369 = vmatprep.subr.msk.bf16.mxu1 %vm1268_vm2, %v6422_v0  ;;  %v3085_v8 = vsel %vm1268_vm2, %v6422_v0, 0 }
 0x8c0   : > { %v2566_v21 = vrot.slane %v2518_v17, %v6880_v30  ;;  %v2512_v44 = vpop.f32.mrb[27].mxu0  ;;  %v7325_v17 = vsub.s32 %v2678_v41, %v6876_v25  ;;  %v6423_v41 = vld [vmem:[%s6804_s22 + $0x18] sm:$0xff]   ;;  %6218 = vmatpush3.bf16.xpose.msra.mxu1 %v3085_v8  ;;  %s8214_s22 = sld [smem:[#allocation18_spill]] }
 0x8c1   : > { %v2526_v28 = vcombine.high %v2510_v24, %v2510_v24  ;;  %v2533_v15 = vrot.slane %v2510_v24, %v6880_v30  ;;  %v2513_v39 = vadd.f32 %v5932_v18, %v2512_v44  ;;  %v7319_v18 = vsub.s32 %v2664_v63, %v6876_v25 }
 0x8c2   : > { %v2567_v42 = vcombine.high %v2566_v21, %v2566_v21  ;;  %v3184_v63 = vsel %vm1268_vm2, %v6421_v43, 0 }
 0x8c3   : > { %v2540_v29 = vrot.slane %v2526_v28, %v6880_v30  ;;  %v2541_v26 = vcombine.high %v2533_v15, %v2533_v15  ;;  %v2543_v14 = vcombine.high %v2513_v39, %v2513_v39  ;;  %v2550_v45 = vrot.slane %v2513_v39, %v6880_v30  ;;  %6230 = vmatpush3.bf16.xpose.msra.mxu0 %v3184_v63 }
 0x8c4   : > { %v2578_v31 = vadd.f32 %v2533_v15, %v6884_v32  ;;  %v7296_v62 = vadd.f32 %v6580_v4, %v2567_v42  ;;  %6231 = vmatprep.subr.bf16.mxu0 %v6590_v60 }
 0x8c5   : > { %v2542_v46 = vcombine.high %v2540_v29, %v2540_v29  ;;  %v2579_v40 = vadd.f32 %v2541_v26, %v6897_v36  ;;  %v2557_v50 = vrot.slane %v2543_v14, %v6880_v30  ;;  %v2558_v52 = vcombine.high %v2550_v45, %v2550_v45 }
 0x8c6   : > { %v2580_v55 = vadd.f32 %v2540_v29, %v6887_v33  ;;  %v7285_v53 = vadd.f32 %v6579_v58, %v2550_v45  ;;  %s8215_s23 = scalar_lea.vmem %s8214_s22, %s6757_s7 }
 0x8c7   : > { %v2559_v56 = vcombine.high %v2557_v50, %v2557_v50  ;;  %v2581_v5 = vadd.f32 %v2542_v46, %v6901_v37  ;;  %v2600_v57 = vcombine.low %v2578_v31, %v2579_v40  ;;  %v7288_v1 = vadd.f32 %v2558_v52, %v6890_v34 }
 0x8c8   : > { %v7291_v48 = vadd.f32 %v2557_v50, %v6905_v38  ;;  %v7301_v37 = vadd.f32 %v2566_v21, %v6927_v54 }
 0x8c9   : > { %v2601_v32 = vcombine.low %v2580_v55, %v2581_v5  ;;  %v7294_v36 = vadd.f32 %v2559_v56, %v6893_v35  ;;  %v2617_v33 = vcombine.low %v7285_v53, %v7288_v1  ;;  %v2608_v3 = vrot.slane %v2600_v57, %v6880_v30 }
 0x8ca   : > { %v2634_v7 = vcombine.low %v7301_v37, %v7296_v62 }
 0x8cb   : > { %v2615_v34 = vrot.slane %v2601_v32, %v6880_v30  ;;  %v2618_v38 = vcombine.low %v7291_v48, %v7294_v36  ;;  %v2625_v35 = vrot.slane %v2617_v33, %v6880_v30 }
 0x8cc   : > { %v2641_v13 = vrot.slane %v2634_v7, %v6880_v30 }
 0x8cd   : > { %v2616_v6 = vcombine.low %v2608_v3, %v2615_v34  ;;  %v2632_v61 = vrot.slane %v2618_v38, %v6880_v30 }
 0x8ce   : > { %v2652_v9 = vsel %vm2651_vm15, %v2641_v13, 0.0 }
 0x8cf   : > { %v2645_v12 = vsel %vm1268_vm2, %v2616_v6, 0.0  ;;  %v2633_v54 = vcombine.low %v2625_v35, %v2632_v61 }
 0x8d0   : > { %2646 = vadd.xlane.f32.xlu1 %v2645_v12 }
 0x8d1   : > { %v2648_v11 = vsel %vm1268_vm2, %v2633_v54, 0.0 }
 0x8d2   : > { %2649 = vadd.xlane.f32.xlu0 %v2648_v11 }
 0x8d6   : > { %2653 = vadd.xlane.f32.xlu0 %v2652_v9 }
 0x95d   : > { %v2647_v24 = vpop.xlane.xlu1 %2646 }
 0x95e   : > { %v2656_v27 = vmul.f32 0.03125, %v2647_v24  ;;  %v3187_v24 = vsel %vm1268_vm2, %v6423_v41, 0 }
 0x95f   : > { %v2650_v21 = vpop.xlane.xlu0 %2649  ;;  %6232 = vmatpush3.bf16.xpose.msra.mxu0 %v3187_v24 }
 0x960   : > { %v2668_v44 = vrot.slane %v2656_v27, %v7319_v18  ;;  %v2675_v28 = vrot.slane %v2656_v27, %v7322_v49  ;;  %v2682_v15 = vrot.slane %v2656_v27, %v7325_v17  ;;  %v2689_v39 = vrot.slane %v2656_v27, %v7328_v51  ;;  %6261 = vmatprep.subr.bf16.mxu0 %v6590_v60  ;;  %v6424_v27 = vld [vmem:[%s6790_s27 + $0x8] sm:$0xff]   ;;  %s8217_s27 = scalar_lea.vmem %s8140_s15, %s6757_s7 }
 0x961   : > { %v2657_v29 = vmul.f32 0.03125, %v2650_v21  ;;  %v1170_v21 = vld [vmem:[%s8213_s10] sm:$0xff]  ;;  %6370 = vmatprep.subr.msk.bf16.mxu1 %vm1268_vm2, %v6424_v27 }
 0x962   : > { %v7334_v26 = vsub.f32 %v2578_v31, %v2668_v44  ;;  %v7336_v14 = vsub.f32 %v2579_v40, %v2675_v28  ;;  %v7338_v42 = vsub.f32 %v2580_v55, %v2682_v15  ;;  %v7340_v25 = vsub.f32 %v2581_v5, %v2689_v39  ;;  %v1171_v44 = vld [vmem:[%s8213_s10 + $0x8] sm:$0xff] }
 0x963   : > { %v2696_v45 = vrot.slane %v2657_v29, %v7319_v18  ;;  %v2703_v46 = vrot.slane %v2657_v29, %v7322_v49  ;;  %v2710_v50 = vrot.slane %v2657_v29, %v7325_v17  ;;  %v2717_v52 = vrot.slane %v2657_v29, %v7328_v51  ;;  %v2654_v56 = vpop.xlane.xlu0 %2653 }
 0x964   : > { %v2658_v57 = vmul.f32 0.03125, %v2654_v56  ;;  %v2752_v31 = vmul.f32 %v7334_v26, %v7334_v26  ;;  %v2753_v40 = vmul.f32 %v7336_v14, %v7336_v14  ;;  %v2754_v55 = vmul.f32 %v7338_v42, %v7338_v42 }
 0x965   : > { %v2755_v5 = vmul.f32 %v7340_v25, %v7340_v25  ;;  %v7355_v58 = vsub.f32 %v7285_v53, %v2696_v45  ;;  %v7358_v32 = vsub.f32 %v7288_v1, %v2703_v46  ;;  %v7361_v4 = vsub.f32 %v7291_v48, %v2710_v50 }
 0x966   : > { %v2724_v33 = vrot.slane %v2658_v57, %v7319_v18  ;;  %v2731_v3 = vrot.slane %v2658_v57, %v7322_v49  ;;  %v2772_v34 = vcombine.low %v2752_v31, %v2753_v40  ;;  %v7366_v38 = vsub.f32 %v7294_v36, %v2717_v52  ;;  %v5937_v31 = vld [vmem:[%s8215_s23] ss:$0 sm:$0xff] }
 0x967   : > { %v2773_v6 = vcombine.low %v2754_v55, %v2755_v5  ;;  %v2756_v35 = vmul.f32 %v7355_v58, %v7355_v58  ;;  %v2757_v53 = vmul.f32 %v7358_v32, %v7358_v32  ;;  %v2758_v1 = vmul.f32 %v7361_v4, %v7361_v4  ;;  %v5938_v40 = vld [vmem:[%s8216_s19] ss:$0 sm:$0xff] }
 0x968   : > { %v7375_v48 = vsub.f32 %v7301_v37, %v2724_v33  ;;  %v7378_v61 = vsub.f32 %v7296_v62, %v2731_v3  ;;  %v2780_v7 = vrot.slane %v2772_v34, %v6880_v30  ;;  %v2759_v36 = vmul.f32 %v7366_v38, %v7366_v38 }
 0x969   : > { %v2787_v12 = vrot.slane %v2773_v6, %v6880_v30  ;;  %v2789_v54 = vcombine.low %v2756_v35, %v2757_v53  ;;  %v3147_v28 = vpack.c.bf16 %v1171_v44, %v1170_v21  ;;  %v3088_v15 = vsel %vm1268_vm2, %v6424_v27, 0 }
 0x96a   : > { %v2790_v11 = vcombine.low %v2758_v1, %v2759_v36  ;;  %v2760_v13 = vmul.f32 %v7375_v48, %v7375_v48  ;;  %v2761_v37 = vmul.f32 %v7378_v61, %v7378_v61  ;;  %6220 = vmatpush3.bf16.xpose.msra.mxu1 %v3088_v15  ;;  %v2933_v5 = vcombine.high %v5937_v31, %v5937_v31 }
 0x96b   : > { %v2788_v9 = vcombine.low %v2780_v7, %v2787_v12  ;;  %v2797_v62 = vrot.slane %v2789_v54, %v6880_v30  ;;  %6234 = vmatmul.mubr.msk.bf16.vlgmr.msra.gmra.mrb[28].mxu0 %vm1268_vm2, %v3147_v28  ;;  %6237 = vmatprep.subr.bf16.mxu1 %v6590_v60  ;;  %v2969_v33 = vcombine.high %v5938_v40, %v5938_v40 }
 0x96c   : > { %v2804_v10 = vrot.slane %v2790_v11, %v6880_v30  ;;  %v2806_v16 = vcombine.low %v2760_v13, %v2761_v37  ;;  %6263 = vmatprep.mubr.msk.bf16.mxu0 %vm6591_vm3, %v6590_v60  ;;  %v2940_v3 = vrot.slane %v5937_v31, %v6880_v30  ;;  %v2947_v34 = vrot.slane %v2933_v5, %v6880_v30 }
 0x96d   : > { %v2817_v19 = vsel %vm1268_vm2, %v2788_v9, 0.0  ;;  %v2976_v6 = vrot.slane %v5938_v40, %v6880_v30  ;;  %v2983_v35 = vrot.slane %v2969_v33, %v6880_v30 }
 0x96e   : > { %2818 = vadd.xlane.f32.xlu1 %v2817_v19  ;;  %v2805_v47 = vcombine.low %v2797_v62, %v2804_v10  ;;  %v2813_v20 = vrot.slane %v2806_v16, %v6880_v30  ;;  %v2948_v1 = vcombine.high %v2940_v3, %v2940_v3  ;;  %v2949_v11 = vcombine.high %v2947_v34, %v2947_v34 }
 0x96f   : > { %v2984_v13 = vcombine.high %v2976_v6, %v2976_v6  ;;  %v2985_v37 = vcombine.high %v2983_v35, %v2983_v35 }
 0x970   : > { %v2820_v22 = vsel %vm1268_vm2, %v2805_v47, 0.0  ;;  %v2823_v23 = vsel %vm2651_vm15, %v2813_v20, 0.0 }
 0x971   : > { %2821 = vadd.xlane.f32.xlu0 %v2820_v22 }
 0x972   : > { %2824 = vadd.xlane.f32.xlu1 %v2823_v23 }
 0x9fb   : > { %v2819_v39 = vpop.xlane.xlu1 %2818 }
 0x9fc   : > { %v2826_v29 = vmul.f32 0.03125, %v2819_v39 }
 0x9fe   : > { %v2829_v45 = vadd.f32 1e-05, %v2826_v29  ;;  %v2822_v46 = vpop.xlane.xlu0 %2821 }
 0x9ff   : > { %v2827_v50 = vmul.f32 0.03125, %v2822_v46  ;;  %v2825_v52 = vpop.xlane.xlu1 %2824 }
 0xa00   : > { %6497 = vrsqrt.f32 %v2829_v45  ;;  %v2828_v56 = vmul.f32 0.03125, %v2825_v52 }
 0xa01   : > { %v2830_v57 = vadd.f32 1e-05, %v2827_v50 }
 0xa02   : > { %v2831_v55 = vadd.f32 1e-05, %v2828_v56 }
 0xa03   : > { %6499 = vrsqrt.f32 %v2830_v57 }
 0xa04   : > { %6501 = vrsqrt.f32 %v2831_v55 }
 0xa0a   : > { %v6498_v53 = vpop.eup %6497 }
 0xa0b   : > { %v2844_v7 = vrot.slane %v6498_v53, %v7319_v18  ;;  %v2851_v36 = vrot.slane %v6498_v53, %v7322_v49  ;;  %v2858_v12 = vrot.slane %v6498_v53, %v7325_v17  ;;  %v2865_v54 = vrot.slane %v6498_v53, %v7328_v51 }
 0xa0d   : > { %v6500_v9 = vpop.eup %6499  ;;  %v2918_v62 = vmul.f32 %v2844_v7, %v7334_v26  ;;  %v2919_v10 = vmul.f32 %v2851_v36, %v7336_v14  ;;  %v2920_v16 = vmul.f32 %v2858_v12, %v7338_v42  ;;  %v2921_v19 = vmul.f32 %v2865_v54, %v7340_v25  ;;  %v5944_v36 = vld [vmem:[%s8217_s27] ss:$0 sm:$0xff] }
 0xa0e   : > { %v6502_v47 = vpop.eup %6501  ;;  %v2872_v20 = vrot.slane %v6500_v9, %v7319_v18  ;;  %v2879_v22 = vrot.slane %v6500_v9, %v7322_v49  ;;  %v2886_v23 = vrot.slane %v6500_v9, %v7325_v17  ;;  %v2893_v59 = vrot.slane %v6500_v9, %v7328_v51 }
 0xa0f   : > { %v2900_v2 = vrot.slane %v6502_v47, %v7319_v18  ;;  %v2907_v43 = vrot.slane %v6502_v47, %v7322_v49  ;;  %v2954_v26 = vmul.f32 %v2940_v3, %v2918_v62  ;;  %v2955_v63 = vmul.f32 %v2948_v1, %v2919_v10 }
 0xa10   : > { %v2922_v14 = vmul.f32 %v2872_v20, %v7355_v58  ;;  %v2923_v42 = vmul.f32 %v2879_v22, %v7358_v32  ;;  %v2924_v25 = vmul.f32 %v2886_v23, %v7361_v4  ;;  %v2925_v0 = vmul.f32 %v2893_v59, %v7366_v38 }
 0xa11   : > { %v2926_v41 = vmul.f32 %v2900_v2, %v7375_v48  ;;  %v2927_v8 = vmul.f32 %v2907_v43, %v7378_v61  ;;  %v2956_v24 = vmul.f32 %v2947_v34, %v2920_v16  ;;  %v2957_v27 = vmul.f32 %v2949_v11, %v2921_v19  ;;  %v5939_v16 = vld [vmem:[%s8218_s25] ss:$0 sm:$0xff]  ;;  %s8225_s25 = sld [smem:[#allocation23_spill]] }
 0xa12   : > { %v2958_v21 = vmul.f32 %v2940_v3, %v2922_v14  ;;  %v2959_v44 = vmul.f32 %v2948_v1, %v2923_v42  ;;  %v2960_v28 = vmul.f32 %v2947_v34, %v2924_v25  ;;  %v2961_v15 = vmul.f32 %v2949_v11, %v2925_v0 }
 0xa13   : > { %v2962_v39 = vmul.f32 %v2940_v3, %v2926_v41  ;;  %v2963_v29 = vmul.f32 %v2948_v1, %v2927_v8  ;;  %v7453_v45 = vadd.f32 %v2976_v6, %v2954_v26  ;;  %v7455_v58 = vadd.f32 %v2984_v13, %v2955_v63  ;;  %v7513_v63 = vld [vmem:[%s8219_s20] ss:$0 sm:$0xff] }
 0xa14   : > { %v7457_v32 = vadd.f32 %v2983_v35, %v2956_v24  ;;  %v7459_v4 = vadd.f32 %v2985_v37, %v2957_v27  ;;  %v7461_v38 = vadd.f32 %v2976_v6, %v2958_v21  ;;  %v7463_v48 = vadd.f32 %v2984_v13, %v2959_v44 }
 0xa15   : > { %v7465_v61 = vadd.f32 %v2983_v35, %v2960_v28  ;;  %v7467_v46 = vadd.f32 %v2985_v37, %v2961_v15  ;;  %v3015_v50 = vcombine.low %v7453_v45, %v7455_v58  ;;  %v7471_v52 = vadd.f32 %v2976_v6, %v2962_v39 }
 0xa16   : > { %v3016_v56 = vcombine.low %v7457_v32, %v7459_v4  ;;  %v3032_v57 = vcombine.low %v7461_v38, %v7463_v48  ;;  %v7477_v31 = vadd.f32 %v2984_v13, %v2963_v29 }
 0xa17   : > { %v3023_v40 = vrot.slane %v3015_v50, %v6880_v30  ;;  %v3033_v55 = vcombine.low %v7465_v61, %v7467_v46  ;;  %s8226_s1 = scalar_lea.vmem %s8225_s25, %s6757_s7 }
 0xa18   : > { %v3030_v5 = vrot.slane %v3016_v56, %v6880_v30  ;;  %v3040_v33 = vrot.slane %v3032_v57, %v6880_v30  ;;  %v3049_v3 = vcombine.low %v7471_v52, %v7477_v31 }
 0xa19   : > { %v3047_v34 = vrot.slane %v3033_v55, %v6880_v30 }
 0xa1a   : > { %v3056_v6 = vrot.slane %v3049_v3, %v6880_v30  ;;  %v3031_v35 = vcombine.low %v3023_v40, %v3030_v5 }
 0xa1b   : > { %v3048_v53 = vcombine.low %v3040_v33, %v3047_v34 }
 0xa1c   : > { %v3061_v1 = vpack.c.bf16 %v3056_v6, %v3056_v6 }
 0xa1d   : > { %v3060_v7 = vpack.c.bf16 %v3048_v53, %v3031_v35 }
 0xa1f   : > { %6221 = vmatprep.mubr.msk.bf16.mxu1 %vm1268_vm2, %v3060_v7 }
 0xa20   : > { %6222 = vmatmul.mubr.msk.bf16.vlgmr.msra.gmra.mrb[44].mxu1 %vm1268_vm2, %v3061_v1 }
 0xa21   : > { %6239 = vmatprep.mubr.msk.bf16.mxu1 %vm6591_vm3, %v6590_v60 }
 0xa3e   : > { %v3223_v12 = vpop.f32.mrb[28].mxu0 }
 0xa3f   : > { %v6235_v54 = vpop.f32.mrb[29].mxu0  ;;  %v3224_v11 = vadd.f32 %v5944_v36, %v3223_v12 }
 0xa40   : > { %v3226_v13 = vpop.f32.mrb[30].mxu0 }
 0xa41   : > { %v3227_v37 = vadd.f32 %v5944_v36, %v3226_v13  ;;  %v6236_v9 = vpop.f32.mrb[31].mxu0  ;;  %v7497_v62 = vpack.c.bf16 %v3224_v11, %v3224_v11 }
 0xa43   : > { %v3250_v10 = vsel %vm1362_vm4, %v7497_v62, 0  ;;  %v7530_v21 = vpack.c.bf16 %v3227_v37, %v3227_v37 }
 0xa44   : > { %6238 = vmatpush3.bf16.xpose.msra.mxu1 %v3250_v10 }
 0xa45   : > { %6243 = vmatprep.subr.bf16.mxu1 %v6590_v60  ;;  %v3792_v54 = vsel %vm1362_vm4, %v7530_v21, 0 }
 0xaf3   : > { %v6223_v19 = vpop.f32.mrb[44].mxu1 }
 0xaf4   : > { %v3133_v47 = vadd.f32 %v6223_v19, %v5939_v16  ;;  %v3124_v20 = vpop.f32.mrb[45].mxu1 }
 0xaf5   : > { %v6224_v22 = vpop.f32.mrb[46].mxu1  ;;  %v3125_v59 = vadd.f32 %v5939_v16, %v3124_v20 }
 0xaf6   : > { %v3127_v23 = vpop.f32.mrb[47].mxu1 }
 0xaf7   : > { %v3128_v2 = vadd.f32 %v5939_v16, %v3127_v23 }
 0xaf9   : > { %v3238_v43 = vpack.c.bf16 %v3128_v2, %v3125_v59  ;;  %v3778_v26 = vpack.c.bf16 %v3133_v47, %v3128_v2 }
 0xafb   : > { %6240 = vmatmul.mubr.msk.bf16.vlgmr.msra.gmra.mrb[48].mxu1 %vm1362_vm4, %v3238_v43  ;;  %v3787_v44 = vrot.slane %v3778_v26, 1 }
 0xafc   : > { %6245 = vmatprep.mubr.msk.bf16.mxu1 %vm6591_vm3, %v6590_v60 }
 0xbce   : > { %v3286_v14 = vpop.f32.mrb[48].mxu1 }
 0xbcf   : > { %v3287_v42 = vadd.f32 %v7513_v63, %v3286_v14  ;;  %v6241_v25 = vpop.f32.mrb[49].mxu1 }
 0xbd0   : > { %v3289_v0 = vpop.f32.mrb[50].mxu1 }
 0xbd1   : > { %v3290_v41 = vadd.f32 %v7513_v63, %v3289_v0  ;;  %v6242_v8 = vpop.f32.mrb[51].mxu1  ;;  %v3293_v24 = vsel %vm1362_vm4, %v3287_v42, -inf }
 0xbd2   : > { %3294 = vmax.xlane.f32.xlu0 %v3293_v24 }
 0xbd3   : > { %v3296_v27 = vsel %vm1488_vm8, %v3290_v41, -inf }
 0xbd4   : > { %3297 = vmax.xlane.f32.xlu1 %v3296_v27 }
 0xbe5   : > { %3374 = vrot.lane.b32.xlu1 %v7497_v62, %s6596_s3 }
 0xbe8   : > { %3317 = vrot.lane.b32.xlu0 %v7497_v62, %s6593_s9 }
 0xbe9   : > { %3372 = vrot.lane.b32.xlu1 %v3238_v43, %s6596_s3 }
 0xbec   : > { %3509 = vrot.lane.b32.xlu0 %v7497_v62, %s6599_s0 }
 0xbed   : > { %3507 = vrot.lane.b32.xlu1 %v3238_v43, %s6599_s0 }
 0xbf0   : > { %3644 = vrot.lane.b32.xlu0 %v7497_v62, %s6600_s12 }
 0xbf1   : > { %3642 = vrot.lane.b32.xlu1 %v3238_v43, %s6600_s12 }
 0xbf4   : > { %3914 = vrot.lane.b32.xlu0 %v7530_v21, %s6596_s3 }
 0xbf5   : > { %3912 = vrot.lane.b32.xlu1 %v3787_v44, %s6596_s3 }
 0xbf8   : > { %4049 = vrot.lane.b32.xlu0 %v7530_v21, %s6599_s0 }
 0xbf9   : > { %4047 = vrot.lane.b32.xlu1 %v3787_v44, %s6599_s0 }
 0xbfc   : > { %4184 = vrot.lane.b32.xlu0 %v7530_v21, %s6600_s12 }
 0xbfd   : > { %4182 = vrot.lane.b32.xlu1 %v3787_v44, %s6600_s12  ;;  %s8222_s12 = sld [smem:[#allocation7_spill]] }
 0xc5f   : > { %v3295_v28 = vpop.xlane.xlu0 %3294 }
 0xc60   : > { %v3299_v15 = vsub.f32 %v3287_v42, %v3295_v28 }
 0xc61   : > { %v3298_v39 = vpop.xlane.xlu1 %3297 }
 0xc62   : > { %v3301_v29 = vmul.f32 1.442695, %v3299_v15  ;;  %v3300_v50 = vsub.f32 %v3290_v41, %v3298_v39 }
 0xc63   : > { %v3318_v56 = vpop.permute.xlu0 %3317 }
 0xc64   : > { %v3303_v57 = vmul.f32 1.442695, %v3300_v50  ;;  %v3324_v40 = vsel %vm3322_vm0, %v3318_v56, 0  ;;  %6503 = vpow2.f32 %v3301_v29 }
 0xc65   : > { %6244 = vmatpush3.bf16.msra.mxu1 %v3324_v40  ;;  %v3375_v55 = vpop.permute.xlu1 %3374 }
 0xc66   : > { %6505 = vpow2.f32 %v3303_v57  ;;  %6249 = vmatprep.subr.bf16.mxu1 %v6590_v60  ;;  %v3380_v36 = vsel %vm1362_vm4, %v3375_v55, 0 }
 0xc67   : > { %v3510_v5 = vpop.permute.xlu0 %3509 }
 0xc68   : > { %v3515_v33 = vsel %vm1362_vm4, %v3510_v5, 0  ;;  %v5959_v5 = vld [vmem:[%s8219_s20 + $0x1] ss:$0 sm:$0xff] }
 0xc69   : > { %6262 = vmatpush3.bf16.xpose.msra.mxu0 %v3515_v33  ;;  %v3373_v3 = vpop.permute.xlu1 %3372 }
 0xc6a   : > { %6273 = vmatprep.subr.bf16.mxu0 %v6590_v60 }
 0xc6b   : > { %v3645_v34 = vpop.permute.xlu0 %3644 }
 0xc6c   : > { %v3650_v1 = vsel %vm1362_vm4, %v3645_v34, 0 }
 0xc6d   : > { %v3508_v35 = vpop.permute.xlu1 %3507 }
 0xc6e   : > { %v7545_v6 = vpop.eup %6503 }
 0xc6f   : > { %v3915_v11 = vpop.permute.xlu0 %3914 }
 0xc70   : > { %v7547_v53 = vpop.eup %6505  ;;  %6264 = vmatmul.mubr.msk.bf16.vlgmr.msra.gmra.mrb[32].mxu0 %vm1362_vm4, %v3508_v35  ;;  %v3920_v13 = vsel %vm1362_vm4, %v3915_v11, 0 }
 0xc71   : > { %6274 = vmatpush3.bf16.xpose.msra.mxu0 %v3650_v1  ;;  %v3315_v7 = vpack.c.bf16 %v7547_v53, %v7545_v6  ;;  %6275 = vmatprep.mubr.msk.bf16.mxu0 %vm6591_vm3, %v6590_v60  ;;  %v3643_v12 = vpop.permute.xlu1 %3642 }
 0xc72   : > { %6285 = vmatprep.subr.bf16.mxu0 %v6590_v60 }
 0xc73   : > { %6246 = vmatmul.mubr.msk.bf16.vlgmr.msra.gmra.mrb[52].mxu1 %vm1362_vm4, %v3315_v7  ;;  %v4050_v37 = vpop.permute.xlu0 %4049 }
 0xc74   : > { %6250 = vmatpush3.bf16.xpose.msra.mxu1 %v3380_v36  ;;  %6251 = vmatprep.mubr.msk.bf16.mxu1 %vm6591_vm3, %v6590_v60  ;;  %v4055_v10 = vsel %vm1362_vm4, %v4050_v37, 0 }
 0xc75   : > { %6255 = vmatprep.subr.bf16.mxu1 %v6590_v60  ;;  %v3913_v9 = vpop.permute.xlu1 %3912 }
 0xc77   : > { %v4185_v16 = vpop.permute.xlu0 %4184 }
 0xc78   : > { %6276 = vmatmul.mubr.msk.bf16.vlgmr.msra.gmra.mrb[36].mxu0 %vm1362_vm4, %v3643_v12  ;;  %v4190_v47 = vsel %vm1362_vm4, %v4185_v16, 0 }
 0xc79   : > { %6286 = vmatpush3.bf16.xpose.msra.mxu0 %v3792_v54  ;;  %6287 = vmatprep.mubr.msk.bf16.mxu0 %vm6591_vm3, %v6590_v60  ;;  %v4048_v19 = vpop.permute.xlu1 %4047 }
 0xc7a   : > { %6297 = vmatprep.subr.bf16.mxu0 %v6590_v60 }
 0xc7b   : > { %6252 = vmatmul.mubr.msk.bf16.vlgmr.msra.gmra.mrb[56].mxu1 %vm1362_vm4, %v3373_v3 }
 0xc7c   : > { %6257 = vmatprep.mubr.msk.bf16.mxu1 %vm6591_vm3, %v6590_v60 }
 0xc7d   : > { %v4183_v20 = vpop.permute.xlu1 %4182 }
 0xc80   : > { %6288 = vmatmul.mubr.msk.bf16.vlgmr.msra.gmra.mrb[40].mxu0 %vm1362_vm4, %v3787_v44 }
 0xc81   : > { %6298 = vmatpush3.bf16.xpose.msra.mxu0 %v3920_v13  ;;  %6299 = vmatprep.mubr.msk.bf16.mxu0 %vm6591_vm3, %v6590_v60 }
 0xc82   : > { %6309 = vmatprep.subr.bf16.mxu0 %v6590_v60 }
 0xc88   : > { %6300 = vmatmul.mubr.msk.bf16.vlgmr.msra.gmra.mrb[44].mxu0 %vm1362_vm4, %v3913_v9 }
 0xc89   : > { %6310 = vmatpush3.bf16.xpose.msra.mxu0 %v4055_v10  ;;  %6311 = vmatprep.mubr.msk.bf16.mxu0 %vm6591_vm3, %v6590_v60 }
 0xc8a   : > { %6321 = vmatprep.subr.bf16.mxu0 %v6590_v60 }
 0xc90   : > { %6312 = vmatmul.mubr.msk.bf16.vlgmr.msra.gmra.mrb[48].mxu0 %vm1362_vm4, %v4048_v19 }
 0xc91   : > { %6322 = vmatpush3.bf16.xpose.msra.mxu0 %v4190_v47  ;;  %6323 = vmatprep.mubr.msk.bf16.mxu0 %vm6591_vm3, %v6590_v60 }
 0xc98   : > { %6324 = vmatmul.mubr.msk.bf16.vlgmr.msra.gmra.mrb[52].mxu0 %vm1362_vm4, %v4183_v20 }
 0xd43   : > { %v3551_v22 = vpop.f32.mrb[32].mxu0 }
 0xd44   : > { %v7586_v23 = vadd.f32 %v7513_v63, %v3551_v22  ;;  %v6265_v59 = vpop.f32.mrb[33].mxu0 }
 0xd45   : > { %v3554_v2 = vpop.f32.mrb[34].mxu0 }
 0xd46   : > { %v7589_v43 = vadd.f32 %v7513_v63, %v3554_v2  ;;  %v7591_v26 = vpop.f32.mrb[52].mxu1  ;;  %v6266_v14 = vpop.f32.mrb[35].mxu0  ;;  %v3558_v42 = vsel %vm1362_vm4, %v7586_v23, -inf }
 0xd47   : > { %3559 = vmax.xlane.f32.xlu0 %v3558_v42  ;;  %v6247_v25 = vpop.f32.mrb[53].mxu1 }
 0xd48   : > { %v7595_v0 = vpop.f32.mrb[54].mxu1  ;;  %v3561_v8 = vsel %vm1488_vm8, %v7589_v43, -inf }
 0xd49   : > { %v6248_v41 = vpop.f32.mrb[55].mxu1 }
 0xd4b   : > { %3562 = vmax.xlane.f32.xlu0 %v3561_v8  ;;  %v3686_v24 = vpop.f32.mrb[36].mxu0 }
 0xd4c   : > { %v7600_v27 = vadd.f32 %v7513_v63, %v3686_v24  ;;  %v6277_v44 = vpop.f32.mrb[37].mxu0 }
 0xd4d   : > { %v3689_v28 = vpop.f32.mrb[38].mxu0 }
 0xd4e   : > { %v7603_v15 = vadd.f32 %v7513_v63, %v3689_v28  ;;  %v3416_v39 = vpop.f32.mrb[56].mxu1  ;;  %v6278_v29 = vpop.f32.mrb[39].mxu0  ;;  %v3693_v50 = vsel %vm1362_vm4, %v7600_v27, -inf }
 0xd4f   : > { %3694 = vmax.xlane.f32.xlu1 %v3693_v50  ;;  %v6253_v56 = vpop.f32.mrb[57].mxu1  ;;  %v7622_v54 = vadd.f32 %v7513_v63, %v3416_v39 }
 0xd50   : > { %v3419_v57 = vpop.f32.mrb[58].mxu1  ;;  %v3696_v40 = vsel %vm1488_vm8, %v7603_v15, -inf }
 0xd51   : > { %3697 = vmax.xlane.f32.xlu0 %v3696_v40  ;;  %v6254_v55 = vpop.f32.mrb[59].mxu1  ;;  %v7615_v1 = vadd.f32 %v7513_v63, %v3419_v57  ;;  %v3423_v16 = vsel %vm1362_vm4, %v7622_v54, -inf }
 0xd53   : > { %v3828_v33 = vpop.f32.mrb[40].mxu0  ;;  %v3426_v13 = vsel %vm1488_vm8, %v7615_v1, -inf }
 0xd54   : > { %v7612_v3 = vadd.f32 %v5959_v5, %v3828_v33  ;;  %v6289_v34 = vpop.f32.mrb[41].mxu0 }
 0xd55   : > { %v3831_v35 = vpop.f32.mrb[42].mxu0 }
 0xd56   : > { %v7617_v7 = vadd.f32 %v5959_v5, %v3831_v35  ;;  %v6290_v36 = vpop.f32.mrb[43].mxu0  ;;  %v3835_v12 = vsel %vm1362_vm4, %v7612_v3, -inf }
 0xd57   : > { %3836 = vmax.xlane.f32.xlu1 %v3835_v12 }
 0xd58   : > { %v3838_v11 = vsel %vm1488_vm8, %v7617_v7, -inf }
 0xd59   : > { %3839 = vmax.xlane.f32.xlu0 %v3838_v11 }
 0xd5b   : > { %v3956_v37 = vpop.f32.mrb[44].mxu0  ;;  %3427 = vmax.xlane.f32.xlu1 %v3426_v13 }
 0xd5c   : > { %v7628_v9 = vadd.f32 %v5959_v5, %v3956_v37  ;;  %v6301_v10 = vpop.f32.mrb[45].mxu0 }
 0xd5d   : > { %v3959_v19 = vpop.f32.mrb[46].mxu0  ;;  %3424 = vmax.xlane.f32.xlu0 %v3423_v16 }
 0xd5e   : > { %v6302_v47 = vpop.f32.mrb[47].mxu0  ;;  %v7632_v63 = vadd.f32 %v5959_v5, %v3959_v19  ;;  %v3963_v20 = vsel %vm1362_vm4, %v7628_v9, -inf }
 0xd60   : > { %v3966_v2 = vsel %vm1488_vm8, %v7632_v63, -inf }
 0xd61   : > { %3964 = vmax.xlane.f32.xlu0 %v3963_v20 }
 0xd63   : > { %v4091_v22 = vpop.f32.mrb[48].mxu0 }
 0xd64   : > { %v6313_v59 = vpop.f32.mrb[49].mxu0  ;;  %v7648_v29 = vadd.f32 %v5959_v5, %v4091_v22 }
 0xd65   : > { %v4094_v14 = vpop.f32.mrb[50].mxu0  ;;  %3967 = vmax.xlane.f32.xlu0 %v3966_v2 }
 0xd66   : > { %v7638_v42 = vadd.f32 %v5959_v5, %v4094_v14  ;;  %v6314_v25 = vpop.f32.mrb[51].mxu0  ;;  %v4098_v50 = vsel %vm1362_vm4, %v7648_v29, -inf }
 0xd68   : > { %v4101_v56 = vsel %vm1488_vm8, %v7638_v42, -inf }
 0xd6b   : > { %v4226_v41 = vpop.f32.mrb[52].mxu0 }
 0xd6c   : > { %v7640_v8 = vadd.f32 %v5959_v5, %v4226_v41  ;;  %v6325_v24 = vpop.f32.mrb[53].mxu0  ;;  %3446 = vrot.lane.b32.xlu1 %v7497_v62, %s6594_s4 }
 0xd6d   : > { %v4229_v44 = vpop.f32.mrb[54].mxu0 }
 0xd6e   : > { %v7644_v28 = vadd.f32 %v5959_v5, %v4229_v44  ;;  %v6326_v39 = vpop.f32.mrb[55].mxu0  ;;  %v4233_v57 = vsel %vm1362_vm4, %v7640_v8, -inf }
 0xd70   : > { %v4236_v40 = vsel %vm1488_vm8, %v7644_v28, -inf }
 0xd7b   : > { %3581 = vrot.lane.b32.xlu0 %v7497_v62, %s6598_s2 }
 0xd90   : > { %4099 = vmax.xlane.f32.xlu1 %v4098_v50 }
 0xd9a   : > { %4102 = vmax.xlane.f32.xlu0 %v4101_v56 }
 0xd9e   : > { %4234 = vmax.xlane.f32.xlu0 %v4233_v57 }
 0xda1   : > { %3716 = vrot.lane.b32.xlu1 %v7497_v62, %s6597_s29 }
 0xda2   : > { %4237 = vmax.xlane.f32.xlu0 %v4236_v40 }
 0xda5   : > { %3859 = vrot.lane.b32.xlu1 %v7530_v21, %s6593_s9  ;;  %s8220_s9 = sld [smem:[#allocation6_spill]] }
 0xda9   : > { %4121 = vrot.lane.b32.xlu1 %v7530_v21, %s6598_s2  ;;  %s8221_s2 = scalar_lea.vmem %s8142_s17, %s6757_s7 }
 0xdad   : > { %4256 = vrot.lane.b32.xlu1 %v7530_v21, %s6597_s29 }
 0xdb8   : > { %3986 = vrot.lane.b32.xlu0 %v7530_v21, %s6594_s4  ;;  %s8228_s4 = sld [smem:[#allocation27_spill]] }
 0xdbe   : > { %s8229_s29 = scalar_lea.vmem %s8228_s4, %s6757_s7 }
 0xdd4   : > { %v3560_v55 = vpop.xlane.xlu0 %3559 }
 0xdd8   : > { %v3563_v5 = vpop.xlane.xlu0 %3562 }
 0xdd9   : > { %v3565_v62 = vsub.f32 %v7589_v43, %v3563_v5  ;;  %v3564_v43 = vsub.f32 %v7586_v23, %v3560_v55 }
 0xddb   : > { %v3568_v33 = vmul.f32 1.442695, %v3565_v62 }
 0xddc   : > { %v3695_v34 = vpop.xlane.xlu1 %3694 }
 0xddd   : > { %6507 = vpow2.f32 %v3568_v33  ;;  %v3699_v23 = vsub.f32 %v7600_v27, %v3695_v34 }
 0xdde   : > { %v3698_v35 = vpop.xlane.xlu0 %3697 }
 0xddf   : > { %v3701_v39 = vmul.f32 1.442695, %v3699_v23 }
 0xde4   : > { %v3837_v36 = vpop.xlane.xlu1 %3836 }
 0xde6   : > { %v3840_v12 = vpop.xlane.xlu0 %3839 }
 0xde7   : > { %v6508_v11 = vpop.eup %6507 }
 0xde8   : > { %v3428_v13 = vpop.xlane.xlu1 %3427  ;;  %v3573_v37 = vsel %vm1488_vm8, %v6508_v11, 0.0 }
 0xde9   : > { %v3430_v10 = vsub.f32 %v7615_v1, %v3428_v13  ;;  %3574 = vadd.xlane.f32.xlu0 %v3573_v37  ;;  %v3566_v1 = vmul.f32 1.442695, %v3564_v43  ;;  %v3700_v13 = vsub.f32 %v7603_v15, %v3698_v35 }
 0xdea   : > { %v3425_v16 = vpop.xlane.xlu0 %3424 }
 0xdeb   : > { %v3433_v19 = vmul.f32 1.442695, %v3430_v10  ;;  %v3429_v21 = vsub.f32 %v7622_v54, %v3425_v16  ;;  %v3703_v37 = vmul.f32 1.442695, %v3700_v13  ;;  %v3841_v10 = vsub.f32 %v7612_v3, %v3837_v36 }
 0xdec   : > { %v3447_v47 = vpop.permute.xlu1 %3446 }
 0xded   : > { %v3431_v20 = vmul.f32 1.442695, %v3429_v21  ;;  %v3452_v22 = vsel %vm3322_vm0, %v3447_v47, 0  ;;  %6509 = vpow2.f32 %v3433_v19  ;;  %v3843_v19 = vmul.f32 1.442695, %v3841_v10 }
 0xdee   : > { %v3965_v59 = vpop.xlane.xlu0 %3964  ;;  %6256 = vmatpush3.bf16.msra.mxu1 %v3452_v22 }
 0xdef   : > { %6511 = vpow2.f32 %v3431_v20  ;;  %v3969_v2 = vsub.f32 %v7628_v9, %v3965_v59  ;;  %6267 = vmatprep.subr.bf16.mxu1 %v6590_v60 }
 0xdf1   : > { %v3971_v14 = vmul.f32 1.442695, %v3969_v2 }
 0xdf2   : > { %v3968_v25 = vpop.xlane.xlu0 %3967 }
 0xdf3   : > { %6513 = vpow2.f32 %v3971_v14  ;;  %v3970_v54 = vsub.f32 %v7632_v63, %v3968_v25 }
 0xdf4   : > { %6515 = vpow2.f32 %v3566_v1 }
 0xdf5   : > { %v3973_v41 = vmul.f32 1.442695, %v3970_v54 }
 0xdf6   : > { %v3582_v50 = vpop.permute.xlu0 %3581 }
 0xdf7   : > { %v7678_v24 = vpop.eup %6509  ;;  %6517 = vpow2.f32 %v3973_v41  ;;  %v3587_v56 = vsel %vm3322_vm0, %v3582_v50, 0 }
 0xdf8   : > { %6519 = vpow2.f32 %v3701_v39 }
 0xdf9   : > { %v7680_v44 = vpop.eup %6511  ;;  %6521 = vpow2.f32 %v3703_v37  ;;  %v3305_v37 = vsel %vm1362_vm4, %v7545_v6, 0.0 }
 0xdfa   : > { %v3445_v9 = vpack.c.bf16 %v7678_v24, %v7680_v44 }
 0xdfc   : > { %6258 = vmatmul.mubr.msk.bf16.vlgmr.msra.gmra.mrb[60].mxu1 %vm1362_vm4, %v3445_v9 }
 0xdfd   : > { %v7686_v57 = vpop.eup %6513  ;;  %6268 = vmatpush3.bf16.msra.mxu1 %v3587_v56  ;;  %6269 = vmatprep.mubr.msk.bf16.mxu1 %vm6591_vm3, %v6590_v60 }
 0xdfe   : > { %v3975_v27 = vsel %vm1362_vm4, %v7686_v57, 0.0  ;;  %6279 = vmatprep.subr.bf16.mxu1 %v6590_v60  ;;  %v6516_v63 = vpop.eup %6515 }
 0xdff   : > { %3976 = vadd.xlane.f32.xlu1 %v3975_v27  ;;  %v3570_v40 = vsel %vm1362_vm4, %v6516_v63, 0.0  ;;  %v3580_v55 = vpack.c.bf16 %v6508_v11, %v6516_v63  ;;  %v3842_v11 = vsub.f32 %v7617_v7, %v3840_v12  ;;  %v3438_v63 = vsel %vm1488_vm8, %v7678_v24, 0.0 }
 0xe00   : > { %v3435_v24 = vsel %vm1362_vm4, %v7680_v44, 0.0  ;;  %v3308_v44 = vsel %vm1488_vm8, %v7547_v53, 0.0 }
 0xe01   : > { %v7694_v5 = vpop.eup %6517  ;;  %v3845_v16 = vmul.f32 1.442695, %v3842_v11 }
 0xe02   : > { %v3978_v62 = vsel %vm1488_vm8, %v7694_v5, 0.0  ;;  %v6520_v33 = vpop.eup %6519 }
 0xe03   : > { %3571 = vadd.xlane.f32.xlu1 %v3570_v40  ;;  %v3705_v34 = vsel %vm1362_vm4, %v6520_v33, 0.0  ;;  %6523 = vpow2.f32 %v3845_v16  ;;  %v6522_v20 = vpop.eup %6521 }
 0xe04   : > { %6270 = vmatmul.mubr.msk.bf16.vlgmr.msra.gmra.mrb[64].mxu1 %vm1362_vm4, %v3580_v55  ;;  %6525 = vpow2.f32 %v3843_v19  ;;  %v3715_v15 = vpack.c.bf16 %v6522_v20, %v6520_v33  ;;  %v3708_v50 = vsel %vm1488_vm8, %v6522_v20, 0.0  ;;  %v3985_v55 = vpack.c.bf16 %v7694_v5, %v7686_v57 }
 0xe05   : > { %6281 = vmatprep.mubr.msk.bf16.mxu1 %vm6591_vm3, %v6590_v60 }
 0xe07   : > { %3979 = vadd.xlane.f32.xlu1 %v3978_v62 }
 0xe0b   : > { %3706 = vadd.xlane.f32.xlu1 %v3705_v34 }
 0xe0d   : > { %v6524_v36 = vpop.eup %6523 }
 0xe0e   : > { %v6526_v2 = vpop.eup %6525  ;;  %v3850_v6 = vsel %vm1488_vm8, %v6524_v36, 0.0 }
 0xe0f   : > { %v3857_v54 = vpack.c.bf16 %v6524_v36, %v6526_v2  ;;  %v3847_v16 = vsel %vm1362_vm4, %v6526_v2, 0.0 }
 0xe1d   : > { %v4100_v21 = vpop.xlane.xlu1 %4099 }
 0xe1e   : > { %v4104_v47 = vsub.f32 %v7648_v29, %v4100_v21 }
 0xe20   : > { %v4106_v43 = vmul.f32 1.442695, %v4104_v47 }
 0xe21   : > { %v3717_v22 = vpop.permute.xlu1 %3716 }
 0xe22   : > { %6527 = vpow2.f32 %v4106_v43  ;;  %v3722_v59 = vsel %vm3322_vm0, %v3717_v22, 0 }
 0xe23   : > { %6280 = vmatpush3.bf16.msra.mxu1 %v3722_v59 }
 0xe24   : > { %6291 = vmatprep.subr.bf16.mxu1 %v6590_v60 }
 0xe25   : > { %v3860_v7 = vpop.permute.xlu1 %3859 }
 0xe26   : > { %v3865_v3 = vsel %vm3322_vm0, %v3860_v7, 0  ;;  %6282 = vmatmul.mubr.msk.bf16.vlgmr.msra.gmra.mrb[68].mxu1 %vm1362_vm4, %v3715_v15 }
 0xe27   : > { %v4103_v35 = vpop.xlane.xlu0 %4102  ;;  %6292 = vmatpush3.bf16.msra.mxu1 %v3865_v3  ;;  %6293 = vmatprep.mubr.msk.bf16.mxu1 %vm6591_vm3, %v6590_v60 }
 0xe28   : > { %v4105_v29 = vsub.f32 %v7638_v42, %v4103_v35  ;;  %6303 = vmatprep.subr.bf16.mxu1 %v6590_v60 }
 0xe29   : > { %v4122_v27 = vpop.permute.xlu1 %4121 }
 0xe2a   : > { %v4108_v12 = vmul.f32 1.442695, %v4105_v29  ;;  %v4127_v62 = vsel %vm3322_vm0, %v4122_v27, 0 }
 0xe2b   : > { %v4235_v1 = vpop.xlane.xlu0 %4234 }
 0xe2c   : > { %v6528_v14 = vpop.eup %6527  ;;  %6529 = vpow2.f32 %v4108_v12  ;;  %v4239_v25 = vsub.f32 %v7640_v8, %v4235_v1 }
 0xe2d   : > { %v4110_v23 = vsel %vm1362_vm4, %v6528_v14, 0.0  ;;  %v4257_v34 = vpop.permute.xlu1 %4256 }
 0xe2e   : > { %v4241_v41 = vmul.f32 1.442695, %v4239_v25  ;;  %4111 = vadd.xlane.f32.xlu0 %v4110_v23  ;;  %6294 = vmatmul.mubr.msk.bf16.vlgmr.msra.gmra.mrb[72].mxu1 %vm1362_vm4, %v3857_v54  ;;  %v4262_v10 = vsel %vm3322_vm0, %v4257_v34, 0 }
 0xe2f   : > { %v4238_v39 = vpop.xlane.xlu0 %4237  ;;  %6305 = vmatprep.mubr.msk.bf16.mxu1 %vm6591_vm3, %v6590_v60 }
 0xe30   : > { %6531 = vpow2.f32 %v4241_v41  ;;  %v4240_v42 = vsub.f32 %v7644_v28, %v4238_v39 }
 0xe32   : > { %v4243_v9 = vmul.f32 1.442695, %v4240_v42  ;;  %3709 = vadd.xlane.f32.xlu0 %v3708_v50 }
 0xe33   : > { %v3987_v56 = vpop.permute.xlu0 %3986 }
 0xe34   : > { %6533 = vpow2.f32 %v4243_v9  ;;  %v3992_v8 = vsel %vm3322_vm0, %v3987_v56, 0 }
 0xe35   : > { %6304 = vmatpush3.bf16.msra.mxu1 %v3992_v8 }
 0xe36   : > { %v6530_v40 = vpop.eup %6529  ;;  %3439 = vadd.xlane.f32.xlu0 %v3438_v63  ;;  %6315 = vmatprep.subr.bf16.mxu1 %v6590_v60 }
 0xe37   : > { %v4113_v28 = vsel %vm1488_vm8, %v6530_v40, 0.0  ;;  %v4120_v11 = vpack.c.bf16 %v6530_v40, %v6528_v14 }
 0xe38   : > { %4114 = vadd.xlane.f32.xlu1 %v4113_v28  ;;  %6306 = vmatmul.mubr.msk.bf16.vlgmr.msra.gmra.mrb[76].mxu1 %vm1362_vm4, %v3985_v55 }
 0xe39   : > { %6316 = vmatpush3.bf16.msra.mxu1 %v4127_v62  ;;  %6317 = vmatprep.mubr.msk.bf16.mxu1 %vm6591_vm3, %v6590_v60 }
 0xe3a   : > { %v6532_v33 = vpop.eup %6531  ;;  %6327 = vmatprep.subr.bf16.mxu1 %v6590_v60 }
 0xe3b   : > { %v4245_v57 = vsel %vm1362_vm4, %v6532_v33, 0.0 }
 0xe3c   : > { %3436 = vadd.xlane.f32.xlu1 %v3435_v24  ;;  %4246 = vadd.xlane.f32.xlu0 %v4245_v57 }
 0xe3e   : > { %v6534_v5 = vpop.eup %6533 }
 0xe3f   : > { %v4248_v13 = vsel %vm1488_vm8, %v6534_v5, 0.0  ;;  %v4255_v19 = vpack.c.bf16 %v6534_v5, %v6532_v33 }
 0xe40   : > { %4249 = vadd.xlane.f32.xlu1 %v4248_v13  ;;  %3306 = vadd.xlane.f32.xlu0 %v3305_v37 }
 0xe41   : > { %6318 = vmatmul.mubr.msk.bf16.vlgmr.msra.gmra.mrb[80].mxu1 %vm1362_vm4, %v4120_v11 }
 0xe42   : > { %6328 = vmatpush3.bf16.msra.mxu1 %v4262_v10  ;;  %6329 = vmatprep.mubr.msk.bf16.mxu1 %vm6591_vm3, %v6590_v60  ;;  %vm5656_vm3 = vcmask 254976  }
 0xe44   : > { %3309 = vadd.xlane.f32.xlu1 %v3308_v44  ;;  %3848 = vadd.xlane.f32.xlu0 %v3847_v16 }
 0xe48   : > { %3851 = vadd.xlane.f32.xlu1 %v3850_v6 }
 0xe49   : > { %6330 = vmatmul.mubr.msk.bf16.vlgmr.msra.gmra.mrb[84].mxu1 %vm1362_vm4, %v4255_v19 }
 0xe76   : > { %v3575_v43 = vpop.xlane.xlu0 %3574 }
 0xe8c   : > { %v3977_v21 = vpop.xlane.xlu1 %3976 }
 0xe90   : > { %v3572_v47 = vpop.xlane.xlu1 %3571 }
 0xe94   : > { %v7748_v20 = vpop.xlane.xlu1 %3979 }
 0xe98   : > { %v3707_v59 = vpop.xlane.xlu1 %3706 }
 0xebb   : > { %v7750_v22 = vpop.xlane.xlu0 %4111 }
 0xebf   : > { %v3710_v60 = vpop.xlane.xlu0 %3709 }
 0xec3   : > { %v3440_v53 = vpop.xlane.xlu0 %3439 }
 0xec4   : > { %6535 = vrcp.f32 %v3440_v53 }
 0xec5   : > { %v7752_v15 = vpop.xlane.xlu1 %4114 }
 0xec9   : > { %v7754_v7 = vpop.xlane.xlu0 %4246  ;;  %v3437_v3 = vpop.xlane.xlu1 %3436 }
 0xeca   : > { %6537 = vrcp.f32 %v3437_v3 }
 0xecb   : > { %6539 = vrcp.f32 %v3572_v47 }
 0xecd   : > { %v3307_v35 = vpop.xlane.xlu0 %3306  ;;  %v7756_v29 = vpop.xlane.xlu1 %4249 }
 0xece   : > { %6541 = vrcp.f32 %v3307_v35  ;;  %v6536_v1 = vpop.eup %6535  ;;  %v6425_v35 = vld [vmem:[%s8220_s9] sm:$0xff]  }
 0xecf   : > { %6543 = vrcp.f32 %v3575_v43  ;;  %v3488_v36 = vpop.f32.mrb[60].mxu1  ;;  %6371 = vmatprep.subr.msk.bf16.mxu0 %vm1268_vm2, %v6425_v35 }
 0xed0   : > { %v6259_v12 = vpop.f32.mrb[61].mxu1 }
 0xed1   : > { %v3310_v2 = vpop.xlane.xlu1 %3309  ;;  %v3491_v14 = vpop.f32.mrb[62].mxu1 }
 0xed2   : > { %6545 = vrcp.f32 %v3310_v2  ;;  %v3496_v25 = vmul.f32 %v6536_v1, %v3491_v14  ;;  %v6260_v54 = vpop.f32.mrb[63].mxu1  ;;  %v3849_v33 = vpop.xlane.xlu0 %3848  ;;  %v4345_v1 = vsel %vm1268_vm2, %v6425_v35, 0  ;;  %v6426_v14 = vld [vmem:[%s8220_s9 + $0x8] sm:$0xff]  }
 0xed3   : > { %6547 = vrcp.f32 %v3707_v59  ;;  %6334 = vmatpush3.bf16.xpose.msra.mxu0 %v4345_v1 }
 0xed4   : > { %v6538_v23 = vpop.eup %6537  ;;  %3501 = vrot.lane.b32.xlu1 %v3496_v25, %s6603_s30  ;;  %6549 = vrcp.f32 %v3710_v60  ;;  %6372 = vmatprep.subr.msk.bf16.mxu0 %vm1268_vm2, %v6426_v14 }
 0xed5   : > { %v3495_v41 = vmul.f32 %v6538_v23, %v3488_v36  ;;  %v6540_v39 = vpop.eup %6539  ;;  %v3852_v24 = vpop.xlane.xlu1 %3851  ;;  %6551 = vrcp.f32 %v3849_v33 }
 0xed6   : > { %6553 = vrcp.f32 %v3852_v24 }
 0xed7   : > { %v3623_v42 = vpop.f32.mrb[64].mxu1  ;;  %3499 = vrot.lane.b32.xlu0 %v3495_v41, %s6603_s30  ;;  %6555 = vrcp.f32 %v3977_v21 }
 0xed8   : > { %v6542_v50 = vpop.eup %6541  ;;  %v3630_v9 = vmul.f32 %v6540_v39, %v3623_v42  ;;  %v6271_v56 = vpop.f32.mrb[65].mxu1  ;;  %6557 = vrcp.f32 %v7748_v20  ;;  %v4348_v39 = vsel %vm1268_vm2, %v6426_v14, 0 }
 0xed9   : > { %v6544_v8 = vpop.eup %6543  ;;  %v3367_v27 = vmul.f32 %v6542_v50, %v7591_v26  ;;  %v3626_v63 = vpop.f32.mrb[66].mxu1  ;;  %6559 = vrcp.f32 %v7750_v22 }
 0xeda   : > { %v3631_v40 = vmul.f32 %v6544_v8, %v3626_v63  ;;  %v6272_v55 = vpop.f32.mrb[67].mxu1  ;;  %6561 = vrcp.f32 %v7752_v15 }
 0xedb   : > { %3369 = vst.msk [vmem:[#allocation3] sm:$0xff] %vm1362_vm4, %v3367_v27  ;;  %3634 = vrot.lane.b32.xlu0 %v3630_v9, %s6604_s26  ;;  %6563 = vrcp.f32 %v7754_v7  ;;  %6336 = vmatpush3.bf16.xpose.msra.mxu0 %v4348_v39 }
 0xedc   : > { %3636 = vrot.lane.b32.xlu1 %v3631_v40, %s6604_s26  ;;  %v6546_v28 = vpop.eup %6545  ;;  %6565 = vrcp.f32 %v7756_v29 }
 0xedd   : > { %v3368_v62 = vmul.f32 %v6546_v28, %v7595_v0  ;;  %v6548_v26 = vpop.eup %6547 }
 0xede   : > { %v6550_v13 = vpop.eup %6549 }
 0xedf   : > { %3370 = vst.msk [vmem:[#allocation3 + $0x8] sm:$0x3] %vm1488_vm8, %v3368_v62  ;;  %v6552_v0 = vpop.eup %6551 }
 0xee0   : > { %v6554_v19 = vpop.eup %6553 }
 0xee1   : > { %v6556_v59 = vpop.eup %6555 }
 0xee2   : > { %v6558_v36 = vpop.eup %6557 }
 0xee3   : > { %v6560_v22 = vpop.eup %6559 }
 0xee4   : > { %v6562_v23 = vpop.eup %6561 }
 0xee5   : > { %v6564_v7 = vpop.eup %6563 }
 0xee6   : > { %v6566_v8 = vpop.eup %6565 }
 0xef9   : > { %v3758_v57 = vpop.f32.mrb[68].mxu1 }
 0xefa   : > { %v3765_v5 = vmul.f32 %v6548_v26, %v3758_v57  ;;  %v6283_v34 = vpop.f32.mrb[69].mxu1 }
 0xefb   : > { %v3761_v37 = vpop.f32.mrb[70].mxu1 }
 0xefc   : > { %v3766_v11 = vmul.f32 %v6550_v13, %v3761_v37  ;;  %3769 = vrot.lane.b32.xlu0 %v3765_v5, %s6605_s8  ;;  %v6284_v10 = vpop.f32.mrb[71].mxu1 }
 0xefe   : > { %3771 = vrot.lane.b32.xlu1 %v3766_v11, %s6605_s8 }
 0xf01   : > { %v3901_v44 = vpop.f32.mrb[72].mxu1 }
 0xf02   : > { %v3908_v16 = vmul.f32 %v6552_v0, %v3901_v44  ;;  %v6295_v6 = vpop.f32.mrb[73].mxu1 }
 0xf03   : > { %v3904_v47 = vpop.f32.mrb[74].mxu1 }
 0xf04   : > { %3910 = vst.msk [vmem:[#allocation3 + $0xa] sm:$0xff] %vm1362_vm4, %v3908_v16  ;;  %v3909_v43 = vmul.f32 %v6554_v19, %v3904_v47  ;;  %v6296_v60 = vpop.f32.mrb[75].mxu1  ;;  %v5968_v19 = vld [vmem:[%s8221_s2] ss:$0 sm:$0xff] }
 0xf06   : > { %3911 = vst.msk [vmem:[#allocation3 + $0x12] sm:$0x3] %vm1488_vm8, %v3909_v43 }
 0xf0b   : > { %v4028_v53 = vpop.f32.mrb[76].mxu1 }
 0xf0c   : > { %v4035_v21 = vmul.f32 %v6556_v59, %v4028_v53  ;;  %v6307_v3 = vpop.f32.mrb[77].mxu1 }
 0xf0d   : > { %v4031_v12 = vpop.f32.mrb[78].mxu1 }
 0xf0e   : > { %v4036_v20 = vmul.f32 %v6558_v36, %v4031_v12  ;;  %4039 = vrot.lane.b32.xlu1 %v4035_v21, %s6603_s30  ;;  %v6308_v2 = vpop.f32.mrb[79].mxu1 }
 0xf10   : > { %4041 = vrot.lane.b32.xlu0 %v4036_v20, %s6603_s30  ;;  %s8230_s30 = sld [smem:[#allocation28_spill]] }
 0xf14   : > { %v4163_v15 = vpop.f32.mrb[80].mxu1 }
 0xf15   : > { %v4170_v25 = vmul.f32 %v6560_v22, %v4163_v15  ;;  %v6319_v54 = vpop.f32.mrb[81].mxu1 }
 0xf16   : > { %v4166_v41 = vpop.f32.mrb[82].mxu1 }
 0xf17   : > { %v4171_v42 = vmul.f32 %v6562_v23, %v4166_v41  ;;  %4174 = vrot.lane.b32.xlu1 %v4170_v25, %s6604_s26  ;;  %v6320_v50 = vpop.f32.mrb[83].mxu1 }
 0xf19   : > { %4176 = vrot.lane.b32.xlu0 %v4171_v42, %s6604_s26  ;;  %s8231_s26 = scalar_lea.vmem %s8230_s30, %s6757_s7 }
 0xf1c   : > { %v4298_v9 = vpop.f32.mrb[84].mxu1 }
 0xf1d   : > { %v4305_v29 = vmul.f32 %v6564_v7, %v4298_v9  ;;  %v6331_v56 = vpop.f32.mrb[85].mxu1 }
 0xf1e   : > { %v4301_v27 = vpop.f32.mrb[86].mxu1 }
 0xf1f   : > { %v4306_v63 = vmul.f32 %v6566_v8, %v4301_v27  ;;  %4309 = vrot.lane.b32.xlu1 %v4305_v29, %s6605_s8  ;;  %v6332_v40 = vpop.f32.mrb[87].mxu1 }
 0xf21   : > { %4311 = vrot.lane.b32.xlu0 %v4306_v63, %s6605_s8  ;;  %s8223_s8 = sld [smem:[#allocation22_spill]] }
 0xf27   : > { %s8224_s27 = scalar_lea.vmem %s8223_s8, %s6757_s7  ;;  %s8232_s7 = sld [smem:[#allocation5_spill]] }
 0xf2d   : > { %p5989_p5 = scmp.ne.s32.totalorder %s8232_s7, 1 }
 0xf2e   : > { %s8233_s22 = sld [smem:[#allocation29_spill]] (!%p5989_p5) }
 0xf46   : > { %v3502_v55 = vpop.permute.xlu1 %3501 }
 0xf47   : > { %3506 = vst.msk [vmem:[#allocation3 + $0x8] sm:$0x3] %vm1625_vm9, %v3502_v55 }
 0xf49   : > { %v3500_v28 = vpop.permute.xlu0 %3499 }
 0xf4a   : > { %3505 = vst.msk [vmem:[#allocation3] sm:$0xff] %vm1623_vm10, %v3500_v28 }
 0xf4d   : > { %v3635_v62 = vpop.permute.xlu0 %3634 }
 0xf4e   : > { %v3637_v33 = vpop.permute.xlu1 %3636  ;;  %3640 = vst.msk [vmem:[#allocation3] sm:$0xff] %vm1760_vm11, %v3635_v62 }
 0xf4f   : > { %3641 = vst.msk [vmem:[#allocation3 + $0x8] sm:$0x3] %vm1762_vm12, %v3637_v33 }
 0xf6e   : > { %v3770_v24 = vpop.permute.xlu0 %3769 }
 0xf6f   : > { %3775 = vst.msk [vmem:[#allocation3] sm:$0xff] %vm1897_vm13, %v3770_v24 }
 0xf70   : > { %v3772_v26 = vpop.permute.xlu1 %3771 }
 0xf71   : > { %3776 = vst.msk [vmem:[#allocation3 + $0x8] sm:$0x3] %vm1899_vm14, %v3772_v26 }
 0xf76   : > { %v4317_v10 = vld [vmem:[#allocation3] sm:$0xff] }
 0xf80   : > { %v4040_v57 = vpop.permute.xlu1 %4039 }
 0xf81   : > { %4045 = vst.msk [vmem:[#allocation3 + $0xa] sm:$0xff] %vm1623_vm10, %v4040_v57 }
 0xf82   : > { %v4042_v5 = vpop.permute.xlu0 %4041 }
 0xf83   : > { %4046 = vst.msk [vmem:[#allocation3 + $0x12] sm:$0x3] %vm1625_vm9, %v4042_v5 }
 0xf89   : > { %v4175_v34 = vpop.permute.xlu1 %4174 }
 0xf8a   : > { %4180 = vst.msk [vmem:[#allocation3 + $0xa] sm:$0xff] %vm1760_vm11, %v4175_v34 }
 0xf8b   : > { %v4177_v13 = vpop.permute.xlu0 %4176 }
 0xf8c   : > { %4181 = vst.msk [vmem:[#allocation3 + $0x12] sm:$0x3] %vm1762_vm12, %v4177_v13 }
 0xf91   : > { %v4310_v37 = vpop.permute.xlu1 %4309 }
 0xf92   : > { %4315 = vst.msk [vmem:[#allocation3 + $0xa] sm:$0xff] %vm1897_vm13, %v4310_v37 }
 0xf93   : > { %v4312_v11 = vpop.permute.xlu0 %4311 }
 0xf94   : > { %4316 = vst.msk [vmem:[#allocation3 + $0x12] sm:$0x3] %vm1899_vm14, %v4312_v11 }
 0xf99   : > { %v4318_v0 = vld [vmem:[#allocation3 + $0x8] sm:$0xff] }
 0xf9a   : > { %v4320_v44 = vpack.c.bf16 %v4318_v0, %v4317_v10 }
 0xf9b   : > { %v4319_v16 = vld [vmem:[#allocation3 + $0x10] sm:$0xf] }
 0xf9c   : > { %6337 = vmatprep.mubr.msk.bf16.mxu0 %vm1268_vm2, %v4320_v44  ;;  %v4321_v6 = vpack.c.bf16 %v4319_v16, %v4319_v16 }
 0xf9e   : > { %6338 = vmatmul.mubr.msk.bf16.vlgmr.msra.gmra.mrb[56].mxu0 %vm1268_vm2, %v4321_v6 }
0x1071   : > { %v6339_v47 = vpop.f32.mrb[56].mxu0 }
0x1072   : > { %v4393_v43 = vadd.f32 %v6339_v47, %v5968_v19  ;;  %v4384_v60 = vpop.f32.mrb[57].mxu0 }
0x1073   : > { %v4385_v59 = vadd.f32 %v5968_v19, %v4384_v60  ;;  %v6340_v53 = vpop.f32.mrb[58].mxu0 }
0x1074   : > { %v4441_v21 = vrot.slane %v4393_v43, %v6880_v30  ;;  %v4387_v3 = vpop.f32.mrb[59].mxu0 }
0x1075   : > { %v4401_v35 = vcombine.high %v4385_v59, %v4385_v59  ;;  %v4408_v36 = vrot.slane %v4385_v59, %v6880_v30  ;;  %v4388_v12 = vadd.f32 %v5968_v19, %v4387_v3 }
0x1076   : > { %v4442_v22 = vcombine.high %v4441_v21, %v4441_v21  ;;  %v4461_v63 = vadd.f32 %v4441_v21, %v7471_v52 }
0x1077   : > { %v4415_v20 = vrot.slane %v4401_v35, %v6880_v30  ;;  %v4416_v2 = vcombine.high %v4408_v36, %v4408_v36  ;;  %v4418_v1 = vcombine.high %v4388_v12, %v4388_v12  ;;  %v4425_v15 = vrot.slane %v4388_v12, %v6880_v30 }
0x1078   : > { %v4453_v25 = vadd.f32 %v4408_v36, %v7453_v45  ;;  %v4462_v56 = vadd.f32 %v4442_v22, %v7477_v31 }
0x1079   : > { %v4417_v14 = vcombine.high %v4415_v20, %v4415_v20  ;;  %v4454_v54 = vadd.f32 %v4416_v2, %v7455_v58  ;;  %v4432_v23 = vrot.slane %v4418_v1, %v6880_v30  ;;  %v4433_v41 = vcombine.high %v4425_v15, %v4425_v15 }
0x107a   : > { %v4455_v39 = vadd.f32 %v4415_v20, %v7457_v32  ;;  %v4457_v9 = vadd.f32 %v4425_v15, %v7461_v38  ;;  %v4509_v28 = vcombine.low %v4461_v63, %v4462_v56 }
0x107b   : > { %v4456_v42 = vadd.f32 %v4417_v14, %v7459_v4  ;;  %v4475_v50 = vcombine.low %v4453_v25, %v4454_v54  ;;  %v4434_v7 = vcombine.high %v4432_v23, %v4432_v23  ;;  %v4458_v29 = vadd.f32 %v4433_v41, %v7463_v48 }
0x107c   : > { %v4459_v8 = vadd.f32 %v4432_v23, %v7465_v61  ;;  %v4516_v62 = vrot.slane %v4509_v28, %v6880_v30  ;;  %v6428_v28 = vld [vmem:[%s8222_s12 + $0x8] sm:$0xff]  }
0x107d   : > { %v4460_v45 = vadd.f32 %v4434_v7, %v7467_v46  ;;  %v4476_v58 = vcombine.low %v4455_v39, %v4456_v42  ;;  %v4492_v27 = vcombine.low %v4457_v9, %v4458_v29  ;;  %v4483_v32 = vrot.slane %v4475_v50, %v6880_v30 }
0x107e   : > { %v4526_v52 = vsel %vm2651_vm15, %v4516_v62, 0.0  ;;  %v6430_v62 = vld [vmem:[%s8222_s12 + $0x18] sm:$0xff]  }
0x107f   : > { %v4490_v4 = vrot.slane %v4476_v58, %v6880_v30  ;;  %v4493_v40 = vcombine.low %v4459_v8, %v4460_v45  ;;  %v4500_v38 = vrot.slane %v4492_v27, %v6880_v30 }
0x1081   : > { %v4491_v55 = vcombine.low %v4483_v32, %v4490_v4  ;;  %v4507_v48 = vrot.slane %v4493_v40, %v6880_v30 }
0x1083   : > { %v4520_v31 = vsel %vm1268_vm2, %v4491_v55, 0.0  ;;  %v4508_v61 = vcombine.low %v4500_v38, %v4507_v48  ;;  %v6427_v38 = vld [vmem:[%s8222_s12] sm:$0xff]  }
0x1084   : > { %4521 = vadd.xlane.f32.xlu1 %v4520_v31  ;;  %6373 = vmatprep.subr.msk.bf16.mxu1 %vm1268_vm2, %v6427_v38  ;;  %v4972_v48 = vsel %vm1268_vm2, %v6427_v38, 0  ;;  %v4975_v31 = vsel %vm1268_vm2, %v6428_v28, 0 }
0x1085   : > { %v4523_v46 = vsel %vm1268_vm2, %v4508_v61, 0.0  ;;  %6342 = vmatpush3.bf16.xpose.msra.mxu1 %v4972_v48  ;;  %v6429_v61 = vld [vmem:[%s8222_s12 + $0x10] sm:$0xff]  }
0x1086   : > { %4524 = vadd.xlane.f32.xlu0 %v4523_v46  ;;  %6374 = vmatprep.subr.msk.bf16.mxu1 %vm1268_vm2, %v6428_v28  ;;  %v4978_v46 = vsel %vm1268_vm2, %v6429_v61, 0 }
0x108a   : > { %4527 = vadd.xlane.f32.xlu0 %v4526_v52  ;;  %v4981_v52 = vsel %vm1268_vm2, %v6430_v62, 0 }
0x108d   : > { %6344 = vmatpush3.bf16.xpose.msra.mxu1 %v4975_v31 }
0x108e   : > { %6375 = vmatprep.subr.msk.bf16.mxu1 %vm1268_vm2, %v6429_v61 }
0x1095   : > { %6346 = vmatpush3.bf16.xpose.msra.mxu1 %v4978_v46 }
0x1096   : > { %6376 = vmatprep.subr.msk.bf16.mxu1 %vm1268_vm2, %v6430_v62 }
0x109d   : > { %6348 = vmatpush3.bf16.xpose.msra.mxu1 %v4981_v52 }
0x1111   : > { %v4522_v33 = vpop.xlane.xlu1 %4521 }
0x1112   : > { %v4529_v24 = vmul.f32 0.03125, %v4522_v33  ;;  %v6431_v33 = vld [vmem:[%s6835_s28] sm:$0xff]  }
0x1113   : > { %v4525_v26 = vpop.xlane.xlu0 %4524  ;;  %6377 = vmatprep.subr.msk.bf16.mxu0 %vm5057_vm1, %v6431_v33 }
0x1114   : > { %v4541_v57 = vrot.slane %v4529_v24, %v7319_v18  ;;  %v4548_v5 = vrot.slane %v4529_v24, %v7322_v49  ;;  %v4555_v34 = vrot.slane %v4529_v24, %v7325_v17  ;;  %v4562_v13 = vrot.slane %v4529_v24, %v7328_v51 }
0x1115   : > { %v4530_v37 = vmul.f32 0.03125, %v4525_v26  ;;  %v5065_v24 = vsel %vm5057_vm1, %v6431_v33, 0 }
0x1116   : > { %v7833_v11 = vsub.f32 %v4453_v25, %v4541_v57  ;;  %v7835_v10 = vsub.f32 %v4454_v54, %v4548_v5  ;;  %v7837_v0 = vsub.f32 %v4455_v39, %v4555_v34  ;;  %v7839_v44 = vsub.f32 %v4456_v42, %v4562_v13  ;;  %6354 = vmatpush3.bf16.xpose.msra.mxu0 %v5065_v24 }
0x1117   : > { %v4569_v16 = vrot.slane %v4530_v37, %v7319_v18  ;;  %v4576_v6 = vrot.slane %v4530_v37, %v7322_v49  ;;  %v4583_v19 = vrot.slane %v4530_v37, %v7325_v17  ;;  %v4590_v47 = vrot.slane %v4530_v37, %v7328_v51  ;;  %v4528_v43 = vpop.xlane.xlu0 %4527 }
0x1118   : > { %v4531_v60 = vmul.f32 0.03125, %v4528_v43  ;;  %v4625_v59 = vmul.f32 %v7833_v11, %v7833_v11  ;;  %v4626_v53 = vmul.f32 %v7835_v10, %v7835_v10  ;;  %v4627_v21 = vmul.f32 %v7837_v0, %v7837_v0 }
0x1119   : > { %v7851_v3 = vsub.f32 %v4457_v9, %v4569_v16  ;;  %v7853_v35 = vsub.f32 %v4458_v29, %v4576_v6  ;;  %v7855_v36 = vsub.f32 %v4459_v8, %v4583_v19  ;;  %v7857_v12 = vsub.f32 %v4460_v45, %v4590_v47  ;;  %v5973_v16 = vld [vmem:[%s8224_s27] ss:$0 sm:$0xff] }
0x111a   : > { %v4597_v20 = vrot.slane %v4531_v60, %v7319_v18  ;;  %v4604_v2 = vrot.slane %v4531_v60, %v7322_v49  ;;  %v4628_v1 = vmul.f32 %v7839_v44, %v7839_v44  ;;  %v4645_v22 = vcombine.low %v4625_v59, %v4626_v53  ;;  %v5974_v19 = vld [vmem:[%s8226_s1] ss:$0 sm:$0xff] }
0x111b   : > { %v4629_v15 = vmul.f32 %v7851_v3, %v7851_v3  ;;  %v4630_v14 = vmul.f32 %v7853_v35, %v7853_v35  ;;  %v4631_v25 = vmul.f32 %v7855_v36, %v7855_v36  ;;  %v4632_v54 = vmul.f32 %v7857_v12, %v7857_v12 }
0x111c   : > { %v7871_v23 = vsub.f32 %v4461_v63, %v4597_v20  ;;  %v7873_v41 = vsub.f32 %v4462_v56, %v4604_v2  ;;  %v4646_v39 = vcombine.low %v4627_v21, %v4628_v1  ;;  %v4653_v42 = vrot.slane %v4645_v22, %v6880_v30 }
0x111d   : > { %v4662_v50 = vcombine.low %v4629_v15, %v4630_v14  ;;  %v4663_v7 = vcombine.low %v4631_v25, %v4632_v54  ;;  %v4806_v60 = vcombine.high %v5973_v16, %v5973_v16  ;;  %v4842_v59 = vcombine.high %v5974_v19, %v5974_v19 }
0x111e   : > { %v4633_v9 = vmul.f32 %v7871_v23, %v7871_v23  ;;  %v4634_v29 = vmul.f32 %v7873_v41, %v7873_v41  ;;  %v4660_v8 = vrot.slane %v4646_v39, %v6880_v30  ;;  %v4813_v53 = vrot.slane %v5973_v16, %v6880_v30 }
0x111f   : > { %v4670_v45 = vrot.slane %v4662_v50, %v6880_v30  ;;  %v4677_v56 = vrot.slane %v4663_v7, %v6880_v30  ;;  %v4820_v21 = vrot.slane %v4806_v60, %v6880_v30  ;;  %v4849_v20 = vrot.slane %v5974_v19, %v6880_v30 }
0x1120   : > { %v4661_v58 = vcombine.low %v4653_v42, %v4660_v8  ;;  %v4679_v27 = vcombine.low %v4633_v9, %v4634_v29  ;;  %v4856_v2 = vrot.slane %v4842_v59, %v6880_v30  ;;  %v4821_v22 = vcombine.high %v4813_v53, %v4813_v53 }
0x1121   : > { %v4678_v63 = vcombine.low %v4670_v45, %v4677_v56  ;;  %v4822_v15 = vcombine.high %v4820_v21, %v4820_v21  ;;  %v4857_v14 = vcombine.high %v4849_v20, %v4849_v20 }
0x1122   : > { %v4690_v32 = vsel %vm1268_vm2, %v4661_v58, 0.0  ;;  %v4686_v4 = vrot.slane %v4679_v27, %v6880_v30  ;;  %v4858_v25 = vcombine.high %v4856_v2, %v4856_v2 }
0x1123   : > { %4691 = vadd.xlane.f32.xlu1 %v4690_v32  ;;  %v4693_v40 = vsel %vm1268_vm2, %v4678_v63, 0.0 }
0x1124   : > { %4694 = vadd.xlane.f32.xlu0 %v4693_v40  ;;  %v4696_v55 = vsel %vm2651_vm15, %v4686_v4, 0.0 }
0x1127   : > { %4697 = vadd.xlane.f32.xlu1 %v4696_v55 }
0x11b0   : > { %v4692_v26 = vpop.xlane.xlu1 %4691 }
0x11b1   : > { %v4699_v57 = vmul.f32 0.03125, %v4692_v26  ;;  %v4695_v5 = vpop.xlane.xlu0 %4694 }
0x11b2   : > { %v4700_v34 = vmul.f32 0.03125, %v4695_v5 }
0x11b3   : > { %v4702_v13 = vadd.f32 1e-05, %v4699_v57 }
0x11b4   : > { %v4703_v37 = vadd.f32 1e-05, %v4700_v34  ;;  %v4698_v6 = vpop.xlane.xlu1 %4697 }
0x11b5   : > { %6567 = vrsqrt.f32 %v4702_v13  ;;  %v4701_v47 = vmul.f32 0.03125, %v4698_v6 }
0x11b6   : > { %6569 = vrsqrt.f32 %v4703_v37 }
0x11b7   : > { %v4704_v43 = vadd.f32 1e-05, %v4701_v47 }
0x11b9   : > { %6571 = vrsqrt.f32 %v4704_v43 }
0x11bf   : > { %v6568_v1 = vpop.eup %6567 }
0x11c0   : > { %v6570_v54 = vpop.eup %6569  ;;  %v4717_v39 = vrot.slane %v6568_v1, %v7319_v18  ;;  %v4724_v42 = vrot.slane %v6568_v1, %v7322_v49  ;;  %v4731_v50 = vrot.slane %v6568_v1, %v7325_v17  ;;  %v4738_v7 = vrot.slane %v6568_v1, %v7328_v51 }
0x11c1   : > { %v4745_v9 = vrot.slane %v6570_v54, %v7319_v18  ;;  %v4752_v29 = vrot.slane %v6570_v54, %v7322_v49  ;;  %v4759_v8 = vrot.slane %v6570_v54, %v7325_v17  ;;  %v4766_v45 = vrot.slane %v6570_v54, %v7328_v51 }
0x11c2   : > { %v4791_v56 = vmul.f32 %v4717_v39, %v7833_v11  ;;  %v4792_v58 = vmul.f32 %v4724_v42, %v7835_v10  ;;  %v4793_v27 = vmul.f32 %v4731_v50, %v7837_v0  ;;  %v4794_v63 = vmul.f32 %v4738_v7, %v7839_v44 }
0x11c3   : > { %v6572_v32 = vpop.eup %6571  ;;  %v4795_v4 = vmul.f32 %v4745_v9, %v7851_v3  ;;  %v4796_v40 = vmul.f32 %v4752_v29, %v7853_v35  ;;  %v4797_v55 = vmul.f32 %v4759_v8, %v7855_v36  ;;  %v4798_v38 = vmul.f32 %v4766_v45, %v7857_v12 }
0x11c4   : > { %v4773_v48 = vrot.slane %v6572_v32, %v7319_v18  ;;  %v4780_v28 = vrot.slane %v6572_v32, %v7322_v49  ;;  %v4827_v11 = vmul.f32 %v4813_v53, %v4791_v56  ;;  %v4828_v31 = vmul.f32 %v4821_v22, %v4792_v58 }
0x11c5   : > { %v4829_v10 = vmul.f32 %v4820_v21, %v4793_v27  ;;  %v4830_v61 = vmul.f32 %v4822_v15, %v4794_v63  ;;  %v4831_v0 = vmul.f32 %v4813_v53, %v4795_v4  ;;  %v4832_v46 = vmul.f32 %v4821_v22, %v4796_v40  ;;  %v5982_v63 = vld [vmem:[%s1072_s18] ss:$0 sm:$0xff] }
0x11c6   : > { %v4799_v44 = vmul.f32 %v4773_v48, %v7871_v23  ;;  %v4800_v3 = vmul.f32 %v4780_v28, %v7873_v41  ;;  %v4833_v62 = vmul.f32 %v4820_v21, %v4797_v55  ;;  %v4834_v35 = vmul.f32 %v4822_v15, %v4798_v38  ;;  %v6432_v15 = vld [vmem:[%s6835_s28 + $0x8] sm:$0xff]  }
0x11c7   : > { %v7936_v52 = vadd.f32 %v4849_v20, %v4827_v11  ;;  %v7938_v36 = vadd.f32 %v4857_v14, %v4828_v31  ;;  %v7940_v12 = vadd.f32 %v4856_v2, %v4829_v10  ;;  %v7942_v33 = vadd.f32 %v4858_v25, %v4830_v61  ;;  %6378 = vmatprep.subr.msk.bf16.mxu0 %vm5057_vm1, %v6432_v15 }
0x11c8   : > { %v4835_v24 = vmul.f32 %v4813_v53, %v4799_v44  ;;  %v4836_v26 = vmul.f32 %v4821_v22, %v4800_v3  ;;  %v7944_v57 = vadd.f32 %v4849_v20, %v4831_v0  ;;  %v7946_v5 = vadd.f32 %v4857_v14, %v4832_v46 }
0x11c9   : > { %v7948_v34 = vadd.f32 %v4856_v2, %v4833_v62  ;;  %v7950_v23 = vadd.f32 %v4858_v25, %v4834_v35  ;;  %v4892_v41 = vcombine.low %v7936_v52, %v7938_v36  ;;  %v4893_v13 = vcombine.low %v7940_v12, %v7942_v33  ;;  %v5975_v25 = vld [vmem:[%s1064_s16] ss:$0 sm:$0xff] }
0x11ca   : > { %v4909_v37 = vcombine.low %v7944_v57, %v7946_v5  ;;  %v4871_v16 = vadd.f32 %v4849_v20, %v4835_v24  ;;  %v4872_v6 = vadd.f32 %v4857_v14, %v4836_v26  ;;  %v5068_v14 = vsel %vm5057_vm1, %v6432_v15, 0 }
0x11cb   : > { %v4900_v19 = vrot.slane %v4892_v41, %v6880_v30  ;;  %v4907_v47 = vrot.slane %v4893_v13, %v6880_v30  ;;  %v4910_v43 = vcombine.low %v7948_v34, %v7950_v23  ;;  %6356 = vmatpush3.bf16.xpose.msra.mxu0 %v5068_v14 }
0x11cc   : > { %v4917_v60 = vrot.slane %v4909_v37, %v6880_v30  ;;  %v4926_v59 = vcombine.low %v4871_v16, %v4872_v6 }
0x11cd   : > { %v4924_v53 = vrot.slane %v4910_v43, %v6880_v30  ;;  %v4908_v2 = vcombine.low %v4900_v19, %v4907_v47 }
0x11ce   : > { %v4933_v21 = vrot.slane %v4926_v59, %v6880_v30 }
0x11cf   : > { %v4925_v1 = vcombine.low %v4917_v60, %v4924_v53 }
0x11d0   : > { %v4938_v22 = vpack.c.bf16 %v4933_v21, %v4933_v21 }
0x11d1   : > { %v4937_v20 = vpack.c.bf16 %v4925_v1, %v4908_v2 }
0x11d3   : > { %6349 = vmatprep.mubr.msk.bf16.mxu1 %vm1268_vm2, %v4937_v20 }
0x11d4   : > { %6350 = vmatmul.mubr.msk.bf16.vlgmr.msra.gmra.mrb[88].mxu1 %vm1268_vm2, %v4938_v22 }
0x12a7   : > { %v6351_v54 = vpop.f32.mrb[88].mxu1 }
0x12a8   : > { %v5026_v39 = vadd.f32 %v6351_v54, %v5975_v25  ;;  %v5017_v42 = vpop.f32.mrb[89].mxu1 }
0x12a9   : > { %v5018_v50 = vadd.f32 %v5975_v25, %v5017_v42  ;;  %v6352_v7 = vpop.f32.mrb[90].mxu1 }
0x12aa   : > { %v5020_v9 = vpop.f32.mrb[91].mxu1  ;;  %v5033_v8 = vmax.f32 %v5026_v39, 0.0 }
0x12ab   : > { %v5021_v29 = vadd.f32 %v5975_v25, %v5020_v9  ;;  %v5031_v45 = vmax.f32 %v5018_v50, 0.0 }
0x12ac   : > { %v5040_v27 = vpack.c.bf16 %v5033_v8, %v5033_v8 }
0x12ad   : > { %v5032_v56 = vmax.f32 %v5021_v29, 0.0 }
0x12af   : > { %v5039_v58 = vpack.c.bf16 %v5032_v56, %v5031_v45 }
0x12b1   : > { %6357 = vmatprep.mubr.msk.bf16.mxu0 %vm5057_vm1, %v5039_v58 }
0x12b2   : > { %6358 = vmatmul.mubr.msk.bf16.vlgmr.msra.gmra.mrb[60].mxu0 %vm5057_vm1, %v5040_v27 }
0x1385   : > { %v6359_v32 = vpop.f32.mrb[60].mxu0 }
0x1386   : > { %v5113_v4 = vadd.f32 %v6359_v32, %v5982_v63  ;;  %v5104_v40 = vpop.f32.mrb[61].mxu0 }
0x1387   : > { %v5105_v55 = vadd.f32 %v5982_v63, %v5104_v40  ;;  %v6360_v38 = vpop.f32.mrb[62].mxu0 }
0x1388   : > { %v5161_v48 = vrot.slane %v5113_v4, %v6880_v30  ;;  %v5107_v28 = vpop.f32.mrb[63].mxu0 }
0x1389   : > { %v5121_v11 = vcombine.high %v5105_v55, %v5105_v55  ;;  %v5128_v31 = vrot.slane %v5105_v55, %v6880_v30  ;;  %v5108_v10 = vadd.f32 %v5982_v63, %v5107_v28 }
0x138a   : > { %v5162_v61 = vcombine.high %v5161_v48, %v5161_v48  ;;  %v5181_v53 = vadd.f32 %v5161_v48, %v4871_v16 }
0x138b   : > { %v5135_v0 = vrot.slane %v5121_v11, %v6880_v30  ;;  %v5136_v46 = vcombine.high %v5128_v31, %v5128_v31  ;;  %v5138_v44 = vcombine.high %v5108_v10, %v5108_v10  ;;  %v5145_v3 = vrot.slane %v5108_v10, %v6880_v30 }
0x138c   : > { %v5173_v35 = vadd.f32 %v5128_v31, %v7936_v52  ;;  %v5182_v41 = vadd.f32 %v5162_v61, %v4872_v6 }
0x138d   : > { %v5137_v62 = vcombine.high %v5135_v0, %v5135_v0  ;;  %v5174_v24 = vadd.f32 %v5136_v46, %v7938_v36  ;;  %v5152_v26 = vrot.slane %v5138_v44, %v6880_v30  ;;  %v5153_v13 = vcombine.high %v5145_v3, %v5145_v3 }
0x138e   : > { %v5175_v37 = vadd.f32 %v5135_v0, %v7940_v12  ;;  %v5177_v60 = vadd.f32 %v5145_v3, %v7944_v57  ;;  %v5229_v22 = vcombine.low %v5181_v53, %v5182_v41 }
0x138f   : > { %v5176_v19 = vadd.f32 %v5137_v62, %v7942_v33  ;;  %v5195_v47 = vcombine.low %v5173_v35, %v5174_v24  ;;  %v5154_v43 = vcombine.high %v5152_v26, %v5152_v26  ;;  %v5178_v59 = vadd.f32 %v5153_v13, %v7946_v5 }
0x1390   : > { %v5179_v21 = vadd.f32 %v5152_v26, %v7948_v34  ;;  %v5236_v34 = vrot.slane %v5229_v22, %v6880_v30 }
0x1391   : > { %v5180_v52 = vadd.f32 %v5154_v43, %v7950_v23  ;;  %v5196_v36 = vcombine.low %v5175_v37, %v5176_v19  ;;  %v5212_v2 = vcombine.low %v5177_v60, %v5178_v59  ;;  %v5203_v6 = vrot.slane %v5195_v47, %v6880_v30 }
0x1392   : > { %v5246_v15 = vsel %vm2651_vm15, %v5236_v34, 0.0 }
0x1393   : > { %v5210_v1 = vrot.slane %v5196_v36, %v6880_v30  ;;  %v5213_v12 = vcombine.low %v5179_v21, %v5180_v52  ;;  %v5220_v20 = vrot.slane %v5212_v2, %v6880_v30 }
0x1395   : > { %v5211_v33 = vcombine.low %v5203_v6, %v5210_v1  ;;  %v5227_v57 = vrot.slane %v5213_v12, %v6880_v30 }
0x1397   : > { %v5240_v5 = vsel %vm1268_vm2, %v5211_v33, 0.0  ;;  %v5228_v16 = vcombine.low %v5220_v20, %v5227_v57 }
0x1398   : > { %5241 = vadd.xlane.f32.xlu0 %v5240_v5 }
0x1399   : > { %v5243_v23 = vsel %vm1268_vm2, %v5228_v16, 0.0 }
0x139a   : > { %5244 = vadd.xlane.f32.xlu1 %v5243_v23  ;;  %v5987_v23 = vld [vmem:[%s8229_s29] ss:$0 sm:$0xff] }
0x139c   : > { %5247 = vadd.xlane.f32.xlu0 %v5246_v15  ;;  %v5988_v15 = vld [vmem:[%s8231_s26] ss:$0 sm:$0xff] }
0x1425   : > { %v5242_v14 = vpop.xlane.xlu0 %5241 }
0x1426   : > { %v5249_v25 = vmul.f32 0.03125, %v5242_v14 }
0x1427   : > { %v5245_v54 = vpop.xlane.xlu1 %5244 }
0x1428   : > { %v5261_v39 = vrot.slane %v5249_v25, %v7319_v18  ;;  %v5268_v42 = vrot.slane %v5249_v25, %v7322_v49  ;;  %v5275_v50 = vrot.slane %v5249_v25, %v7325_v17  ;;  %v5282_v7 = vrot.slane %v5249_v25, %v7328_v51 }
0x1429   : > { %v5250_v9 = vmul.f32 0.03125, %v5245_v54  ;;  %v5248_v29 = vpop.xlane.xlu0 %5247  ;;  %v5526_v54 = vcombine.high %v5987_v23, %v5987_v23 }
0x142a   : > { %v8007_v8 = vsub.f32 %v5173_v35, %v5261_v39  ;;  %v8009_v45 = vsub.f32 %v5174_v24, %v5268_v42  ;;  %v8011_v56 = vsub.f32 %v5175_v37, %v5275_v50  ;;  %v8013_v58 = vsub.f32 %v5176_v19, %v5282_v7 }
0x142b   : > { %v5289_v27 = vrot.slane %v5250_v9, %v7319_v18  ;;  %v5296_v63 = vrot.slane %v5250_v9, %v7322_v49  ;;  %v5303_v32 = vrot.slane %v5250_v9, %v7325_v17  ;;  %v5310_v4 = vrot.slane %v5250_v9, %v7328_v51 }
0x142c   : > { %v5251_v40 = vmul.f32 0.03125, %v5248_v29  ;;  %v5345_v55 = vmul.f32 %v8007_v8, %v8007_v8  ;;  %v5346_v38 = vmul.f32 %v8009_v45, %v8009_v45  ;;  %v5347_v48 = vmul.f32 %v8011_v56, %v8011_v56 }
0x142d   : > { %v8025_v28 = vsub.f32 %v5177_v60, %v5289_v27  ;;  %v8027_v11 = vsub.f32 %v5178_v59, %v5296_v63  ;;  %v8029_v31 = vsub.f32 %v5179_v21, %v5303_v32  ;;  %v8031_v10 = vsub.f32 %v5180_v52, %v5310_v4 }
0x142e   : > { %v5317_v61 = vrot.slane %v5251_v40, %v7319_v18  ;;  %v5324_v0 = vrot.slane %v5251_v40, %v7322_v49  ;;  %v5348_v46 = vmul.f32 %v8013_v58, %v8013_v58  ;;  %v5365_v44 = vcombine.low %v5345_v55, %v5346_v38 }
0x142f   : > { %v5349_v3 = vmul.f32 %v8025_v28, %v8025_v28  ;;  %v5350_v62 = vmul.f32 %v8027_v11, %v8027_v11  ;;  %v5351_v35 = vmul.f32 %v8029_v31, %v8029_v31  ;;  %v5352_v24 = vmul.f32 %v8031_v10, %v8031_v10 }
0x1430   : > { %v8045_v26 = vsub.f32 %v5181_v53, %v5317_v61  ;;  %v8047_v13 = vsub.f32 %v5182_v41, %v5324_v0  ;;  %v5366_v37 = vcombine.low %v5347_v48, %v5348_v46  ;;  %v5373_v19 = vrot.slane %v5365_v44, %v6880_v30 }
0x1431   : > { %v5382_v47 = vcombine.low %v5349_v3, %v5350_v62  ;;  %v5383_v43 = vcombine.low %v5351_v35, %v5352_v24  ;;  %v5562_v39 = vcombine.high %v5988_v15, %v5988_v15  ;;  %v5533_v50 = vrot.slane %v5987_v23, %v6880_v30 }
0x1432   : > { %v5353_v60 = vmul.f32 %v8045_v26, %v8045_v26  ;;  %v5354_v59 = vmul.f32 %v8047_v13, %v8047_v13  ;;  %v5380_v21 = vrot.slane %v5366_v37, %v6880_v30  ;;  %v5540_v7 = vrot.slane %v5526_v54, %v6880_v30 }
0x1433   : > { %v5390_v52 = vrot.slane %v5382_v47, %v6880_v30  ;;  %v5397_v53 = vrot.slane %v5383_v43, %v6880_v30  ;;  %v5569_v9 = vrot.slane %v5988_v15, %v6880_v30  ;;  %v5576_v29 = vrot.slane %v5562_v39, %v6880_v30 }
0x1434   : > { %v5381_v36 = vcombine.low %v5373_v19, %v5380_v21  ;;  %v5399_v41 = vcombine.low %v5353_v60, %v5354_v59  ;;  %v5541_v63 = vcombine.high %v5533_v50, %v5533_v50  ;;  %v5542_v32 = vcombine.high %v5540_v7, %v5540_v7 }
0x1435   : > { %v5398_v2 = vcombine.low %v5390_v52, %v5397_v53  ;;  %v5577_v4 = vcombine.high %v5569_v9, %v5569_v9  ;;  %v5578_v40 = vcombine.high %v5576_v29, %v5576_v29 }
0x1436   : > { %v5410_v6 = vsel %vm1268_vm2, %v5381_v36, 0.0  ;;  %v5406_v1 = vrot.slane %v5399_v41, %v6880_v30 }
0x1437   : > { %5411 = vadd.xlane.f32.xlu1 %v5410_v6  ;;  %v5413_v12 = vsel %vm1268_vm2, %v5398_v2, 0.0 }
0x1438   : > { %5414 = vadd.xlane.f32.xlu0 %v5413_v12  ;;  %v5416_v22 = vsel %vm2651_vm15, %v5406_v1, 0.0 }
0x143b   : > { %5417 = vadd.xlane.f32.xlu1 %v5416_v22 }
0x14c4   : > { %v5412_v33 = vpop.xlane.xlu1 %5411 }
0x14c5   : > { %v5419_v20 = vmul.f32 0.03125, %v5412_v33  ;;  %v5415_v57 = vpop.xlane.xlu0 %5414 }
0x14c6   : > { %v5420_v5 = vmul.f32 0.03125, %v5415_v57 }
0x14c7   : > { %v5422_v16 = vadd.f32 1e-05, %v5419_v20 }
0x14c8   : > { %v5423_v34 = vadd.f32 1e-05, %v5420_v5  ;;  %v5418_v14 = vpop.xlane.xlu1 %5417 }
0x14c9   : > { %6573 = vrsqrt.f32 %v5422_v16  ;;  %v5421_v25 = vmul.f32 0.03125, %v5418_v14 }
0x14ca   : > { %6575 = vrsqrt.f32 %v5423_v34 }
0x14cb   : > { %v5424_v42 = vadd.f32 1e-05, %v5421_v25 }
0x14cd   : > { %6577 = vrsqrt.f32 %v5424_v42 }
0x14d3   : > { %v6574_v27 = vpop.eup %6573 }
0x14d4   : > { %v6576_v55 = vpop.eup %6575  ;;  %v5437_v38 = vrot.slane %v6574_v27, %v7319_v18  ;;  %v5444_v48 = vrot.slane %v6574_v27, %v7322_v49  ;;  %v5451_v61 = vrot.slane %v6574_v27, %v7325_v17  ;;  %v5458_v0 = vrot.slane %v6574_v27, %v7328_v51 }
0x14d5   : > { %v5465_v46 = vrot.slane %v6576_v55, %v7319_v18  ;;  %v5472_v44 = vrot.slane %v6576_v55, %v7322_v49  ;;  %v5479_v3 = vrot.slane %v6576_v55, %v7325_v17  ;;  %v5486_v62 = vrot.slane %v6576_v55, %v7328_v51 }
0x14d6   : > { %v5511_v35 = vmul.f32 %v5437_v38, %v8007_v8  ;;  %v5512_v24 = vmul.f32 %v5444_v48, %v8009_v45  ;;  %v5513_v37 = vmul.f32 %v5451_v61, %v8011_v56  ;;  %v5514_v19 = vmul.f32 %v5458_v0, %v8013_v58 }
0x14d7   : > { %v6578_v47 = vpop.eup %6577  ;;  %v5515_v43 = vmul.f32 %v5465_v46, %v8025_v28  ;;  %v5516_v60 = vmul.f32 %v5472_v44, %v8027_v11  ;;  %v5517_v59 = vmul.f32 %v5479_v3, %v8029_v31  ;;  %v5518_v21 = vmul.f32 %v5486_v62, %v8031_v10 }
0x14d8   : > { %v5547_v17 = vmul.f32 %v5533_v50, %v5511_v35  ;;  %v5548_v52 = vmul.f32 %v5541_v63, %v5512_v24  ;;  %v5549_v51 = vmul.f32 %v5540_v7, %v5513_v37  ;;  %v5550_v53 = vmul.f32 %v5542_v32, %v5514_v19 }
0x14d9   : > { %v5493_v8 = vrot.slane %v6578_v47, %v7319_v18  ;;  %v5500_v45 = vrot.slane %v6578_v47, %v7322_v49  ;;  %v5551_v56 = vmul.f32 %v5533_v50, %v5515_v43  ;;  %v5552_v36 = vmul.f32 %v5541_v63, %v5516_v60 }
0x14da   : > { %v5583_v58 = vadd.f32 %v5569_v9, %v5547_v17  ;;  %v5584_v41 = vadd.f32 %v5577_v4, %v5548_v52  ;;  %v5585_v2 = vadd.f32 %v5576_v29, %v5549_v51  ;;  %v5586_v28 = vadd.f32 %v5578_v40, %v5550_v53 }
0x14db   : > { %v5519_v11 = vmul.f32 %v5493_v8, %v8045_v26  ;;  %v5520_v31 = vmul.f32 %v5500_v45, %v8047_v13  ;;  %v5553_v6 = vmul.f32 %v5540_v7, %v5517_v59  ;;  %v5554_v10 = vmul.f32 %v5542_v32, %v5518_v21 }
0x14dc   : > { %v5603_v1 = vcombine.low %v5583_v58, %v5584_v41  ;;  %v5604_v12 = vcombine.low %v5585_v2, %v5586_v28  ;;  %v5587_v22 = vadd.f32 %v5569_v9, %v5551_v56  ;;  %v5588_v33 = vadd.f32 %v5577_v4, %v5552_v36 }
0x14dd   : > { %v5555_v18 = vmul.f32 %v5533_v50, %v5519_v11  ;;  %v5556_v20 = vmul.f32 %v5541_v63, %v5520_v31  ;;  %v5589_v49 = vadd.f32 %v5576_v29, %v5553_v6  ;;  %v5590_v34 = vadd.f32 %v5578_v40, %v5554_v10 }
0x14de   : > { %v5611_v57 = vrot.slane %v5603_v1, %v6880_v30  ;;  %v5618_v5 = vrot.slane %v5604_v12, %v6880_v30  ;;  %v5626_v16 = vrot.slane %v5587_v22, %v6880_v30 }
0x14df   : > { %v5591_v26 = vadd.f32 %v5569_v9, %v5555_v18  ;;  %v5592_v23 = vadd.f32 %v5577_v4, %v5556_v20  ;;  %v5627_v13 = vcombine.low %v5588_v33, %v5589_v49 }
0x14e0   : > { %v5619_v15 = vcombine.low %v5611_v57, %v5618_v5  ;;  %5657 = vst.msk [vmem:[#allocation2 + $0x8] sm:$0x3] %vm5656_vm3, %v5626_v16  ;;  %5665 = vst.msk [vmem:[%s8233_s22 + $0x8] sm:$0x3] (!%p5989_p5), %vm5656_vm3, %v5626_v16 }
0x14e1   : > { %v5628_v14 = vcombine.low %v5590_v34, %v5591_v26  ;;  %v5650_v25 = vrot.slane %v5592_v23, %v6880_v30  ;;  %v5635_v54 = vrot.slane %v5627_v13, %v6880_v30  ;;  %5663 = sbr.rel (%p5989_p5) target bundleno = 5352 (0x14e8), region = 132 }
0x14e2   : > { %5655 = vst.msk [vmem:[#allocation2] sm:$0xff] %vm1268_vm2, %v5619_v15  ;;  %5664 = vst.msk [vmem:[%s8233_s22] sm:$0xff] (!%p5989_p5), %vm1268_vm2, %v5619_v15 }
0x14e3   : > { %v5642_v39 = vrot.slane %v5628_v14, %v6880_v30  ;;  %5659 = vst.msk [vmem:[#allocation2 + $0x18] sm:$0x3] %vm5656_vm3, %v5650_v25  ;;  %5667 = vst.msk [vmem:[%s8233_s22 + $0x18] sm:$0x3] (!%p5989_p5), %vm5656_vm3, %v5650_v25 }
0x14e5   : > { %v5643_v42 = vcombine.low %v5635_v54, %v5642_v39 }
0x14e7   : > { %5658 = vst.msk [vmem:[#allocation2 + $0x10] sm:$0xff] %vm1268_vm2, %v5643_v42  ;;  %5666 = vst.msk [vmem:[%s8233_s22 + $0x10] sm:$0xff] (!%p5989_p5), %vm1268_vm2, %v5643_v42 }
0x14e8 PF: > { %s8234_s0 = sld [smem:[#allocation4_spill]] }
0x14ee   : > { %s36_s27 = sadd.s32 1, %s8234_s0  }
0x14ef   : > { %p33_p6 = scmp.ge.s32.totalorder %s36_s27, 4  }
0x14f1   :  { %35 = sbr.rel (!%p33_p6) target bundleno = 23 (0x17), region = 215 }

</bundles_post_ra>
